<compile_context>
chip_gen: v7x
topology: tpu7x:2x2x1
jax: 0.10.0
libtpu: 0.0.40
codegen_flags: <defaults>
</compile_context>

<pallas_src>
import functools

import numpy as np
import jax
import jax.numpy as jnp
from jax.experimental import pallas as pl
from jax.experimental.pallas import tpu as pltpu


_LANE = 128
_IN_MAX_S = 4096      # spatial tile (rows of the (S, 128) slab) for instance norm


def _round_up(x, m):
    return (x + m - 1) // m * m


def _vmem_limit_bytes():
    # Generation-aware scoped-VMEM budget: ~3/4 of physical, capped at 96 MiB
    # (-> ~48 MiB on v7x's 64 MiB VMEM, 96 MiB on v5e/v6e's 128 MiB).
    try:
        cap = pltpu.get_tpu_info().vmem_capacity_bytes
    except Exception:
        cap = 64 * 1024 * 1024
    return int(min(cap * 3 // 4, 96 * 1024 * 1024))


_VMEM_LIMIT = _vmem_limit_bytes()


# ---------------------------------------------------------------------------
# Pallas kernels
# ---------------------------------------------------------------------------

def _gemm_kernel(a_ref, b_ref, o_ref):
    # Single-K-block GEMM: (TM, Kp) @ (Kp, Np) -> (TM, Np) f32 (bf16 operands).
    o_ref[...] = jnp.dot(a_ref[...], b_ref[...],
                         preferred_element_type=jnp.float32)


def _rowtap_kernel(a_ref, b_ref, o_ref, *, k, th, wo):
    # a_ref: (1, (th + 2p) * wo, KcP) row-halo'd, kw-expanded activation slab (bf16).
    # b_ref: (k, KcP, Np) full k-tap weight, resident across the whole grid.
    # The kh reduction is unrolled in-kernel: k MXU pushes per row block.
    m = th * wo
    acc = jnp.zeros((m, o_ref.shape[-1]), jnp.float32)
    for kh in range(k):
        a = a_ref[0, pl.ds(kh * wo, m), :]
        acc = acc + jnp.dot(a, b_ref[kh], preferred_element_type=jnp.float32)
    o_ref[0] = acc


def _in_stats_kernel(x_ref, stat_ref):
    # One-pass stats: per-channel sum / sum-of-squares accumulated over S tiles.
    @pl.when(pl.program_id(1) == 0)
    def _():
        stat_ref[...] = jnp.zeros_like(stat_ref)

    x = x_ref[0]                                     # (TS, Np) f32
    stat_ref[0, 0:1, :] += jnp.sum(x, axis=0, keepdims=True)
    stat_ref[0, 1:2, :] += jnp.sum(x * x, axis=0, keepdims=True)


def _in_apply_kernel(x_ref, stat_ref, g_ref, b_ref, o_ref, *, act, inv_s, eps):
    x = x_ref[0]                                     # (TS, Np) f32
    mean = stat_ref[0, 0:1, :] * inv_s
    var = stat_ref[0, 1:2, :] * inv_s - mean * mean  # biased var, matches torch IN
    scale = jax.lax.rsqrt(jnp.maximum(var, 0.0) + eps) * g_ref[...]
    y = (x - mean) * scale + b_ref[...]
    if act == "relu":
        y = jnp.maximum(y, 0.0)
    elif act == "tanh05":
        y = jnp.tanh(y) * 0.5 + 0.5
    o_ref[0] = y.astype(o_ref.dtype)


def _in_apply_res_kernel(x_ref, r_ref, stat_ref, g_ref, b_ref, o_ref, *, inv_s, eps):
    # Instance norm + residual add (tail of a ResidualBlock).
    x = x_ref[0]
    mean = stat_ref[0, 0:1, :] * inv_s
    var = stat_ref[0, 1:2, :] * inv_s - mean * mean
    scale = jax.lax.rsqrt(jnp.maximum(var, 0.0) + eps) * g_ref[...]
    y = (x - mean) * scale + b_ref[...] + r_ref[0].astype(jnp.float32)
    o_ref[0] = y.astype(o_ref.dtype)


# ---------------------------------------------------------------------------
# Pallas wrappers
# ---------------------------------------------------------------------------

def pallas_gemm(a, b):
    """a: (M, K), b: (K, Np) with Np % 128 == 0 -> (M, Np) float32.
    bf16 operands, f32 accumulation.  K is zero-padded to a lane multiple and
    kept as one block (K <= 2048 everywhere in this net); B stays resident
    across the M-parallel grid."""
    M, K = a.shape
    K2, Np = b.shape
    assert K == K2 and Np % _LANE == 0
    Kp = _round_up(K, _LANE)
    assert Kp <= 2048
    TM = 512 if M >= 512 else _round_up(M, 8)
    Mp = _round_up(M, TM)

    a = a.astype(jnp.bfloat16)
    b = b.astype(jnp.bfloat16)
    if (Mp, Kp) != (M, K):
        a = jnp.pad(a, ((0, Mp - M), (0, Kp - K)))
    if Kp != K:
        b = jnp.pad(b, ((0, Kp - K), (0, 0)))

    flops = 2 * Mp * Kp * Np
    bytes_accessed = Mp * Kp * 2 + Kp * Np * 2 + Mp * Np * 4

    out = pl.pallas_call(
        _gemm_kernel,
        grid=(Mp // TM,),
        in_specs=[pl.BlockSpec((TM, Kp), lambda m: (m, 0)),
                  pl.BlockSpec((Kp, Np), lambda m: (0, 0))],     # B resident
        out_specs=pl.BlockSpec((TM, Np), lambda m: (m, 0)),
        out_shape=jax.ShapeDtypeStruct((Mp, Np), jnp.float32),
        compiler_params=pltpu.CompilerParams(
            dimension_semantics=("parallel",),
            vmem_limit_bytes=_VMEM_LIMIT),
        cost_estimate=pl.CostEstimate(flops=int(flops), transcendentals=0,
                                      bytes_accessed=int(bytes_accessed)),
    )(a, b)
    return out[:M]


def _pad_gather_indices(n, p, up):
    """Source indices realizing nearest-`up`x upsample followed by reflection
    padding by p (PyTorch ReflectionPad2d semantics), for one axis of length n."""
    m = up * n
    pos = np.arange(-p, m + p)
    pos = np.abs(pos)
    pos = np.where(pos >= m, 2 * (m - 1) - pos, pos)
    return (pos // up).astype(np.int32)


def _pick_rowtap_th(ho, wo, p, kcp, np_lanes):
    # Largest row block TH in {16,8,4,2,1} whose double-buffered A/O footprint
    # stays comfortably under the scoped-VMEM budget.
    budget = _VMEM_LIMIT // 4
    for th in (16, 8, 4, 2, 1):
        if th > ho:
            continue
        a_bytes = (th + 2 * p) * wo * kcp * 2
        o_bytes = th * wo * np_lanes * 4
        if 2 * (a_bytes + o_bytes) <= budget:
            return th
    return 1


def conv2d_rowtap(x, w, k, up=1):
    """Stride-1, reflection-padded kxk conv on an NHWC bf16 input, with an optional
    nearest-2x upsample folded into the patch gather (src index = dst // up).
    Only the kw taps are materialized (k-fold, not k*k); the kh taps are an unrolled
    in-kernel reduction over a row-halo'd slab, and the full k-tap weight stays
    resident in VMEM.  Returns ((N, Ho*Wo, Np) f32 lane-padded, Ho, Wo)."""
    N, H, W, Cin = x.shape
    p = k // 2
    Ho, Wo = up * H, up * W
    Cout = w.shape[-1]
    Np = _round_up(Cout, _LANE)
    Kc = k * Cin
    KcP = _round_up(Kc, _LANE)

    row_idx = _pad_gather_indices(H, p, up)          # (Ho + 2p,)
    col_idx = _pad_gather_indices(W, p, up)          # (Wo + 2p,)

    xr = jnp.take(x, row_idx, axis=1)                # (N, Ho+2p, W, Cin)
    taps = [jnp.take(xr, col_idx[j:j + Wo], axis=2) for j in range(k)]
    xw = jnp.concatenate(taps, axis=-1)              # (N, Ho+2p, Wo, Kc)
    if KcP != Kc:
        xw = jnp.pad(xw, ((0, 0), (0, 0), (0, 0), (0, KcP - Kc)))

    TH = _pick_rowtap_th(Ho, Wo, p, KcP, Np)
    n_rb = -(-Ho // TH)
    Hop = n_rb * TH
    if Hop != Ho:
        xw = jnp.pad(xw, ((0, 0), (0, Hop - Ho), (0, 0), (0, 0)))

    # Row blocks carry a 2p-row halo so the kh shift is a plain in-block slice.
    slabs = [xw[:, r * TH: r * TH + TH + 2 * p] for r in range(n_rb)]
    a = jnp.stack(slabs, axis=1).reshape(
        N * n_rb, (TH + 2 * p) * Wo, KcP).astype(jnp.bfloat16)

    b = jnp.pad(w.reshape(k, Kc, Cout),
                ((0, 0), (0, KcP - Kc), (0, Np - Cout))).astype(jnp.bfloat16)

    NB = N * n_rb
    flops = 2 * NB * TH * Wo * KcP * Np * k
    bytes_accessed = (NB * (TH + 2 * p) * Wo * KcP * 2 + k * KcP * Np * 2
                      + NB * TH * Wo * Np * 4)

    out = pl.pallas_call(
        functools.partial(_rowtap_kernel, k=k, th=TH, wo=Wo),
        grid=(NB,),
        in_specs=[
            pl.BlockSpec((1, (TH + 2 * p) * Wo, KcP), lambda i: (i, 0, 0)),
            pl.BlockSpec((k, KcP, Np), lambda i: (0, 0, 0)),     # weight resident
        ],
        out_specs=pl.BlockSpec((1, TH * Wo, Np), lambda i: (i, 0, 0)),
        out_shape=jax.ShapeDtypeStruct((NB, TH * Wo, Np), jnp.float32),
        compiler_params=pltpu.CompilerParams(
            dimension_semantics=("parallel",),
            vmem_limit_bytes=_VMEM_LIMIT),
        cost_estimate=pl.CostEstimate(flops=int(flops), transcendentals=0,
                                      bytes_accessed=int(bytes_accessed)),
    )(a, b)

    out = out.reshape(N, Hop * Wo, Np)
    if Hop != Ho:
        out = out[:, :Ho * Wo]
    return out, Ho, Wo


def conv2d_im2col(x, w, k, stride):
    """Reflection-padded conv (PyTorch semantics), NHWC bf16 input, no bias, as
    im2col + Pallas GEMM.  Used for the stride-2 convs and for d1 (Cin=3), where
    full-depth im2col fills the MXU contraction better than the row-tap scheme.
    Returns ((N, Ho*Wo, Np) f32 lane-padded, Ho, Wo)."""
    N, H, W, Cin = x.shape
    p = k // 2
    Cout = w.shape[-1]
    Np = _round_up(Cout, _LANE)

    xp = jnp.pad(x, ((0, 0), (p, p), (p, p), (0, 0)), mode="reflect")
    Ho = (H + 2 * p - k) // stride + 1
    Wo = (W + 2 * p - k) // stride + 1
    cols = [xp[:, di:di + stride * Ho:stride, dj:dj + stride * Wo:stride, :]
            for di in range(k) for dj in range(k)]
    patches = jnp.concatenate(cols, axis=-1).reshape(N * Ho * Wo, k * k * Cin)
    wb = jnp.pad(w.reshape(k * k * Cin, Cout), ((0, 0), (0, Np - Cout)))

    out = pallas_gemm(patches, wb)                   # (N*Ho*Wo, Np) f32
    return out.reshape(N, Ho * Wo, Np), Ho, Wo


def pallas_instance_norm(y, gamma, beta, act=None, residual=None,
                         out_dtype=jnp.bfloat16, eps=1e-5):
    """y: (N, S, Np) f32 lane-padded conv output.  Two-pass, S-tiled instance norm:
    pass 1 accumulates per-channel sum/sumsq over S tiles; pass 2 applies the affine
    + optional ReLU / tanh*0.5+0.5 / residual add and emits `out_dtype` (bf16 between
    layers).  Zero-padded channels stay exactly zero and are sliced off by callers."""
    N, S, Np = y.shape
    Cout = gamma.shape[0]
    g = jnp.pad(gamma.astype(jnp.float32), (0, Np - Cout),
                constant_values=1.0).reshape(1, Np)
    b = jnp.pad(beta.astype(jnp.float32), (0, Np - Cout)).reshape(1, Np)

    TS = S if S <= _IN_MAX_S else _IN_MAX_S
    Sp = _round_up(S, TS)
    if Sp != S:
        # zero rows contribute nothing to sum/sumsq; divisor below uses true S
        y = jnp.pad(y, ((0, 0), (0, Sp - S), (0, 0)))
        if residual is not None:
            residual = jnp.pad(residual, ((0, 0), (0, Sp - S), (0, 0)))
    nS = Sp // TS

    x_spec = pl.BlockSpec((1, TS, Np), lambda n, s: (n, s, 0))
    stat_spec = pl.BlockSpec((1, 8, Np), lambda n, s: (n, 0, 0))
    gb_spec = pl.BlockSpec((1, Np), lambda n, s: (0, 0))

    stats = pl.pallas_call(
        _in_stats_kernel,
        grid=(N, nS),
        in_specs=[x_spec],
        out_specs=stat_spec,
        out_shape=jax.ShapeDtypeStruct((N, 8, Np), jnp.float32),
        compiler_params=pltpu.CompilerParams(
            dimension_semantics=("parallel", "arbitrary"),
            vmem_limit_bytes=_VMEM_LIMIT),
    )(y)

    if residual is None:
        kernel = functools.partial(_in_apply_kernel, act=act, inv_s=1.0 / S, eps=eps)
        args = (y, stats, g, b)
        in_specs = [x_spec, stat_spec, gb_spec, gb_spec]
    else:
        kernel = functools.partial(_in_apply_res_kernel, inv_s=1.0 / S, eps=eps)
        args = (y, residual.astype(jnp.bfloat16), stats, g, b)
        in_specs = [x_spec, x_spec, stat_spec, gb_spec, gb_spec]

    out = pl.pallas_call(
        kernel,
        grid=(N, nS),
        in_specs=in_specs,
        out_specs=x_spec,
        out_shape=jax.ShapeDtypeStruct((N, Sp, Np), out_dtype),
        compiler_params=pltpu.CompilerParams(
            dimension_semantics=("parallel", "parallel"),
            vmem_limit_bytes=_VMEM_LIMIT),
    )(*args)
    return out[:, :S] if Sp != S else out


# ---------------------------------------------------------------------------
# Model building blocks (NHWC / bf16 everywhere inside the model)
# ---------------------------------------------------------------------------

def conv_in_block(x, params, k, stride=1, act=None, residual=None, up=1,
                  out_dtype=jnp.bfloat16):
    """[NearestUp2x ->] ReflectionPad -> Conv(k, stride) -> InstanceNorm(affine)
    [+ReLU / +tanh*0.5+0.5 / +residual].  The conv bias is omitted on purpose:
    it is exactly cancelled by the instance norm's per-instance mean subtraction."""
    N = x.shape[0]
    Cin = x.shape[-1]
    w = params["w"]
    Cout = w.shape[-1]

    if up == 1 and (stride != 1 or k * Cin < _LANE):
        # stride-2 convs and d1 (Cin=3): full-depth im2col GEMM
        y, Ho, Wo = conv2d_im2col(x, w, k, stride)
    else:
        y, Ho, Wo = conv2d_rowtap(x, w, k, up=up)

    res = None
    if residual is not None:
        assert residual.shape[-1] == y.shape[-1]
        res = residual.reshape(N, Ho * Wo, residual.shape[-1])

    out = pallas_instance_norm(y, params["gamma"], params["beta"], act=act,
                               residual=res, out_dtype=out_dtype)
    return out[:, :, :Cout].reshape(N, Ho, Wo, Cout)


IMAGENET_MEAN = jnp.array([0.485, 0.456, 0.406], jnp.float32).reshape(1, 3, 1, 1)
IMAGENET_STD = jnp.array([0.229, 0.224, 0.225], jnp.float32).reshape(1, 3, 1, 1)


def stylization_forward(image, params, normalize=True):
    # TODO(synk): per_channel_normalize is not shown in the module source;
    # assumed to be ImageNet mean/std channel normalization.
    if normalize:
        image = (image - IMAGENET_MEAN) / IMAGENET_STD

    # single NCHW -> NHWC layout change at entry; bf16 activations throughout
    x = jnp.transpose(image, (0, 2, 3, 1)).astype(jnp.bfloat16)

    # down_convolution
    x = conv_in_block(x, params["d1"], 9, stride=1, act="relu")
    x = conv_in_block(x, params["d2"], 3, stride=2, act="relu")
    x = conv_in_block(x, params["d3"], 3, stride=2, act="relu")

    # 5 residual blocks
    for p1, p2 in params["res"]:
        y = conv_in_block(x, p1, 3, act="relu")
        x = conv_in_block(y, p2, 3, act=None, residual=x)

    # up_convolution: nearest-2x upsample folded into the conv patch gather
    x = conv_in_block(x, params["u1"], 3, act="relu", up=2)
    x = conv_in_block(x, params["u2"], 3, act="relu", up=2)
    x = conv_in_block(x, params["u3"], 9, act="tanh05", out_dtype=jnp.float32)

    return jnp.transpose(x, (0, 3, 1, 2))            # NHWC -> NCHW once at exit


# ---------------------------------------------------------------------------
# Deterministic parameter initialization
# ---------------------------------------------------------------------------

def init_conv(key, cin, cout, k):
    kw, kb = jax.random.split(key)
    scale = 1.0 / np.sqrt(cin * k * k)
    return dict(
        w=jax.random.normal(kw, (k, k, cin, cout), jnp.float32) * scale,
        # bias kept to mirror the PyTorch parameters, but never applied: it is a
        # mathematical no-op because InstanceNorm follows every conv.
        b=jax.random.uniform(kb, (cout,), jnp.float32, -scale, scale),
        gamma=jnp.ones((cout,), jnp.float32),
        beta=jnp.zeros((cout,), jnp.float32),
    )


def init_params(key):
    keys = jax.random.split(key, 16)
    return {
        "d1": init_conv(keys[0], 3, 32, 9),
        "d2": init_conv(keys[1], 32, 64, 3),
        "d3": init_conv(keys[2], 64, 128, 3),
        "res": [
            (init_conv(keys[3 + 2 * i], 128, 128, 3),
             init_conv(keys[4 + 2 * i], 128, 128, 3))
            for i in range(5)
        ],
        "u1": init_conv(keys[13], 128, 64, 3),
        "u2": init_conv(keys[14], 64, 32, 3),
        "u3": init_conv(keys[15], 32, 3, 9),
    }


# ---------------------------------------------------------------------------

if __name__ == "__main__":
    key = jax.random.PRNGKey(0)
    k_img, k_par = jax.random.split(key)
    image = jax.random.uniform(k_img, (2, 3, 16, 16), dtype=jnp.float32)  # NCHW
    params = init_params(k_par)

    fwd = jax.jit(functools.partial(stylization_forward, normalize=True))
    out = fwd(image, params)
    out = jax.block_until_ready(out)

    assert out.shape == (2, 3, 16, 16), out.shape
    assert bool(jnp.all(jnp.isfinite(out)))
    assert bool(jnp.all(out >= 0.0)) and bool(jnp.all(out <= 1.0))  # tanh*0.5+0.5 range
    print("KERNEL_OK")
</pallas_src>

<mosaic_0001>
module attributes {stable_mosaic.version = 11 : i64} {
  func.func @_gemm_kernel(%arg0: i32, %arg1: memref<512x256xbf16, #tpu.memory_space<vmem>>, %arg2: memref<256x128xbf16, #tpu.memory_space<vmem>>, %arg3: memref<512x128xf32, #tpu.memory_space<vmem>>) attributes {dimension_semantics = [#tpu.dimension_semantics<parallel>], iteration_bounds = array<i64: 1>, scalar_prefetch = 0 : i64, scratch_operands = 0 : i64, tpu.core_type = #tpu.core_type<tc>, window_params = [{transform_indices = @transform_0, window_bounds = array<i64: 512, 256>}, {pipeline_mode = #tpu.pipeline_mode<synchronous>, transform_indices = @transform_1, window_bounds = array<i64: 256, 128>}, {transform_indices = @transform_2, window_bounds = array<i64: 512, 128>}]} {
    %c0 = arith.constant 0 : index
    %c0_0 = arith.constant 0 : index
    %0 = vector.load %arg1[%c0, %c0_0] : memref<512x256xbf16, #tpu.memory_space<vmem>>, vector<512x256xbf16>
    %c0_1 = arith.constant 0 : index
    %c0_2 = arith.constant 0 : index
    %1 = vector.load %arg2[%c0_1, %c0_2] : memref<256x128xbf16, #tpu.memory_space<vmem>>, vector<256x128xbf16>
    %cst = arith.constant dense<0.000000e+00> : vector<512x128xf32>
    %2 = tpu.matmul %0, %1, %cst {dimension_numbers = #tpu.dot_dimension_numbers<[1], [0], [0], [1], [0, 0, 1, 1], [], []>} : vector<512x256xbf16>, vector<256x128xbf16>, vector<512x128xf32> -> vector<512x128xf32>
    %c0_3 = arith.constant 0 : index
    %c0_4 = arith.constant 0 : index
    %3 = vector.load %arg3[%c0_3, %c0_4] : memref<512x128xf32, #tpu.memory_space<vmem>>, vector<512x128xf32>
    tpu.vector_store %arg3[%c0_3, %c0_4], %2 {strides = array<i32>} : memref<512x128xf32, #tpu.memory_space<vmem>>, vector<512x128xf32>,
    return
  }
  func.func @transform_0(%arg0: i32) -> (i32, i32) {
    %c0_i32 = arith.constant 0 : i32
    %c0_i32_0 = arith.constant 0 : i32
    return %arg0, %c0_i32 : i32, i32
  }
  func.func @transform_1(%arg0: i32) -> (i32, i32) {
    %c0_i32 = arith.constant 0 : i32
    %c0_i32_0 = arith.constant 0 : i32
    %c0_i32_1 = arith.constant 0 : i32
    return %c0_i32, %c0_i32_0 : i32, i32
  }
  func.func @transform_2(%arg0: i32) -> (i32, i32) {
    %c0_i32 = arith.constant 0 : i32
    %c0_i32_0 = arith.constant 0 : i32
    return %arg0, %c0_i32 : i32, i32
  }
}

module attributes {stable_mosaic.version = 11 : i64} {
  func.func @_in_stats_kernel(%arg0: i32, %arg1: i32, %arg2: memref<1x256x128xf32, #tpu.memory_space<vmem>>, %arg3: memref<1x8x128xf32, #tpu.memory_space<vmem>>) attributes {dimension_semantics = [#tpu.dimension_semantics<parallel>, #tpu.dimension_semantics<arbitrary>], iteration_bounds = array<i64: 2, 1>, scalar_prefetch = 0 : i64, scratch_operands = 0 : i64, tpu.core_type = #tpu.core_type<tc>, window_params = [{transform_indices = @transform_0, window_bounds = array<i64: 1, 256, 128>}, {transform_indices = @transform_1, window_bounds = array<i64: 1, 8, 128>}]} {
    %c0_i32 = arith.constant 0 : i32
    %0 = arith.cmpi eq, %arg1, %c0_i32 : i32
    %1 = arith.extui %0 : i1 to i32
    %c0_i32_0 = arith.constant 0 : i32
    %2 = arith.cmpi ne, %1, %c0_i32_0 : i32
    scf.if %2 {
      %cst_15 = arith.constant 0.000000e+00 : f32
      %22 = vector.broadcast %cst_15 : f32 to vector<1x8x128xf32>
      %c0_16 = arith.constant 0 : index
      %c0_17 = arith.constant 0 : index
      %c0_18 = arith.constant 0 : index
      %23 = vector.load %arg3[%c0_16, %c0_17, %c0_18] : memref<1x8x128xf32, #tpu.memory_space<vmem>>, vector<1x8x128xf32>
      tpu.vector_store %arg3[%c0_16, %c0_17, %c0_18], %22 {strides = array<i32>} : memref<1x8x128xf32, #tpu.memory_space<vmem>>, vector<1x8x128xf32>,
    } else {
    }
    %c0 = arith.constant 0 : index
    %c0_1 = arith.constant 0 : index
    %c0_2 = arith.constant 0 : index
    %3 = vector.load %arg2[%c0, %c0_1, %c0_2] : memref<1x256x128xf32, #tpu.memory_space<vmem>>, vector<1x256x128xf32>
    %4 = vector.shape_cast %3 : vector<1x256x128xf32> to vector<256x128xf32>
    %c0_3 = arith.constant 0 : index
    %c0_4 = arith.constant 0 : index
    %c0_5 = arith.constant 0 : index
    %5 = vector.load %arg3[%c0_3, %c0_4, %c0_5] : memref<1x8x128xf32, #tpu.memory_space<vmem>>, vector<1x1x128xf32>
    %6 = vector.shape_cast %5 : vector<1x1x128xf32> to vector<1x128xf32>
    %cst = arith.constant dense<0.000000e+00> : vector<128xf32>
    %7 = vector.multi_reduction <add>, %4, %cst [0] : vector<256x128xf32> to vector<128xf32>
    %8 = vector.shape_cast %7 : vector<128xf32> to vector<1x128xf32>
    %9 = arith.addf %6, %8 : vector<1x128xf32>
    %c0_6 = arith.constant 0 : index
    %c0_7 = arith.constant 0 : index
    %c0_8 = arith.constant 0 : index
    %10 = vector.load %arg3[%c0_6, %c0_7, %c0_8] : memref<1x8x128xf32, #tpu.memory_space<vmem>>, vector<1x1x128xf32>
    %11 = vector.shape_cast %10 : vector<1x1x128xf32> to vector<1x128xf32>
    %12 = vector.shape_cast %9 : vector<1x128xf32> to vector<1x1x128xf32>
    tpu.vector_store %arg3[%c0_6, %c0_7, %c0_8], %12 {strides = array<i32>} : memref<1x8x128xf32, #tpu.memory_space<vmem>>, vector<1x1x128xf32>,
    %c0_9 = arith.constant 0 : index
    %c1 = arith.constant 1 : index
    %c0_10 = arith.constant 0 : index
    %13 = vector.load %arg3[%c0_9, %c1, %c0_10] : memref<1x8x128xf32, #tpu.memory_space<vmem>>, vector<1x1x128xf32>
    %14 = vector.shape_cast %13 : vector<1x1x128xf32> to vector<1x128xf32>
    %15 = arith.mulf %4, %4 : vector<256x128xf32>
    %cst_11 = arith.constant dense<0.000000e+00> : vector<128xf32>
    %16 = vector.multi_reduction <add>, %15, %cst_11 [0] : vector<256x128xf32> to vector<128xf32>
    %17 = vector.shape_cast %16 : vector<128xf32> to vector<1x128xf32>
    %18 = arith.addf %14, %17 : vector<1x128xf32>
    %c0_12 = arith.constant 0 : index
    %c1_13 = arith.constant 1 : index
    %c0_14 = arith.constant 0 : index
    %19 = vector.load %arg3[%c0_12, %c1_13, %c0_14] : memref<1x8x128xf32, #tpu.memory_space<vmem>>, vector<1x1x128xf32>
    %20 = vector.shape_cast %19 : vector<1x1x128xf32> to vector<1x128xf32>
    %21 = vector.shape_cast %18 : vector<1x128xf32> to vector<1x1x128xf32>
    tpu.vector_store %arg3[%c0_12, %c1_13, %c0_14], %21 {strides = array<i32>} : memref<1x8x128xf32, #tpu.memory_space<vmem>>, vector<1x1x128xf32>,
    return
  }
  func.func @transform_0(%arg0: i32, %arg1: i32) -> (i32, i32, i32) {
    %c0_i32 = arith.constant 0 : i32
    %c0_i32_0 = arith.constant 0 : i32
    return %arg0, %arg1, %c0_i32 : i32, i32, i32
  }
  func.func @transform_1(%arg0: i32, %arg1: i32) -> (i32, i32, i32) {
    %c0_i32 = arith.constant 0 : i32
    %c0_i32_0 = arith.constant 0 : i32
    %c0_i32_1 = arith.constant 0 : i32
    return %arg0, %c0_i32, %c0_i32_0 : i32, i32, i32
  }
}

module attributes {stable_mosaic.version = 11 : i64} {
  func.func @_in_apply_kernel(%arg0: i32, %arg1: i32, %arg2: memref<1x256x128xf32, #tpu.memory_space<vmem>>, %arg3: memref<1x8x128xf32, #tpu.memory_space<vmem>>, %arg4: memref<1x128xf32, #tpu.memory_space<vmem>>, %arg5: memref<1x128xf32, #tpu.memory_space<vmem>>, %arg6: memref<1x256x128xbf16, #tpu.memory_space<vmem>>) attributes {dimension_semantics = [#tpu.dimension_semantics<parallel>, #tpu.dimension_semantics<parallel>], iteration_bounds = array<i64: 2, 1>, scalar_prefetch = 0 : i64, scratch_operands = 0 : i64, tpu.core_type = #tpu.core_type<tc>, window_params = [{transform_indices = @transform_0, window_bounds = array<i64: 1, 256, 128>}, {transform_indices = @transform_1, window_bounds = array<i64: 1, 8, 128>}, {pipeline_mode = #tpu.pipeline_mode<synchronous>, transform_indices = @transform_2, window_bounds = array<i64: 1, 128>}, {pipeline_mode = #tpu.pipeline_mode<synchronous>, transform_indices = @transform_3, window_bounds = array<i64: 1, 128>}, {transform_indices = @transform_4, window_bounds = array<i64: 1, 256, 128>}]} {
    %c0 = arith.constant 0 : index
    %c0_0 = arith.constant 0 : index
    %c0_1 = arith.constant 0 : index
    %0 = vector.load %arg2[%c0, %c0_0, %c0_1] : memref<1x256x128xf32, #tpu.memory_space<vmem>>, vector<1x256x128xf32>
    %1 = vector.shape_cast %0 : vector<1x256x128xf32> to vector<256x128xf32>
    %c0_2 = arith.constant 0 : index
    %c0_3 = arith.constant 0 : index
    %c0_4 = arith.constant 0 : index
    %2 = vector.load %arg3[%c0_2, %c0_3, %c0_4] : memref<1x8x128xf32, #tpu.memory_space<vmem>>, vector<1x1x128xf32>
    %3 = vector.shape_cast %2 : vector<1x1x128xf32> to vector<1x128xf32>
    %cst = arith.constant 3.906250e-03 : f32
    %4 = vector.broadcast %cst : f32 to vector<1x128xf32>
    %5 = arith.mulf %3, %4 : vector<1x128xf32>
    %c0_5 = arith.constant 0 : index
    %c1 = arith.constant 1 : index
    %c0_6 = arith.constant 0 : index
    %6 = vector.load %arg3[%c0_5, %c1, %c0_6] : memref<1x8x128xf32, #tpu.memory_space<vmem>>, vector<1x1x128xf32>
    %7 = vector.shape_cast %6 : vector<1x1x128xf32> to vector<1x128xf32>
    %cst_7 = arith.constant 3.906250e-03 : f32
    %8 = vector.broadcast %cst_7 : f32 to vector<1x128xf32>
    %9 = arith.mulf %7, %8 : vector<1x128xf32>
    %10 = arith.mulf %5, %5 : vector<1x128xf32>
    %11 = arith.subf %9, %10 : vector<1x128xf32>
    %cst_8 = arith.constant 0.000000e+00 : f32
    %12 = vector.broadcast %cst_8 : f32 to vector<1x128xf32>
    %13 = arith.maximumf %11, %12 : vector<1x128xf32>
    %cst_9 = arith.constant 9.99999974E-6 : f32
    %14 = vector.broadcast %cst_9 : f32 to vector<1x128xf32>
    %15 = arith.addf %13, %14 : vector<1x128xf32>
    %16 = math.rsqrt %15 : vector<1x128xf32>
    %c0_10 = arith.constant 0 : index
    %c0_11 = arith.constant 0 : index
    %17 = vector.load %arg4[%c0_10, %c0_11] : memref<1x128xf32, #tpu.memory_space<vmem>>, vector<1x128xf32>
    %18 = arith.mulf %16, %17 : vector<1x128xf32>
    %19 = vector.broadcast %5 : vector<1x128xf32> to vector<256x128xf32>
    %20 = arith.subf %1, %19 : vector<256x128xf32>
    %21 = vector.broadcast %18 : vector<1x128xf32> to vector<256x128xf32>
    %22 = arith.mulf %20, %21 : vector<256x128xf32>
    %c0_12 = arith.constant 0 : index
    %c0_13 = arith.constant 0 : index
    %23 = vector.load %arg5[%c0_12, %c0_13] : memref<1x128xf32, #tpu.memory_space<vmem>>, vector<1x128xf32>
    %24 = vector.broadcast %23 : vector<1x128xf32> to vector<256x128xf32>
    %25 = arith.addf %22, %24 : vector<256x128xf32>
    %cst_14 = arith.constant 0.000000e+00 : f32
    %26 = vector.broadcast %cst_14 : f32 to vector<256x128xf32>
    %27 = arith.maximumf %25, %26 : vector<256x128xf32>
    %28 = arith.truncf %27 : vector<256x128xf32> to vector<256x128xbf16>
    %c0_15 = arith.constant 0 : index
    %c0_16 = arith.constant 0 : index
    %c0_17 = arith.constant 0 : index
    %29 = vector.load %arg6[%c0_15, %c0_16, %c0_17] : memref<1x256x128xbf16, #tpu.memory_space<vmem>>, vector<1x256x128xbf16>
    %30 = vector.shape_cast %29 : vector<1x256x128xbf16> to vector<256x128xbf16>
    %31 = vector.shape_cast %28 : vector<256x128xbf16> to vector<1x256x128xbf16>
    tpu.vector_store %arg6[%c0_15, %c0_16, %c0_17], %31 {strides = array<i32>} : memref<1x256x128xbf16, #tpu.memory_space<vmem>>, vector<1x256x128xbf16>,
    return
  }
  func.func @transform_0(%arg0: i32, %arg1: i32) -> (i32, i32, i32) {
    %c0_i32 = arith.constant 0 : i32
    %c0_i32_0 = arith.constant 0 : i32
    return %arg0, %arg1, %c0_i32 : i32, i32, i32
  }
  func.func @transform_1(%arg0: i32, %arg1: i32) -> (i32, i32, i32) {
    %c0_i32 = arith.constant 0 : i32
    %c0_i32_0 = arith.constant 0 : i32
    %c0_i32_1 = arith.constant 0 : i32
    return %arg0, %c0_i32, %c0_i32_0 : i32, i32, i32
  }
  func.func @transform_2(%arg0: i32, %arg1: i32) -> (i32, i32) {
    %c0_i32 = arith.constant 0 : i32
    %c0_i32_0 = arith.constant 0 : i32
    %c0_i32_1 = arith.constant 0 : i32
    return %c0_i32, %c0_i32_0 : i32, i32
  }
  func.func @transform_3(%arg0: i32, %arg1: i32) -> (i32, i32) {
    %c0_i32 = arith.constant 0 : i32
    %c0_i32_0 = arith.constant 0 : i32
    %c0_i32_1 = arith.constant 0 : i32
    return %c0_i32, %c0_i32_0 : i32, i32
  }
  func.func @transform_4(%arg0: i32, %arg1: i32) -> (i32, i32, i32) {
    %c0_i32 = arith.constant 0 : i32
    %c0_i32_0 = arith.constant 0 : i32
    return %arg0, %arg1, %c0_i32 : i32, i32, i32
  }
}

module attributes {stable_mosaic.version = 11 : i64} {
  func.func @_gemm_kernel(%arg0: i32, %arg1: memref<128x384xbf16, #tpu.memory_space<vmem>>, %arg2: memref<384x128xbf16, #tpu.memory_space<vmem>>, %arg3: memref<128x128xf32, #tpu.memory_space<vmem>>) attributes {dimension_semantics = [#tpu.dimension_semantics<parallel>], iteration_bounds = array<i64: 1>, scalar_prefetch = 0 : i64, scratch_operands = 0 : i64, tpu.core_type = #tpu.core_type<tc>, window_params = [{transform_indices = @transform_0, window_bounds = array<i64: 128, 384>}, {pipeline_mode = #tpu.pipeline_mode<synchronous>, transform_indices = @transform_1, window_bounds = array<i64: 384, 128>}, {transform_indices = @transform_2, window_bounds = array<i64: 128, 128>}]} {
    %c0 = arith.constant 0 : index
    %c0_0 = arith.constant 0 : index
    %0 = vector.load %arg1[%c0, %c0_0] : memref<128x384xbf16, #tpu.memory_space<vmem>>, vector<128x384xbf16>
    %c0_1 = arith.constant 0 : index
    %c0_2 = arith.constant 0 : index
    %1 = vector.load %arg2[%c0_1, %c0_2] : memref<384x128xbf16, #tpu.memory_space<vmem>>, vector<384x128xbf16>
    %cst = arith.constant dense<0.000000e+00> : vector<128x128xf32>
    %2 = tpu.matmul %0, %1, %cst {dimension_numbers = #tpu.dot_dimension_numbers<[1], [0], [0], [1], [0, 0, 1, 1], [], []>} : vector<128x384xbf16>, vector<384x128xbf16>, vector<128x128xf32> -> vector<128x128xf32>
    %c0_3 = arith.constant 0 : index
    %c0_4 = arith.constant 0 : index
    %3 = vector.load %arg3[%c0_3, %c0_4] : memref<128x128xf32, #tpu.memory_space<vmem>>, vector<128x128xf32>
    tpu.vector_store %arg3[%c0_3, %c0_4], %2 {strides = array<i32>} : memref<128x128xf32, #tpu.memory_space<vmem>>, vector<128x128xf32>,
    return
  }
  func.func @transform_0(%arg0: i32) -> (i32, i32) {
    %c0_i32 = arith.constant 0 : i32
    %c0_i32_0 = arith.constant 0 : i32
    return %arg0, %c0_i32 : i32, i32
  }
  func.func @transform_1(%arg0: i32) -> (i32, i32) {
    %c0_i32 = arith.constant 0 : i32
    %c0_i32_0 = arith.constant 0 : i32
    %c0_i32_1 = arith.constant 0 : i32
    return %c0_i32, %c0_i32_0 : i32, i32
  }
  func.func @transform_2(%arg0: i32) -> (i32, i32) {
    %c0_i32 = arith.constant 0 : i32
    %c0_i32_0 = arith.constant 0 : i32
    return %arg0, %c0_i32 : i32, i32
  }
}

module attributes {stable_mosaic.version = 11 : i64} {
  func.func @_in_stats_kernel(%arg0: i32, %arg1: i32, %arg2: memref<1x64x128xf32, #tpu.memory_space<vmem>>, %arg3: memref<1x8x128xf32, #tpu.memory_space<vmem>>) attributes {dimension_semantics = [#tpu.dimension_semantics<parallel>, #tpu.dimension_semantics<arbitrary>], iteration_bounds = array<i64: 2, 1>, scalar_prefetch = 0 : i64, scratch_operands = 0 : i64, tpu.core_type = #tpu.core_type<tc>, window_params = [{transform_indices = @transform_0, window_bounds = array<i64: 1, 64, 128>}, {transform_indices = @transform_1, window_bounds = array<i64: 1, 8, 128>}]} {
    %c0_i32 = arith.constant 0 : i32
    %0 = arith.cmpi eq, %arg1, %c0_i32 : i32
    %1 = arith.extui %0 : i1 to i32
    %c0_i32_0 = arith.constant 0 : i32
    %2 = arith.cmpi ne, %1, %c0_i32_0 : i32
    scf.if %2 {
      %cst_15 = arith.constant 0.000000e+00 : f32
      %22 = vector.broadcast %cst_15 : f32 to vector<1x8x128xf32>
      %c0_16 = arith.constant 0 : index
      %c0_17 = arith.constant 0 : index
      %c0_18 = arith.constant 0 : index
      %23 = vector.load %arg3[%c0_16, %c0_17, %c0_18] : memref<1x8x128xf32, #tpu.memory_space<vmem>>, vector<1x8x128xf32>
      tpu.vector_store %arg3[%c0_16, %c0_17, %c0_18], %22 {strides = array<i32>} : memref<1x8x128xf32, #tpu.memory_space<vmem>>, vector<1x8x128xf32>,
    } else {
    }
    %c0 = arith.constant 0 : index
    %c0_1 = arith.constant 0 : index
    %c0_2 = arith.constant 0 : index
    %3 = vector.load %arg2[%c0, %c0_1, %c0_2] : memref<1x64x128xf32, #tpu.memory_space<vmem>>, vector<1x64x128xf32>
    %4 = vector.shape_cast %3 : vector<1x64x128xf32> to vector<64x128xf32>
    %c0_3 = arith.constant 0 : index
    %c0_4 = arith.constant 0 : index
    %c0_5 = arith.constant 0 : index
    %5 = vector.load %arg3[%c0_3, %c0_4, %c0_5] : memref<1x8x128xf32, #tpu.memory_space<vmem>>, vector<1x1x128xf32>
    %6 = vector.shape_cast %5 : vector<1x1x128xf32> to vector<1x128xf32>
    %cst = arith.constant dense<0.000000e+00> : vector<128xf32>
    %7 = vector.multi_reduction <add>, %4, %cst [0] : vector<64x128xf32> to vector<128xf32>
    %8 = vector.shape_cast %7 : vector<128xf32> to vector<1x128xf32>
    %9 = arith.addf %6, %8 : vector<1x128xf32>
    %c0_6 = arith.constant 0 : index
    %c0_7 = arith.constant 0 : index
    %c0_8 = arith.constant 0 : index
    %10 = vector.load %arg3[%c0_6, %c0_7, %c0_8] : memref<1x8x128xf32, #tpu.memory_space<vmem>>, vector<1x1x128xf32>
    %11 = vector.shape_cast %10 : vector<1x1x128xf32> to vector<1x128xf32>
    %12 = vector.shape_cast %9 : vector<1x128xf32> to vector<1x1x128xf32>
    tpu.vector_store %arg3[%c0_6, %c0_7, %c0_8], %12 {strides = array<i32>} : memref<1x8x128xf32, #tpu.memory_space<vmem>>, vector<1x1x128xf32>,
    %c0_9 = arith.constant 0 : index
    %c1 = arith.constant 1 : index
    %c0_10 = arith.constant 0 : index
    %13 = vector.load %arg3[%c0_9, %c1, %c0_10] : memref<1x8x128xf32, #tpu.memory_space<vmem>>, vector<1x1x128xf32>
    %14 = vector.shape_cast %13 : vector<1x1x128xf32> to vector<1x128xf32>
    %15 = arith.mulf %4, %4 : vector<64x128xf32>
    %cst_11 = arith.constant dense<0.000000e+00> : vector<128xf32>
    %16 = vector.multi_reduction <add>, %15, %cst_11 [0] : vector<64x128xf32> to vector<128xf32>
    %17 = vector.shape_cast %16 : vector<128xf32> to vector<1x128xf32>
    %18 = arith.addf %14, %17 : vector<1x128xf32>
    %c0_12 = arith.constant 0 : index
    %c1_13 = arith.constant 1 : index
    %c0_14 = arith.constant 0 : index
    %19 = vector.load %arg3[%c0_12, %c1_13, %c0_14] : memref<1x8x128xf32, #tpu.memory_space<vmem>>, vector<1x1x128xf32>
    %20 = vector.shape_cast %19 : vector<1x1x128xf32> to vector<1x128xf32>
    %21 = vector.shape_cast %18 : vector<1x128xf32> to vector<1x1x128xf32>
    tpu.vector_store %arg3[%c0_12, %c1_13, %c0_14], %21 {strides = array<i32>} : memref<1x8x128xf32, #tpu.memory_space<vmem>>, vector<1x1x128xf32>,
    return
  }
  func.func @transform_0(%arg0: i32, %arg1: i32) -> (i32, i32, i32) {
    %c0_i32 = arith.constant 0 : i32
    %c0_i32_0 = arith.constant 0 : i32
    return %arg0, %arg1, %c0_i32 : i32, i32, i32
  }
  func.func @transform_1(%arg0: i32, %arg1: i32) -> (i32, i32, i32) {
    %c0_i32 = arith.constant 0 : i32
    %c0_i32_0 = arith.constant 0 : i32
    %c0_i32_1 = arith.constant 0 : i32
    return %arg0, %c0_i32, %c0_i32_0 : i32, i32, i32
  }
}

module attributes {stable_mosaic.version = 11 : i64} {
  func.func @_in_apply_kernel(%arg0: i32, %arg1: i32, %arg2: memref<1x64x128xf32, #tpu.memory_space<vmem>>, %arg3: memref<1x8x128xf32, #tpu.memory_space<vmem>>, %arg4: memref<1x128xf32, #tpu.memory_space<vmem>>, %arg5: memref<1x128xf32, #tpu.memory_space<vmem>>, %arg6: memref<1x64x128xbf16, #tpu.memory_space<vmem>>) attributes {dimension_semantics = [#tpu.dimension_semantics<parallel>, #tpu.dimension_semantics<parallel>], iteration_bounds = array<i64: 2, 1>, scalar_prefetch = 0 : i64, scratch_operands = 0 : i64, tpu.core_type = #tpu.core_type<tc>, window_params = [{transform_indices = @transform_0, window_bounds = array<i64: 1, 64, 128>}, {transform_indices = @transform_1, window_bounds = array<i64: 1, 8, 128>}, {pipeline_mode = #tpu.pipeline_mode<synchronous>, transform_indices = @transform_2, window_bounds = array<i64: 1, 128>}, {pipeline_mode = #tpu.pipeline_mode<synchronous>, transform_indices = @transform_3, window_bounds = array<i64: 1, 128>}, {transform_indices = @transform_4, window_bounds = array<i64: 1, 64, 128>}]} {
    %c0 = arith.constant 0 : index
    %c0_0 = arith.constant 0 : index
    %c0_1 = arith.constant 0 : index
    %0 = vector.load %arg2[%c0, %c0_0, %c0_1] : memref<1x64x128xf32, #tpu.memory_space<vmem>>, vector<1x64x128xf32>
    %1 = vector.shape_cast %0 : vector<1x64x128xf32> to vector<64x128xf32>
    %c0_2 = arith.constant 0 : index
    %c0_3 = arith.constant 0 : index
    %c0_4 = arith.constant 0 : index
    %2 = vector.load %arg3[%c0_2, %c0_3, %c0_4] : memref<1x8x128xf32, #tpu.memory_space<vmem>>, vector<1x1x128xf32>
    %3 = vector.shape_cast %2 : vector<1x1x128xf32> to vector<1x128xf32>
    %cst = arith.constant 1.562500e-02 : f32
    %4 = vector.broadcast %cst : f32 to vector<1x128xf32>
    %5 = arith.mulf %3, %4 : vector<1x128xf32>
    %c0_5 = arith.constant 0 : index
    %c1 = arith.constant 1 : index
    %c0_6 = arith.constant 0 : index
    %6 = vector.load %arg3[%c0_5, %c1, %c0_6] : memref<1x8x128xf32, #tpu.memory_space<vmem>>, vector<1x1x128xf32>
    %7 = vector.shape_cast %6 : vector<1x1x128xf32> to vector<1x128xf32>
    %cst_7 = arith.constant 1.562500e-02 : f32
    %8 = vector.broadcast %cst_7 : f32 to vector<1x128xf32>
    %9 = arith.mulf %7, %8 : vector<1x128xf32>
    %10 = arith.mulf %5, %5 : vector<1x128xf32>
    %11 = arith.subf %9, %10 : vector<1x128xf32>
    %cst_8 = arith.constant 0.000000e+00 : f32
    %12 = vector.broadcast %cst_8 : f32 to vector<1x128xf32>
    %13 = arith.maximumf %11, %12 : vector<1x128xf32>
    %cst_9 = arith.constant 9.99999974E-6 : f32
    %14 = vector.broadcast %cst_9 : f32 to vector<1x128xf32>
    %15 = arith.addf %13, %14 : vector<1x128xf32>
    %16 = math.rsqrt %15 : vector<1x128xf32>
    %c0_10 = arith.constant 0 : index
    %c0_11 = arith.constant 0 : index
    %17 = vector.load %arg4[%c0_10, %c0_11] : memref<1x128xf32, #tpu.memory_space<vmem>>, vector<1x128xf32>
    %18 = arith.mulf %16, %17 : vector<1x128xf32>
    %19 = vector.broadcast %5 : vector<1x128xf32> to vector<64x128xf32>
    %20 = arith.subf %1, %19 : vector<64x128xf32>
    %21 = vector.broadcast %18 : vector<1x128xf32> to vector<64x128xf32>
    %22 = arith.mulf %20, %21 : vector<64x128xf32>
    %c0_12 = arith.constant 0 : index
    %c0_13 = arith.constant 0 : index
    %23 = vector.load %arg5[%c0_12, %c0_13] : memref<1x128xf32, #tpu.memory_space<vmem>>, vector<1x128xf32>
    %24 = vector.broadcast %23 : vector<1x128xf32> to vector<64x128xf32>
    %25 = arith.addf %22, %24 : vector<64x128xf32>
    %cst_14 = arith.constant 0.000000e+00 : f32
    %26 = vector.broadcast %cst_14 : f32 to vector<64x128xf32>
    %27 = arith.maximumf %25, %26 : vector<64x128xf32>
    %28 = arith.truncf %27 : vector<64x128xf32> to vector<64x128xbf16>
    %c0_15 = arith.constant 0 : index
    %c0_16 = arith.constant 0 : index
    %c0_17 = arith.constant 0 : index
    %29 = vector.load %arg6[%c0_15, %c0_16, %c0_17] : memref<1x64x128xbf16, #tpu.memory_space<vmem>>, vector<1x64x128xbf16>
    %30 = vector.shape_cast %29 : vector<1x64x128xbf16> to vector<64x128xbf16>
    %31 = vector.shape_cast %28 : vector<64x128xbf16> to vector<1x64x128xbf16>
    tpu.vector_store %arg6[%c0_15, %c0_16, %c0_17], %31 {strides = array<i32>} : memref<1x64x128xbf16, #tpu.memory_space<vmem>>, vector<1x64x128xbf16>,
    return
  }
  func.func @transform_0(%arg0: i32, %arg1: i32) -> (i32, i32, i32) {
    %c0_i32 = arith.constant 0 : i32
    %c0_i32_0 = arith.constant 0 : i32
    return %arg0, %arg1, %c0_i32 : i32, i32, i32
  }
  func.func @transform_1(%arg0: i32, %arg1: i32) -> (i32, i32, i32) {
    %c0_i32 = arith.constant 0 : i32
    %c0_i32_0 = arith.constant 0 : i32
    %c0_i32_1 = arith.constant 0 : i32
    return %arg0, %c0_i32, %c0_i32_0 : i32, i32, i32
  }
  func.func @transform_2(%arg0: i32, %arg1: i32) -> (i32, i32) {
    %c0_i32 = arith.constant 0 : i32
    %c0_i32_0 = arith.constant 0 : i32
    %c0_i32_1 = arith.constant 0 : i32
    return %c0_i32, %c0_i32_0 : i32, i32
  }
  func.func @transform_3(%arg0: i32, %arg1: i32) -> (i32, i32) {
    %c0_i32 = arith.constant 0 : i32
    %c0_i32_0 = arith.constant 0 : i32
    %c0_i32_1 = arith.constant 0 : i32
    return %c0_i32, %c0_i32_0 : i32, i32
  }
  func.func @transform_4(%arg0: i32, %arg1: i32) -> (i32, i32, i32) {
    %c0_i32 = arith.constant 0 : i32
    %c0_i32_0 = arith.constant 0 : i32
    return %arg0, %arg1, %c0_i32 : i32, i32, i32
  }
}

module attributes {stable_mosaic.version = 11 : i64} {
  func.func @_gemm_kernel(%arg0: i32, %arg1: memref<32x640xbf16, #tpu.memory_space<vmem>>, %arg2: memref<640x128xbf16, #tpu.memory_space<vmem>>, %arg3: memref<32x128xf32, #tpu.memory_space<vmem>>) attributes {dimension_semantics = [#tpu.dimension_semantics<parallel>], iteration_bounds = array<i64: 1>, scalar_prefetch = 0 : i64, scratch_operands = 0 : i64, tpu.core_type = #tpu.core_type<tc>, window_params = [{transform_indices = @transform_0, window_bounds = array<i64: 32, 640>}, {pipeline_mode = #tpu.pipeline_mode<synchronous>, transform_indices = @transform_1, window_bounds = array<i64: 640, 128>}, {transform_indices = @transform_2, window_bounds = array<i64: 32, 128>}]} {
    %c0 = arith.constant 0 : index
    %c0_0 = arith.constant 0 : index
    %0 = vector.load %arg1[%c0, %c0_0] : memref<32x640xbf16, #tpu.memory_space<vmem>>, vector<32x640xbf16>
    %c0_1 = arith.constant 0 : index
    %c0_2 = arith.constant 0 : index
    %1 = vector.load %arg2[%c0_1, %c0_2] : memref<640x128xbf16, #tpu.memory_space<vmem>>, vector<640x128xbf16>
    %cst = arith.constant dense<0.000000e+00> : vector<32x128xf32>
    %2 = tpu.matmul %0, %1, %cst {dimension_numbers = #tpu.dot_dimension_numbers<[1], [0], [0], [1], [0, 0, 1, 1], [], []>} : vector<32x640xbf16>, vector<640x128xbf16>, vector<32x128xf32> -> vector<32x128xf32>
    %c0_3 = arith.constant 0 : index
    %c0_4 = arith.constant 0 : index
    %3 = vector.load %arg3[%c0_3, %c0_4] : memref<32x128xf32, #tpu.memory_space<vmem>>, vector<32x128xf32>
    tpu.vector_store %arg3[%c0_3, %c0_4], %2 {strides = array<i32>} : memref<32x128xf32, #tpu.memory_space<vmem>>, vector<32x128xf32>,
    return
  }
  func.func @transform_0(%arg0: i32) -> (i32, i32) {
    %c0_i32 = arith.constant 0 : i32
    %c0_i32_0 = arith.constant 0 : i32
    return %arg0, %c0_i32 : i32, i32
  }
  func.func @transform_1(%arg0: i32) -> (i32, i32) {
    %c0_i32 = arith.constant 0 : i32
    %c0_i32_0 = arith.constant 0 : i32
    %c0_i32_1 = arith.constant 0 : i32
    return %c0_i32, %c0_i32_0 : i32, i32
  }
  func.func @transform_2(%arg0: i32) -> (i32, i32) {
    %c0_i32 = arith.constant 0 : i32
    %c0_i32_0 = arith.constant 0 : i32
    return %arg0, %c0_i32 : i32, i32
  }
}

module attributes {stable_mosaic.version = 11 : i64} {
  func.func @_in_apply_kernel(%arg0: i32, %arg1: i32, %arg2: memref<1x16x128xf32, #tpu.memory_space<vmem>>, %arg3: memref<1x8x128xf32, #tpu.memory_space<vmem>>, %arg4: memref<1x128xf32, #tpu.memory_space<vmem>>, %arg5: memref<1x128xf32, #tpu.memory_space<vmem>>, %arg6: memref<1x16x128xbf16, #tpu.memory_space<vmem>>) attributes {dimension_semantics = [#tpu.dimension_semantics<parallel>, #tpu.dimension_semantics<parallel>], iteration_bounds = array<i64: 2, 1>, scalar_prefetch = 0 : i64, scratch_operands = 0 : i64, tpu.core_type = #tpu.core_type<tc>, window_params = [{transform_indices = @transform_0, window_bounds = array<i64: 1, 16, 128>}, {transform_indices = @transform_1, window_bounds = array<i64: 1, 8, 128>}, {pipeline_mode = #tpu.pipeline_mode<synchronous>, transform_indices = @transform_2, window_bounds = array<i64: 1, 128>}, {pipeline_mode = #tpu.pipeline_mode<synchronous>, transform_indices = @transform_3, window_bounds = array<i64: 1, 128>}, {transform_indices = @transform_4, window_bounds = array<i64: 1, 16, 128>}]} {
    %c0 = arith.constant 0 : index
    %c0_0 = arith.constant 0 : index
    %c0_1 = arith.constant 0 : index
    %0 = vector.load %arg2[%c0, %c0_0, %c0_1] : memref<1x16x128xf32, #tpu.memory_space<vmem>>, vector<1x16x128xf32>
    %1 = vector.shape_cast %0 : vector<1x16x128xf32> to vector<16x128xf32>
    %c0_2 = arith.constant 0 : index
    %c0_3 = arith.constant 0 : index
    %c0_4 = arith.constant 0 : index
    %2 = vector.load %arg3[%c0_2, %c0_3, %c0_4] : memref<1x8x128xf32, #tpu.memory_space<vmem>>, vector<1x1x128xf32>
    %3 = vector.shape_cast %2 : vector<1x1x128xf32> to vector<1x128xf32>
    %cst = arith.constant 6.250000e-02 : f32
    %4 = vector.broadcast %cst : f32 to vector<1x128xf32>
    %5 = arith.mulf %3, %4 : vector<1x128xf32>
    %c0_5 = arith.constant 0 : index
    %c1 = arith.constant 1 : index
    %c0_6 = arith.constant 0 : index
    %6 = vector.load %arg3[%c0_5, %c1, %c0_6] : memref<1x8x128xf32, #tpu.memory_space<vmem>>, vector<1x1x128xf32>
    %7 = vector.shape_cast %6 : vector<1x1x128xf32> to vector<1x128xf32>
    %cst_7 = arith.constant 6.250000e-02 : f32
    %8 = vector.broadcast %cst_7 : f32 to vector<1x128xf32>
    %9 = arith.mulf %7, %8 : vector<1x128xf32>
    %10 = arith.mulf %5, %5 : vector<1x128xf32>
    %11 = arith.subf %9, %10 : vector<1x128xf32>
    %cst_8 = arith.constant 0.000000e+00 : f32
    %12 = vector.broadcast %cst_8 : f32 to vector<1x128xf32>
    %13 = arith.maximumf %11, %12 : vector<1x128xf32>
    %cst_9 = arith.constant 9.99999974E-6 : f32
    %14 = vector.broadcast %cst_9 : f32 to vector<1x128xf32>
    %15 = arith.addf %13, %14 : vector<1x128xf32>
    %16 = math.rsqrt %15 : vector<1x128xf32>
    %c0_10 = arith.constant 0 : index
    %c0_11 = arith.constant 0 : index
    %17 = vector.load %arg4[%c0_10, %c0_11] : memref<1x128xf32, #tpu.memory_space<vmem>>, vector<1x128xf32>
    %18 = arith.mulf %16, %17 : vector<1x128xf32>
    %19 = vector.broadcast %5 : vector<1x128xf32> to vector<16x128xf32>
    %20 = arith.subf %1, %19 : vector<16x128xf32>
    %21 = vector.broadcast %18 : vector<1x128xf32> to vector<16x128xf32>
    %22 = arith.mulf %20, %21 : vector<16x128xf32>
    %c0_12 = arith.constant 0 : index
    %c0_13 = arith.constant 0 : index
    %23 = vector.load %arg5[%c0_12, %c0_13] : memref<1x128xf32, #tpu.memory_space<vmem>>, vector<1x128xf32>
    %24 = vector.broadcast %23 : vector<1x128xf32> to vector<16x128xf32>
    %25 = arith.addf %22, %24 : vector<16x128xf32>
    %cst_14 = arith.constant 0.000000e+00 : f32
    %26 = vector.broadcast %cst_14 : f32 to vector<16x128xf32>
    %27 = arith.maximumf %25, %26 : vector<16x128xf32>
    %28 = arith.truncf %27 : vector<16x128xf32> to vector<16x128xbf16>
    %c0_15 = arith.constant 0 : index
    %c0_16 = arith.constant 0 : index
    %c0_17 = arith.constant 0 : index
    %29 = vector.load %arg6[%c0_15, %c0_16, %c0_17] : memref<1x16x128xbf16, #tpu.memory_space<vmem>>, vector<1x16x128xbf16>
    %30 = vector.shape_cast %29 : vector<1x16x128xbf16> to vector<16x128xbf16>
    %31 = vector.shape_cast %28 : vector<16x128xbf16> to vector<1x16x128xbf16>
    tpu.vector_store %arg6[%c0_15, %c0_16, %c0_17], %31 {strides = array<i32>} : memref<1x16x128xbf16, #tpu.memory_space<vmem>>, vector<1x16x128xbf16>,
    return
  }
  func.func @transform_0(%arg0: i32, %arg1: i32) -> (i32, i32, i32) {
    %c0_i32 = arith.constant 0 : i32
    %c0_i32_0 = arith.constant 0 : i32
    return %arg0, %arg1, %c0_i32 : i32, i32, i32
  }
  func.func @transform_1(%arg0: i32, %arg1: i32) -> (i32, i32, i32) {
    %c0_i32 = arith.constant 0 : i32
    %c0_i32_0 = arith.constant 0 : i32
    %c0_i32_1 = arith.constant 0 : i32
    return %arg0, %c0_i32, %c0_i32_0 : i32, i32, i32
  }
  func.func @transform_2(%arg0: i32, %arg1: i32) -> (i32, i32) {
    %c0_i32 = arith.constant 0 : i32
    %c0_i32_0 = arith.constant 0 : i32
    %c0_i32_1 = arith.constant 0 : i32
    return %c0_i32, %c0_i32_0 : i32, i32
  }
  func.func @transform_3(%arg0: i32, %arg1: i32) -> (i32, i32) {
    %c0_i32 = arith.constant 0 : i32
    %c0_i32_0 = arith.constant 0 : i32
    %c0_i32_1 = arith.constant 0 : i32
    return %c0_i32, %c0_i32_0 : i32, i32
  }
  func.func @transform_4(%arg0: i32, %arg1: i32) -> (i32, i32, i32) {
    %c0_i32 = arith.constant 0 : i32
    %c0_i32_0 = arith.constant 0 : i32
    return %arg0, %arg1, %c0_i32 : i32, i32, i32
  }
}

module attributes {stable_mosaic.version = 11 : i64} {
  func.func @_in_stats_kernel(%arg0: i32, %arg1: i32, %arg2: memref<1x16x128xf32, #tpu.memory_space<vmem>>, %arg3: memref<1x8x128xf32, #tpu.memory_space<vmem>>) attributes {dimension_semantics = [#tpu.dimension_semantics<parallel>, #tpu.dimension_semantics<arbitrary>], iteration_bounds = array<i64: 2, 1>, scalar_prefetch = 0 : i64, scratch_operands = 0 : i64, tpu.core_type = #tpu.core_type<tc>, window_params = [{transform_indices = @transform_0, window_bounds = array<i64: 1, 16, 128>}, {transform_indices = @transform_1, window_bounds = array<i64: 1, 8, 128>}]} {
    %c0_i32 = arith.constant 0 : i32
    %0 = arith.cmpi eq, %arg1, %c0_i32 : i32
    %1 = arith.extui %0 : i1 to i32
    %c0_i32_0 = arith.constant 0 : i32
    %2 = arith.cmpi ne, %1, %c0_i32_0 : i32
    scf.if %2 {
      %cst_15 = arith.constant 0.000000e+00 : f32
      %22 = vector.broadcast %cst_15 : f32 to vector<1x8x128xf32>
      %c0_16 = arith.constant 0 : index
      %c0_17 = arith.constant 0 : index
      %c0_18 = arith.constant 0 : index
      %23 = vector.load %arg3[%c0_16, %c0_17, %c0_18] : memref<1x8x128xf32, #tpu.memory_space<vmem>>, vector<1x8x128xf32>
      tpu.vector_store %arg3[%c0_16, %c0_17, %c0_18], %22 {strides = array<i32>} : memref<1x8x128xf32, #tpu.memory_space<vmem>>, vector<1x8x128xf32>,
    } else {
    }
    %c0 = arith.constant 0 : index
    %c0_1 = arith.constant 0 : index
    %c0_2 = arith.constant 0 : index
    %3 = vector.load %arg2[%c0, %c0_1, %c0_2] : memref<1x16x128xf32, #tpu.memory_space<vmem>>, vector<1x16x128xf32>
    %4 = vector.shape_cast %3 : vector<1x16x128xf32> to vector<16x128xf32>
    %c0_3 = arith.constant 0 : index
    %c0_4 = arith.constant 0 : index
    %c0_5 = arith.constant 0 : index
    %5 = vector.load %arg3[%c0_3, %c0_4, %c0_5] : memref<1x8x128xf32, #tpu.memory_space<vmem>>, vector<1x1x128xf32>
    %6 = vector.shape_cast %5 : vector<1x1x128xf32> to vector<1x128xf32>
    %cst = arith.constant dense<0.000000e+00> : vector<128xf32>
    %7 = vector.multi_reduction <add>, %4, %cst [0] : vector<16x128xf32> to vector<128xf32>
    %8 = vector.shape_cast %7 : vector<128xf32> to vector<1x128xf32>
    %9 = arith.addf %6, %8 : vector<1x128xf32>
    %c0_6 = arith.constant 0 : index
    %c0_7 = arith.constant 0 : index
    %c0_8 = arith.constant 0 : index
    %10 = vector.load %arg3[%c0_6, %c0_7, %c0_8] : memref<1x8x128xf32, #tpu.memory_space<vmem>>, vector<1x1x128xf32>
    %11 = vector.shape_cast %10 : vector<1x1x128xf32> to vector<1x128xf32>
    %12 = vector.shape_cast %9 : vector<1x128xf32> to vector<1x1x128xf32>
    tpu.vector_store %arg3[%c0_6, %c0_7, %c0_8], %12 {strides = array<i32>} : memref<1x8x128xf32, #tpu.memory_space<vmem>>, vector<1x1x128xf32>,
    %c0_9 = arith.constant 0 : index
    %c1 = arith.constant 1 : index
    %c0_10 = arith.constant 0 : index
    %13 = vector.load %arg3[%c0_9, %c1, %c0_10] : memref<1x8x128xf32, #tpu.memory_space<vmem>>, vector<1x1x128xf32>
    %14 = vector.shape_cast %13 : vector<1x1x128xf32> to vector<1x128xf32>
    %15 = arith.mulf %4, %4 : vector<16x128xf32>
    %cst_11 = arith.constant dense<0.000000e+00> : vector<128xf32>
    %16 = vector.multi_reduction <add>, %15, %cst_11 [0] : vector<16x128xf32> to vector<128xf32>
    %17 = vector.shape_cast %16 : vector<128xf32> to vector<1x128xf32>
    %18 = arith.addf %14, %17 : vector<1x128xf32>
    %c0_12 = arith.constant 0 : index
    %c1_13 = arith.constant 1 : index
    %c0_14 = arith.constant 0 : index
    %19 = vector.load %arg3[%c0_12, %c1_13, %c0_14] : memref<1x8x128xf32, #tpu.memory_space<vmem>>, vector<1x1x128xf32>
    %20 = vector.shape_cast %19 : vector<1x1x128xf32> to vector<1x128xf32>
    %21 = vector.shape_cast %18 : vector<1x128xf32> to vector<1x1x128xf32>
    tpu.vector_store %arg3[%c0_12, %c1_13, %c0_14], %21 {strides = array<i32>} : memref<1x8x128xf32, #tpu.memory_space<vmem>>, vector<1x1x128xf32>,
    return
  }
  func.func @transform_0(%arg0: i32, %arg1: i32) -> (i32, i32, i32) {
    %c0_i32 = arith.constant 0 : i32
    %c0_i32_0 = arith.constant 0 : i32
    return %arg0, %arg1, %c0_i32 : i32, i32, i32
  }
  func.func @transform_1(%arg0: i32, %arg1: i32) -> (i32, i32, i32) {
    %c0_i32 = arith.constant 0 : i32
    %c0_i32_0 = arith.constant 0 : i32
    %c0_i32_1 = arith.constant 0 : i32
    return %arg0, %c0_i32, %c0_i32_0 : i32, i32, i32
  }
}

module attributes {stable_mosaic.version = 11 : i64} {
  func.func @_rowtap_kernel(%arg0: i32, %arg1: memref<1x24x384xbf16, #tpu.memory_space<vmem>>, %arg2: memref<3x384x128xbf16, #tpu.memory_space<vmem>>, %arg3: memref<1x16x128xf32, #tpu.memory_space<vmem>>) attributes {dimension_semantics = [#tpu.dimension_semantics<parallel>], iteration_bounds = array<i64: 2>, scalar_prefetch = 0 : i64, scratch_operands = 0 : i64, tpu.core_type = #tpu.core_type<tc>, window_params = [{transform_indices = @transform_0, window_bounds = array<i64: 1, 24, 384>}, {pipeline_mode = #tpu.pipeline_mode<synchronous>, transform_indices = @transform_1, window_bounds = array<i64: 3, 384, 128>}, {transform_indices = @transform_2, window_bounds = array<i64: 1, 16, 128>}]} {
    %cst = arith.constant 0.000000e+00 : f32
    %0 = vector.broadcast %cst : f32 to vector<16x128xf32>
    %c0 = arith.constant 0 : index
    %c0_0 = arith.constant 0 : index
    %c0_1 = arith.constant 0 : index
    %1 = vector.load %arg1[%c0, %c0_0, %c0_1] : memref<1x24x384xbf16, #tpu.memory_space<vmem>>, vector<1x16x384xbf16>
    %2 = vector.shape_cast %1 : vector<1x16x384xbf16> to vector<16x384xbf16>
    %c0_2 = arith.constant 0 : index
    %c0_3 = arith.constant 0 : index
    %c0_4 = arith.constant 0 : index
    %3 = vector.load %arg2[%c0_2, %c0_3, %c0_4] : memref<3x384x128xbf16, #tpu.memory_space<vmem>>, vector<1x384x128xbf16>
    %4 = vector.shape_cast %3 : vector<1x384x128xbf16> to vector<384x128xbf16>
    %cst_5 = arith.constant dense<0.000000e+00> : vector<16x128xf32>
    %5 = tpu.matmul %2, %4, %cst_5 {dimension_numbers = #tpu.dot_dimension_numbers<[1], [0], [0], [1], [0, 0, 1, 1], [], []>} : vector<16x384xbf16>, vector<384x128xbf16>, vector<16x128xf32> -> vector<16x128xf32>
    %6 = arith.addf %0, %5 : vector<16x128xf32>
    %c0_6 = arith.constant 0 : index
    %c4 = arith.constant 4 : index
    %c0_7 = arith.constant 0 : index
    %7 = vector.load %arg1[%c0_6, %c4, %c0_7] : memref<1x24x384xbf16, #tpu.memory_space<vmem>>, vector<1x16x384xbf16>
    %8 = vector.shape_cast %7 : vector<1x16x384xbf16> to vector<16x384xbf16>
    %c1 = arith.constant 1 : index
    %c0_8 = arith.constant 0 : index
    %c0_9 = arith.constant 0 : index
    %9 = vector.load %arg2[%c1, %c0_8, %c0_9] : memref<3x384x128xbf16, #tpu.memory_space<vmem>>, vector<1x384x128xbf16>
    %10 = vector.shape_cast %9 : vector<1x384x128xbf16> to vector<384x128xbf16>
    %cst_10 = arith.constant dense<0.000000e+00> : vector<16x128xf32>
    %11 = tpu.matmul %8, %10, %cst_10 {dimension_numbers = #tpu.dot_dimension_numbers<[1], [0], [0], [1], [0, 0, 1, 1], [], []>} : vector<16x384xbf16>, vector<384x128xbf16>, vector<16x128xf32> -> vector<16x128xf32>
    %12 = arith.addf %6, %11 : vector<16x128xf32>
    %c0_11 = arith.constant 0 : index
    %c8 = arith.constant 8 : index
    %c0_12 = arith.constant 0 : index
    %13 = vector.load %arg1[%c0_11, %c8, %c0_12] : memref<1x24x384xbf16, #tpu.memory_space<vmem>>, vector<1x16x384xbf16>
    %14 = vector.shape_cast %13 : vector<1x16x384xbf16> to vector<16x384xbf16>
    %c2 = arith.constant 2 : index
    %c0_13 = arith.constant 0 : index
    %c0_14 = arith.constant 0 : index
    %15 = vector.load %arg2[%c2, %c0_13, %c0_14] : memref<3x384x128xbf16, #tpu.memory_space<vmem>>, vector<1x384x128xbf16>
    %16 = vector.shape_cast %15 : vector<1x384x128xbf16> to vector<384x128xbf16>
    %cst_15 = arith.constant dense<0.000000e+00> : vector<16x128xf32>
    %17 = tpu.matmul %14, %16, %cst_15 {dimension_numbers = #tpu.dot_dimension_numbers<[1], [0], [0], [1], [0, 0, 1, 1], [], []>} : vector<16x384xbf16>, vector<384x128xbf16>, vector<16x128xf32> -> vector<16x128xf32>
    %18 = arith.addf %12, %17 : vector<16x128xf32>
    %c0_16 = arith.constant 0 : index
    %c0_17 = arith.constant 0 : index
    %c0_18 = arith.constant 0 : index
    %19 = vector.load %arg3[%c0_16, %c0_17, %c0_18] : memref<1x16x128xf32, #tpu.memory_space<vmem>>, vector<1x16x128xf32>
    %20 = vector.shape_cast %19 : vector<1x16x128xf32> to vector<16x128xf32>
    %21 = vector.shape_cast %18 : vector<16x128xf32> to vector<1x16x128xf32>
    tpu.vector_store %arg3[%c0_16, %c0_17, %c0_18], %21 {strides = array<i32>} : memref<1x16x128xf32, #tpu.memory_space<vmem>>, vector<1x16x128xf32>,
    return
  }
  func.func @transform_0(%arg0: i32) -> (i32, i32, i32) {
    %c0_i32 = arith.constant 0 : i32
    %c0_i32_0 = arith.constant 0 : i32
    %c0_i32_1 = arith.constant 0 : i32
    return %arg0, %c0_i32, %c0_i32_0 : i32, i32, i32
  }
  func.func @transform_1(%arg0: i32) -> (i32, i32, i32) {
    %c0_i32 = arith.constant 0 : i32
    %c0_i32_0 = arith.constant 0 : i32
    %c0_i32_1 = arith.constant 0 : i32
    %c0_i32_2 = arith.constant 0 : i32
    return %c0_i32, %c0_i32_0, %c0_i32_1 : i32, i32, i32
  }
  func.func @transform_2(%arg0: i32) -> (i32, i32, i32) {
    %c0_i32 = arith.constant 0 : i32
    %c0_i32_0 = arith.constant 0 : i32
    %c0_i32_1 = arith.constant 0 : i32
    return %arg0, %c0_i32, %c0_i32_0 : i32, i32, i32
  }
}

module attributes {stable_mosaic.version = 11 : i64} {
  func.func @_in_apply_res_kernel(%arg0: i32, %arg1: i32, %arg2: memref<1x16x128xf32, #tpu.memory_space<vmem>>, %arg3: memref<1x16x128xbf16, #tpu.memory_space<vmem>>, %arg4: memref<1x8x128xf32, #tpu.memory_space<vmem>>, %arg5: memref<1x128xf32, #tpu.memory_space<vmem>>, %arg6: memref<1x128xf32, #tpu.memory_space<vmem>>, %arg7: memref<1x16x128xbf16, #tpu.memory_space<vmem>>) attributes {dimension_semantics = [#tpu.dimension_semantics<parallel>, #tpu.dimension_semantics<parallel>], iteration_bounds = array<i64: 2, 1>, scalar_prefetch = 0 : i64, scratch_operands = 0 : i64, tpu.core_type = #tpu.core_type<tc>, window_params = [{transform_indices = @transform_0, window_bounds = array<i64: 1, 16, 128>}, {transform_indices = @transform_1, window_bounds = array<i64: 1, 16, 128>}, {transform_indices = @transform_2, window_bounds = array<i64: 1, 8, 128>}, {pipeline_mode = #tpu.pipeline_mode<synchronous>, transform_indices = @transform_3, window_bounds = array<i64: 1, 128>}, {pipeline_mode = #tpu.pipeline_mode<synchronous>, transform_indices = @transform_4, window_bounds = array<i64: 1, 128>}, {transform_indices = @transform_5, window_bounds = array<i64: 1, 16, 128>}]} {
    %c0 = arith.constant 0 : index
    %c0_0 = arith.constant 0 : index
    %c0_1 = arith.constant 0 : index
    %0 = vector.load %arg2[%c0, %c0_0, %c0_1] : memref<1x16x128xf32, #tpu.memory_space<vmem>>, vector<1x16x128xf32>
    %1 = vector.shape_cast %0 : vector<1x16x128xf32> to vector<16x128xf32>
    %c0_2 = arith.constant 0 : index
    %c0_3 = arith.constant 0 : index
    %c0_4 = arith.constant 0 : index
    %2 = vector.load %arg4[%c0_2, %c0_3, %c0_4] : memref<1x8x128xf32, #tpu.memory_space<vmem>>, vector<1x1x128xf32>
    %3 = vector.shape_cast %2 : vector<1x1x128xf32> to vector<1x128xf32>
    %cst = arith.constant 6.250000e-02 : f32
    %4 = vector.broadcast %cst : f32 to vector<1x128xf32>
    %5 = arith.mulf %3, %4 : vector<1x128xf32>
    %c0_5 = arith.constant 0 : index
    %c1 = arith.constant 1 : index
    %c0_6 = arith.constant 0 : index
    %6 = vector.load %arg4[%c0_5, %c1, %c0_6] : memref<1x8x128xf32, #tpu.memory_space<vmem>>, vector<1x1x128xf32>
    %7 = vector.shape_cast %6 : vector<1x1x128xf32> to vector<1x128xf32>
    %cst_7 = arith.constant 6.250000e-02 : f32
    %8 = vector.broadcast %cst_7 : f32 to vector<1x128xf32>
    %9 = arith.mulf %7, %8 : vector<1x128xf32>
    %10 = arith.mulf %5, %5 : vector<1x128xf32>
    %11 = arith.subf %9, %10 : vector<1x128xf32>
    %cst_8 = arith.constant 0.000000e+00 : f32
    %12 = vector.broadcast %cst_8 : f32 to vector<1x128xf32>
    %13 = arith.maximumf %11, %12 : vector<1x128xf32>
    %cst_9 = arith.constant 9.99999974E-6 : f32
    %14 = vector.broadcast %cst_9 : f32 to vector<1x128xf32>
    %15 = arith.addf %13, %14 : vector<1x128xf32>
    %16 = math.rsqrt %15 : vector<1x128xf32>
    %c0_10 = arith.constant 0 : index
    %c0_11 = arith.constant 0 : index
    %17 = vector.load %arg5[%c0_10, %c0_11] : memref<1x128xf32, #tpu.memory_space<vmem>>, vector<1x128xf32>
    %18 = arith.mulf %16, %17 : vector<1x128xf32>
    %19 = vector.broadcast %5 : vector<1x128xf32> to vector<16x128xf32>
    %20 = arith.subf %1, %19 : vector<16x128xf32>
    %21 = vector.broadcast %18 : vector<1x128xf32> to vector<16x128xf32>
    %22 = arith.mulf %20, %21 : vector<16x128xf32>
    %c0_12 = arith.constant 0 : index
    %c0_13 = arith.constant 0 : index
    %23 = vector.load %arg6[%c0_12, %c0_13] : memref<1x128xf32, #tpu.memory_space<vmem>>, vector<1x128xf32>
    %24 = vector.broadcast %23 : vector<1x128xf32> to vector<16x128xf32>
    %25 = arith.addf %22, %24 : vector<16x128xf32>
    %c0_14 = arith.constant 0 : index
    %c0_15 = arith.constant 0 : index
    %c0_16 = arith.constant 0 : index
    %26 = vector.load %arg3[%c0_14, %c0_15, %c0_16] : memref<1x16x128xbf16, #tpu.memory_space<vmem>>, vector<1x16x128xbf16>
    %27 = vector.shape_cast %26 : vector<1x16x128xbf16> to vector<16x128xbf16>
    %28 = arith.extf %27 : vector<16x128xbf16> to vector<16x128xf32>
    %29 = arith.addf %25, %28 : vector<16x128xf32>
    %30 = arith.truncf %29 : vector<16x128xf32> to vector<16x128xbf16>
    %c0_17 = arith.constant 0 : index
    %c0_18 = arith.constant 0 : index
    %c0_19 = arith.constant 0 : index
    %31 = vector.load %arg7[%c0_17, %c0_18, %c0_19] : memref<1x16x128xbf16, #tpu.memory_space<vmem>>, vector<1x16x128xbf16>
    %32 = vector.shape_cast %31 : vector<1x16x128xbf16> to vector<16x128xbf16>
    %33 = vector.shape_cast %30 : vector<16x128xbf16> to vector<1x16x128xbf16>
    tpu.vector_store %arg7[%c0_17, %c0_18, %c0_19], %33 {strides = array<i32>} : memref<1x16x128xbf16, #tpu.memory_space<vmem>>, vector<1x16x128xbf16>,
    return
  }
  func.func @transform_0(%arg0: i32, %arg1: i32) -> (i32, i32, i32) {
    %c0_i32 = arith.constant 0 : i32
    %c0_i32_0 = arith.constant 0 : i32
    return %arg0, %arg1, %c0_i32 : i32, i32, i32
  }
  func.func @transform_1(%arg0: i32, %arg1: i32) -> (i32, i32, i32) {
    %c0_i32 = arith.constant 0 : i32
    %c0_i32_0 = arith.constant 0 : i32
    return %arg0, %arg1, %c0_i32 : i32, i32, i32
  }
  func.func @transform_2(%arg0: i32, %arg1: i32) -> (i32, i32, i32) {
    %c0_i32 = arith.constant 0 : i32
    %c0_i32_0 = arith.constant 0 : i32
    %c0_i32_1 = arith.constant 0 : i32
    return %arg0, %c0_i32, %c0_i32_0 : i32, i32, i32
  }
  func.func @transform_3(%arg0: i32, %arg1: i32) -> (i32, i32) {
    %c0_i32 = arith.constant 0 : i32
    %c0_i32_0 = arith.constant 0 : i32
    %c0_i32_1 = arith.constant 0 : i32
    return %c0_i32, %c0_i32_0 : i32, i32
  }
  func.func @transform_4(%arg0: i32, %arg1: i32) -> (i32, i32) {
    %c0_i32 = arith.constant 0 : i32
    %c0_i32_0 = arith.constant 0 : i32
    %c0_i32_1 = arith.constant 0 : i32
    return %c0_i32, %c0_i32_0 : i32, i32
  }
  func.func @transform_5(%arg0: i32, %arg1: i32) -> (i32, i32, i32) {
    %c0_i32 = arith.constant 0 : i32
    %c0_i32_0 = arith.constant 0 : i32
    return %arg0, %arg1, %c0_i32 : i32, i32, i32
  }
}

module attributes {stable_mosaic.version = 11 : i64} {
  func.func @_rowtap_kernel(%arg0: i32, %arg1: memref<1x80x384xbf16, #tpu.memory_space<vmem>>, %arg2: memref<3x384x128xbf16, #tpu.memory_space<vmem>>, %arg3: memref<1x64x128xf32, #tpu.memory_space<vmem>>) attributes {dimension_semantics = [#tpu.dimension_semantics<parallel>], iteration_bounds = array<i64: 2>, scalar_prefetch = 0 : i64, scratch_operands = 0 : i64, tpu.core_type = #tpu.core_type<tc>, window_params = [{transform_indices = @transform_0, window_bounds = array<i64: 1, 80, 384>}, {pipeline_mode = #tpu.pipeline_mode<synchronous>, transform_indices = @transform_1, window_bounds = array<i64: 3, 384, 128>}, {transform_indices = @transform_2, window_bounds = array<i64: 1, 64, 128>}]} {
    %cst = arith.constant 0.000000e+00 : f32
    %0 = vector.broadcast %cst : f32 to vector<64x128xf32>
    %c0 = arith.constant 0 : index
    %c0_0 = arith.constant 0 : index
    %c0_1 = arith.constant 0 : index
    %1 = vector.load %arg1[%c0, %c0_0, %c0_1] : memref<1x80x384xbf16, #tpu.memory_space<vmem>>, vector<1x64x384xbf16>
    %2 = vector.shape_cast %1 : vector<1x64x384xbf16> to vector<64x384xbf16>
    %c0_2 = arith.constant 0 : index
    %c0_3 = arith.constant 0 : index
    %c0_4 = arith.constant 0 : index
    %3 = vector.load %arg2[%c0_2, %c0_3, %c0_4] : memref<3x384x128xbf16, #tpu.memory_space<vmem>>, vector<1x384x128xbf16>
    %4 = vector.shape_cast %3 : vector<1x384x128xbf16> to vector<384x128xbf16>
    %cst_5 = arith.constant dense<0.000000e+00> : vector<64x128xf32>
    %5 = tpu.matmul %2, %4, %cst_5 {dimension_numbers = #tpu.dot_dimension_numbers<[1], [0], [0], [1], [0, 0, 1, 1], [], []>} : vector<64x384xbf16>, vector<384x128xbf16>, vector<64x128xf32> -> vector<64x128xf32>
    %6 = arith.addf %0, %5 : vector<64x128xf32>
    %c0_6 = arith.constant 0 : index
    %c8 = arith.constant 8 : index
    %c0_7 = arith.constant 0 : index
    %7 = vector.load %arg1[%c0_6, %c8, %c0_7] : memref<1x80x384xbf16, #tpu.memory_space<vmem>>, vector<1x64x384xbf16>
    %8 = vector.shape_cast %7 : vector<1x64x384xbf16> to vector<64x384xbf16>
    %c1 = arith.constant 1 : index
    %c0_8 = arith.constant 0 : index
    %c0_9 = arith.constant 0 : index
    %9 = vector.load %arg2[%c1, %c0_8, %c0_9] : memref<3x384x128xbf16, #tpu.memory_space<vmem>>, vector<1x384x128xbf16>
    %10 = vector.shape_cast %9 : vector<1x384x128xbf16> to vector<384x128xbf16>
    %cst_10 = arith.constant dense<0.000000e+00> : vector<64x128xf32>
    %11 = tpu.matmul %8, %10, %cst_10 {dimension_numbers = #tpu.dot_dimension_numbers<[1], [0], [0], [1], [0, 0, 1, 1], [], []>} : vector<64x384xbf16>, vector<384x128xbf16>, vector<64x128xf32> -> vector<64x128xf32>
    %12 = arith.addf %6, %11 : vector<64x128xf32>
    %c0_11 = arith.constant 0 : index
    %c16 = arith.constant 16 : index
    %c0_12 = arith.constant 0 : index
    %13 = vector.load %arg1[%c0_11, %c16, %c0_12] : memref<1x80x384xbf16, #tpu.memory_space<vmem>>, vector<1x64x384xbf16>
    %14 = vector.shape_cast %13 : vector<1x64x384xbf16> to vector<64x384xbf16>
    %c2 = arith.constant 2 : index
    %c0_13 = arith.constant 0 : index
    %c0_14 = arith.constant 0 : index
    %15 = vector.load %arg2[%c2, %c0_13, %c0_14] : memref<3x384x128xbf16, #tpu.memory_space<vmem>>, vector<1x384x128xbf16>
    %16 = vector.shape_cast %15 : vector<1x384x128xbf16> to vector<384x128xbf16>
    %cst_15 = arith.constant dense<0.000000e+00> : vector<64x128xf32>
    %17 = tpu.matmul %14, %16, %cst_15 {dimension_numbers = #tpu.dot_dimension_numbers<[1], [0], [0], [1], [0, 0, 1, 1], [], []>} : vector<64x384xbf16>, vector<384x128xbf16>, vector<64x128xf32> -> vector<64x128xf32>
    %18 = arith.addf %12, %17 : vector<64x128xf32>
    %c0_16 = arith.constant 0 : index
    %c0_17 = arith.constant 0 : index
    %c0_18 = arith.constant 0 : index
    %19 = vector.load %arg3[%c0_16, %c0_17, %c0_18] : memref<1x64x128xf32, #tpu.memory_space<vmem>>, vector<1x64x128xf32>
    %20 = vector.shape_cast %19 : vector<1x64x128xf32> to vector<64x128xf32>
    %21 = vector.shape_cast %18 : vector<64x128xf32> to vector<1x64x128xf32>
    tpu.vector_store %arg3[%c0_16, %c0_17, %c0_18], %21 {strides = array<i32>} : memref<1x64x128xf32, #tpu.memory_space<vmem>>, vector<1x64x128xf32>,
    return
  }
  func.func @transform_0(%arg0: i32) -> (i32, i32, i32) {
    %c0_i32 = arith.constant 0 : i32
    %c0_i32_0 = arith.constant 0 : i32
    %c0_i32_1 = arith.constant 0 : i32
    return %arg0, %c0_i32, %c0_i32_0 : i32, i32, i32
  }
  func.func @transform_1(%arg0: i32) -> (i32, i32, i32) {
    %c0_i32 = arith.constant 0 : i32
    %c0_i32_0 = arith.constant 0 : i32
    %c0_i32_1 = arith.constant 0 : i32
    %c0_i32_2 = arith.constant 0 : i32
    return %c0_i32, %c0_i32_0, %c0_i32_1 : i32, i32, i32
  }
  func.func @transform_2(%arg0: i32) -> (i32, i32, i32) {
    %c0_i32 = arith.constant 0 : i32
    %c0_i32_0 = arith.constant 0 : i32
    %c0_i32_1 = arith.constant 0 : i32
    return %arg0, %c0_i32, %c0_i32_0 : i32, i32, i32
  }
}

module attributes {stable_mosaic.version = 11 : i64} {
  func.func @_rowtap_kernel(%arg0: i32, %arg1: memref<1x288x256xbf16, #tpu.memory_space<vmem>>, %arg2: memref<3x256x128xbf16, #tpu.memory_space<vmem>>, %arg3: memref<1x256x128xf32, #tpu.memory_space<vmem>>) attributes {dimension_semantics = [#tpu.dimension_semantics<parallel>], iteration_bounds = array<i64: 2>, scalar_prefetch = 0 : i64, scratch_operands = 0 : i64, tpu.core_type = #tpu.core_type<tc>, window_params = [{transform_indices = @transform_0, window_bounds = array<i64: 1, 288, 256>}, {pipeline_mode = #tpu.pipeline_mode<synchronous>, transform_indices = @transform_1, window_bounds = array<i64: 3, 256, 128>}, {transform_indices = @transform_2, window_bounds = array<i64: 1, 256, 128>}]} {
    %cst = arith.constant 0.000000e+00 : f32
    %0 = vector.broadcast %cst : f32 to vector<256x128xf32>
    %c0 = arith.constant 0 : index
    %c0_0 = arith.constant 0 : index
    %c0_1 = arith.constant 0 : index
    %1 = vector.load %arg1[%c0, %c0_0, %c0_1] : memref<1x288x256xbf16, #tpu.memory_space<vmem>>, vector<1x256x256xbf16>
    %2 = vector.shape_cast %1 : vector<1x256x256xbf16> to vector<256x256xbf16>
    %c0_2 = arith.constant 0 : index
    %c0_3 = arith.constant 0 : index
    %c0_4 = arith.constant 0 : index
    %3 = vector.load %arg2[%c0_2, %c0_3, %c0_4] : memref<3x256x128xbf16, #tpu.memory_space<vmem>>, vector<1x256x128xbf16>
    %4 = vector.shape_cast %3 : vector<1x256x128xbf16> to vector<256x128xbf16>
    %cst_5 = arith.constant dense<0.000000e+00> : vector<256x128xf32>
    %5 = tpu.matmul %2, %4, %cst_5 {dimension_numbers = #tpu.dot_dimension_numbers<[1], [0], [0], [1], [0, 0, 1, 1], [], []>} : vector<256x256xbf16>, vector<256x128xbf16>, vector<256x128xf32> -> vector<256x128xf32>
    %6 = arith.addf %0, %5 : vector<256x128xf32>
    %c0_6 = arith.constant 0 : index
    %c16 = arith.constant 16 : index
    %c0_7 = arith.constant 0 : index
    %7 = vector.load %arg1[%c0_6, %c16, %c0_7] : memref<1x288x256xbf16, #tpu.memory_space<vmem>>, vector<1x256x256xbf16>
    %8 = vector.shape_cast %7 : vector<1x256x256xbf16> to vector<256x256xbf16>
    %c1 = arith.constant 1 : index
    %c0_8 = arith.constant 0 : index
    %c0_9 = arith.constant 0 : index
    %9 = vector.load %arg2[%c1, %c0_8, %c0_9] : memref<3x256x128xbf16, #tpu.memory_space<vmem>>, vector<1x256x128xbf16>
    %10 = vector.shape_cast %9 : vector<1x256x128xbf16> to vector<256x128xbf16>
    %cst_10 = arith.constant dense<0.000000e+00> : vector<256x128xf32>
    %11 = tpu.matmul %8, %10, %cst_10 {dimension_numbers = #tpu.dot_dimension_numbers<[1], [0], [0], [1], [0, 0, 1, 1], [], []>} : vector<256x256xbf16>, vector<256x128xbf16>, vector<256x128xf32> -> vector<256x128xf32>
    %12 = arith.addf %6, %11 : vector<256x128xf32>
    %c0_11 = arith.constant 0 : index
    %c32 = arith.constant 32 : index
    %c0_12 = arith.constant 0 : index
    %13 = vector.load %arg1[%c0_11, %c32, %c0_12] : memref<1x288x256xbf16, #tpu.memory_space<vmem>>, vector<1x256x256xbf16>
    %14 = vector.shape_cast %13 : vector<1x256x256xbf16> to vector<256x256xbf16>
    %c2 = arith.constant 2 : index
    %c0_13 = arith.constant 0 : index
    %c0_14 = arith.constant 0 : index
    %15 = vector.load %arg2[%c2, %c0_13, %c0_14] : memref<3x256x128xbf16, #tpu.memory_space<vmem>>, vector<1x256x128xbf16>
    %16 = vector.shape_cast %15 : vector<1x256x128xbf16> to vector<256x128xbf16>
    %cst_15 = arith.constant dense<0.000000e+00> : vector<256x128xf32>
    %17 = tpu.matmul %14, %16, %cst_15 {dimension_numbers = #tpu.dot_dimension_numbers<[1], [0], [0], [1], [0, 0, 1, 1], [], []>} : vector<256x256xbf16>, vector<256x128xbf16>, vector<256x128xf32> -> vector<256x128xf32>
    %18 = arith.addf %12, %17 : vector<256x128xf32>
    %c0_16 = arith.constant 0 : index
    %c0_17 = arith.constant 0 : index
    %c0_18 = arith.constant 0 : index
    %19 = vector.load %arg3[%c0_16, %c0_17, %c0_18] : memref<1x256x128xf32, #tpu.memory_space<vmem>>, vector<1x256x128xf32>
    %20 = vector.shape_cast %19 : vector<1x256x128xf32> to vector<256x128xf32>
    %21 = vector.shape_cast %18 : vector<256x128xf32> to vector<1x256x128xf32>
    tpu.vector_store %arg3[%c0_16, %c0_17, %c0_18], %21 {strides = array<i32>} : memref<1x256x128xf32, #tpu.memory_space<vmem>>, vector<1x256x128xf32>,
    return
  }
  func.func @transform_0(%arg0: i32) -> (i32, i32, i32) {
    %c0_i32 = arith.constant 0 : i32
    %c0_i32_0 = arith.constant 0 : i32
    %c0_i32_1 = arith.constant 0 : i32
    return %arg0, %c0_i32, %c0_i32_0 : i32, i32, i32
  }
  func.func @transform_1(%arg0: i32) -> (i32, i32, i32) {
    %c0_i32 = arith.constant 0 : i32
    %c0_i32_0 = arith.constant 0 : i32
    %c0_i32_1 = arith.constant 0 : i32
    %c0_i32_2 = arith.constant 0 : i32
    return %c0_i32, %c0_i32_0, %c0_i32_1 : i32, i32, i32
  }
  func.func @transform_2(%arg0: i32) -> (i32, i32, i32) {
    %c0_i32 = arith.constant 0 : i32
    %c0_i32_0 = arith.constant 0 : i32
    %c0_i32_1 = arith.constant 0 : i32
    return %arg0, %c0_i32, %c0_i32_0 : i32, i32, i32
  }
}

module attributes {stable_mosaic.version = 11 : i64} {
  func.func @_rowtap_kernel(%arg0: i32, %arg1: memref<1x384x384xbf16, #tpu.memory_space<vmem>>, %arg2: memref<9x384x128xbf16, #tpu.memory_space<vmem>>, %arg3: memref<1x256x128xf32, #tpu.memory_space<vmem>>) attributes {dimension_semantics = [#tpu.dimension_semantics<parallel>], iteration_bounds = array<i64: 2>, scalar_prefetch = 0 : i64, scratch_operands = 0 : i64, tpu.core_type = #tpu.core_type<tc>, window_params = [{transform_indices = @transform_0, window_bounds = array<i64: 1, 384, 384>}, {pipeline_mode = #tpu.pipeline_mode<synchronous>, transform_indices = @transform_1, window_bounds = array<i64: 9, 384, 128>}, {transform_indices = @transform_2, window_bounds = array<i64: 1, 256, 128>}]} {
    %cst = arith.constant 0.000000e+00 : f32
    %0 = vector.broadcast %cst : f32 to vector<256x128xf32>
    %c0 = arith.constant 0 : index
    %c0_0 = arith.constant 0 : index
    %c0_1 = arith.constant 0 : index
    %1 = vector.load %arg1[%c0, %c0_0, %c0_1] : memref<1x384x384xbf16, #tpu.memory_space<vmem>>, vector<1x256x384xbf16>
    %2 = vector.shape_cast %1 : vector<1x256x384xbf16> to vector<256x384xbf16>
    %c0_2 = arith.constant 0 : index
    %c0_3 = arith.constant 0 : index
    %c0_4 = arith.constant 0 : index
    %3 = vector.load %arg2[%c0_2, %c0_3, %c0_4] : memref<9x384x128xbf16, #tpu.memory_space<vmem>>, vector<1x384x128xbf16>
    %4 = vector.shape_cast %3 : vector<1x384x128xbf16> to vector<384x128xbf16>
    %cst_5 = arith.constant dense<0.000000e+00> : vector<256x128xf32>
    %5 = tpu.matmul %2, %4, %cst_5 {dimension_numbers = #tpu.dot_dimension_numbers<[1], [0], [0], [1], [0, 0, 1, 1], [], []>} : vector<256x384xbf16>, vector<384x128xbf16>, vector<256x128xf32> -> vector<256x128xf32>
    %6 = arith.addf %0, %5 : vector<256x128xf32>
    %c0_6 = arith.constant 0 : index
    %c16 = arith.constant 16 : index
    %c0_7 = arith.constant 0 : index
    %7 = vector.load %arg1[%c0_6, %c16, %c0_7] : memref<1x384x384xbf16, #tpu.memory_space<vmem>>, vector<1x256x384xbf16>
    %8 = vector.shape_cast %7 : vector<1x256x384xbf16> to vector<256x384xbf16>
    %c1 = arith.constant 1 : index
    %c0_8 = arith.constant 0 : index
    %c0_9 = arith.constant 0 : index
    %9 = vector.load %arg2[%c1, %c0_8, %c0_9] : memref<9x384x128xbf16, #tpu.memory_space<vmem>>, vector<1x384x128xbf16>
    %10 = vector.shape_cast %9 : vector<1x384x128xbf16> to vector<384x128xbf16>
    %cst_10 = arith.constant dense<0.000000e+00> : vector<256x128xf32>
    %11 = tpu.matmul %8, %10, %cst_10 {dimension_numbers = #tpu.dot_dimension_numbers<[1], [0], [0], [1], [0, 0, 1, 1], [], []>} : vector<256x384xbf16>, vector<384x128xbf16>, vector<256x128xf32> -> vector<256x128xf32>
    %12 = arith.addf %6, %11 : vector<256x128xf32>
    %c0_11 = arith.constant 0 : index
    %c32 = arith.constant 32 : index
    %c0_12 = arith.constant 0 : index
    %13 = vector.load %arg1[%c0_11, %c32, %c0_12] : memref<1x384x384xbf16, #tpu.memory_space<vmem>>, vector<1x256x384xbf16>
    %14 = vector.shape_cast %13 : vector<1x256x384xbf16> to vector<256x384xbf16>
    %c2 = arith.constant 2 : index
    %c0_13 = arith.constant 0 : index
    %c0_14 = arith.constant 0 : index
    %15 = vector.load %arg2[%c2, %c0_13, %c0_14] : memref<9x384x128xbf16, #tpu.memory_space<vmem>>, vector<1x384x128xbf16>
    %16 = vector.shape_cast %15 : vector<1x384x128xbf16> to vector<384x128xbf16>
    %cst_15 = arith.constant dense<0.000000e+00> : vector<256x128xf32>
    %17 = tpu.matmul %14, %16, %cst_15 {dimension_numbers = #tpu.dot_dimension_numbers<[1], [0], [0], [1], [0, 0, 1, 1], [], []>} : vector<256x384xbf16>, vector<384x128xbf16>, vector<256x128xf32> -> vector<256x128xf32>
    %18 = arith.addf %12, %17 : vector<256x128xf32>
    %c0_16 = arith.constant 0 : index
    %c48 = arith.constant 48 : index
    %c0_17 = arith.constant 0 : index
    %19 = vector.load %arg1[%c0_16, %c48, %c0_17] : memref<1x384x384xbf16, #tpu.memory_space<vmem>>, vector<1x256x384xbf16>
    %20 = vector.shape_cast %19 : vector<1x256x384xbf16> to vector<256x384xbf16>
    %c3 = arith.constant 3 : index
    %c0_18 = arith.constant 0 : index
    %c0_19 = arith.constant 0 : index
    %21 = vector.load %arg2[%c3, %c0_18, %c0_19] : memref<9x384x128xbf16, #tpu.memory_space<vmem>>, vector<1x384x128xbf16>
    %22 = vector.shape_cast %21 : vector<1x384x128xbf16> to vector<384x128xbf16>
    %cst_20 = arith.constant dense<0.000000e+00> : vector<256x128xf32>
    %23 = tpu.matmul %20, %22, %cst_20 {dimension_numbers = #tpu.dot_dimension_numbers<[1], [0], [0], [1], [0, 0, 1, 1], [], []>} : vector<256x384xbf16>, vector<384x128xbf16>, vector<256x128xf32> -> vector<256x128xf32>
    %24 = arith.addf %18, %23 : vector<256x128xf32>
    %c0_21 = arith.constant 0 : index
    %c64 = arith.constant 64 : index
    %c0_22 = arith.constant 0 : index
    %25 = vector.load %arg1[%c0_21, %c64, %c0_22] : memref<1x384x384xbf16, #tpu.memory_space<vmem>>, vector<1x256x384xbf16>
    %26 = vector.shape_cast %25 : vector<1x256x384xbf16> to vector<256x384xbf16>
    %c4 = arith.constant 4 : index
    %c0_23 = arith.constant 0 : index
    %c0_24 = arith.constant 0 : index
    %27 = vector.load %arg2[%c4, %c0_23, %c0_24] : memref<9x384x128xbf16, #tpu.memory_space<vmem>>, vector<1x384x128xbf16>
    %28 = vector.shape_cast %27 : vector<1x384x128xbf16> to vector<384x128xbf16>
    %cst_25 = arith.constant dense<0.000000e+00> : vector<256x128xf32>
    %29 = tpu.matmul %26, %28, %cst_25 {dimension_numbers = #tpu.dot_dimension_numbers<[1], [0], [0], [1], [0, 0, 1, 1], [], []>} : vector<256x384xbf16>, vector<384x128xbf16>, vector<256x128xf32> -> vector<256x128xf32>
    %30 = arith.addf %24, %29 : vector<256x128xf32>
    %c0_26 = arith.constant 0 : index
    %c80 = arith.constant 80 : index
    %c0_27 = arith.constant 0 : index
    %31 = vector.load %arg1[%c0_26, %c80, %c0_27] : memref<1x384x384xbf16, #tpu.memory_space<vmem>>, vector<1x256x384xbf16>
    %32 = vector.shape_cast %31 : vector<1x256x384xbf16> to vector<256x384xbf16>
    %c5 = arith.constant 5 : index
    %c0_28 = arith.constant 0 : index
    %c0_29 = arith.constant 0 : index
    %33 = vector.load %arg2[%c5, %c0_28, %c0_29] : memref<9x384x128xbf16, #tpu.memory_space<vmem>>, vector<1x384x128xbf16>
    %34 = vector.shape_cast %33 : vector<1x384x128xbf16> to vector<384x128xbf16>
    %cst_30 = arith.constant dense<0.000000e+00> : vector<256x128xf32>
    %35 = tpu.matmul %32, %34, %cst_30 {dimension_numbers = #tpu.dot_dimension_numbers<[1], [0], [0], [1], [0, 0, 1, 1], [], []>} : vector<256x384xbf16>, vector<384x128xbf16>, vector<256x128xf32> -> vector<256x128xf32>
    %36 = arith.addf %30, %35 : vector<256x128xf32>
    %c0_31 = arith.constant 0 : index
    %c96 = arith.constant 96 : index
    %c0_32 = arith.constant 0 : index
    %37 = vector.load %arg1[%c0_31, %c96, %c0_32] : memref<1x384x384xbf16, #tpu.memory_space<vmem>>, vector<1x256x384xbf16>
    %38 = vector.shape_cast %37 : vector<1x256x384xbf16> to vector<256x384xbf16>
    %c6 = arith.constant 6 : index
    %c0_33 = arith.constant 0 : index
    %c0_34 = arith.constant 0 : index
    %39 = vector.load %arg2[%c6, %c0_33, %c0_34] : memref<9x384x128xbf16, #tpu.memory_space<vmem>>, vector<1x384x128xbf16>
    %40 = vector.shape_cast %39 : vector<1x384x128xbf16> to vector<384x128xbf16>
    %cst_35 = arith.constant dense<0.000000e+00> : vector<256x128xf32>
    %41 = tpu.matmul %38, %40, %cst_35 {dimension_numbers = #tpu.dot_dimension_numbers<[1], [0], [0], [1], [0, 0, 1, 1], [], []>} : vector<256x384xbf16>, vector<384x128xbf16>, vector<256x128xf32> -> vector<256x128xf32>
    %42 = arith.addf %36, %41 : vector<256x128xf32>
    %c0_36 = arith.constant 0 : index
    %c112 = arith.constant 112 : index
    %c0_37 = arith.constant 0 : index
    %43 = vector.load %arg1[%c0_36, %c112, %c0_37] : memref<1x384x384xbf16, #tpu.memory_space<vmem>>, vector<1x256x384xbf16>
    %44 = vector.shape_cast %43 : vector<1x256x384xbf16> to vector<256x384xbf16>
    %c7 = arith.constant 7 : index
    %c0_38 = arith.constant 0 : index
    %c0_39 = arith.constant 0 : index
    %45 = vector.load %arg2[%c7, %c0_38, %c0_39] : memref<9x384x128xbf16, #tpu.memory_space<vmem>>, vector<1x384x128xbf16>
    %46 = vector.shape_cast %45 : vector<1x384x128xbf16> to vector<384x128xbf16>
    %cst_40 = arith.constant dense<0.000000e+00> : vector<256x128xf32>
    %47 = tpu.matmul %44, %46, %cst_40 {dimension_numbers = #tpu.dot_dimension_numbers<[1], [0], [0], [1], [0, 0, 1, 1], [], []>} : vector<256x384xbf16>, vector<384x128xbf16>, vector<256x128xf32> -> vector<256x128xf32>
    %48 = arith.addf %42, %47 : vector<256x128xf32>
    %c0_41 = arith.constant 0 : index
    %c128 = arith.constant 128 : index
    %c0_42 = arith.constant 0 : index
    %49 = vector.load %arg1[%c0_41, %c128, %c0_42] : memref<1x384x384xbf16, #tpu.memory_space<vmem>>, vector<1x256x384xbf16>
    %50 = vector.shape_cast %49 : vector<1x256x384xbf16> to vector<256x384xbf16>
    %c8 = arith.constant 8 : index
    %c0_43 = arith.constant 0 : index
    %c0_44 = arith.constant 0 : index
    %51 = vector.load %arg2[%c8, %c0_43, %c0_44] : memref<9x384x128xbf16, #tpu.memory_space<vmem>>, vector<1x384x128xbf16>
    %52 = vector.shape_cast %51 : vector<1x384x128xbf16> to vector<384x128xbf16>
    %cst_45 = arith.constant dense<0.000000e+00> : vector<256x128xf32>
    %53 = tpu.matmul %50, %52, %cst_45 {dimension_numbers = #tpu.dot_dimension_numbers<[1], [0], [0], [1], [0, 0, 1, 1], [], []>} : vector<256x384xbf16>, vector<384x128xbf16>, vector<256x128xf32> -> vector<256x128xf32>
    %54 = arith.addf %48, %53 : vector<256x128xf32>
    %c0_46 = arith.constant 0 : index
    %c0_47 = arith.constant 0 : index
    %c0_48 = arith.constant 0 : index
    %55 = vector.load %arg3[%c0_46, %c0_47, %c0_48] : memref<1x256x128xf32, #tpu.memory_space<vmem>>, vector<1x256x128xf32>
    %56 = vector.shape_cast %55 : vector<1x256x128xf32> to vector<256x128xf32>
    %57 = vector.shape_cast %54 : vector<256x128xf32> to vector<1x256x128xf32>
    tpu.vector_store %arg3[%c0_46, %c0_47, %c0_48], %57 {strides = array<i32>} : memref<1x256x128xf32, #tpu.memory_space<vmem>>, vector<1x256x128xf32>,
    return
  }
  func.func @transform_0(%arg0: i32) -> (i32, i32, i32) {
    %c0_i32 = arith.constant 0 : i32
    %c0_i32_0 = arith.constant 0 : i32
    %c0_i32_1 = arith.constant 0 : i32
    return %arg0, %c0_i32, %c0_i32_0 : i32, i32, i32
  }
  func.func @transform_1(%arg0: i32) -> (i32, i32, i32) {
    %c0_i32 = arith.constant 0 : i32
    %c0_i32_0 = arith.constant 0 : i32
    %c0_i32_1 = arith.constant 0 : i32
    %c0_i32_2 = arith.constant 0 : i32
    return %c0_i32, %c0_i32_0, %c0_i32_1 : i32, i32, i32
  }
  func.func @transform_2(%arg0: i32) -> (i32, i32, i32) {
    %c0_i32 = arith.constant 0 : i32
    %c0_i32_0 = arith.constant 0 : i32
    %c0_i32_1 = arith.constant 0 : i32
    return %arg0, %c0_i32, %c0_i32_0 : i32, i32, i32
  }
}

module attributes {stable_mosaic.version = 11 : i64} {
  func.func @_in_apply_kernel(%arg0: i32, %arg1: i32, %arg2: memref<1x256x128xf32, #tpu.memory_space<vmem>>, %arg3: memref<1x8x128xf32, #tpu.memory_space<vmem>>, %arg4: memref<1x128xf32, #tpu.memory_space<vmem>>, %arg5: memref<1x128xf32, #tpu.memory_space<vmem>>, %arg6: memref<1x256x128xf32, #tpu.memory_space<vmem>>) attributes {dimension_semantics = [#tpu.dimension_semantics<parallel>, #tpu.dimension_semantics<parallel>], iteration_bounds = array<i64: 2, 1>, scalar_prefetch = 0 : i64, scratch_operands = 0 : i64, tpu.core_type = #tpu.core_type<tc>, window_params = [{transform_indices = @transform_0, window_bounds = array<i64: 1, 256, 128>}, {transform_indices = @transform_1, window_bounds = array<i64: 1, 8, 128>}, {pipeline_mode = #tpu.pipeline_mode<synchronous>, transform_indices = @transform_2, window_bounds = array<i64: 1, 128>}, {pipeline_mode = #tpu.pipeline_mode<synchronous>, transform_indices = @transform_3, window_bounds = array<i64: 1, 128>}, {transform_indices = @transform_4, window_bounds = array<i64: 1, 256, 128>}]} {
    %c0 = arith.constant 0 : index
    %c0_0 = arith.constant 0 : index
    %c0_1 = arith.constant 0 : index
    %0 = vector.load %arg2[%c0, %c0_0, %c0_1] : memref<1x256x128xf32, #tpu.memory_space<vmem>>, vector<1x256x128xf32>
    %1 = vector.shape_cast %0 : vector<1x256x128xf32> to vector<256x128xf32>
    %c0_2 = arith.constant 0 : index
    %c0_3 = arith.constant 0 : index
    %c0_4 = arith.constant 0 : index
    %2 = vector.load %arg3[%c0_2, %c0_3, %c0_4] : memref<1x8x128xf32, #tpu.memory_space<vmem>>, vector<1x1x128xf32>
    %3 = vector.shape_cast %2 : vector<1x1x128xf32> to vector<1x128xf32>
    %cst = arith.constant 3.906250e-03 : f32
    %4 = vector.broadcast %cst : f32 to vector<1x128xf32>
    %5 = arith.mulf %3, %4 : vector<1x128xf32>
    %c0_5 = arith.constant 0 : index
    %c1 = arith.constant 1 : index
    %c0_6 = arith.constant 0 : index
    %6 = vector.load %arg3[%c0_5, %c1, %c0_6] : memref<1x8x128xf32, #tpu.memory_space<vmem>>, vector<1x1x128xf32>
    %7 = vector.shape_cast %6 : vector<1x1x128xf32> to vector<1x128xf32>
    %cst_7 = arith.constant 3.906250e-03 : f32
    %8 = vector.broadcast %cst_7 : f32 to vector<1x128xf32>
    %9 = arith.mulf %7, %8 : vector<1x128xf32>
    %10 = arith.mulf %5, %5 : vector<1x128xf32>
    %11 = arith.subf %9, %10 : vector<1x128xf32>
    %cst_8 = arith.constant 0.000000e+00 : f32
    %12 = vector.broadcast %cst_8 : f32 to vector<1x128xf32>
    %13 = arith.maximumf %11, %12 : vector<1x128xf32>
    %cst_9 = arith.constant 9.99999974E-6 : f32
    %14 = vector.broadcast %cst_9 : f32 to vector<1x128xf32>
    %15 = arith.addf %13, %14 : vector<1x128xf32>
    %16 = math.rsqrt %15 : vector<1x128xf32>
    %c0_10 = arith.constant 0 : index
    %c0_11 = arith.constant 0 : index
    %17 = vector.load %arg4[%c0_10, %c0_11] : memref<1x128xf32, #tpu.memory_space<vmem>>, vector<1x128xf32>
    %18 = arith.mulf %16, %17 : vector<1x128xf32>
    %19 = vector.broadcast %5 : vector<1x128xf32> to vector<256x128xf32>
    %20 = arith.subf %1, %19 : vector<256x128xf32>
    %21 = vector.broadcast %18 : vector<1x128xf32> to vector<256x128xf32>
    %22 = arith.mulf %20, %21 : vector<256x128xf32>
    %c0_12 = arith.constant 0 : index
    %c0_13 = arith.constant 0 : index
    %23 = vector.load %arg5[%c0_12, %c0_13] : memref<1x128xf32, #tpu.memory_space<vmem>>, vector<1x128xf32>
    %24 = vector.broadcast %23 : vector<1x128xf32> to vector<256x128xf32>
    %25 = arith.addf %22, %24 : vector<256x128xf32>
    %26 = math.tanh %25 : vector<256x128xf32>
    %cst_14 = arith.constant 5.000000e-01 : f32
    %27 = vector.broadcast %cst_14 : f32 to vector<256x128xf32>
    %28 = arith.mulf %26, %27 : vector<256x128xf32>
    %cst_15 = arith.constant 5.000000e-01 : f32
    %29 = vector.broadcast %cst_15 : f32 to vector<256x128xf32>
    %30 = arith.addf %28, %29 : vector<256x128xf32>
    %c0_16 = arith.constant 0 : index
    %c0_17 = arith.constant 0 : index
    %c0_18 = arith.constant 0 : index
    %31 = vector.load %arg6[%c0_16, %c0_17, %c0_18] : memref<1x256x128xf32, #tpu.memory_space<vmem>>, vector<1x256x128xf32>
    %32 = vector.shape_cast %31 : vector<1x256x128xf32> to vector<256x128xf32>
    %33 = vector.shape_cast %30 : vector<256x128xf32> to vector<1x256x128xf32>
    tpu.vector_store %arg6[%c0_16, %c0_17, %c0_18], %33 {strides = array<i32>} : memref<1x256x128xf32, #tpu.memory_space<vmem>>, vector<1x256x128xf32>,
    return
  }
  func.func @transform_0(%arg0: i32, %arg1: i32) -> (i32, i32, i32) {
    %c0_i32 = arith.constant 0 : i32
    %c0_i32_0 = arith.constant 0 : i32
    return %arg0, %arg1, %c0_i32 : i32, i32, i32
  }
  func.func @transform_1(%arg0: i32, %arg1: i32) -> (i32, i32, i32) {
    %c0_i32 = arith.constant 0 : i32
    %c0_i32_0 = arith.constant 0 : i32
    %c0_i32_1 = arith.constant 0 : i32
    return %arg0, %c0_i32, %c0_i32_0 : i32, i32, i32
  }
  func.func @transform_2(%arg0: i32, %arg1: i32) -> (i32, i32) {
    %c0_i32 = arith.constant 0 : i32
    %c0_i32_0 = arith.constant 0 : i32
    %c0_i32_1 = arith.constant 0 : i32
    return %c0_i32, %c0_i32_0 : i32, i32
  }
  func.func @transform_3(%arg0: i32, %arg1: i32) -> (i32, i32) {
    %c0_i32 = arith.constant 0 : i32
    %c0_i32_0 = arith.constant 0 : i32
    %c0_i32_1 = arith.constant 0 : i32
    return %c0_i32, %c0_i32_0 : i32, i32
  }
  func.func @transform_4(%arg0: i32, %arg1: i32) -> (i32, i32, i32) {
    %c0_i32 = arith.constant 0 : i32
    %c0_i32_0 = arith.constant 0 : i32
    return %arg0, %arg1, %c0_i32 : i32, i32, i32
  }
}

</mosaic_0001>

<bundles_post_ra>
// kernel: stylization_forward.49
= control target key start
LH: loop header
LB: loop body
LE: loop exit
PB: predicated region body
PF: predicated region fallthrough
CT: control target
= control target key end

     0   :  { %s430_s6 = smov 0   ;;  %s432_s7 = smov 0   ;;  %s504_s0 = inlined_call_operand.vmem [shape: f32[2,256,128], index: 0, kind: input, shape index: {}]   ;;  %s505_s1 = inlined_call_operand.vmem [shape: f32[2,8,128], index: 1, kind: output, shape index: {}]  }
   0x1   :  { %s434_s8 = smov 0  }
   0x2 LB: > { %s23_s9 = sadd.s32 1, %s413_s7  ;;  %p363_p0 = scmp.ge.s32.totalorder %s417_s8, 1  ;;  %s417_s8 = sphi %s434_s8, %s11_s8   ;;  %s413_s7 = sphi %s432_s7, %s507_s7   ;;  %s409_s6 = sphi %s430_s6, %s506_s6  }
   0x3   : > { %p25_p1 = scmp.ge.s32.totalorder %s23_s9, 2  ;;  %p106_p2 = scmp.lt.s32.totalorder %s417_s8, 3 }
   0x5   : > { %s509_s9 = smov (%p25_p1, %s23_s9), 0  ;;  %p107_p3 = pnand %p363_p0, %p106_p2 }
   0x6   : > { %p130_p4 = scmp.lt.s32.totalorder (!%p107_p3), %s409_s6, 1  ;;  %v419_v0 = vmov (!%p107_p3), 0.0  }
   0x7   : > { %110 = sbr.rel (%p107_p3) target bundleno = 97 (0x61), region = 24 }
   0xe   : > { %s511_s6 = smov (!%p130_p4, %s409_s6), 1 }
   0xf   : > { %s369_s10 = sshll.u32 %s511_s6, 8  ;;  %s366_s11 = sshll.u32 %s511_s6, 3 }
  0x10   : > { %s451_s14 = scalar_lea.vmem %s504_s0, %s369_s10  ;;  %s456_s17 = scalar_lea.vmem %s505_s1, %s366_s11 }
  0x11   : > { %147 = vst [vmem:[%s456_s17] sm:$0xff] %v419_v0  ;;  %v148_v1 = vld [vmem:[%s451_s14] sm:$0xff]  ;;  %v149_v2 = vld [vmem:[%s451_s14 + $0x8] sm:$0xff]  ;;  %v150_v3 = vld [vmem:[%s451_s14 + $0x10] sm:$0xff] }
  0x12   : > { %v151_v4 = vld [vmem:[%s451_s14 + $0x18] sm:$0xff]  ;;  %v181_v5 = vadd.f32 %v149_v2, %v148_v1  ;;  %v221_v6 = vmul.f32 %v148_v1, %v148_v1  ;;  %v222_v7 = vmul.f32 %v149_v2, %v149_v2  ;;  %v223_v8 = vmul.f32 %v150_v3, %v150_v3  ;;  %v152_v9 = vld [vmem:[%s451_s14 + $0x20] sm:$0xff]  ;;  %v153_v13 = vld [vmem:[%s451_s14 + $0x28] sm:$0xff] }
  0x13   : > { %v224_v11 = vmul.f32 %v151_v4, %v151_v4  ;;  %v225_v15 = vmul.f32 %v152_v9, %v152_v9  ;;  %v154_v17 = vld [vmem:[%s451_s14 + $0x30] sm:$0xff]  ;;  %v226_v19 = vmul.f32 %v153_v13, %v153_v13  ;;  %v155_v21 = vld [vmem:[%s451_s14 + $0x38] sm:$0xff]  ;;  %v156_v25 = vld [vmem:[%s451_s14 + $0x40] sm:$0xff] }
  0x14   : > { %v182_v10 = vadd.f32 %v181_v5, %v150_v3  ;;  %v253_v12 = vadd.f32 %v222_v7, %v221_v6  ;;  %v227_v23 = vmul.f32 %v154_v17, %v154_v17  ;;  %v228_v27 = vmul.f32 %v155_v21, %v155_v21  ;;  %v157_v29 = vld [vmem:[%s451_s14 + $0x48] sm:$0xff]  ;;  %v158_v33 = vld [vmem:[%s451_s14 + $0x50] sm:$0xff]  ;;  %v159_v37 = vld [vmem:[%s451_s14 + $0x58] sm:$0xff] }
  0x15   : > { %v229_v31 = vmul.f32 %v156_v25, %v156_v25  ;;  %v230_v35 = vmul.f32 %v157_v29, %v157_v29  ;;  %v231_v39 = vmul.f32 %v158_v33, %v158_v33  ;;  %v160_v41 = vld [vmem:[%s451_s14 + $0x60] sm:$0xff]  ;;  %v232_v43 = vmul.f32 %v159_v37, %v159_v37  ;;  %v161_v45 = vld [vmem:[%s451_s14 + $0x68] sm:$0xff]  ;;  %v162_v49 = vld [vmem:[%s451_s14 + $0x70] sm:$0xff] }
  0x16   : > { %v183_v14 = vadd.f32 %v182_v10, %v151_v4  ;;  %v254_v16 = vadd.f32 %v253_v12, %v223_v8  ;;  %v233_v47 = vmul.f32 %v160_v41, %v160_v41  ;;  %v234_v51 = vmul.f32 %v161_v45, %v161_v45  ;;  %v163_v53 = vld [vmem:[%s451_s14 + $0x78] sm:$0xff]  ;;  %v164_v57 = vld [vmem:[%s451_s14 + $0x80] sm:$0xff]  ;;  %v165_v61 = vld [vmem:[%s451_s14 + $0x88] sm:$0xff] }
  0x17   : > { %v235_v55 = vmul.f32 %v162_v49, %v162_v49  ;;  %v236_v59 = vmul.f32 %v163_v53, %v163_v53  ;;  %v237_v63 = vmul.f32 %v164_v57, %v164_v57  ;;  %v166_v1 = vld [vmem:[%s451_s14 + $0x90] sm:$0xff]  ;;  %v238_v3 = vmul.f32 %v165_v61, %v165_v61  ;;  %v167_v5 = vld [vmem:[%s451_s14 + $0x98] sm:$0xff] }
  0x18   : > { %v184_v18 = vadd.f32 %v183_v14, %v152_v9  ;;  %v255_v20 = vadd.f32 %v254_v16, %v224_v11  ;;  %v239_v7 = vmul.f32 %v166_v1, %v166_v1  ;;  %v168_v9 = vld [vmem:[%s451_s14 + $0xa0] sm:$0xff]  ;;  %v240_v11 = vmul.f32 %v167_v5, %v167_v5 }
  0x1a   : > { %v185_v22 = vadd.f32 %v184_v18, %v153_v13  ;;  %v256_v24 = vadd.f32 %v255_v20, %v225_v15  ;;  %v169_v13 = vld [vmem:[%s451_s14 + $0xa8] sm:$0xff]  ;;  %v241_v15 = vmul.f32 %v168_v9, %v168_v9 }
  0x1c   : > { %v186_v26 = vadd.f32 %v185_v22, %v154_v17  ;;  %v257_v28 = vadd.f32 %v256_v24, %v226_v19  ;;  %v170_v17 = vld [vmem:[%s451_s14 + $0xb0] sm:$0xff]  ;;  %v242_v19 = vmul.f32 %v169_v13, %v169_v13 }
  0x1e   : > { %v187_v30 = vadd.f32 %v186_v26, %v155_v21  ;;  %v258_v32 = vadd.f32 %v257_v28, %v227_v23  ;;  %v171_v21 = vld [vmem:[%s451_s14 + $0xb8] sm:$0xff]  ;;  %v243_v23 = vmul.f32 %v170_v17, %v170_v17 }
  0x20   : > { %v188_v34 = vadd.f32 %v187_v30, %v156_v25  ;;  %v259_v36 = vadd.f32 %v258_v32, %v228_v27  ;;  %v172_v25 = vld [vmem:[%s451_s14 + $0xc0] sm:$0xff]  ;;  %v244_v27 = vmul.f32 %v171_v21, %v171_v21 }
  0x22   : > { %v189_v38 = vadd.f32 %v188_v34, %v157_v29  ;;  %v260_v40 = vadd.f32 %v259_v36, %v229_v31  ;;  %v173_v29 = vld [vmem:[%s451_s14 + $0xc8] sm:$0xff]  ;;  %v245_v31 = vmul.f32 %v172_v25, %v172_v25 }
  0x24   : > { %v190_v42 = vadd.f32 %v189_v38, %v158_v33  ;;  %v261_v44 = vadd.f32 %v260_v40, %v230_v35  ;;  %v174_v33 = vld [vmem:[%s451_s14 + $0xd0] sm:$0xff]  ;;  %v246_v35 = vmul.f32 %v173_v29, %v173_v29 }
  0x26   : > { %v191_v46 = vadd.f32 %v190_v42, %v159_v37  ;;  %v262_v48 = vadd.f32 %v261_v44, %v231_v39  ;;  %v175_v37 = vld [vmem:[%s451_s14 + $0xd8] sm:$0xff]  ;;  %v247_v39 = vmul.f32 %v174_v33, %v174_v33 }
  0x28   : > { %v192_v50 = vadd.f32 %v191_v46, %v160_v41  ;;  %v263_v52 = vadd.f32 %v262_v48, %v232_v43  ;;  %v176_v41 = vld [vmem:[%s451_s14 + $0xe0] sm:$0xff]  ;;  %v248_v43 = vmul.f32 %v175_v37, %v175_v37 }
  0x2a   : > { %v193_v54 = vadd.f32 %v192_v50, %v161_v45  ;;  %v264_v56 = vadd.f32 %v263_v52, %v233_v47  ;;  %v177_v45 = vld [vmem:[%s451_s14 + $0xe8] sm:$0xff]  ;;  %v249_v47 = vmul.f32 %v176_v41, %v176_v41 }
  0x2c   : > { %v194_v58 = vadd.f32 %v193_v54, %v162_v49  ;;  %v265_v60 = vadd.f32 %v264_v56, %v234_v51  ;;  %v178_v49 = vld [vmem:[%s451_s14 + $0xf0] sm:$0xff]  ;;  %v250_v51 = vmul.f32 %v177_v45, %v177_v45 }
  0x2e   : > { %v195_v62 = vadd.f32 %v194_v58, %v163_v53  ;;  %v266_v0 = vadd.f32 %v265_v60, %v235_v55  ;;  %v179_v53 = vld [vmem:[%s451_s14 + $0xf8] sm:$0xff]  ;;  %v251_v55 = vmul.f32 %v178_v49, %v178_v49 }
  0x2f   : > { %v252_v58 = vmul.f32 %v179_v53, %v179_v53 }
  0x30   : > { %v196_v2 = vadd.f32 %v195_v62, %v164_v57  ;;  %v267_v4 = vadd.f32 %v266_v0, %v236_v59 }
  0x32   : > { %v197_v6 = vadd.f32 %v196_v2, %v165_v61  ;;  %v268_v8 = vadd.f32 %v267_v4, %v237_v63 }
  0x34   : > { %v198_v10 = vadd.f32 %v197_v6, %v166_v1  ;;  %v269_v12 = vadd.f32 %v268_v8, %v238_v3 }
  0x36   : > { %v199_v14 = vadd.f32 %v198_v10, %v167_v5  ;;  %v270_v16 = vadd.f32 %v269_v12, %v239_v7  ;;  %v180_v7 = vld [vmem:[%s456_s17] sm:$0x1]  ;;  %v220_v12 = vld [vmem:[%s456_s17 + $0x1] sm:$0x1] }
  0x38   : > { %v200_v18 = vadd.f32 %v199_v14, %v168_v9  ;;  %v271_v20 = vadd.f32 %v270_v16, %v240_v11 }
  0x3a   : > { %v201_v22 = vadd.f32 %v200_v18, %v169_v13  ;;  %v272_v24 = vadd.f32 %v271_v20, %v241_v15 }
  0x3c   : > { %v202_v26 = vadd.f32 %v201_v22, %v170_v17  ;;  %v273_v28 = vadd.f32 %v272_v24, %v242_v19 }
  0x3e   : > { %v203_v30 = vadd.f32 %v202_v26, %v171_v21  ;;  %v274_v32 = vadd.f32 %v273_v28, %v243_v23 }
  0x40   : > { %v204_v34 = vadd.f32 %v203_v30, %v172_v25  ;;  %v275_v36 = vadd.f32 %v274_v32, %v244_v27 }
  0x42   : > { %v205_v38 = vadd.f32 %v204_v34, %v173_v29  ;;  %v276_v40 = vadd.f32 %v275_v36, %v245_v31 }
  0x44   : > { %v206_v42 = vadd.f32 %v205_v38, %v174_v33  ;;  %v277_v44 = vadd.f32 %v276_v40, %v246_v35 }
  0x46   : > { %v207_v46 = vadd.f32 %v206_v42, %v175_v37  ;;  %v278_v48 = vadd.f32 %v277_v44, %v247_v39 }
  0x48   : > { %v208_v50 = vadd.f32 %v207_v46, %v176_v41  ;;  %v279_v52 = vadd.f32 %v278_v48, %v248_v43 }
  0x4a   : > { %v209_v54 = vadd.f32 %v208_v50, %v177_v45  ;;  %v280_v56 = vadd.f32 %v279_v52, %v249_v47 }
  0x4c   : > { %v210_v57 = vadd.f32 %v209_v54, %v178_v49  ;;  %v281_v59 = vadd.f32 %v280_v56, %v250_v51 }
  0x4e   : > { %v211_v60 = vadd.f32 %v210_v57, %v179_v53  ;;  %v282_v61 = vadd.f32 %v281_v59, %v251_v55 }
  0x50   : > { %v212_v62 = vrot.slane %v211_v60, 4  ;;  %v283_v63 = vadd.f32 %v282_v61, %v252_v58 }
  0x52   : > { %v213_v0 = vadd.f32 %v212_v62, %v211_v60  ;;  %v284_v1 = vrot.slane %v283_v63, 4 }
  0x54   : > { %v214_v2 = vrot.slane %v213_v0, 2  ;;  %v285_v3 = vadd.f32 %v284_v1, %v283_v63 }
  0x56   : > { %v215_v4 = vadd.f32 %v214_v2, %v213_v0  ;;  %v286_v5 = vrot.slane %v285_v3, 2 }
  0x58   : > { %v216_v6 = vrot.slane %v215_v4, 1  ;;  %v287_v8 = vadd.f32 %v286_v5, %v285_v3 }
  0x5a   : > { %v217_v9 = vadd.f32 %v216_v6, %v215_v4  ;;  %v288_v10 = vrot.slane %v287_v8, 1 }
  0x5c   : > { %v218_v11 = vadd.f32 %v217_v9, %v180_v7  ;;  %v289_v13 = vadd.f32 %v288_v10, %v287_v8 }
  0x5e   : > { %219 = vst [vmem:[%s456_s17] sm:$0x1] %v218_v11  ;;  %v290_v14 = vadd.f32 %v289_v13, %v220_v12 }
  0x60   : > { %291 = vst [vmem:[%s456_s17 + $0x1] sm:$0x1] %v290_v14 }
  0x61 PF: > { %s11_s8 = sadd.s32 1, %s417_s8   ;;  %s506_s6 = smov %s413_s7 }
  0x62   : > { %p8_p5 = scmp.ge.s32.totalorder %s11_s8, 4   ;;  %s507_s7 = smov %s509_s9 }
  0x64   :  { %10 = sbr.rel (!%p8_p5) target bundleno = 2 (0x2), region = 58 }

// kernel: stylization_forward.50
= control target key start
LH: loop header
LB: loop body
LE: loop exit
PB: predicated region body
PF: predicated region fallthrough
CT: control target
= control target key end

     0   :  { %s948_s15 = smov 0   ;;  %s950_s16 = smov 0   ;;  %s1324_s0 = inlined_call_operand.vmem [shape: f32[2,256,128], index: 0, kind: input, shape index: {}]   ;;  %s1325_s1 = inlined_call_operand.vmem [shape: f32[2,8,128], index: 1, kind: input, shape index: {}]   ;;  %s1326_s2 = inlined_call_operand.vmem [shape: f32[1,128], index: 2, kind: input, shape index: {}]   ;;  %s1327_s3 = inlined_call_operand.vmem [shape: f32[1,128], index: 3, kind: input, shape index: {}]   ;;  %s1328_s4 = inlined_call_operand.vmem [shape: bf16[2,256,128], index: 4, kind: output, shape index: {}]  }
   0x1   :  { %s952_s17 = smov 0  }
   0x2 LB: > { %s26_s18 = sadd.s32 1, %s917_s16  ;;  %p703_p0 = scmp.ge.s32.totalorder %s921_s17, 1  ;;  %s921_s17 = sphi %s952_s17, %s14_s17   ;;  %s917_s16 = sphi %s950_s16, %s1337_s16   ;;  %s913_s15 = sphi %s948_s15, %s1336_s15  }
   0x3   : > { %p28_p1 = scmp.ge.s32.totalorder %s26_s18, 2  ;;  %p192_p2 = scmp.lt.s32.totalorder %s921_s17, 3 }
   0x5   : > { %s1339_s18 = smov (%p28_p1, %s26_s18), 0  ;;  %p193_p3 = pnand %p703_p0, %p192_p2 }
   0x6   : > { %p231_p4 = scmp.lt.s32.totalorder (!%p193_p3), %s913_s15, 1  ;;  %v297_v3 = vlaneseq (!%p193_p3)  ;;  %v295_v26 = vld [vmem:[%s1326_s2] sm:$0x1] (!%p193_p3) }
   0x7   : > { %196 = sbr.rel (%p193_p3) target bundleno = 78 (0x4e), region = 36 }
   0x8   : > { %v972_v7 = vshrl.u32 (!%p193_p3), %v297_v3, 7 }
   0xa   : > { %v299_v10 = vsub.s32 (!%p193_p3), 0, %v972_v7 }
   0xe   : > { %s1341_s15 = smov (!%p231_p4, %s913_s15), 1 }
   0xf   : > { %s706_s19 = sshll.u32 %s1341_s15, 3  ;;  %s744_s23 = sshll.u32 %s1341_s15, 8 }
  0x10   : > { %s243_s22 = scalar_lea.vmem %s1325_s1, %s706_s19  ;;  %s978_s26 = scalar_lea.vmem %s1324_s0, %s744_s23 }
  0x11   : > { %v286_v0 = vld [vmem:[%s243_s22] sm:$0x1]  ;;  %v288_v2 = vld [vmem:[%s243_s22 + $0x1] sm:$0x1]  ;;  %v985_v12 = vld [vmem:[%s978_s26 + $0x8] sm:$0xff]  ;;  %s745_s5 = sshll.u32 %s1341_s15, 7 }
  0x12   : > { %v287_v1 = vmul.f32 0.00390625, %v286_v0  ;;  %v289_v4 = vmul.f32 0.00390625, %v288_v2  ;;  %v982_v11 = vld [vmem:[%s978_s26] sm:$0xff]  ;;  %v992_v14 = vld [vmem:[%s978_s26 + $0x10] sm:$0xff]  ;;  %v995_v15 = vld [vmem:[%s978_s26 + $0x18] sm:$0xff]  ;;  %s1177_s8 = scalar_lea.vmem %s1328_s4, %s745_s5 }
  0x13   : > { %v998_v16 = vld [vmem:[%s978_s26 + $0x20] sm:$0xff]  ;;  %v1001_v17 = vld [vmem:[%s978_s26 + $0x28] sm:$0xff]  ;;  %v1004_v18 = vld [vmem:[%s978_s26 + $0x30] sm:$0xff] }
  0x14   : > { %v290_v5 = vmul.f32 %v287_v1, %v287_v1  ;;  %v989_v13 = vrot.slane %v287_v1, %v299_v10  ;;  %v1007_v19 = vld [vmem:[%s978_s26 + $0x38] sm:$0xff]  ;;  %v1010_v20 = vld [vmem:[%s978_s26 + $0x40] sm:$0xff]  ;;  %v1013_v21 = vld [vmem:[%s978_s26 + $0x48] sm:$0xff] }
  0x15   : > { %v1016_v22 = vld [vmem:[%s978_s26 + $0x50] sm:$0xff]  ;;  %v1019_v23 = vld [vmem:[%s978_s26 + $0x58] sm:$0xff]  ;;  %v1022_v24 = vld [vmem:[%s978_s26 + $0x60] sm:$0xff] }
  0x16   : > { %v291_v6 = vsub.f32 %v289_v4, %v290_v5  ;;  %v1025_v25 = vld [vmem:[%s978_s26 + $0x68] sm:$0xff]  ;;  %v301_v27 = vsub.f32 %v982_v11, %v989_v13  ;;  %v302_v28 = vsub.f32 %v985_v12, %v989_v13  ;;  %v1035_v29 = vld [vmem:[%s978_s26 + $0x70] sm:$0xff]  ;;  %v1038_v30 = vld [vmem:[%s978_s26 + $0x78] sm:$0xff]  ;;  %v303_v32 = vsub.f32 %v992_v14, %v989_v13 }
  0x17   : > { %v1041_v31 = vld [vmem:[%s978_s26 + $0x80] sm:$0xff]  ;;  %v304_v33 = vsub.f32 %v995_v15, %v989_v13  ;;  %v305_v34 = vsub.f32 %v998_v16, %v989_v13  ;;  %v306_v35 = vsub.f32 %v1001_v17, %v989_v13  ;;  %v1052_v36 = vld [vmem:[%s978_s26 + $0x88] sm:$0xff]  ;;  %v1055_v37 = vld [vmem:[%s978_s26 + $0x90] sm:$0xff]  ;;  %v307_v39 = vsub.f32 %v1004_v18, %v989_v13 }
  0x18   : > { %v292_v8 = vmax.f32 %v291_v6, 0.0  ;;  %v1058_v38 = vld [vmem:[%s978_s26 + $0x98] sm:$0xff]  ;;  %v308_v40 = vsub.f32 %v1007_v19, %v989_v13  ;;  %v309_v41 = vsub.f32 %v1010_v20, %v989_v13  ;;  %v310_v42 = vsub.f32 %v1013_v21, %v989_v13  ;;  %v1069_v43 = vld [vmem:[%s978_s26 + $0xa0] sm:$0xff]  ;;  %v1072_v44 = vld [vmem:[%s978_s26 + $0xa8] sm:$0xff] }
  0x19   : > { %v1075_v45 = vld [vmem:[%s978_s26 + $0xb0] sm:$0xff]  ;;  %v311_v46 = vsub.f32 %v1016_v22, %v989_v13  ;;  %v312_v47 = vsub.f32 %v1019_v23, %v989_v13  ;;  %v313_v48 = vsub.f32 %v1022_v24, %v989_v13  ;;  %v314_v49 = vsub.f32 %v1025_v25, %v989_v13  ;;  %v1086_v50 = vld [vmem:[%s978_s26 + $0xb8] sm:$0xff]  ;;  %v1089_v51 = vld [vmem:[%s978_s26 + $0xc0] sm:$0xff] }
  0x1a   : > { %v293_v9 = vadd.f32 1e-05, %v292_v8  ;;  %v1092_v52 = vld [vmem:[%s978_s26 + $0xc8] sm:$0xff]  ;;  %v315_v54 = vsub.f32 %v1035_v29, %v989_v13  ;;  %v316_v55 = vsub.f32 %v1038_v30, %v989_v13  ;;  %v317_v56 = vsub.f32 %v1041_v31, %v989_v13  ;;  %v1103_v58 = vld [vmem:[%s978_s26 + $0xd0] sm:$0xff]  ;;  %v1106_v59 = vld [vmem:[%s978_s26 + $0xd8] sm:$0xff] }
  0x1b   : > { %v318_v57 = vsub.f32 %v1052_v36, %v989_v13  ;;  %v1109_v60 = vld [vmem:[%s978_s26 + $0xe0] sm:$0xff]  ;;  %v319_v62 = vsub.f32 %v1055_v37, %v989_v13  ;;  %v320_v63 = vsub.f32 %v1058_v38, %v989_v13  ;;  %v321_v0 = vsub.f32 %v1069_v43, %v989_v13  ;;  %v1118_v1 = vld [vmem:[%s978_s26 + $0xe8] sm:$0xff]  ;;  %v1121_v2 = vld [vmem:[%s978_s26 + $0xf0] sm:$0xff] }
  0x1c   : > { %897 = vrsqrt.f32 %v293_v9  ;;  %v1124_v3 = vld [vmem:[%s978_s26 + $0xf8] sm:$0xff]  ;;  %v322_v4 = vsub.f32 %v1072_v44, %v989_v13  ;;  %v323_v5 = vsub.f32 %v1075_v45, %v989_v13  ;;  %v324_v6 = vsub.f32 %v1086_v50, %v989_v13  ;;  %v1147_v15 = vld [vmem:[%s1327_s3] ss:$0 sm:$0xff] }
  0x1d   : > { %v325_v8 = vsub.f32 %v1089_v51, %v989_v13 }
  0x26   : > { %v898_v53 = vpop.eup %897 }
  0x27   : > { %v296_v61 = vmul.f32 %v898_v53, %v295_v26 }
  0x29   : > { %v1136_v9 = vrot.slane %v296_v61, %v299_v10 }
  0x2b   : > { %v337_v18 = vmul.f32 %v1136_v9, %v301_v27  ;;  %v338_v19 = vmul.f32 %v1136_v9, %v302_v28  ;;  %v339_v26 = vmul.f32 %v1136_v9, %v303_v32  ;;  %v340_v53 = vmul.f32 %v1136_v9, %v304_v33 }
  0x2c   : > { %v341_v61 = vmul.f32 %v1136_v9, %v305_v34  ;;  %v342_v7 = vmul.f32 %v1136_v9, %v306_v35  ;;  %v343_v10 = vmul.f32 %v1136_v9, %v307_v39  ;;  %v344_v14 = vmul.f32 %v1136_v9, %v308_v40 }
  0x2d   : > { %v376_v16 = vadd.f32 %v1147_v15, %v337_v18  ;;  %v377_v17 = vadd.f32 %v1147_v15, %v338_v19  ;;  %v378_v27 = vadd.f32 %v1147_v15, %v339_v26  ;;  %v379_v28 = vadd.f32 %v1147_v15, %v340_v53 }
  0x2e   : > { %v380_v32 = vadd.f32 %v1147_v15, %v341_v61  ;;  %v381_v33 = vadd.f32 %v1147_v15, %v342_v7  ;;  %v382_v34 = vadd.f32 %v1147_v15, %v343_v10  ;;  %v383_v35 = vadd.f32 %v1147_v15, %v344_v14 }
  0x2f   : > { %v408_v39 = vmax.f32 %v376_v16, 0.0  ;;  %v409_v12 = vmax.f32 %v377_v17, 0.0  ;;  %v410_v40 = vmax.f32 %v378_v27, 0.0  ;;  %v411_v11 = vmax.f32 %v379_v28, 0.0 }
  0x30   : > { %v412_v18 = vmax.f32 %v380_v32, 0.0  ;;  %v413_v19 = vmax.f32 %v381_v33, 0.0  ;;  %v414_v26 = vmax.f32 %v382_v34, 0.0  ;;  %v415_v7 = vmax.f32 %v383_v35, 0.0 }
  0x31   : > { %v781_v10 = vpack.c.bf16 %v409_v12, %v408_v39  ;;  %v786_v53 = vpack.c.bf16 %v411_v11, %v410_v40  ;;  %v345_v14 = vmul.f32 %v1136_v9, %v309_v41  ;;  %v346_v16 = vmul.f32 %v1136_v9, %v310_v42 }
  0x32   : > { %v791_v17 = vpack.c.bf16 %v413_v19, %v412_v18  ;;  %v796_v61 = vpack.c.bf16 %v415_v7, %v414_v26  ;;  %v347_v27 = vmul.f32 %v1136_v9, %v311_v46  ;;  %v348_v11 = vmul.f32 %v1136_v9, %v312_v47 }
  0x33   : > { %782 = vst [vmem:[%s1177_s8] sm:$0xff] %v781_v10   ;;  %858 = vst [vmem:[%s1177_s8 + $0x8] sm:$0xff] %v786_v53   ;;  %v384_v20 = vadd.f32 %v1147_v15, %v345_v14  ;;  %v385_v21 = vadd.f32 %v1147_v15, %v346_v16  ;;  %v349_v41 = vmul.f32 %v1136_v9, %v313_v48 }
  0x34   : > { %v350_v22 = vmul.f32 %v1136_v9, %v314_v49  ;;  %859 = vst [vmem:[%s1177_s8 + $0x10] sm:$0xff] %v791_v17   ;;  %860 = vst [vmem:[%s1177_s8 + $0x18] sm:$0xff] %v796_v61   ;;  %v386_v23 = vadd.f32 %v1147_v15, %v347_v27  ;;  %v387_v42 = vadd.f32 %v1147_v15, %v348_v11 }
  0x35   : > { %v351_v46 = vmul.f32 %v1136_v9, %v315_v54  ;;  %v352_v24 = vmul.f32 %v1136_v9, %v316_v55  ;;  %v416_v47 = vmax.f32 %v384_v20, 0.0  ;;  %v417_v25 = vmax.f32 %v385_v21, 0.0 }
  0x36   : > { %v388_v48 = vadd.f32 %v1147_v15, %v349_v41  ;;  %v389_v49 = vadd.f32 %v1147_v15, %v350_v22  ;;  %v418_v12 = vmax.f32 %v386_v23, 0.0  ;;  %v419_v28 = vmax.f32 %v387_v42, 0.0 }
  0x37   : > { %v390_v32 = vadd.f32 %v1147_v15, %v351_v46  ;;  %v391_v29 = vadd.f32 %v1147_v15, %v352_v24  ;;  %v801_v54 = vpack.c.bf16 %v417_v25, %v416_v47  ;;  %v353_v30 = vmul.f32 %v1136_v9, %v317_v56 }
  0x38   : > { %v420_v33 = vmax.f32 %v388_v48, 0.0  ;;  %v421_v34 = vmax.f32 %v389_v49, 0.0  ;;  %v806_v55 = vpack.c.bf16 %v419_v28, %v418_v12  ;;  %v354_v40 = vmul.f32 %v1136_v9, %v318_v57 }
  0x39   : > { %v422_v35 = vmax.f32 %v390_v32, 0.0  ;;  %v423_v39 = vmax.f32 %v391_v29, 0.0  ;;  %861 = vst [vmem:[%s1177_s8 + $0x20] sm:$0xff] %v801_v54   ;;  %v392_v19 = vadd.f32 %v1147_v15, %v353_v30  ;;  %v355_v31 = vmul.f32 %v1136_v9, %v319_v62 }
  0x3a   : > { %v811_v18 = vpack.c.bf16 %v421_v34, %v420_v33  ;;  %v356_v56 = vmul.f32 %v1136_v9, %v320_v63  ;;  %862 = vst [vmem:[%s1177_s8 + $0x28] sm:$0xff] %v806_v55   ;;  %v393_v36 = vadd.f32 %v1147_v15, %v354_v40  ;;  %v357_v57 = vmul.f32 %v1136_v9, %v321_v0 }
  0x3b   : > { %v816_v26 = vpack.c.bf16 %v423_v39, %v422_v35  ;;  %v358_v37 = vmul.f32 %v1136_v9, %v322_v4  ;;  %v424_v62 = vmax.f32 %v392_v19, 0.0  ;;  %v394_v38 = vadd.f32 %v1147_v15, %v355_v31 }
  0x3c   : > { %863 = vst [vmem:[%s1177_s8 + $0x30] sm:$0xff] %v811_v18   ;;  %v395_v63 = vadd.f32 %v1147_v15, %v356_v56  ;;  %v359_v7 = vmul.f32 %v1136_v9, %v323_v5  ;;  %v425_v43 = vmax.f32 %v393_v36, 0.0  ;;  %v396_v0 = vadd.f32 %v1147_v15, %v357_v57 }
  0x3d   : > { %864 = vst [vmem:[%s1177_s8 + $0x38] sm:$0xff] %v816_v26   ;;  %v397_v44 = vadd.f32 %v1147_v15, %v358_v37  ;;  %v360_v4 = vmul.f32 %v1136_v9, %v324_v6  ;;  %v426_v10 = vmax.f32 %v394_v38, 0.0  ;;  %v361_v45 = vmul.f32 %v1136_v9, %v325_v8 }
  0x3e   : > { %v427_v53 = vmax.f32 %v395_v63, 0.0  ;;  %v398_v14 = vadd.f32 %v1147_v15, %v359_v7  ;;  %v821_v5 = vpack.c.bf16 %v425_v43, %v424_v62  ;;  %v428_v16 = vmax.f32 %v396_v0, 0.0 }
  0x3f   : > { %v429_v17 = vmax.f32 %v397_v44, 0.0  ;;  %v399_v61 = vadd.f32 %v1147_v15, %v360_v4  ;;  %v1329_v6 = vsub.f32 %v1092_v52, %v989_v13  ;;  %v400_v20 = vadd.f32 %v1147_v15, %v361_v45 }
  0x40   : > { %v826_v27 = vpack.c.bf16 %v427_v53, %v426_v10  ;;  %v430_v50 = vmax.f32 %v398_v14, 0.0  ;;  %865 = vst [vmem:[%s1177_s8 + $0x40] sm:$0xff] %v821_v5   ;;  %v1330_v8 = vsub.f32 %v1103_v58, %v989_v13  ;;  %v1331_v22 = vsub.f32 %v1106_v59, %v989_v13 }
  0x41   : > { %v362_v11 = vmul.f32 %v1136_v9, %v1329_v6  ;;  %v831_v21 = vpack.c.bf16 %v429_v17, %v428_v16  ;;  %v431_v51 = vmax.f32 %v399_v61, 0.0  ;;  %v432_v42 = vmax.f32 %v400_v20, 0.0 }
  0x42   : > { %v363_v41 = vmul.f32 %v1136_v9, %v1330_v8  ;;  %v364_v23 = vmul.f32 %v1136_v9, %v1331_v22  ;;  %866 = vst [vmem:[%s1177_s8 + $0x48] sm:$0xff] %v826_v27   ;;  %v1332_v46 = vsub.f32 %v1109_v60, %v989_v13  ;;  %v1333_v58 = vsub.f32 %v1118_v1, %v989_v13 }
  0x43   : > { %v401_v52 = vadd.f32 %v1147_v15, %v362_v11  ;;  %867 = vst [vmem:[%s1177_s8 + $0x50] sm:$0xff] %v831_v21   ;;  %v836_v25 = vpack.c.bf16 %v431_v51, %v430_v50  ;;  %v1334_v49 = vsub.f32 %v1121_v2, %v989_v13  ;;  %v1335_v32 = vsub.f32 %v1124_v3, %v989_v13 }
  0x44   : > { %v365_v24 = vmul.f32 %v1136_v9, %v1332_v46  ;;  %v366_v47 = vmul.f32 %v1136_v9, %v1333_v58  ;;  %v402_v59 = vadd.f32 %v1147_v15, %v363_v41  ;;  %v403_v48 = vadd.f32 %v1147_v15, %v364_v23 }
  0x45   : > { %v367_v12 = vmul.f32 %v1136_v9, %v1334_v49  ;;  %v433_v60 = vmax.f32 %v401_v52, 0.0  ;;  %v368_v29 = vmul.f32 %v1136_v9, %v1335_v32  ;;  %868 = vst [vmem:[%s1177_s8 + $0x58] sm:$0xff] %v836_v25  }
  0x46   : > { %v404_v28 = vadd.f32 %v1147_v15, %v365_v24  ;;  %v405_v1 = vadd.f32 %v1147_v15, %v366_v47  ;;  %v434_v54 = vmax.f32 %v402_v59, 0.0  ;;  %v435_v33 = vmax.f32 %v403_v48, 0.0 }
  0x47   : > { %v406_v2 = vadd.f32 %v1147_v15, %v367_v12  ;;  %v841_v34 = vpack.c.bf16 %v433_v60, %v432_v42  ;;  %v407_v35 = vadd.f32 %v1147_v15, %v368_v29 }
  0x48   : > { %v436_v30 = vmax.f32 %v404_v28, 0.0  ;;  %v437_v55 = vmax.f32 %v405_v1, 0.0  ;;  %v846_v39 = vpack.c.bf16 %v435_v33, %v434_v54 }
  0x49   : > { %v438_v40 = vmax.f32 %v406_v2, 0.0  ;;  %869 = vst [vmem:[%s1177_s8 + $0x60] sm:$0xff] %v841_v34   ;;  %v439_v19 = vmax.f32 %v407_v35, 0.0 }
  0x4a   : > { %v851_v18 = vpack.c.bf16 %v437_v55, %v436_v30  ;;  %870 = vst [vmem:[%s1177_s8 + $0x68] sm:$0xff] %v846_v39  }
  0x4b   : > { %v856_v13 = vpack.c.bf16 %v439_v19, %v438_v40 }
  0x4c   : > { %871 = vst [vmem:[%s1177_s8 + $0x70] sm:$0xff] %v851_v18  }
  0x4d   : > { %872 = vst [vmem:[%s1177_s8 + $0x78] sm:$0xff] %v856_v13  }
  0x4e PF: > { %s14_s17 = sadd.s32 1, %s921_s17   ;;  %s1336_s15 = smov %s917_s16 }
  0x4f   : > { %p11_p5 = scmp.ge.s32.totalorder %s14_s17, 4   ;;  %s1337_s16 = smov %s1339_s18 }
  0x51   :  { %13 = sbr.rel (!%p11_p5) target bundleno = 2 (0x2), region = 69 }

// kernel: stylization_forward.48
= control target key start
LH: loop header
LB: loop body
LE: loop exit
PB: predicated region body
PF: predicated region fallthrough
CT: control target
= control target key end

     0   :  { %v1106_v0 = vmov 0   ;;  %s1586_s1 = inlined_call_operand.vmem [shape: bf16[256,128], index: 1, kind: input, shape index: {}]   ;;  %s1587_s0 = inlined_call_operand.vmem [shape: bf16[512,256], index: 0, kind: input, shape index: {}]   ;;  %s1588_s2 = inlined_call_operand.vmem [shape: f32[512,128], index: 2, kind: output, shape index: {}]  }
   0x1   :  { %524 = vmatprep.subr.bf16.mxu0 %v1106_v0  ;;  %961 = vmatprep.subr.bf16.mxu1 %v1106_v0  ;;  %v994_v1 = vld [vmem:[%s1586_s1] sm:$0xff]   ;;  %v995_v2 = vld [vmem:[%s1586_s1 + $0x8] sm:$0xff]   ;;  %v996_v3 = vld [vmem:[%s1586_s1 + $0x10] sm:$0xff]  }
   0x2   :  { %525 = vmatpush1.bf16.msra.mxu0 %v994_v1  ;;  %977 = vmatpush1.bf16.msra.mxu1 %v994_v1  ;;  %v997_v4 = vld [vmem:[%s1586_s1 + $0x18] sm:$0xff]   ;;  %v998_v5 = vld [vmem:[%s1586_s1 + $0x20] sm:$0xff]   ;;  %v999_v7 = vld [vmem:[%s1586_s1 + $0x28] sm:$0xff]  }
   0x3   :  { %526 = vmatprep.subr.bf16.mxu0 %v1106_v0  ;;  %962 = vmatprep.subr.bf16.mxu1 %v1106_v0  ;;  %v1012_v6 = vld [vmem:[%s1587_s0 + $0x4] ss:$8 sps:$4 sm:$0xff]   ;;  %v1000_v9 = vld [vmem:[%s1586_s1 + $0x30] sm:$0xff]   ;;  %v1001_v10 = vld [vmem:[%s1586_s1 + $0x38] sm:$0xff]  }
   0x4   :  { %v1015_v8 = vld [vmem:[%s1587_s0 + $0x104] ss:$8 sps:$4 sm:$0xff]   ;;  %556 = vmatprep.mubr.bf16.mxu0 %v1012_v6  ;;  %v1004_v13 = vld [vmem:[%s1586_s1 + $0x50] sm:$0xff]   ;;  %v1005_v14 = vld [vmem:[%s1586_s1 + $0x58] sm:$0xff]  }
   0x5   :  { %684 = vmatprep.mubr.bf16.mxu1 %v1015_v8  ;;  %v1002_v11 = vld [vmem:[%s1586_s1 + $0x40] sm:$0xff]   ;;  %v1003_v12 = vld [vmem:[%s1586_s1 + $0x48] sm:$0xff]   ;;  %v1008_v17 = vld [vmem:[%s1586_s1 + $0x70] sm:$0xff]  }
   0x6   :  { %527 = vmatpush1.bf16.msra.mxu0 %v995_v2  ;;  %978 = vmatpush1.bf16.msra.mxu1 %v995_v2  ;;  %v1006_v15 = vld [vmem:[%s1586_s1 + $0x60] sm:$0xff]   ;;  %v1007_v16 = vld [vmem:[%s1586_s1 + $0x68] sm:$0xff]   ;;  %v1009_v18 = vld [vmem:[%s1586_s1 + $0x78] sm:$0xff]  }
   0x7   :  { %528 = vmatprep.subr.bf16.mxu0 %v1106_v0  ;;  %963 = vmatprep.subr.bf16.mxu1 %v1106_v0  ;;  %v1010_v19 = vld [vmem:[%s1587_s0] ss:$8 sps:$4 sm:$0xff]   ;;  %v1016_v21 = vld [vmem:[%s1587_s0 + $0x14] ss:$8 sps:$4 sm:$0xff]   ;;  %v1020_v23 = vld [vmem:[%s1587_s0 + $0x10] ss:$8 sps:$4 sm:$0xff]  }
   0x8   :  { %v1013_v20 = vld [vmem:[%s1587_s0 + $0x100] ss:$8 sps:$4 sm:$0xff]   ;;  %v1018_v22 = vld [vmem:[%s1587_s0 + $0x114] ss:$8 sps:$4 sm:$0xff]   ;;  %v1021_v24 = vld [vmem:[%s1587_s0 + $0x110] ss:$8 sps:$4 sm:$0xff]  }
   0x9   :  { %v1022_v25 = vld [vmem:[%s1587_s0 + $0x24] ss:$8 sps:$4 sm:$0xff]   ;;  %v1026_v27 = vld [vmem:[%s1587_s0 + $0x20] ss:$8 sps:$4 sm:$0xff]   ;;  %v1028_v29 = vld [vmem:[%s1587_s0 + $0x34] ss:$8 sps:$4 sm:$0xff]  }
   0xa   :  { %529 = vmatpush1.bf16.msra.mxu0 %v996_v3  ;;  %979 = vmatpush1.bf16.msra.mxu1 %v996_v3  ;;  %v1024_v26 = vld [vmem:[%s1587_s0 + $0x124] ss:$8 sps:$4 sm:$0xff]   ;;  %v1027_v28 = vld [vmem:[%s1587_s0 + $0x120] ss:$8 sps:$4 sm:$0xff]   ;;  %v1030_v30 = vld [vmem:[%s1587_s0 + $0x134] ss:$8 sps:$4 sm:$0xff]  }
   0xb   :  { %530 = vmatprep.subr.bf16.mxu0 %v1106_v0  ;;  %964 = vmatprep.subr.bf16.mxu1 %v1106_v0  ;;  %v1032_v31 = vld [vmem:[%s1587_s0 + $0x30] ss:$8 sps:$4 sm:$0xff]   ;;  %v1034_v33 = vld [vmem:[%s1587_s0 + $0x44] ss:$8 sps:$4 sm:$0xff]   ;;  %v1038_v35 = vld [vmem:[%s1587_s0 + $0x40] ss:$8 sps:$4 sm:$0xff]  }
   0xc   :  { %v1033_v32 = vld [vmem:[%s1587_s0 + $0x130] ss:$8 sps:$4 sm:$0xff]   ;;  %v1036_v34 = vld [vmem:[%s1587_s0 + $0x144] ss:$8 sps:$4 sm:$0xff]   ;;  %v1039_v36 = vld [vmem:[%s1587_s0 + $0x140] ss:$8 sps:$4 sm:$0xff]  }
   0xd   :  { %v1040_v37 = vld [vmem:[%s1587_s0 + $0x54] ss:$8 sps:$4 sm:$0xff]   ;;  %v1044_v39 = vld [vmem:[%s1587_s0 + $0x50] ss:$8 sps:$4 sm:$0xff]   ;;  %v1046_v41 = vld [vmem:[%s1587_s0 + $0x64] ss:$8 sps:$4 sm:$0xff]  }
   0xe   :  { %531 = vmatpush1.bf16.msra.mxu0 %v997_v4  ;;  %980 = vmatpush1.bf16.msra.mxu1 %v997_v4  ;;  %v1042_v38 = vld [vmem:[%s1587_s0 + $0x154] ss:$8 sps:$4 sm:$0xff]   ;;  %v1045_v40 = vld [vmem:[%s1587_s0 + $0x150] ss:$8 sps:$4 sm:$0xff]   ;;  %v1048_v42 = vld [vmem:[%s1587_s0 + $0x164] ss:$8 sps:$4 sm:$0xff]  }
   0xf   :  { %532 = vmatprep.subr.bf16.mxu0 %v1106_v0  ;;  %965 = vmatprep.subr.bf16.mxu1 %v1106_v0  ;;  %v1050_v43 = vld [vmem:[%s1587_s0 + $0x60] ss:$8 sps:$4 sm:$0xff]   ;;  %v1052_v45 = vld [vmem:[%s1587_s0 + $0x74] ss:$8 sps:$4 sm:$0xff]   ;;  %v1056_v47 = vld [vmem:[%s1587_s0 + $0x70] ss:$8 sps:$4 sm:$0xff]  }
  0x10   :  { %v1051_v44 = vld [vmem:[%s1587_s0 + $0x160] ss:$8 sps:$4 sm:$0xff]   ;;  %v1054_v46 = vld [vmem:[%s1587_s0 + $0x174] ss:$8 sps:$4 sm:$0xff]   ;;  %v1057_v48 = vld [vmem:[%s1587_s0 + $0x170] ss:$8 sps:$4 sm:$0xff]  }
  0x11   :  { %v1058_v49 = vld [vmem:[%s1587_s0 + $0x84] ss:$8 sps:$4 sm:$0xff]   ;;  %v1062_v51 = vld [vmem:[%s1587_s0 + $0x80] ss:$8 sps:$4 sm:$0xff]   ;;  %v1064_v53 = vld [vmem:[%s1587_s0 + $0x94] ss:$8 sps:$4 sm:$0xff]  }
  0x12   :  { %533 = vmatpush1.bf16.msra.mxu0 %v998_v5  ;;  %981 = vmatpush1.bf16.msra.mxu1 %v998_v5  ;;  %v1060_v50 = vld [vmem:[%s1587_s0 + $0x184] ss:$8 sps:$4 sm:$0xff]   ;;  %v1063_v52 = vld [vmem:[%s1587_s0 + $0x180] ss:$8 sps:$4 sm:$0xff]   ;;  %v1066_v54 = vld [vmem:[%s1587_s0 + $0x194] ss:$8 sps:$4 sm:$0xff]  }
  0x13   :  { %534 = vmatprep.subr.bf16.mxu0 %v1106_v0  ;;  %966 = vmatprep.subr.bf16.mxu1 %v1106_v0  ;;  %v1068_v55 = vld [vmem:[%s1587_s0 + $0x90] ss:$8 sps:$4 sm:$0xff]   ;;  %v1070_v57 = vld [vmem:[%s1587_s0 + $0xa4] ss:$8 sps:$4 sm:$0xff]   ;;  %v1074_v59 = vld [vmem:[%s1587_s0 + $0xa0] ss:$8 sps:$4 sm:$0xff]  }
  0x14   :  { %v1069_v56 = vld [vmem:[%s1587_s0 + $0x190] ss:$8 sps:$4 sm:$0xff]   ;;  %v1072_v58 = vld [vmem:[%s1587_s0 + $0x1a4] ss:$8 sps:$4 sm:$0xff]   ;;  %v1075_v60 = vld [vmem:[%s1587_s0 + $0x1a0] ss:$8 sps:$4 sm:$0xff]  }
  0x15   :  { %v1076_v61 = vld [vmem:[%s1587_s0 + $0xb4] ss:$8 sps:$4 sm:$0xff]   ;;  %v1080_v63 = vld [vmem:[%s1587_s0 + $0xb0] ss:$8 sps:$4 sm:$0xff]   ;;  %v1082_v1 = vld [vmem:[%s1587_s0 + $0xc4] ss:$8 sps:$4 sm:$0xff]  }
  0x16   :  { %535 = vmatpush1.bf16.msra.mxu0 %v999_v7  ;;  %982 = vmatpush1.bf16.msra.mxu1 %v999_v7  ;;  %v1078_v62 = vld [vmem:[%s1587_s0 + $0x1b4] ss:$8 sps:$4 sm:$0xff]   ;;  %v1084_v2 = vld [vmem:[%s1587_s0 + $0x1c4] ss:$8 sps:$4 sm:$0xff]   ;;  %v1086_v3 = vld [vmem:[%s1587_s0 + $0xc0] ss:$8 sps:$4 sm:$0xff]  }
  0x17   :  { %536 = vmatprep.subr.bf16.mxu0 %v1106_v0  ;;  %967 = vmatprep.subr.bf16.mxu1 %v1106_v0  ;;  %v1087_v4 = vld [vmem:[%s1587_s0 + $0x1c0] ss:$8 sps:$4 sm:$0xff]   ;;  %v1088_v5 = vld [vmem:[%s1587_s0 + $0xd4] ss:$8 sps:$4 sm:$0xff]   ;;  %v1092_v7 = vld [vmem:[%s1587_s0 + $0xd0] ss:$8 sps:$4 sm:$0xff]  }
  0x18   :  { %v1090_v6 = vld [vmem:[%s1587_s0 + $0x1d4] ss:$8 sps:$4 sm:$0xff]   ;;  %v1093_v8 = vld [vmem:[%s1587_s0 + $0x1d0] ss:$8 sps:$4 sm:$0xff]  }
  0x1a   :  { %537 = vmatpush1.bf16.msra.mxu0 %v1000_v9  ;;  %983 = vmatpush1.bf16.msra.mxu1 %v1000_v9  ;;  %v1094_v9 = vld [vmem:[%s1587_s0 + $0xe4] ss:$8 sps:$4 sm:$0xff]  }
  0x1b   :  { %538 = vmatprep.subr.bf16.mxu0 %v1106_v0  ;;  %968 = vmatprep.subr.bf16.mxu1 %v1106_v0 }
  0x1e   :  { %539 = vmatpush1.bf16.msra.mxu0 %v1001_v10  ;;  %984 = vmatpush1.bf16.msra.mxu1 %v1001_v10  ;;  %v1096_v10 = vld [vmem:[%s1587_s0 + $0x1e4] ss:$8 sps:$4 sm:$0xff]  }
  0x1f   :  { %540 = vmatprep.subr.bf16.mxu0 %v1106_v0  ;;  %969 = vmatprep.subr.bf16.mxu1 %v1106_v0 }
  0x22   :  { %541 = vmatpush1.bf16.msra.mxu0 %v1002_v11  ;;  %985 = vmatpush1.bf16.msra.mxu1 %v1002_v11  ;;  %v1098_v11 = vld [vmem:[%s1587_s0 + $0xe0] ss:$8 sps:$4 sm:$0xff]  }
  0x23   :  { %542 = vmatprep.subr.bf16.mxu0 %v1106_v0  ;;  %970 = vmatprep.subr.bf16.mxu1 %v1106_v0 }
  0x26   :  { %543 = vmatpush1.bf16.msra.mxu0 %v1003_v12  ;;  %986 = vmatpush1.bf16.msra.mxu1 %v1003_v12  ;;  %v1099_v12 = vld [vmem:[%s1587_s0 + $0x1e0] ss:$8 sps:$4 sm:$0xff]  }
  0x27   :  { %544 = vmatprep.subr.bf16.mxu0 %v1106_v0  ;;  %971 = vmatprep.subr.bf16.mxu1 %v1106_v0 }
  0x2a   :  { %545 = vmatpush1.bf16.msra.mxu0 %v1004_v13  ;;  %987 = vmatpush1.bf16.msra.mxu1 %v1004_v13  ;;  %v1100_v13 = vld [vmem:[%s1587_s0 + $0xf4] ss:$8 sps:$4 sm:$0xff]  }
  0x2b   :  { %546 = vmatprep.subr.bf16.mxu0 %v1106_v0  ;;  %972 = vmatprep.subr.bf16.mxu1 %v1106_v0 }
  0x2e   :  { %547 = vmatpush1.bf16.msra.mxu0 %v1005_v14  ;;  %988 = vmatpush1.bf16.msra.mxu1 %v1005_v14  ;;  %v1102_v14 = vld [vmem:[%s1587_s0 + $0x1f4] ss:$8 sps:$4 sm:$0xff]  }
  0x2f   :  { %548 = vmatprep.subr.bf16.mxu0 %v1106_v0  ;;  %973 = vmatprep.subr.bf16.mxu1 %v1106_v0 }
  0x32   :  { %549 = vmatpush1.bf16.msra.mxu0 %v1006_v15  ;;  %989 = vmatpush1.bf16.msra.mxu1 %v1006_v15  ;;  %v1104_v15 = vld [vmem:[%s1587_s0 + $0xf0] ss:$8 sps:$4 sm:$0xff]  }
  0x33   :  { %550 = vmatprep.subr.bf16.mxu0 %v1106_v0  ;;  %974 = vmatprep.subr.bf16.mxu1 %v1106_v0 }
  0x36   :  { %551 = vmatpush1.bf16.msra.mxu0 %v1007_v16  ;;  %990 = vmatpush1.bf16.msra.mxu1 %v1007_v16  ;;  %v1105_v16 = vld [vmem:[%s1587_s0 + $0x1f0] ss:$8 sps:$4 sm:$0xff]  }
  0x37   :  { %552 = vmatprep.subr.bf16.mxu0 %v1106_v0  ;;  %975 = vmatprep.subr.bf16.mxu1 %v1106_v0 }
  0x3a   :  { %553 = vmatpush1.bf16.msra.mxu0 %v1008_v17  ;;  %991 = vmatpush1.bf16.msra.mxu1 %v1008_v17 }
  0x3b   :  { %554 = vmatprep.subr.bf16.mxu0 %v1106_v0  ;;  %976 = vmatprep.subr.bf16.mxu1 %v1106_v0  ;;  %v1081_v0 = vld [vmem:[%s1587_s0 + $0x1b0] ss:$8 sps:$4 sm:$0xff]  }
  0x3e   :  { %555 = vmatpush1.bf16.msra.mxu0 %v1009_v18  ;;  %992 = vmatpush1.bf16.msra.mxu1 %v1009_v18 }
  0x41   :  { %557 = vmatmul.mubr.bf16.vlgmr.msra.gmra.mrb[0].mxu0 %v1010_v19  ;;  %685 = vmatmul.mubr.bf16.vlgmr.msra.gmra.mrb[0].mxu1 %v1013_v20 }
  0x42   :  { %564 = vmatprep.mubr.bf16.mxu0 %v1016_v21  ;;  %692 = vmatprep.mubr.bf16.mxu1 %v1018_v22 }
  0x49   :  { %565 = vmatmul.mubr.bf16.gmra.mrb[4].mxu0 %v1020_v23  ;;  %693 = vmatmul.mubr.bf16.gmra.mrb[4].mxu1 %v1021_v24 }
  0x4a   :  { %572 = vmatprep.mubr.bf16.mxu0 %v1022_v25  ;;  %700 = vmatprep.mubr.bf16.mxu1 %v1024_v26 }
  0x51   :  { %573 = vmatmul.mubr.bf16.gmra.mrb[8].mxu0 %v1026_v27  ;;  %701 = vmatmul.mubr.bf16.gmra.mrb[8].mxu1 %v1027_v28 }
  0x52   :  { %580 = vmatprep.mubr.bf16.mxu0 %v1028_v29  ;;  %708 = vmatprep.mubr.bf16.mxu1 %v1030_v30 }
  0x59   :  { %581 = vmatmul.mubr.bf16.gmra.mrb[12].mxu0 %v1032_v31  ;;  %709 = vmatmul.mubr.bf16.gmra.mrb[12].mxu1 %v1033_v32 }
  0x5a   :  { %588 = vmatprep.mubr.bf16.mxu0 %v1034_v33  ;;  %716 = vmatprep.mubr.bf16.mxu1 %v1036_v34 }
  0x61   :  { %589 = vmatmul.mubr.bf16.gmra.mrb[16].mxu0 %v1038_v35  ;;  %717 = vmatmul.mubr.bf16.gmra.mrb[16].mxu1 %v1039_v36 }
  0x62   :  { %596 = vmatprep.mubr.bf16.mxu0 %v1040_v37  ;;  %724 = vmatprep.mubr.bf16.mxu1 %v1042_v38 }
  0x69   :  { %597 = vmatmul.mubr.bf16.gmra.mrb[20].mxu0 %v1044_v39  ;;  %725 = vmatmul.mubr.bf16.gmra.mrb[20].mxu1 %v1045_v40 }
  0x6a   :  { %604 = vmatprep.mubr.bf16.mxu0 %v1046_v41  ;;  %732 = vmatprep.mubr.bf16.mxu1 %v1048_v42 }
  0x71   :  { %605 = vmatmul.mubr.bf16.gmra.mrb[24].mxu0 %v1050_v43  ;;  %733 = vmatmul.mubr.bf16.gmra.mrb[24].mxu1 %v1051_v44 }
  0x72   :  { %612 = vmatprep.mubr.bf16.mxu0 %v1052_v45  ;;  %740 = vmatprep.mubr.bf16.mxu1 %v1054_v46 }
  0x79   :  { %613 = vmatmul.mubr.bf16.gmra.mrb[28].mxu0 %v1056_v47  ;;  %741 = vmatmul.mubr.bf16.gmra.mrb[28].mxu1 %v1057_v48 }
  0x7a   :  { %620 = vmatprep.mubr.bf16.mxu0 %v1058_v49  ;;  %748 = vmatprep.mubr.bf16.mxu1 %v1060_v50 }
  0x81   :  { %621 = vmatmul.mubr.bf16.gmra.mrb[32].mxu0 %v1062_v51  ;;  %749 = vmatmul.mubr.bf16.gmra.mrb[32].mxu1 %v1063_v52 }
  0x82   :  { %628 = vmatprep.mubr.bf16.mxu0 %v1064_v53  ;;  %756 = vmatprep.mubr.bf16.mxu1 %v1066_v54 }
  0x89   :  { %629 = vmatmul.mubr.bf16.gmra.mrb[36].mxu0 %v1068_v55  ;;  %757 = vmatmul.mubr.bf16.gmra.mrb[36].mxu1 %v1069_v56 }
  0x8a   :  { %636 = vmatprep.mubr.bf16.mxu0 %v1070_v57  ;;  %764 = vmatprep.mubr.bf16.mxu1 %v1072_v58 }
  0x91   :  { %637 = vmatmul.mubr.bf16.gmra.mrb[40].mxu0 %v1074_v59  ;;  %765 = vmatmul.mubr.bf16.gmra.mrb[40].mxu1 %v1075_v60 }
  0x92   :  { %644 = vmatprep.mubr.bf16.mxu0 %v1076_v61  ;;  %772 = vmatprep.mubr.bf16.mxu1 %v1078_v62 }
  0x99   :  { %645 = vmatmul.mubr.bf16.gmra.mrb[44].mxu0 %v1080_v63  ;;  %773 = vmatmul.mubr.bf16.gmra.mrb[44].mxu1 %v1081_v0 }
  0x9a   :  { %652 = vmatprep.mubr.bf16.mxu0 %v1082_v1  ;;  %780 = vmatprep.mubr.bf16.mxu1 %v1084_v2 }
  0xa1   :  { %653 = vmatmul.mubr.bf16.gmra.mrb[48].mxu0 %v1086_v3  ;;  %781 = vmatmul.mubr.bf16.gmra.mrb[48].mxu1 %v1087_v4 }
  0xa2   :  { %660 = vmatprep.mubr.bf16.mxu0 %v1088_v5  ;;  %788 = vmatprep.mubr.bf16.mxu1 %v1090_v6 }
  0xa9   :  { %661 = vmatmul.mubr.bf16.gmra.mrb[52].mxu0 %v1092_v7  ;;  %789 = vmatmul.mubr.bf16.gmra.mrb[52].mxu1 %v1093_v8 }
  0xaa   :  { %668 = vmatprep.mubr.bf16.mxu0 %v1094_v9  ;;  %796 = vmatprep.mubr.bf16.mxu1 %v1096_v10 }
  0xb1   :  { %669 = vmatmul.mubr.bf16.gmra.mrb[56].mxu0 %v1098_v11  ;;  %797 = vmatmul.mubr.bf16.gmra.mrb[56].mxu1 %v1099_v12 }
  0xb2   :  { %676 = vmatprep.mubr.bf16.mxu0 %v1100_v13  ;;  %804 = vmatprep.mubr.bf16.mxu1 %v1102_v14 }
  0xb9   :  { %677 = vmatmul.mubr.bf16.gmra.mrb[60].mxu0 %v1104_v15  ;;  %805 = vmatmul.mubr.bf16.gmra.mrb[60].mxu1 %v1105_v16 }
 0x114   :  { %v558_v17 = vpop.f32.mrb[0].mxu0  ;;  %v686_v18 = vpop.f32.mrb[0].mxu1 }
 0x115   :  { %813 = vst [vmem:[%s1588_s2] sm:$0xff] %v558_v17  ;;  %845 = vst [vmem:[%s1588_s2 + $0x100] sm:$0xff] %v686_v18  ;;  %v560_v19 = vpop.f32.mrb[1].mxu0  ;;  %v688_v20 = vpop.f32.mrb[1].mxu1 }
 0x116   :  { %v561_v21 = vpop.f32.mrb[2].mxu0  ;;  %v689_v22 = vpop.f32.mrb[2].mxu1 }
 0x117   :  { %814 = vst [vmem:[%s1588_s2 + $0x8] sm:$0xff] %v561_v21  ;;  %846 = vst [vmem:[%s1588_s2 + $0x108] sm:$0xff] %v689_v22  ;;  %v563_v23 = vpop.f32.mrb[3].mxu0  ;;  %v691_v24 = vpop.f32.mrb[3].mxu1 }
 0x11c   :  { %v566_v25 = vpop.f32.mrb[4].mxu0  ;;  %v694_v26 = vpop.f32.mrb[4].mxu1 }
 0x11d   :  { %815 = vst [vmem:[%s1588_s2 + $0x10] sm:$0xff] %v566_v25  ;;  %847 = vst [vmem:[%s1588_s2 + $0x110] sm:$0xff] %v694_v26  ;;  %v568_v27 = vpop.f32.mrb[5].mxu0  ;;  %v696_v28 = vpop.f32.mrb[5].mxu1 }
 0x11e   :  { %v569_v29 = vpop.f32.mrb[6].mxu0  ;;  %v697_v30 = vpop.f32.mrb[6].mxu1 }
 0x11f   :  { %816 = vst [vmem:[%s1588_s2 + $0x18] sm:$0xff] %v569_v29  ;;  %848 = vst [vmem:[%s1588_s2 + $0x118] sm:$0xff] %v697_v30  ;;  %v571_v31 = vpop.f32.mrb[7].mxu0  ;;  %v699_v32 = vpop.f32.mrb[7].mxu1 }
 0x124   :  { %v574_v33 = vpop.f32.mrb[8].mxu0  ;;  %v702_v34 = vpop.f32.mrb[8].mxu1 }
 0x125   :  { %817 = vst [vmem:[%s1588_s2 + $0x20] sm:$0xff] %v574_v33  ;;  %849 = vst [vmem:[%s1588_s2 + $0x120] sm:$0xff] %v702_v34  ;;  %v576_v35 = vpop.f32.mrb[9].mxu0  ;;  %v704_v36 = vpop.f32.mrb[9].mxu1 }
 0x126   :  { %v577_v37 = vpop.f32.mrb[10].mxu0  ;;  %v705_v38 = vpop.f32.mrb[10].mxu1 }
 0x127   :  { %818 = vst [vmem:[%s1588_s2 + $0x28] sm:$0xff] %v577_v37  ;;  %850 = vst [vmem:[%s1588_s2 + $0x128] sm:$0xff] %v705_v38  ;;  %v579_v39 = vpop.f32.mrb[11].mxu0  ;;  %v707_v40 = vpop.f32.mrb[11].mxu1 }
 0x12c   :  { %v582_v41 = vpop.f32.mrb[12].mxu0  ;;  %v710_v42 = vpop.f32.mrb[12].mxu1 }
 0x12d   :  { %819 = vst [vmem:[%s1588_s2 + $0x30] sm:$0xff] %v582_v41  ;;  %851 = vst [vmem:[%s1588_s2 + $0x130] sm:$0xff] %v710_v42  ;;  %v584_v43 = vpop.f32.mrb[13].mxu0  ;;  %v712_v44 = vpop.f32.mrb[13].mxu1 }
 0x12e   :  { %v585_v45 = vpop.f32.mrb[14].mxu0  ;;  %v713_v46 = vpop.f32.mrb[14].mxu1 }
 0x12f   :  { %820 = vst [vmem:[%s1588_s2 + $0x38] sm:$0xff] %v585_v45  ;;  %852 = vst [vmem:[%s1588_s2 + $0x138] sm:$0xff] %v713_v46  ;;  %v587_v47 = vpop.f32.mrb[15].mxu0  ;;  %v715_v48 = vpop.f32.mrb[15].mxu1 }
 0x134   :  { %v590_v49 = vpop.f32.mrb[16].mxu0  ;;  %v718_v50 = vpop.f32.mrb[16].mxu1 }
 0x135   :  { %821 = vst [vmem:[%s1588_s2 + $0x40] sm:$0xff] %v590_v49  ;;  %853 = vst [vmem:[%s1588_s2 + $0x140] sm:$0xff] %v718_v50  ;;  %v592_v51 = vpop.f32.mrb[17].mxu0  ;;  %v720_v52 = vpop.f32.mrb[17].mxu1 }
 0x136   :  { %v593_v53 = vpop.f32.mrb[18].mxu0  ;;  %v721_v54 = vpop.f32.mrb[18].mxu1 }
 0x137   :  { %822 = vst [vmem:[%s1588_s2 + $0x48] sm:$0xff] %v593_v53  ;;  %854 = vst [vmem:[%s1588_s2 + $0x148] sm:$0xff] %v721_v54  ;;  %v595_v55 = vpop.f32.mrb[19].mxu0  ;;  %v723_v56 = vpop.f32.mrb[19].mxu1 }
 0x13c   :  { %v598_v57 = vpop.f32.mrb[20].mxu0  ;;  %v726_v58 = vpop.f32.mrb[20].mxu1 }
 0x13d   :  { %823 = vst [vmem:[%s1588_s2 + $0x50] sm:$0xff] %v598_v57  ;;  %855 = vst [vmem:[%s1588_s2 + $0x150] sm:$0xff] %v726_v58  ;;  %v600_v59 = vpop.f32.mrb[21].mxu0  ;;  %v728_v60 = vpop.f32.mrb[21].mxu1 }
 0x13e   :  { %v601_v61 = vpop.f32.mrb[22].mxu0  ;;  %v729_v62 = vpop.f32.mrb[22].mxu1 }
 0x13f   :  { %824 = vst [vmem:[%s1588_s2 + $0x58] sm:$0xff] %v601_v61  ;;  %856 = vst [vmem:[%s1588_s2 + $0x158] sm:$0xff] %v729_v62  ;;  %v603_v63 = vpop.f32.mrb[23].mxu0  ;;  %v731_v0 = vpop.f32.mrb[23].mxu1 }
 0x144   :  { %v606_v1 = vpop.f32.mrb[24].mxu0  ;;  %v734_v2 = vpop.f32.mrb[24].mxu1 }
 0x145   :  { %825 = vst [vmem:[%s1588_s2 + $0x60] sm:$0xff] %v606_v1  ;;  %857 = vst [vmem:[%s1588_s2 + $0x160] sm:$0xff] %v734_v2  ;;  %v608_v3 = vpop.f32.mrb[25].mxu0  ;;  %v736_v4 = vpop.f32.mrb[25].mxu1 }
 0x146   :  { %v609_v5 = vpop.f32.mrb[26].mxu0  ;;  %v737_v6 = vpop.f32.mrb[26].mxu1 }
 0x147   :  { %826 = vst [vmem:[%s1588_s2 + $0x68] sm:$0xff] %v609_v5  ;;  %858 = vst [vmem:[%s1588_s2 + $0x168] sm:$0xff] %v737_v6  ;;  %v611_v7 = vpop.f32.mrb[27].mxu0  ;;  %v739_v8 = vpop.f32.mrb[27].mxu1 }
 0x14c   :  { %v614_v9 = vpop.f32.mrb[28].mxu0  ;;  %v742_v10 = vpop.f32.mrb[28].mxu1 }
 0x14d   :  { %827 = vst [vmem:[%s1588_s2 + $0x70] sm:$0xff] %v614_v9  ;;  %859 = vst [vmem:[%s1588_s2 + $0x170] sm:$0xff] %v742_v10  ;;  %v616_v11 = vpop.f32.mrb[29].mxu0  ;;  %v744_v12 = vpop.f32.mrb[29].mxu1 }
 0x14e   :  { %v617_v13 = vpop.f32.mrb[30].mxu0  ;;  %v745_v14 = vpop.f32.mrb[30].mxu1 }
 0x14f   :  { %828 = vst [vmem:[%s1588_s2 + $0x78] sm:$0xff] %v617_v13  ;;  %860 = vst [vmem:[%s1588_s2 + $0x178] sm:$0xff] %v745_v14  ;;  %v619_v15 = vpop.f32.mrb[31].mxu0  ;;  %v747_v16 = vpop.f32.mrb[31].mxu1 }
 0x154   :  { %v622_v17 = vpop.f32.mrb[32].mxu0  ;;  %v750_v18 = vpop.f32.mrb[32].mxu1 }
 0x155   :  { %829 = vst [vmem:[%s1588_s2 + $0x80] sm:$0xff] %v622_v17  ;;  %861 = vst [vmem:[%s1588_s2 + $0x180] sm:$0xff] %v750_v18  ;;  %v624_v19 = vpop.f32.mrb[33].mxu0  ;;  %v752_v20 = vpop.f32.mrb[33].mxu1 }
 0x156   :  { %v625_v21 = vpop.f32.mrb[34].mxu0  ;;  %v753_v22 = vpop.f32.mrb[34].mxu1 }
 0x157   :  { %830 = vst [vmem:[%s1588_s2 + $0x88] sm:$0xff] %v625_v21  ;;  %862 = vst [vmem:[%s1588_s2 + $0x188] sm:$0xff] %v753_v22  ;;  %v627_v23 = vpop.f32.mrb[35].mxu0  ;;  %v755_v24 = vpop.f32.mrb[35].mxu1 }
 0x15c   :  { %v630_v25 = vpop.f32.mrb[36].mxu0  ;;  %v758_v26 = vpop.f32.mrb[36].mxu1 }
 0x15d   :  { %831 = vst [vmem:[%s1588_s2 + $0x90] sm:$0xff] %v630_v25  ;;  %863 = vst [vmem:[%s1588_s2 + $0x190] sm:$0xff] %v758_v26  ;;  %v632_v27 = vpop.f32.mrb[37].mxu0  ;;  %v760_v28 = vpop.f32.mrb[37].mxu1 }
 0x15e   :  { %v633_v29 = vpop.f32.mrb[38].mxu0  ;;  %v761_v30 = vpop.f32.mrb[38].mxu1 }
 0x15f   :  { %832 = vst [vmem:[%s1588_s2 + $0x98] sm:$0xff] %v633_v29  ;;  %864 = vst [vmem:[%s1588_s2 + $0x198] sm:$0xff] %v761_v30  ;;  %v635_v31 = vpop.f32.mrb[39].mxu0  ;;  %v763_v32 = vpop.f32.mrb[39].mxu1 }
 0x164   :  { %v638_v33 = vpop.f32.mrb[40].mxu0  ;;  %v766_v34 = vpop.f32.mrb[40].mxu1 }
 0x165   :  { %833 = vst [vmem:[%s1588_s2 + $0xa0] sm:$0xff] %v638_v33  ;;  %865 = vst [vmem:[%s1588_s2 + $0x1a0] sm:$0xff] %v766_v34  ;;  %v640_v35 = vpop.f32.mrb[41].mxu0  ;;  %v768_v36 = vpop.f32.mrb[41].mxu1 }
 0x166   :  { %v641_v37 = vpop.f32.mrb[42].mxu0  ;;  %v769_v38 = vpop.f32.mrb[42].mxu1 }
 0x167   :  { %834 = vst [vmem:[%s1588_s2 + $0xa8] sm:$0xff] %v641_v37  ;;  %866 = vst [vmem:[%s1588_s2 + $0x1a8] sm:$0xff] %v769_v38  ;;  %v643_v39 = vpop.f32.mrb[43].mxu0  ;;  %v771_v40 = vpop.f32.mrb[43].mxu1 }
 0x16c   :  { %v646_v41 = vpop.f32.mrb[44].mxu0  ;;  %v774_v42 = vpop.f32.mrb[44].mxu1 }
 0x16d   :  { %835 = vst [vmem:[%s1588_s2 + $0xb0] sm:$0xff] %v646_v41  ;;  %867 = vst [vmem:[%s1588_s2 + $0x1b0] sm:$0xff] %v774_v42  ;;  %v648_v43 = vpop.f32.mrb[45].mxu0  ;;  %v776_v44 = vpop.f32.mrb[45].mxu1 }
 0x16e   :  { %v649_v45 = vpop.f32.mrb[46].mxu0  ;;  %v777_v46 = vpop.f32.mrb[46].mxu1 }
 0x16f   :  { %836 = vst [vmem:[%s1588_s2 + $0xb8] sm:$0xff] %v649_v45  ;;  %868 = vst [vmem:[%s1588_s2 + $0x1b8] sm:$0xff] %v777_v46  ;;  %v651_v47 = vpop.f32.mrb[47].mxu0  ;;  %v779_v48 = vpop.f32.mrb[47].mxu1 }
 0x174   :  { %v654_v49 = vpop.f32.mrb[48].mxu0  ;;  %v782_v50 = vpop.f32.mrb[48].mxu1 }
 0x175   :  { %837 = vst [vmem:[%s1588_s2 + $0xc0] sm:$0xff] %v654_v49  ;;  %869 = vst [vmem:[%s1588_s2 + $0x1c0] sm:$0xff] %v782_v50  ;;  %v656_v51 = vpop.f32.mrb[49].mxu0  ;;  %v784_v52 = vpop.f32.mrb[49].mxu1 }
 0x176   :  { %v657_v53 = vpop.f32.mrb[50].mxu0  ;;  %v785_v54 = vpop.f32.mrb[50].mxu1 }
 0x177   :  { %838 = vst [vmem:[%s1588_s2 + $0xc8] sm:$0xff] %v657_v53  ;;  %870 = vst [vmem:[%s1588_s2 + $0x1c8] sm:$0xff] %v785_v54  ;;  %v659_v55 = vpop.f32.mrb[51].mxu0  ;;  %v787_v56 = vpop.f32.mrb[51].mxu1 }
 0x17c   :  { %v662_v57 = vpop.f32.mrb[52].mxu0  ;;  %v790_v58 = vpop.f32.mrb[52].mxu1 }
 0x17d   :  { %839 = vst [vmem:[%s1588_s2 + $0xd0] sm:$0xff] %v662_v57  ;;  %871 = vst [vmem:[%s1588_s2 + $0x1d0] sm:$0xff] %v790_v58  ;;  %v664_v59 = vpop.f32.mrb[53].mxu0  ;;  %v792_v60 = vpop.f32.mrb[53].mxu1 }
 0x17e   :  { %v665_v61 = vpop.f32.mrb[54].mxu0  ;;  %v793_v62 = vpop.f32.mrb[54].mxu1 }
 0x17f   :  { %840 = vst [vmem:[%s1588_s2 + $0xd8] sm:$0xff] %v665_v61  ;;  %872 = vst [vmem:[%s1588_s2 + $0x1d8] sm:$0xff] %v793_v62  ;;  %v667_v63 = vpop.f32.mrb[55].mxu0  ;;  %v795_v0 = vpop.f32.mrb[55].mxu1 }
 0x184   :  { %v670_v1 = vpop.f32.mrb[56].mxu0  ;;  %v798_v2 = vpop.f32.mrb[56].mxu1 }
 0x185   :  { %841 = vst [vmem:[%s1588_s2 + $0xe0] sm:$0xff] %v670_v1  ;;  %873 = vst [vmem:[%s1588_s2 + $0x1e0] sm:$0xff] %v798_v2  ;;  %v672_v3 = vpop.f32.mrb[57].mxu0  ;;  %v800_v4 = vpop.f32.mrb[57].mxu1 }
 0x186   :  { %v673_v5 = vpop.f32.mrb[58].mxu0  ;;  %v801_v6 = vpop.f32.mrb[58].mxu1 }
 0x187   :  { %842 = vst [vmem:[%s1588_s2 + $0xe8] sm:$0xff] %v673_v5  ;;  %874 = vst [vmem:[%s1588_s2 + $0x1e8] sm:$0xff] %v801_v6  ;;  %v675_v7 = vpop.f32.mrb[59].mxu0  ;;  %v803_v8 = vpop.f32.mrb[59].mxu1 }
 0x18c   :  { %v678_v9 = vpop.f32.mrb[60].mxu0  ;;  %v806_v10 = vpop.f32.mrb[60].mxu1 }
 0x18d   :  { %843 = vst [vmem:[%s1588_s2 + $0xf0] sm:$0xff] %v678_v9  ;;  %875 = vst [vmem:[%s1588_s2 + $0x1f0] sm:$0xff] %v806_v10  ;;  %v680_v11 = vpop.f32.mrb[61].mxu0  ;;  %v808_v12 = vpop.f32.mrb[61].mxu1 }
 0x18e   :  { %v681_v13 = vpop.f32.mrb[62].mxu0  ;;  %v809_v14 = vpop.f32.mrb[62].mxu1 }
 0x18f   :  { %844 = vst [vmem:[%s1588_s2 + $0xf8] sm:$0xff] %v681_v13  ;;  %876 = vst [vmem:[%s1588_s2 + $0x1f8] sm:$0xff] %v809_v14  ;;  %v683_v15 = vpop.f32.mrb[63].mxu0  ;;  %v811_v16 = vpop.f32.mrb[63].mxu1 }

// kernel: stylization_forward.52
= control target key start
LH: loop header
LB: loop body
LE: loop exit
PB: predicated region body
PF: predicated region fallthrough
CT: control target
= control target key end

     0   :  { %s334_s6 = smov 0   ;;  %s336_s7 = smov 0   ;;  %s374_s0 = inlined_call_operand.vmem [shape: f32[2,64,128], index: 0, kind: input, shape index: {}]   ;;  %s375_s1 = inlined_call_operand.vmem [shape: f32[2,8,128], index: 1, kind: output, shape index: {}]  }
   0x1   :  { %s338_s8 = smov 0  }
   0x2 LB: > { %s23_s9 = sadd.s32 1, %s317_s7  ;;  %p267_p0 = scmp.ge.s32.totalorder %s321_s8, 1  ;;  %s321_s8 = sphi %s338_s8, %s11_s8   ;;  %s317_s7 = sphi %s336_s7, %s377_s7   ;;  %s313_s6 = sphi %s334_s6, %s376_s6  }
   0x3   : > { %p25_p1 = scmp.ge.s32.totalorder %s23_s9, 2  ;;  %p106_p2 = scmp.lt.s32.totalorder %s321_s8, 3 }
   0x5   : > { %s379_s9 = smov (%p25_p1, %s23_s9), 0  ;;  %p107_p3 = pnand %p267_p0, %p106_p2 }
   0x6   : > { %p130_p4 = scmp.lt.s32.totalorder (!%p107_p3), %s313_s6, 1  ;;  %v323_v0 = vmov (!%p107_p3), 0.0  }
   0x7   : > { %110 = sbr.rel (%p107_p3) target bundleno = 49 (0x31), region = 24 }
   0xe   : > { %s381_s6 = smov (!%p130_p4, %s313_s6), 1 }
   0xf   : > { %s273_s10 = sshll.u32 %s381_s6, 6  ;;  %s270_s11 = sshll.u32 %s381_s6, 3 }
  0x10   : > { %s137_s14 = scalar_lea.vmem %s374_s0, %s273_s10  ;;  %s358_s17 = scalar_lea.vmem %s375_s1, %s270_s11 }
  0x11   : > { %147 = vst [vmem:[%s358_s17] sm:$0xff] %v323_v0  ;;  %v148_v1 = vld [vmem:[%s137_s14] sm:$0xff]  ;;  %v149_v2 = vld [vmem:[%s137_s14 + $0x8] sm:$0xff]  ;;  %v150_v3 = vld [vmem:[%s137_s14 + $0x10] sm:$0xff] }
  0x12   : > { %v151_v4 = vld [vmem:[%s137_s14 + $0x18] sm:$0xff]  ;;  %v157_v5 = vadd.f32 %v149_v2, %v148_v1  ;;  %v173_v6 = vmul.f32 %v148_v1, %v148_v1  ;;  %v174_v7 = vmul.f32 %v149_v2, %v149_v2  ;;  %v175_v8 = vmul.f32 %v150_v3, %v150_v3  ;;  %v152_v9 = vld [vmem:[%s137_s14 + $0x20] sm:$0xff]  ;;  %v153_v13 = vld [vmem:[%s137_s14 + $0x28] sm:$0xff] }
  0x13   : > { %v176_v11 = vmul.f32 %v151_v4, %v151_v4  ;;  %v177_v15 = vmul.f32 %v152_v9, %v152_v9  ;;  %v154_v17 = vld [vmem:[%s137_s14 + $0x30] sm:$0xff]  ;;  %v178_v19 = vmul.f32 %v153_v13, %v153_v13  ;;  %v155_v21 = vld [vmem:[%s137_s14 + $0x38] sm:$0xff] }
  0x14   : > { %v158_v10 = vadd.f32 %v157_v5, %v150_v3  ;;  %v181_v12 = vadd.f32 %v174_v7, %v173_v6  ;;  %v179_v23 = vmul.f32 %v154_v17, %v154_v17  ;;  %v180_v26 = vmul.f32 %v155_v21, %v155_v21 }
  0x16   : > { %v159_v14 = vadd.f32 %v158_v10, %v151_v4  ;;  %v182_v16 = vadd.f32 %v181_v12, %v175_v8 }
  0x18   : > { %v160_v18 = vadd.f32 %v159_v14, %v152_v9  ;;  %v183_v20 = vadd.f32 %v182_v16, %v176_v11  ;;  %v156_v40 = vld [vmem:[%s358_s17] sm:$0x1]  ;;  %v172_v43 = vld [vmem:[%s358_s17 + $0x1] sm:$0x1] }
  0x1a   : > { %v161_v22 = vadd.f32 %v160_v18, %v153_v13  ;;  %v184_v24 = vadd.f32 %v183_v20, %v177_v15 }
  0x1c   : > { %v162_v25 = vadd.f32 %v161_v22, %v154_v17  ;;  %v185_v27 = vadd.f32 %v184_v24, %v178_v19 }
  0x1e   : > { %v163_v28 = vadd.f32 %v162_v25, %v155_v21  ;;  %v186_v29 = vadd.f32 %v185_v27, %v179_v23 }
  0x20   : > { %v164_v30 = vrot.slane %v163_v28, 4  ;;  %v187_v31 = vadd.f32 %v186_v29, %v180_v26 }
  0x22   : > { %v165_v32 = vadd.f32 %v164_v30, %v163_v28  ;;  %v188_v33 = vrot.slane %v187_v31, 4 }
  0x24   : > { %v166_v34 = vrot.slane %v165_v32, 2  ;;  %v189_v35 = vadd.f32 %v188_v33, %v187_v31 }
  0x26   : > { %v167_v36 = vadd.f32 %v166_v34, %v165_v32  ;;  %v190_v37 = vrot.slane %v189_v35, 2 }
  0x28   : > { %v168_v38 = vrot.slane %v167_v36, 1  ;;  %v191_v39 = vadd.f32 %v190_v37, %v189_v35 }
  0x2a   : > { %v169_v41 = vadd.f32 %v168_v38, %v167_v36  ;;  %v192_v42 = vrot.slane %v191_v39, 1 }
  0x2c   : > { %v170_v44 = vadd.f32 %v169_v41, %v156_v40  ;;  %v193_v45 = vadd.f32 %v192_v42, %v191_v39 }
  0x2e   : > { %171 = vst [vmem:[%s358_s17] sm:$0x1] %v170_v44  ;;  %v194_v46 = vadd.f32 %v193_v45, %v172_v43 }
  0x30   : > { %195 = vst [vmem:[%s358_s17 + $0x1] sm:$0x1] %v194_v46 }
  0x31 PF: > { %s11_s8 = sadd.s32 1, %s321_s8   ;;  %s376_s6 = smov %s317_s7 }
  0x32   : > { %p8_p5 = scmp.ge.s32.totalorder %s11_s8, 4   ;;  %s377_s7 = smov %s379_s9 }
  0x34   :  { %10 = sbr.rel (!%p8_p5) target bundleno = 2 (0x2), region = 58 }

// kernel: stylization_forward.51
= control target key start
LH: loop header
LB: loop body
LE: loop exit
PB: predicated region body
PF: predicated region fallthrough
CT: control target
= control target key end

     0   :  { %s1001_s1 = inlined_call_operand.vmem [shape: bf16[384,128], index: 1, kind: input, shape index: {}]   ;;  %s1002_s0 = inlined_call_operand.vmem [shape: bf16[128,384], index: 0, kind: input, shape index: {}]   ;;  %s1003_s2 = inlined_call_operand.vmem [shape: f32[128,128], index: 2, kind: output, shape index: {}]  }
   0x1   :  { %v738_v0 = vld [vmem:[%s1001_s1 + $0x40] sm:$0xff]   ;;  %v741_v3 = vld [vmem:[%s1001_s1 + $0x48] sm:$0xff]   ;;  %v744_v6 = vld [vmem:[%s1001_s1 + $0x50] sm:$0xff]  }
   0x2   :  { %v739_v1 = vld [vmem:[%s1001_s1] sm:$0xff]   ;;  %626 = vmatprep.subr.bf16.mxu0 %v738_v0  ;;  %v742_v4 = vld [vmem:[%s1001_s1 + $0x8] sm:$0xff]   ;;  %v745_v7 = vld [vmem:[%s1001_s1 + $0x10] sm:$0xff]  }
   0x3   :  { %v740_v2 = vld [vmem:[%s1001_s1 + $0x80] sm:$0xff]   ;;  %627 = vmatpush3.bf16.msra.mxu0 %v739_v1  ;;  %v743_v5 = vld [vmem:[%s1001_s1 + $0x88] sm:$0xff]   ;;  %v746_v8 = vld [vmem:[%s1001_s1 + $0x90] sm:$0xff]  }
   0x4   :  { %706 = vmatprep.subr.bf16.mxu1 %v740_v2  ;;  %628 = vmatprep.subr.bf16.mxu0 %v741_v3  ;;  %v747_v9 = vld [vmem:[%s1001_s1 + $0x58] sm:$0xff]   ;;  %v750_v12 = vld [vmem:[%s1001_s1 + $0x60] sm:$0xff]   ;;  %v753_v15 = vld [vmem:[%s1001_s1 + $0x68] sm:$0xff]  }
   0x5   :  { %707 = vmatpush3.bf16.msra.mxu1 %v740_v2  ;;  %v748_v10 = vld [vmem:[%s1001_s1 + $0x18] sm:$0xff]   ;;  %v752_v13 = vld [vmem:[%s1001_s1 + $0xa0] sm:$0xff]   ;;  %v755_v16 = vld [vmem:[%s1001_s1 + $0xa8] sm:$0xff]  }
   0x6   :  { %708 = vmatprep.subr.bf16.mxu1 %v743_v5  ;;  %v749_v11 = vld [vmem:[%s1001_s1 + $0x98] sm:$0xff]   ;;  %v751_v14 = vld [vmem:[%s1001_s1 + $0x20] sm:$0xff]   ;;  %v754_v17 = vld [vmem:[%s1001_s1 + $0x28] sm:$0xff]  }
   0x7   :  { %629 = vmatpush3.bf16.msra.mxu0 %v742_v4  ;;  %v756_v18 = vld [vmem:[%s1001_s1 + $0x70] sm:$0xff]   ;;  %v759_v21 = vld [vmem:[%s1001_s1 + $0x78] sm:$0xff]   ;;  %v762_v26 = vld [vmem:[%s1002_s0] ss:$12 sps:$4 sm:$0xff]  }
   0x8   :  { %630 = vmatprep.subr.bf16.mxu0 %v744_v6  ;;  %v757_v19 = vld [vmem:[%s1001_s1 + $0x30] sm:$0xff]   ;;  %v761_v22 = vld [vmem:[%s1001_s1 + $0xb8] sm:$0xff]   ;;  %v766_v28 = vld [vmem:[%s1002_s0 + $0x20] ss:$12 sps:$4 sm:$0xff]  }
   0x9   :  { %709 = vmatpush3.bf16.msra.mxu1 %v743_v5  ;;  %v758_v20 = vld [vmem:[%s1001_s1 + $0xb0] sm:$0xff]   ;;  %v760_v25 = vld [vmem:[%s1001_s1 + $0x38] sm:$0xff]   ;;  %v782_v36 = vld [vmem:[%s1002_s0 + $0x80] ss:$12 sps:$4 sm:$0xff]  }
   0xa   :  { %710 = vmatprep.subr.bf16.mxu1 %v746_v8  ;;  %v764_v23 = vld [vmem:[%s1002_s0 + $0x4] ss:$12 sps:$4 sm:$0xff]   ;;  %v765_v24 = vld [vmem:[%s1002_s0 + $0x8] ss:$12 sps:$4 sm:$0xff]   ;;  %v775_v35 = vld [vmem:[%s1002_s0 + $0x4c] ss:$12 sps:$4 sm:$0xff]  }
   0xb   :  { %631 = vmatpush3.bf16.msra.mxu0 %v745_v7  ;;  %396 = vmatprep.mubr.bf16.mxu0 %v764_v23  ;;  %v767_v27 = vld [vmem:[%s1002_s0 + $0x1c] ss:$12 sps:$4 sm:$0xff]   ;;  %v773_v29 = vld [vmem:[%s1002_s0 + $0x38] ss:$12 sps:$4 sm:$0xff]   ;;  %v770_v31 = vld [vmem:[%s1002_s0 + $0x34] ss:$12 sps:$4 sm:$0xff]  }
   0xc   :  { %632 = vmatprep.subr.bf16.mxu0 %v747_v9  ;;  %722 = vmatprep.mubr.bf16.mxu1 %v765_v24  ;;  %v769_v30 = vld [vmem:[%s1002_s0 + $0x18] ss:$12 sps:$4 sm:$0xff]   ;;  %v774_v32 = vld [vmem:[%s1002_s0 + $0x50] ss:$12 sps:$4 sm:$0xff]   ;;  %v781_v33 = vld [vmem:[%s1002_s0 + $0x68] ss:$12 sps:$4 sm:$0xff]  }
   0xd   :  { %711 = vmatpush3.bf16.msra.mxu1 %v746_v8  ;;  %v772_v34 = vld [vmem:[%s1002_s0 + $0x30] ss:$12 sps:$4 sm:$0xff]   ;;  %v789_v37 = vld [vmem:[%s1002_s0 + $0x98] ss:$12 sps:$4 sm:$0xff]   ;;  %v777_v38 = vld [vmem:[%s1002_s0 + $0x48] ss:$12 sps:$4 sm:$0xff]  }
   0xe   :  { %712 = vmatprep.subr.bf16.mxu1 %v749_v11  ;;  %v778_v39 = vld [vmem:[%s1002_s0 + $0x64] ss:$12 sps:$4 sm:$0xff]   ;;  %v780_v41 = vld [vmem:[%s1002_s0 + $0x60] ss:$12 sps:$4 sm:$0xff]   ;;  %v783_v42 = vld [vmem:[%s1002_s0 + $0x7c] ss:$12 sps:$4 sm:$0xff]  }
   0xf   :  { %633 = vmatpush3.bf16.msra.mxu0 %v748_v10  ;;  %v790_v40 = vld [vmem:[%s1002_s0 + $0xb0] ss:$12 sps:$4 sm:$0xff]   ;;  %v785_v43 = vld [vmem:[%s1002_s0 + $0x78] ss:$12 sps:$4 sm:$0xff]   ;;  %v786_v44 = vld [vmem:[%s1002_s0 + $0x94] ss:$12 sps:$4 sm:$0xff]  }
  0x10   :  { %634 = vmatprep.subr.bf16.mxu0 %v750_v12  ;;  %v788_v45 = vld [vmem:[%s1002_s0 + $0x90] ss:$12 sps:$4 sm:$0xff]   ;;  %v791_v46 = vld [vmem:[%s1002_s0 + $0xac] ss:$12 sps:$4 sm:$0xff]   ;;  %v793_v47 = vld [vmem:[%s1002_s0 + $0xa8] ss:$12 sps:$4 sm:$0xff]  }
  0x11   :  { %713 = vmatpush3.bf16.msra.mxu1 %v749_v11 }
  0x12   :  { %714 = vmatprep.subr.bf16.mxu1 %v752_v13 }
  0x13   :  { %635 = vmatpush3.bf16.msra.mxu0 %v751_v14 }
  0x14   :  { %636 = vmatprep.subr.bf16.mxu0 %v753_v15 }
  0x15   :  { %715 = vmatpush3.bf16.msra.mxu1 %v752_v13 }
  0x16   :  { %716 = vmatprep.subr.bf16.mxu1 %v755_v16 }
  0x17   :  { %637 = vmatpush3.bf16.msra.mxu0 %v754_v17 }
  0x18   :  { %638 = vmatprep.subr.bf16.mxu0 %v756_v18 }
  0x19   :  { %717 = vmatpush3.bf16.msra.mxu1 %v755_v16 }
  0x1a   :  { %718 = vmatprep.subr.bf16.mxu1 %v758_v20 }
  0x1b   :  { %639 = vmatpush3.bf16.msra.mxu0 %v757_v19 }
  0x1c   :  { %640 = vmatprep.subr.bf16.mxu0 %v759_v21 }
  0x1d   :  { %719 = vmatpush3.bf16.msra.mxu1 %v758_v20 }
  0x1e   :  { %720 = vmatprep.subr.bf16.mxu1 %v761_v22 }
  0x1f   :  { %641 = vmatpush3.bf16.msra.mxu0 %v760_v25 }
  0x21   :  { %721 = vmatpush3.bf16.msra.mxu1 %v761_v22 }
  0x22   :  { %397 = vmatmul.mubr.bf16.vlgmr.msra.gmra.mrb[0].mxu0 %v762_v26 }
  0x23   :  { %404 = vmatprep.mubr.bf16.mxu0 %v767_v27 }
  0x24   :  { %723 = vmatmul.mubr.bf16.vlgmr.msra.gmra.mrb[0].mxu1 %v766_v28 }
  0x25   :  { %726 = vmatprep.mubr.bf16.mxu1 %v773_v29 }
  0x2a   :  { %405 = vmatmul.mubr.bf16.gmra.mrb[4].mxu0 %v769_v30 }
  0x2b   :  { %412 = vmatprep.mubr.bf16.mxu0 %v770_v31 }
  0x2c   :  { %727 = vmatmul.mubr.bf16.gmra.mrb[4].mxu1 %v774_v32 }
  0x2d   :  { %730 = vmatprep.mubr.bf16.mxu1 %v781_v33 }
  0x32   :  { %413 = vmatmul.mubr.bf16.gmra.mrb[8].mxu0 %v772_v34 }
  0x33   :  { %420 = vmatprep.mubr.bf16.mxu0 %v775_v35 }
  0x34   :  { %731 = vmatmul.mubr.bf16.gmra.mrb[8].mxu1 %v782_v36 }
  0x35   :  { %734 = vmatprep.mubr.bf16.mxu1 %v789_v37 }
  0x3a   :  { %421 = vmatmul.mubr.bf16.gmra.mrb[12].mxu0 %v777_v38 }
  0x3b   :  { %428 = vmatprep.mubr.bf16.mxu0 %v778_v39 }
  0x3c   :  { %735 = vmatmul.mubr.bf16.gmra.mrb[12].mxu1 %v790_v40 }
  0x42   :  { %429 = vmatmul.mubr.bf16.gmra.mrb[16].mxu0 %v780_v41 }
  0x43   :  { %436 = vmatprep.mubr.bf16.mxu0 %v783_v42 }
  0x4a   :  { %437 = vmatmul.mubr.bf16.gmra.mrb[20].mxu0 %v785_v43 }
  0x4b   :  { %444 = vmatprep.mubr.bf16.mxu0 %v786_v44 }
  0x52   :  { %445 = vmatmul.mubr.bf16.gmra.mrb[24].mxu0 %v788_v45 }
  0x53   :  { %452 = vmatprep.mubr.bf16.mxu0 %v791_v46 }
  0x5a   :  { %453 = vmatmul.mubr.bf16.gmra.mrb[28].mxu0 %v793_v47 }
  0xf5   :  { %v642_v48 = vpop.f32.mrb[0].mxu0 }
  0xf6   :  { %v643_v49 = vpop.f32.mrb[1].mxu0 }
  0xf7   :  { %v644_v50 = vadd.f32 %v643_v49, %v642_v48  ;;  %v645_v51 = vpop.f32.mrb[2].mxu0  ;;  %v724_v52 = vpop.f32.mrb[0].mxu1 }
  0xf8   :  { %v646_v53 = vpop.f32.mrb[3].mxu0  ;;  %v495_v54 = vpop.f32.mrb[1].mxu1 }
  0xf9   :  { %v647_v55 = vadd.f32 %v646_v53, %v645_v51  ;;  %v496_v56 = vadd.f32 %v644_v50, %v495_v54  ;;  %v725_v57 = vpop.f32.mrb[2].mxu1 }
  0xfa   :  { %v498_v58 = vpop.f32.mrb[3].mxu1 }
  0xfb   :  { %558 = vst [vmem:[%s1003_s2] sm:$0xff] %v496_v56  ;;  %v499_v59 = vadd.f32 %v647_v55, %v498_v58 }
  0xfd   :  { %559 = vst [vmem:[%s1003_s2 + $0x8] sm:$0xff] %v499_v59  ;;  %v648_v60 = vpop.f32.mrb[4].mxu0 }
  0xfe   :  { %v649_v61 = vpop.f32.mrb[5].mxu0 }
  0xff   :  { %v650_v62 = vadd.f32 %v649_v61, %v648_v60  ;;  %v651_v63 = vpop.f32.mrb[6].mxu0  ;;  %v728_v0 = vpop.f32.mrb[4].mxu1 }
 0x100   :  { %v652_v1 = vpop.f32.mrb[7].mxu0  ;;  %v511_v2 = vpop.f32.mrb[5].mxu1 }
 0x101   :  { %v504_v3 = vadd.f32 %v724_v52, %v650_v62  ;;  %v653_v4 = vadd.f32 %v652_v1, %v651_v63  ;;  %v729_v5 = vpop.f32.mrb[6].mxu1 }
 0x102   :  { %v514_v6 = vpop.f32.mrb[7].mxu1 }
 0x103   :  { %560 = vst [vmem:[%s1003_s2 + $0x10] sm:$0xff] %v504_v3  ;;  %v507_v7 = vadd.f32 %v725_v57, %v653_v4 }
 0x105   :  { %561 = vst [vmem:[%s1003_s2 + $0x18] sm:$0xff] %v507_v7  ;;  %v654_v8 = vpop.f32.mrb[8].mxu0 }
 0x106   :  { %v655_v9 = vpop.f32.mrb[9].mxu0 }
 0x107   :  { %v656_v10 = vadd.f32 %v655_v9, %v654_v8  ;;  %v657_v11 = vpop.f32.mrb[10].mxu0  ;;  %v732_v12 = vpop.f32.mrb[8].mxu1 }
 0x108   :  { %v658_v13 = vpop.f32.mrb[11].mxu0  ;;  %v527_v14 = vpop.f32.mrb[9].mxu1 }
 0x109   :  { %v659_v15 = vadd.f32 %v658_v13, %v657_v11  ;;  %v512_v16 = vadd.f32 %v656_v10, %v511_v2  ;;  %v733_v17 = vpop.f32.mrb[10].mxu1 }
 0x10a   :  { %v530_v18 = vpop.f32.mrb[11].mxu1 }
 0x10b   :  { %562 = vst [vmem:[%s1003_s2 + $0x20] sm:$0xff] %v512_v16  ;;  %v515_v19 = vadd.f32 %v659_v15, %v514_v6 }
 0x10d   :  { %563 = vst [vmem:[%s1003_s2 + $0x28] sm:$0xff] %v515_v19  ;;  %v660_v20 = vpop.f32.mrb[12].mxu0 }
 0x10e   :  { %v661_v21 = vpop.f32.mrb[13].mxu0 }
 0x10f   :  { %v662_v22 = vadd.f32 %v661_v21, %v660_v20  ;;  %v663_v23 = vpop.f32.mrb[14].mxu0  ;;  %v736_v24 = vpop.f32.mrb[12].mxu1 }
 0x110   :  { %v664_v25 = vpop.f32.mrb[15].mxu0  ;;  %v543_v26 = vpop.f32.mrb[13].mxu1 }
 0x111   :  { %v520_v27 = vadd.f32 %v728_v0, %v662_v22  ;;  %v665_v28 = vadd.f32 %v664_v25, %v663_v23  ;;  %v737_v29 = vpop.f32.mrb[14].mxu1 }
 0x112   :  { %v546_v30 = vpop.f32.mrb[15].mxu1 }
 0x113   :  { %564 = vst [vmem:[%s1003_s2 + $0x30] sm:$0xff] %v520_v27  ;;  %v523_v31 = vadd.f32 %v729_v5, %v665_v28 }
 0x115   :  { %565 = vst [vmem:[%s1003_s2 + $0x38] sm:$0xff] %v523_v31  ;;  %v666_v32 = vpop.f32.mrb[16].mxu0 }
 0x116   :  { %v667_v33 = vpop.f32.mrb[17].mxu0 }
 0x117   :  { %v668_v34 = vadd.f32 %v667_v33, %v666_v32  ;;  %v669_v35 = vpop.f32.mrb[18].mxu0 }
 0x118   :  { %v670_v36 = vpop.f32.mrb[19].mxu0 }
 0x119   :  { %v671_v37 = vadd.f32 %v670_v36, %v669_v35  ;;  %v528_v38 = vadd.f32 %v668_v34, %v527_v14 }
 0x11b   :  { %566 = vst [vmem:[%s1003_s2 + $0x40] sm:$0xff] %v528_v38  ;;  %v531_v39 = vadd.f32 %v671_v37, %v530_v18 }
 0x11d   :  { %567 = vst [vmem:[%s1003_s2 + $0x48] sm:$0xff] %v531_v39  ;;  %v672_v40 = vpop.f32.mrb[20].mxu0 }
 0x11e   :  { %v673_v41 = vpop.f32.mrb[21].mxu0 }
 0x11f   :  { %v674_v42 = vadd.f32 %v673_v41, %v672_v40  ;;  %v675_v43 = vpop.f32.mrb[22].mxu0 }
 0x120   :  { %v676_v44 = vpop.f32.mrb[23].mxu0 }
 0x121   :  { %v536_v45 = vadd.f32 %v732_v12, %v674_v42  ;;  %v677_v46 = vadd.f32 %v676_v44, %v675_v43 }
 0x123   :  { %568 = vst [vmem:[%s1003_s2 + $0x50] sm:$0xff] %v536_v45  ;;  %v539_v47 = vadd.f32 %v733_v17, %v677_v46 }
 0x125   :  { %569 = vst [vmem:[%s1003_s2 + $0x58] sm:$0xff] %v539_v47  ;;  %v678_v48 = vpop.f32.mrb[24].mxu0 }
 0x126   :  { %v679_v49 = vpop.f32.mrb[25].mxu0 }
 0x127   :  { %v680_v50 = vadd.f32 %v679_v49, %v678_v48  ;;  %v681_v51 = vpop.f32.mrb[26].mxu0 }
 0x128   :  { %v682_v52 = vpop.f32.mrb[27].mxu0 }
 0x129   :  { %v683_v53 = vadd.f32 %v682_v52, %v681_v51  ;;  %v544_v54 = vadd.f32 %v680_v50, %v543_v26 }
 0x12b   :  { %570 = vst [vmem:[%s1003_s2 + $0x60] sm:$0xff] %v544_v54  ;;  %v547_v55 = vadd.f32 %v683_v53, %v546_v30 }
 0x12d   :  { %571 = vst [vmem:[%s1003_s2 + $0x68] sm:$0xff] %v547_v55  ;;  %v684_v56 = vpop.f32.mrb[28].mxu0 }
 0x12e   :  { %v685_v57 = vpop.f32.mrb[29].mxu0 }
 0x12f   :  { %v686_v58 = vadd.f32 %v685_v57, %v684_v56  ;;  %v687_v59 = vpop.f32.mrb[30].mxu0 }
 0x130   :  { %v688_v60 = vpop.f32.mrb[31].mxu0 }
 0x131   :  { %v552_v61 = vadd.f32 %v736_v24, %v686_v58  ;;  %v689_v62 = vadd.f32 %v688_v60, %v687_v59 }
 0x133   :  { %572 = vst [vmem:[%s1003_s2 + $0x70] sm:$0xff] %v552_v61  ;;  %v555_v63 = vadd.f32 %v737_v29, %v689_v62 }
 0x135   :  { %573 = vst [vmem:[%s1003_s2 + $0x78] sm:$0xff] %v555_v63 }

// kernel: stylization_forward.53
= control target key start
LH: loop header
LB: loop body
LE: loop exit
PB: predicated region body
PF: predicated region fallthrough
CT: control target
= control target key end

     0   :  { %s588_s15 = smov 0   ;;  %s590_s16 = smov 0   ;;  %s635_s0 = inlined_call_operand.vmem [shape: f32[2,64,128], index: 0, kind: input, shape index: {}]   ;;  %s636_s1 = inlined_call_operand.vmem [shape: f32[2,8,128], index: 1, kind: input, shape index: {}]   ;;  %s637_s2 = inlined_call_operand.vmem [shape: f32[1,128], index: 2, kind: input, shape index: {}]   ;;  %s638_s3 = inlined_call_operand.vmem [shape: f32[1,128], index: 3, kind: input, shape index: {}]   ;;  %s639_s4 = inlined_call_operand.vmem [shape: bf16[2,64,128], index: 4, kind: output, shape index: {}]  }
   0x1   :  { %s592_s17 = smov 0  }
   0x2 LB: > { %s26_s18 = sadd.s32 1, %s557_s16  ;;  %p463_p0 = scmp.ge.s32.totalorder %s561_s17, 1  ;;  %s561_s17 = sphi %s592_s17, %s14_s17   ;;  %s557_s16 = sphi %s590_s16, %s641_s16   ;;  %s553_s15 = sphi %s588_s15, %s640_s15  }
   0x3   : > { %p28_p1 = scmp.ge.s32.totalorder %s26_s18, 2  ;;  %p192_p2 = scmp.lt.s32.totalorder %s561_s17, 3 }
   0x5   : > { %s643_s18 = smov (%p28_p1, %s26_s18), 0  ;;  %p193_p3 = pnand %p463_p0, %p192_p2 }
   0x6   : > { %p231_p4 = scmp.lt.s32.totalorder (!%p193_p3), %s553_s15, 1  ;;  %v273_v6 = vlaneseq (!%p193_p3)  ;;  %v271_v14 = vld [vmem:[%s637_s2] sm:$0x1] (!%p193_p3) }
   0x7   : > { %196 = sbr.rel (%p193_p3) target bundleno = 53 (0x35), region = 36  ;;  %v469_v32 = vld [vmem:[%s638_s3] ss:$0 sm:$0xff] (!%p193_p3) }
   0x8   : > { %v274_v9 = vshrl.u32 (!%p193_p3), %v273_v6, 7 }
   0xa   : > { %v275_v10 = vsub.s32 (!%p193_p3), 0, %v274_v9 }
   0xe   : > { %s645_s15 = smov (!%p231_p4, %s553_s15), 1 }
   0xf   : > { %s466_s19 = sshll.u32 %s645_s15, 3  ;;  %s480_s23 = sshll.u32 %s645_s15, 6 }
  0x10   : > { %s243_s22 = scalar_lea.vmem %s636_s1, %s466_s19  ;;  %s238_s26 = scalar_lea.vmem %s635_s0, %s480_s23 }
  0x11   : > { %v262_v0 = vld [vmem:[%s243_s22] sm:$0x1]  ;;  %v264_v2 = vld [vmem:[%s243_s22 + $0x1] sm:$0x1]  ;;  %v255_v13 = vld [vmem:[%s238_s26 + $0x8] sm:$0xff]  ;;  %s481_s5 = sshll.u32 %s645_s15, 5 }
  0x12   : > { %v263_v1 = vmul.f32 0.015625, %v262_v0  ;;  %v265_v3 = vmul.f32 0.015625, %v264_v2  ;;  %v254_v12 = vld [vmem:[%s238_s26] sm:$0xff]  ;;  %v256_v15 = vld [vmem:[%s238_s26 + $0x10] sm:$0xff]  ;;  %v257_v16 = vld [vmem:[%s238_s26 + $0x18] sm:$0xff]  ;;  %s252_s8 = scalar_lea.vmem %s639_s4, %s481_s5 }
  0x13   : > { %v258_v17 = vld [vmem:[%s238_s26 + $0x20] sm:$0xff]  ;;  %v259_v18 = vld [vmem:[%s238_s26 + $0x28] sm:$0xff]  ;;  %v260_v19 = vld [vmem:[%s238_s26 + $0x30] sm:$0xff] }
  0x14   : > { %v266_v4 = vmul.f32 %v263_v1, %v263_v1  ;;  %v276_v11 = vrot.slane %v263_v1, %v275_v10  ;;  %v261_v20 = vld [vmem:[%s238_s26 + $0x38] sm:$0xff] }
  0x16   : > { %v267_v5 = vsub.f32 %v265_v3, %v266_v4  ;;  %v277_v22 = vsub.f32 %v254_v12, %v276_v11  ;;  %v278_v24 = vsub.f32 %v255_v13, %v276_v11  ;;  %v279_v25 = vsub.f32 %v256_v15, %v276_v11 }
  0x17   : > { %v280_v26 = vsub.f32 %v257_v16, %v276_v11  ;;  %v281_v27 = vsub.f32 %v258_v17, %v276_v11  ;;  %v282_v28 = vsub.f32 %v259_v18, %v276_v11  ;;  %v283_v29 = vsub.f32 %v260_v19, %v276_v11 }
  0x18   : > { %v268_v7 = vmax.f32 %v267_v5, 0.0  ;;  %v284_v30 = vsub.f32 %v261_v20, %v276_v11 }
  0x1a   : > { %v269_v8 = vadd.f32 1e-05, %v268_v7 }
  0x1c   : > { %537 = vrsqrt.f32 %v269_v8 }
  0x26   : > { %v538_v21 = vpop.eup %537 }
  0x27   : > { %v272_v23 = vmul.f32 %v538_v21, %v271_v14 }
  0x29   : > { %v288_v31 = vrot.slane %v272_v23, %v275_v10 }
  0x2b   : > { %v289_v33 = vmul.f32 %v288_v31, %v277_v22  ;;  %v290_v34 = vmul.f32 %v288_v31, %v278_v24  ;;  %v291_v35 = vmul.f32 %v288_v31, %v279_v25  ;;  %v292_v36 = vmul.f32 %v288_v31, %v280_v26 }
  0x2c   : > { %v293_v37 = vmul.f32 %v288_v31, %v281_v27  ;;  %v294_v38 = vmul.f32 %v288_v31, %v282_v28  ;;  %v295_v39 = vmul.f32 %v288_v31, %v283_v29  ;;  %v296_v40 = vmul.f32 %v288_v31, %v284_v30 }
  0x2d   : > { %v304_v41 = vadd.f32 %v469_v32, %v289_v33  ;;  %v305_v42 = vadd.f32 %v469_v32, %v290_v34  ;;  %v306_v43 = vadd.f32 %v469_v32, %v291_v35  ;;  %v307_v44 = vadd.f32 %v469_v32, %v292_v36 }
  0x2e   : > { %v308_v45 = vadd.f32 %v469_v32, %v293_v37  ;;  %v309_v46 = vadd.f32 %v469_v32, %v294_v38  ;;  %v310_v47 = vadd.f32 %v469_v32, %v295_v39  ;;  %v311_v48 = vadd.f32 %v469_v32, %v296_v40 }
  0x2f   : > { %v312_v49 = vmax.f32 %v304_v41, 0.0  ;;  %v313_v50 = vmax.f32 %v305_v42, 0.0  ;;  %v314_v51 = vmax.f32 %v306_v43, 0.0  ;;  %v315_v52 = vmax.f32 %v307_v44, 0.0 }
  0x30   : > { %v316_v53 = vmax.f32 %v308_v45, 0.0  ;;  %v317_v54 = vmax.f32 %v309_v46, 0.0  ;;  %v318_v55 = vmax.f32 %v310_v47, 0.0  ;;  %v319_v56 = vmax.f32 %v311_v48, 0.0 }
  0x31   : > { %v493_v57 = vpack.c.bf16 %v313_v50, %v312_v49  ;;  %v498_v58 = vpack.c.bf16 %v315_v52, %v314_v51 }
  0x32   : > { %v503_v59 = vpack.c.bf16 %v317_v54, %v316_v53  ;;  %v508_v60 = vpack.c.bf16 %v319_v56, %v318_v55 }
  0x33   : > { %494 = vst [vmem:[%s252_s8] sm:$0xff] %v493_v57   ;;  %510 = vst [vmem:[%s252_s8 + $0x8] sm:$0xff] %v498_v58  }
  0x34   : > { %511 = vst [vmem:[%s252_s8 + $0x10] sm:$0xff] %v503_v59   ;;  %512 = vst [vmem:[%s252_s8 + $0x18] sm:$0xff] %v508_v60  }
  0x35 PF: > { %s14_s17 = sadd.s32 1, %s561_s17   ;;  %s640_s15 = smov %s557_s16 }
  0x36   : > { %p11_p5 = scmp.ge.s32.totalorder %s14_s17, 4   ;;  %s641_s16 = smov %s643_s18 }
  0x38   :  { %13 = sbr.rel (!%p11_p5) target bundleno = 2 (0x2), region = 69 }

// kernel: stylization_forward.54
= control target key start
LH: loop header
LB: loop body
LE: loop exit
PB: predicated region body
PF: predicated region fallthrough
CT: control target
= control target key end

     0   :  { %s918_s1 = inlined_call_operand.vmem [shape: bf16[640,128], index: 1, kind: input, shape index: {}]   ;;  %s919_s0 = inlined_call_operand.vmem [shape: bf16[32,640], index: 0, kind: input, shape index: {}]   ;;  %s920_s2 = inlined_call_operand.vmem [shape: f32[32,128], index: 2, kind: output, shape index: {}]  }
   0x1   :  { %v687_v0 = vld [vmem:[%s918_s1 + $0x40] sm:$0xff]   ;;  %v691_v4 = vld [vmem:[%s918_s1 + $0x48] sm:$0xff]   ;;  %v695_v8 = vld [vmem:[%s918_s1 + $0x50] sm:$0xff]  }
   0x2   :  { %v688_v1 = vld [vmem:[%s918_s1 + $0xc0] sm:$0xff]   ;;  %601 = vmatprep.subr.bf16.mxu0 %v687_v0  ;;  %v692_v5 = vld [vmem:[%s918_s1 + $0xc8] sm:$0xff]   ;;  %v696_v9 = vld [vmem:[%s918_s1 + $0xd0] sm:$0xff]  }
   0x3   :  { %v689_v2 = vld [vmem:[%s918_s1] sm:$0xff]   ;;  %629 = vmatprep.subr.bf16.mxu1 %v688_v1  ;;  %v693_v6 = vld [vmem:[%s918_s1 + $0x8] sm:$0xff]   ;;  %v697_v10 = vld [vmem:[%s918_s1 + $0x10] sm:$0xff]  }
   0x4   :  { %v690_v3 = vld [vmem:[%s918_s1 + $0x80] sm:$0xff]   ;;  %602 = vmatpush3.bf16.msra.mxu0 %v689_v2  ;;  %v694_v7 = vld [vmem:[%s918_s1 + $0x88] sm:$0xff]   ;;  %v698_v11 = vld [vmem:[%s918_s1 + $0x90] sm:$0xff]  }
   0x5   :  { %630 = vmatpush3.bf16.msra.mxu1 %v690_v3  ;;  %603 = vmatprep.subr.bf16.mxu0 %v691_v4  ;;  %v699_v12 = vld [vmem:[%s918_s1 + $0x58] sm:$0xff]   ;;  %v703_v16 = vld [vmem:[%s918_s1 + $0x60] sm:$0xff]   ;;  %v707_v20 = vld [vmem:[%s918_s1 + $0x68] sm:$0xff]  }
   0x6   :  { %631 = vmatprep.subr.bf16.mxu1 %v692_v5  ;;  %v700_v13 = vld [vmem:[%s918_s1 + $0xd8] sm:$0xff]   ;;  %v704_v17 = vld [vmem:[%s918_s1 + $0xe0] sm:$0xff]   ;;  %v708_v21 = vld [vmem:[%s918_s1 + $0xe8] sm:$0xff]  }
   0x7   :  { %v701_v14 = vld [vmem:[%s918_s1 + $0x18] sm:$0xff]   ;;  %v705_v18 = vld [vmem:[%s918_s1 + $0x20] sm:$0xff]   ;;  %v709_v22 = vld [vmem:[%s918_s1 + $0x28] sm:$0xff]  }
   0x8   :  { %604 = vmatpush3.bf16.msra.mxu0 %v693_v6  ;;  %v702_v15 = vld [vmem:[%s918_s1 + $0x98] sm:$0xff]   ;;  %v706_v19 = vld [vmem:[%s918_s1 + $0xa0] sm:$0xff]   ;;  %v710_v23 = vld [vmem:[%s918_s1 + $0xa8] sm:$0xff]  }
   0x9   :  { %632 = vmatpush3.bf16.msra.mxu1 %v694_v7  ;;  %605 = vmatprep.subr.bf16.mxu0 %v695_v8  ;;  %v711_v24 = vld [vmem:[%s918_s1 + $0x70] sm:$0xff]   ;;  %v715_v28 = vld [vmem:[%s918_s1 + $0x78] sm:$0xff]   ;;  %v724_v35 = vld [vmem:[%s919_s0 + $0xc] ss:$20 sps:$4 sm:$0xff]  }
   0xa   :  { %633 = vmatprep.subr.bf16.mxu1 %v696_v9  ;;  %v712_v25 = vld [vmem:[%s918_s1 + $0xf0] sm:$0xff]   ;;  %v716_v29 = vld [vmem:[%s918_s1 + $0xf8] sm:$0xff]   ;;  %v725_v36 = vld [vmem:[%s918_s1 + $0x100] sm:$0xff]   ;;  %477 = vmatprep.mubr.bf16.mxu1 %v724_v35 }
   0xb   :  { %v713_v26 = vld [vmem:[%s918_s1 + $0x30] sm:$0xff]   ;;  %v717_v30 = vld [vmem:[%s918_s1 + $0x38] sm:$0xff]   ;;  %v726_v37 = vld [vmem:[%s918_s1 + $0x108] sm:$0xff]  }
   0xc   :  { %606 = vmatpush3.bf16.msra.mxu0 %v697_v10  ;;  %v714_v27 = vld [vmem:[%s918_s1 + $0xb0] sm:$0xff]   ;;  %v718_v31 = vld [vmem:[%s918_s1 + $0xb8] sm:$0xff]   ;;  %v730_v39 = vld [vmem:[%s919_s0 + $0x2c] ss:$20 sps:$4 sm:$0xff]  }
   0xd   :  { %634 = vmatpush3.bf16.msra.mxu1 %v698_v11  ;;  %607 = vmatprep.subr.bf16.mxu0 %v699_v12  ;;  %v719_v32 = vld [vmem:[%s919_s0] ss:$20 sps:$4 sm:$0xff]   ;;  %v721_v33 = vld [vmem:[%s919_s0 + $0x4] ss:$20 sps:$4 sm:$0xff]   ;;  %v722_v34 = vld [vmem:[%s919_s0 + $0x8] ss:$20 sps:$4 sm:$0xff]  }
   0xe   :  { %635 = vmatprep.subr.bf16.mxu1 %v700_v13  ;;  %428 = vmatprep.mubr.bf16.mxu0 %v721_v33  ;;  %v727_v38 = vld [vmem:[%s918_s1 + $0x110] sm:$0xff]   ;;  %v728_v41 = vld [vmem:[%s918_s1 + $0x118] sm:$0xff]   ;;  %v729_v45 = vld [vmem:[%s918_s1 + $0x120] sm:$0xff]  }
   0xf   :  { %v732_v40 = vld [vmem:[%s919_s0 + $0x34] ss:$20 sps:$4 sm:$0xff]   ;;  %v736_v43 = vld [vmem:[%s919_s0 + $0x30] ss:$20 sps:$4 sm:$0xff]   ;;  %v738_v48 = vld [vmem:[%s918_s1 + $0x138] sm:$0xff]  }
  0x10   :  { %608 = vmatpush3.bf16.msra.mxu0 %v701_v14  ;;  %v735_v42 = vld [vmem:[%s919_s0 + $0x28] ss:$20 sps:$4 sm:$0xff]   ;;  %v739_v44 = vld [vmem:[%s919_s0 + $0x10] ss:$20 sps:$4 sm:$0xff]   ;;  %v740_v49 = vld [vmem:[%s919_s0 + $0x38] ss:$20 sps:$4 sm:$0xff]  }
  0x11   :  { %636 = vmatpush3.bf16.msra.mxu1 %v702_v15  ;;  %609 = vmatprep.subr.bf16.mxu0 %v703_v16  ;;  %v734_v46 = vld [vmem:[%s918_s1 + $0x128] sm:$0xff]   ;;  %v737_v47 = vld [vmem:[%s918_s1 + $0x130] sm:$0xff]  }
  0x12   :  { %637 = vmatprep.subr.bf16.mxu1 %v704_v17 }
  0x14   :  { %610 = vmatpush3.bf16.msra.mxu0 %v705_v18 }
  0x15   :  { %638 = vmatpush3.bf16.msra.mxu1 %v706_v19  ;;  %611 = vmatprep.subr.bf16.mxu0 %v707_v20 }
  0x16   :  { %639 = vmatprep.subr.bf16.mxu1 %v708_v21 }
  0x18   :  { %612 = vmatpush3.bf16.msra.mxu0 %v709_v22 }
  0x19   :  { %640 = vmatpush3.bf16.msra.mxu1 %v710_v23  ;;  %613 = vmatprep.subr.bf16.mxu0 %v711_v24 }
  0x1a   :  { %641 = vmatprep.subr.bf16.mxu1 %v712_v25 }
  0x1c   :  { %614 = vmatpush3.bf16.msra.mxu0 %v713_v26 }
  0x1d   :  { %642 = vmatpush3.bf16.msra.mxu1 %v714_v27  ;;  %615 = vmatprep.subr.bf16.mxu0 %v715_v28 }
  0x1e   :  { %643 = vmatprep.subr.bf16.mxu1 %v716_v29 }
  0x20   :  { %616 = vmatpush3.bf16.msra.mxu0 %v717_v30 }
  0x21   :  { %644 = vmatpush3.bf16.msra.mxu1 %v718_v31  ;;  %667 = vmatprep.subr.bf16.mxu0 %v725_v36 }
  0x23   :  { %429 = vmatmul.mubr.bf16.vlgmr.msra.gmra.mrb[0].mxu0 %v719_v32 }
  0x24   :  { %478 = vmatmul.mubr.bf16.vlgmr.msra.gmra.mrb[0].mxu1 %v722_v34  ;;  %668 = vmatpush3.bf16.msra.mxu0 %v725_v36 }
  0x25   :  { %669 = vmatprep.subr.bf16.mxu0 %v726_v37  ;;  %436 = vmatprep.mubr.bf16.mxu0 %v730_v39 }
  0x26   :  { %485 = vmatprep.mubr.bf16.mxu1 %v732_v40 }
  0x28   :  { %670 = vmatpush3.bf16.msra.mxu0 %v726_v37 }
  0x29   :  { %671 = vmatprep.subr.bf16.mxu0 %v727_v38 }
  0x2b   :  { %437 = vmatmul.mubr.bf16.gmra.mrb[4].mxu0 %v735_v42 }
  0x2c   :  { %486 = vmatmul.mubr.bf16.gmra.mrb[4].mxu1 %v736_v43  ;;  %672 = vmatpush3.bf16.msra.mxu0 %v727_v38 }
  0x2d   :  { %673 = vmatprep.subr.bf16.mxu0 %v728_v41  ;;  %683 = vmatprep.mubr.bf16.mxu0 %v739_v44 }
  0x30   :  { %674 = vmatpush3.bf16.msra.mxu0 %v728_v41 }
  0x31   :  { %675 = vmatprep.subr.bf16.mxu0 %v729_v45 }
  0x34   :  { %676 = vmatpush3.bf16.msra.mxu0 %v729_v45 }
  0x35   :  { %677 = vmatprep.subr.bf16.mxu0 %v734_v46 }
  0x38   :  { %678 = vmatpush3.bf16.msra.mxu0 %v734_v46 }
  0x39   :  { %679 = vmatprep.subr.bf16.mxu0 %v737_v47 }
  0x3c   :  { %680 = vmatpush3.bf16.msra.mxu0 %v737_v47 }
  0x3d   :  { %681 = vmatprep.subr.bf16.mxu0 %v738_v48 }
  0x40   :  { %682 = vmatpush3.bf16.msra.mxu0 %v738_v48 }
  0x43   :  { %684 = vmatmul.mubr.bf16.vlgmr.msra.gmra.mrb[8].mxu0 %v740_v49 }
  0xf6   :  { %v617_v50 = vpop.f32.mrb[0].mxu0 }
  0xf7   :  { %v645_v51 = vpop.f32.mrb[0].mxu1  ;;  %v618_v52 = vpop.f32.mrb[1].mxu0 }
  0xf8   :  { %v619_v53 = vadd.f32 %v618_v52, %v617_v50  ;;  %v646_v54 = vpop.f32.mrb[1].mxu1  ;;  %v620_v55 = vpop.f32.mrb[2].mxu0 }
  0xf9   :  { %v647_v56 = vadd.f32 %v646_v54, %v645_v51  ;;  %v648_v57 = vpop.f32.mrb[2].mxu1  ;;  %v621_v58 = vpop.f32.mrb[3].mxu0 }
  0xfa   :  { %v622_v59 = vadd.f32 %v621_v58, %v620_v55  ;;  %v649_v60 = vpop.f32.mrb[3].mxu1 }
  0xfb   :  { %v650_v61 = vadd.f32 %v649_v60, %v648_v57  ;;  %v480_v62 = vadd.f32 %v647_v56, %v619_v53 }
  0xfd   :  { %v483_v63 = vadd.f32 %v650_v61, %v622_v59 }
  0xfe   :  { %v623_v0 = vpop.f32.mrb[4].mxu0 }
  0xff   :  { %v651_v1 = vpop.f32.mrb[4].mxu1  ;;  %v624_v2 = vpop.f32.mrb[5].mxu0 }
 0x100   :  { %v625_v3 = vadd.f32 %v624_v2, %v623_v0  ;;  %v652_v4 = vpop.f32.mrb[5].mxu1  ;;  %v626_v5 = vpop.f32.mrb[6].mxu0 }
 0x101   :  { %v653_v6 = vadd.f32 %v652_v4, %v651_v1  ;;  %v654_v7 = vpop.f32.mrb[6].mxu1  ;;  %v627_v8 = vpop.f32.mrb[7].mxu0 }
 0x102   :  { %v628_v9 = vadd.f32 %v627_v8, %v626_v5  ;;  %v655_v10 = vpop.f32.mrb[7].mxu1 }
 0x103   :  { %v656_v11 = vadd.f32 %v655_v10, %v654_v7  ;;  %v488_v12 = vadd.f32 %v653_v6, %v625_v3 }
 0x105   :  { %v491_v13 = vadd.f32 %v656_v11, %v628_v9 }
 0x116   :  { %v685_v14 = vpop.f32.mrb[8].mxu0 }
 0x117   :  { %v537_v15 = vadd.f32 %v685_v14, %v488_v12  ;;  %v528_v16 = vpop.f32.mrb[9].mxu0 }
 0x118   :  { %v529_v17 = vadd.f32 %v528_v16, %v480_v62  ;;  %v686_v18 = vpop.f32.mrb[10].mxu0 }
 0x119   :  { %545 = vst [vmem:[%s920_s2 + $0x10] sm:$0xff] %v537_v15  ;;  %v540_v19 = vadd.f32 %v686_v18, %v491_v13  ;;  %v531_v20 = vpop.f32.mrb[11].mxu0 }
 0x11a   :  { %543 = vst [vmem:[%s920_s2] sm:$0xff] %v529_v17  ;;  %v532_v21 = vadd.f32 %v531_v20, %v483_v63 }
 0x11b   :  { %546 = vst [vmem:[%s920_s2 + $0x18] sm:$0xff] %v540_v19 }
 0x11c   :  { %544 = vst [vmem:[%s920_s2 + $0x8] sm:$0xff] %v532_v21 }

// kernel: stylization_forward.56
= control target key start
LH: loop header
LB: loop body
LE: loop exit
PB: predicated region body
PF: predicated region fallthrough
CT: control target
= control target key end

     0   :  { %s498_s15 = smov 0   ;;  %s500_s16 = smov 0   ;;  %s548_s0 = inlined_call_operand.vmem [shape: f32[2,16,128], index: 0, kind: input, shape index: {}]   ;;  %s549_s1 = inlined_call_operand.vmem [shape: f32[2,8,128], index: 1, kind: input, shape index: {}]   ;;  %s550_s2 = inlined_call_operand.vmem [shape: f32[1,128], index: 2, kind: input, shape index: {}]   ;;  %s551_s3 = inlined_call_operand.vmem [shape: f32[1,128], index: 3, kind: input, shape index: {}]   ;;  %s552_s4 = inlined_call_operand.vmem [shape: bf16[2,16,128], index: 4, kind: output, shape index: {}]  }
   0x1   :  { %s502_s17 = smov 0  }
   0x2 LB: > { %s26_s18 = sadd.s32 1, %s467_s16  ;;  %p403_p0 = scmp.ge.s32.totalorder %s471_s17, 1  ;;  %s471_s17 = sphi %s502_s17, %s14_s17   ;;  %s467_s16 = sphi %s500_s16, %s554_s16   ;;  %s463_s15 = sphi %s498_s15, %s553_s15  }
   0x3   : > { %p28_p1 = scmp.ge.s32.totalorder %s26_s18, 2  ;;  %p192_p2 = scmp.lt.s32.totalorder %s471_s17, 3 }
   0x5   : > { %s556_s18 = smov (%p28_p1, %s26_s18), 0  ;;  %p193_p3 = pnand %p403_p0, %p192_p2 }
   0x6   : > { %p231_p4 = scmp.lt.s32.totalorder (!%p193_p3), %s463_s15, 1  ;;  %v267_v6 = vlaneseq (!%p193_p3)  ;;  %v265_v14 = vld [vmem:[%s550_s2] sm:$0x1] (!%p193_p3) }
   0x7   : > { %196 = sbr.rel (%p193_p3) target bundleno = 52 (0x34), region = 36  ;;  %v409_v20 = vld [vmem:[%s551_s3] ss:$0 sm:$0xff] (!%p193_p3) }
   0x8   : > { %v268_v9 = vshrl.u32 (!%p193_p3), %v267_v6, 7 }
   0xa   : > { %v269_v10 = vsub.s32 (!%p193_p3), 0, %v268_v9 }
   0xe   : > { %s558_s15 = smov (!%p231_p4, %s463_s15), 1 }
   0xf   : > { %s406_s19 = sshll.u32 %s558_s15, 3  ;;  %s414_s23 = sshll.u32 %s558_s15, 4 }
  0x10   : > { %s243_s22 = scalar_lea.vmem %s549_s1, %s406_s19  ;;  %s238_s26 = scalar_lea.vmem %s548_s0, %s414_s23 }
  0x11   : > { %v256_v0 = vld [vmem:[%s243_s22] sm:$0x1]  ;;  %v258_v2 = vld [vmem:[%s243_s22 + $0x1] sm:$0x1]  ;;  %v255_v13 = vld [vmem:[%s238_s26 + $0x8] sm:$0xff]  ;;  %s252_s7 = scalar_lea.vmem %s552_s4, %s406_s19 }
  0x12   : > { %v257_v1 = vmul.f32 0.0625, %v256_v0  ;;  %v259_v3 = vmul.f32 0.0625, %v258_v2  ;;  %v254_v12 = vld [vmem:[%s238_s26] sm:$0xff] }
  0x14   : > { %v260_v4 = vmul.f32 %v257_v1, %v257_v1  ;;  %v270_v11 = vrot.slane %v257_v1, %v269_v10 }
  0x16   : > { %v261_v5 = vsub.f32 %v259_v3, %v260_v4  ;;  %v271_v17 = vsub.f32 %v254_v12, %v270_v11  ;;  %v272_v18 = vsub.f32 %v255_v13, %v270_v11 }
  0x18   : > { %v262_v7 = vmax.f32 %v261_v5, 0.0 }
  0x1a   : > { %v263_v8 = vadd.f32 1e-05, %v262_v7 }
  0x1c   : > { %447 = vrsqrt.f32 %v263_v8 }
  0x26   : > { %v448_v15 = vpop.eup %447 }
  0x27   : > { %v266_v16 = vmul.f32 %v448_v15, %v265_v14 }
  0x29   : > { %v276_v19 = vrot.slane %v266_v16, %v269_v10 }
  0x2b   : > { %v277_v21 = vmul.f32 %v276_v19, %v271_v17  ;;  %v278_v22 = vmul.f32 %v276_v19, %v272_v18 }
  0x2d   : > { %v286_v23 = vadd.f32 %v409_v20, %v277_v21  ;;  %v287_v24 = vadd.f32 %v409_v20, %v278_v22 }
  0x2f   : > { %v288_v25 = vmax.f32 %v286_v23, 0.0  ;;  %v289_v26 = vmax.f32 %v287_v24, 0.0 }
  0x31   : > { %v421_v27 = vpack.c.bf16 %v289_v26, %v288_v25 }
  0x33   : > { %422 = vst [vmem:[%s252_s7] sm:$0xff] %v421_v27  }
  0x34 PF: > { %s14_s17 = sadd.s32 1, %s471_s17   ;;  %s553_s15 = smov %s467_s16 }
  0x35   : > { %p11_p5 = scmp.ge.s32.totalorder %s14_s17, 4   ;;  %s554_s16 = smov %s556_s18 }
  0x37   :  { %13 = sbr.rel (!%p11_p5) target bundleno = 2 (0x2), region = 69 }

// kernel: stylization_forward.55
= control target key start
LH: loop header
LB: loop body
LE: loop exit
PB: predicated region body
PF: predicated region fallthrough
CT: control target
= control target key end

     0   :  { %s310_s6 = smov 0   ;;  %s312_s7 = smov 0   ;;  %s343_s0 = inlined_call_operand.vmem [shape: f32[2,16,128], index: 0, kind: input, shape index: {}]   ;;  %s344_s1 = inlined_call_operand.vmem [shape: f32[2,8,128], index: 1, kind: output, shape index: {}]  }
   0x1   :  { %s314_s8 = smov 0  }
   0x2 LB: > { %s23_s9 = sadd.s32 1, %s293_s7  ;;  %p243_p0 = scmp.ge.s32.totalorder %s297_s8, 1  ;;  %s297_s8 = sphi %s314_s8, %s11_s8   ;;  %s293_s7 = sphi %s312_s7, %s346_s7   ;;  %s289_s6 = sphi %s310_s6, %s345_s6  }
   0x3   : > { %p25_p1 = scmp.ge.s32.totalorder %s23_s9, 2  ;;  %p106_p2 = scmp.lt.s32.totalorder %s297_s8, 3 }
   0x5   : > { %s348_s9 = smov (%p25_p1, %s23_s9), 0  ;;  %p107_p3 = pnand %p243_p0, %p106_p2 }
   0x6   : > { %p130_p4 = scmp.lt.s32.totalorder (!%p107_p3), %s289_s6, 1  ;;  %v299_v0 = vmov (!%p107_p3), 0.0  }
   0x7   : > { %110 = sbr.rel (%p107_p3) target bundleno = 37 (0x25), region = 24 }
   0xe   : > { %s350_s6 = smov (!%p130_p4, %s289_s6), 1 }
   0xf   : > { %s249_s10 = sshll.u32 %s350_s6, 4  ;;  %s246_s11 = sshll.u32 %s350_s6, 3 }
  0x10   : > { %s137_s14 = scalar_lea.vmem %s343_s0, %s249_s10  ;;  %s142_s17 = scalar_lea.vmem %s344_s1, %s246_s11 }
  0x11   : > { %147 = vst [vmem:[%s142_s17] sm:$0xff] %v299_v0  ;;  %v148_v1 = vld [vmem:[%s137_s14] sm:$0xff]  ;;  %v149_v2 = vld [vmem:[%s137_s14 + $0x8] sm:$0xff] }
  0x12   : > { %v151_v3 = vadd.f32 %v149_v2, %v148_v1  ;;  %v161_v4 = vmul.f32 %v148_v1, %v148_v1  ;;  %v162_v5 = vmul.f32 %v149_v2, %v149_v2 }
  0x14   : > { %v152_v6 = vrot.slane %v151_v3, 4  ;;  %v163_v7 = vadd.f32 %v162_v5, %v161_v4 }
  0x16   : > { %v153_v8 = vadd.f32 %v152_v6, %v151_v3  ;;  %v164_v9 = vrot.slane %v163_v7, 4 }
  0x18   : > { %v154_v10 = vrot.slane %v153_v8, 2  ;;  %v165_v11 = vadd.f32 %v164_v9, %v163_v7  ;;  %v150_v16 = vld [vmem:[%s142_s17] sm:$0x1]  ;;  %v160_v19 = vld [vmem:[%s142_s17 + $0x1] sm:$0x1] }
  0x1a   : > { %v155_v12 = vadd.f32 %v154_v10, %v153_v8  ;;  %v166_v13 = vrot.slane %v165_v11, 2 }
  0x1c   : > { %v156_v14 = vrot.slane %v155_v12, 1  ;;  %v167_v15 = vadd.f32 %v166_v13, %v165_v11 }
  0x1e   : > { %v157_v17 = vadd.f32 %v156_v14, %v155_v12  ;;  %v168_v18 = vrot.slane %v167_v15, 1 }
  0x20   : > { %v158_v20 = vadd.f32 %v157_v17, %v150_v16  ;;  %v169_v21 = vadd.f32 %v168_v18, %v167_v15 }
  0x22   : > { %159 = vst [vmem:[%s142_s17] sm:$0x1] %v158_v20  ;;  %v170_v22 = vadd.f32 %v169_v21, %v160_v19 }
  0x24   : > { %171 = vst [vmem:[%s142_s17 + $0x1] sm:$0x1] %v170_v22 }
  0x25 PF: > { %s11_s8 = sadd.s32 1, %s297_s8   ;;  %s345_s6 = smov %s293_s7 }
  0x26   : > { %p8_p5 = scmp.ge.s32.totalorder %s11_s8, 4   ;;  %s346_s7 = smov %s348_s9 }
  0x28   :  { %10 = sbr.rel (!%p8_p5) target bundleno = 2 (0x2), region = 58 }

// kernel: stylization_forward.62
= control target key start
LH: loop header
LB: loop body
LE: loop exit
PB: predicated region body
PF: predicated region fallthrough
CT: control target
= control target key end

     0   :  { %s595_s18 = smov 0   ;;  %s597_s19 = smov 0   ;;  %s645_s0 = inlined_call_operand.vmem [shape: f32[2,16,128], index: 0, kind: input, shape index: {}]   ;;  %s646_s1 = inlined_call_operand.vmem [shape: bf16[2,16,128], index: 1, kind: input, shape index: {}]   ;;  %s647_s2 = inlined_call_operand.vmem [shape: f32[2,8,128], index: 2, kind: input, shape index: {}]   ;;  %s648_s3 = inlined_call_operand.vmem [shape: f32[1,128], index: 3, kind: input, shape index: {}]   ;;  %s649_s4 = inlined_call_operand.vmem [shape: f32[1,128], index: 4, kind: input, shape index: {}]   ;;  %s650_s5 = inlined_call_operand.vmem [shape: bf16[2,16,128], index: 5, kind: output, shape index: {}]  }
   0x1   :  { %s599_s20 = smov 0  }
   0x2 LB: > { %s27_s21 = sadd.s32 1, %s559_s19  ;;  %p488_p0 = scmp.ge.s32.totalorder %s563_s20, 1  ;;  %s563_s20 = sphi %s599_s20, %s15_s20   ;;  %s559_s19 = sphi %s597_s19, %s652_s19   ;;  %s555_s18 = sphi %s595_s18, %s651_s18  }
   0x3   : > { %p29_p1 = scmp.ge.s32.totalorder %s27_s21, 2  ;;  %p234_p2 = scmp.lt.s32.totalorder %s563_s20, 3 }
   0x5   : > { %s654_s21 = smov (%p29_p1, %s27_s21), 0  ;;  %p235_p3 = pnand %p488_p0, %p234_p2 }
   0x6   : > { %p284_p4 = scmp.lt.s32.totalorder (!%p235_p3), %s555_s18, 1  ;;  %v330_v6 = vlaneseq (!%p235_p3)  ;;  %v328_v14 = vld [vmem:[%s648_s3] sm:$0x1] (!%p235_p3) }
   0x7   : > { %238 = sbr.rel (%p235_p3) target bundleno = 52 (0x34), region = 40  ;;  %v496_v21 = vld [vmem:[%s649_s4] ss:$0 sm:$0xff] (!%p235_p3) }
   0x8   : > { %v331_v9 = vshrl.u32 (!%p235_p3), %v330_v6, 7 }
   0xa   : > { %v332_v10 = vsub.s32 (!%p235_p3), 0, %v331_v9 }
   0xe   : > { %s656_s18 = smov (!%p284_p4, %s555_s18), 1 }
   0xf   : > { %s613_s22 = sshll.u32 %s656_s18, 3  ;;  %s501_s26 = sshll.u32 %s656_s18, 4 }
  0x10   : > { %s306_s25 = scalar_lea.vmem %s647_s2, %s613_s22  ;;  %s291_s29 = scalar_lea.vmem %s645_s0, %s501_s26 }
  0x11   : > { %v319_v0 = vld [vmem:[%s306_s25] sm:$0x1]  ;;  %v321_v1 = vld [vmem:[%s306_s25 + $0x1] sm:$0x1]  ;;  %v318_v13 = vld [vmem:[%s291_s29 + $0x8] sm:$0xff]  ;;  %s301_s9 = scalar_lea.vmem %s646_s1, %s613_s22  ;;  %s315_s14 = scalar_lea.vmem %s650_s5, %s613_s22 }
  0x12   : > { %v320_v2 = vmul.f32 0.0625, %v319_v0  ;;  %v322_v3 = vmul.f32 0.0625, %v321_v1  ;;  %v317_v12 = vld [vmem:[%s291_s29] sm:$0xff] }
  0x13   : > { %v507_v19 = vld [vmem:[%s301_s9] sm:$0xff]  }
  0x14   : > { %v323_v4 = vmul.f32 %v320_v2, %v320_v2  ;;  %v333_v11 = vrot.slane %v320_v2, %v332_v10  ;;  %v508_v24 = vunpack.c.l.bf16 %v507_v19  ;;  %v509_v25 = vunpack.c.h.bf16 %v507_v19 }
  0x16   : > { %v324_v5 = vsub.f32 %v322_v3, %v323_v4  ;;  %v334_v17 = vsub.f32 %v317_v12, %v333_v11  ;;  %v335_v18 = vsub.f32 %v318_v13, %v333_v11 }
  0x18   : > { %v325_v7 = vmax.f32 %v324_v5, 0.0 }
  0x1a   : > { %v326_v8 = vadd.f32 1e-05, %v325_v7 }
  0x1c   : > { %539 = vrsqrt.f32 %v326_v8 }
  0x26   : > { %v540_v15 = vpop.eup %539 }
  0x27   : > { %v329_v16 = vmul.f32 %v540_v15, %v328_v14 }
  0x29   : > { %v339_v20 = vrot.slane %v329_v16, %v332_v10 }
  0x2b   : > { %v340_v22 = vmul.f32 %v339_v20, %v334_v17  ;;  %v341_v23 = vmul.f32 %v339_v20, %v335_v18 }
  0x2d   : > { %v349_v26 = vadd.f32 %v496_v21, %v340_v22  ;;  %v350_v27 = vadd.f32 %v496_v21, %v341_v23 }
  0x2f   : > { %v355_v28 = vadd.f32 %v508_v24, %v349_v26  ;;  %v356_v29 = vadd.f32 %v509_v25, %v350_v27 }
  0x31   : > { %v513_v30 = vpack.c.bf16 %v356_v29, %v355_v28 }
  0x33   : > { %514 = vst [vmem:[%s315_s14] sm:$0xff] %v513_v30  }
  0x34 PF: > { %s15_s20 = sadd.s32 1, %s563_s20   ;;  %s651_s18 = smov %s559_s19 }
  0x35   : > { %p12_p5 = scmp.ge.s32.totalorder %s15_s20, 4   ;;  %s652_s19 = smov %s654_s21 }
  0x37   :  { %14 = sbr.rel (!%p12_p5) target bundleno = 2 (0x2), region = 76 }

// kernel: stylization_forward.57
= control target key start
LH: loop header
LB: loop body
LE: loop exit
PB: predicated region body
PF: predicated region fallthrough
CT: control target
= control target key end

     0   :  { %s1579_s9 = smov 0   ;;  %s1877_s0 = inlined_call_operand.vmem [shape: bf16[2,24,384], index: 0, kind: input, shape index: {}]   ;;  %s1878_s1 = inlined_call_operand.vmem [shape: bf16[3,384,128], index: 1, kind: input, shape index: {}]   ;;  %s1879_s2 = inlined_call_operand.vmem [shape: f32[2,16,128], index: 2, kind: output, shape index: {}]  }
   0x1 LB: > { %s1101_s10 = sadd.s32 4294967295, %s1560_s9   ;;  %p1105_p0 = scmp.ge.s32.totalorder %s1560_s9, 1  ;;  %s1560_s9 = sphi %s1579_s9, %s12_s9  }
   0x2   : > { %p112_p1 = scmp.lt.s32.totalorder %s1560_s9, 3 }
   0x4   : > { %p113_p2 = pnand %p1105_p0, %p112_p1 }
   0x5   : > { %v1470_v0 = vld [vmem:[%s1878_s1 + $0x100] sm:$0xff] (!%p113_p2)   ;;  %v1562_v1 = vmov (!%p113_p2), 0.0   ;;  %v1473_v4 = vld [vmem:[%s1878_s1 + $0x108] sm:$0xff] (!%p113_p2)   ;;  %vm1563_vm0 = vmmov (!%p113_p2), 0   ;;  %v1476_v7 = vld [vmem:[%s1878_s1 + $0x110] sm:$0xff] (!%p113_p2)   ;;  %p134_p3 = scmp.lt.s32.totalorder (!%p113_p2), %s1101_s10, 1 }
   0x6   : > { %116 = sbr.rel (%p113_p2) target bundleno = 325 (0x145), region = 28  ;;  %1385 = vmatprep.subr.bf16.mxu1 (!%p113_p2), %v1562_v1  ;;  %v1471_v2 = vld [vmem:[%s1878_s1 + $0x140] sm:$0xff] (!%p113_p2)   ;;  %1292 = vmatprep.subr.bf16.mxu0 (!%p113_p2), %v1470_v0  ;;  %v1474_v5 = vld [vmem:[%s1878_s1 + $0x148] sm:$0xff] (!%p113_p2)   ;;  %v1477_v8 = vld [vmem:[%s1878_s1 + $0x150] sm:$0xff] (!%p113_p2)   ;;  %vm273_vm1 = vcmask (!%p113_p2), 1045504  }
   0x7   : > { %v1472_v3 = vld [vmem:[%s1878_s1 + $0xc0] sm:$0xff] (!%p113_p2)   ;;  %1386 = vmatpush3.bf16.msra.mxu1 (!%p113_p2), %v1471_v2  ;;  %v1475_v6 = vld [vmem:[%s1878_s1 + $0xc8] sm:$0xff] (!%p113_p2)   ;;  %1401 = vmatprep.mubr.msk.bf16.mxu1 (!%p113_p2), %vm1563_vm0, %v1562_v1  ;;  %v1478_v9 = vld [vmem:[%s1878_s1 + $0xd0] sm:$0xff] (!%p113_p2)  }
   0x8   : > { %1293 = vmatpush3.bf16.msra.mxu0 (!%p113_p2), %v1472_v3  ;;  %1387 = vmatprep.subr.bf16.mxu1 (!%p113_p2), %v1562_v1  ;;  %v1479_v10 = vld [vmem:[%s1878_s1 + $0x118] sm:$0xff] (!%p113_p2)   ;;  %v1482_v13 = vld [vmem:[%s1878_s1 + $0x120] sm:$0xff] (!%p113_p2)   ;;  %v1485_v16 = vld [vmem:[%s1878_s1 + $0x128] sm:$0xff] (!%p113_p2)  }
   0x9   : > { %1294 = vmatprep.subr.bf16.mxu0 (!%p113_p2), %v1473_v4  ;;  %v1480_v11 = vld [vmem:[%s1878_s1 + $0x158] sm:$0xff] (!%p113_p2)   ;;  %v1483_v14 = vld [vmem:[%s1878_s1 + $0x160] sm:$0xff] (!%p113_p2)   ;;  %v1486_v17 = vld [vmem:[%s1878_s1 + $0x168] sm:$0xff] (!%p113_p2)  }
   0xa   : > { %v1481_v12 = vld [vmem:[%s1878_s1 + $0xd8] sm:$0xff] (!%p113_p2)   ;;  %v1484_v15 = vld [vmem:[%s1878_s1 + $0xe0] sm:$0xff] (!%p113_p2)   ;;  %v1487_v18 = vld [vmem:[%s1878_s1 + $0xe8] sm:$0xff] (!%p113_p2)  }
   0xb   : > { %1388 = vmatpush3.bf16.msra.mxu1 (!%p113_p2), %v1474_v5  ;;  %v1488_v19 = vld [vmem:[%s1878_s1 + $0x130] sm:$0xff] (!%p113_p2)   ;;  %v1491_v22 = vld [vmem:[%s1878_s1 + $0x138] sm:$0xff] (!%p113_p2)   ;;  %v1500_v43 = vld [vmem:[%s1878_s1 + $0x40] sm:$0xff] (!%p113_p2)  }
   0xc   : > { %1295 = vmatpush3.bf16.msra.mxu0 (!%p113_p2), %v1475_v6  ;;  %1389 = vmatprep.subr.bf16.mxu1 (!%p113_p2), %v1562_v1  ;;  %v1489_v20 = vld [vmem:[%s1878_s1 + $0x170] sm:$0xff] (!%p113_p2)   ;;  %v1492_v26 = vld [vmem:[%s1878_s1 + $0x178] sm:$0xff] (!%p113_p2)   ;;  %v1501_v45 = vld [vmem:[%s1878_s1 + $0x80] sm:$0xff] (!%p113_p2)  }
   0xd   : > { %1296 = vmatprep.subr.bf16.mxu0 %v1476_v7  ;;  %s1881_s10 = smov (!%p134_p3, %s1101_s10), 1  ;;  %v1490_v21 = vld [vmem:[%s1878_s1 + $0xf0] sm:$0xff]   ;;  %v1493_v33 = vld [vmem:[%s1878_s1 + $0xf8] sm:$0xff]   ;;  %v1502_v47 = vld [vmem:[%s1878_s1] sm:$0xff]  }
   0xe   : > { %s1459_s17 = smul.u32 36, %s1881_s10  ;;  %v1503_v48 = vld [vmem:[%s1878_s1 + $0x48] sm:$0xff]   ;;  %v1506_v51 = vld [vmem:[%s1878_s1 + $0x50] sm:$0xff]   ;;  %v1509_v54 = vld [vmem:[%s1878_s1 + $0x58] sm:$0xff]   ;;  %s1291_s4 = sshll.u32 %s1881_s10, 4 }
   0xf   : > { %1390 = vmatpush3.bf16.msra.mxu1 %v1477_v8  ;;  %v1504_v49 = vld [vmem:[%s1878_s1 + $0x88] sm:$0xff]   ;;  %v1507_v52 = vld [vmem:[%s1878_s1 + $0x90] sm:$0xff]   ;;  %v1510_v55 = vld [vmem:[%s1878_s1 + $0x98] sm:$0xff]   ;;  %s143_s7 = scalar_lea.vmem %s1879_s2, %s1291_s4 }
  0x10   : > { %1297 = vmatpush3.bf16.msra.mxu0 %v1478_v9  ;;  %1391 = vmatprep.subr.bf16.mxu1 %v1562_v1  ;;  %s1665_s28 = scalar_lea.vmem %s1877_s0, %s1459_s17  ;;  %v1505_v50 = vld [vmem:[%s1878_s1 + $0x8] sm:$0xff]   ;;  %v1508_v53 = vld [vmem:[%s1878_s1 + $0x10] sm:$0xff]   ;;  %v1511_v56 = vld [vmem:[%s1878_s1 + $0x18] sm:$0xff]  }
  0x11   : > { %1298 = vmatprep.subr.bf16.mxu0 %v1479_v10  ;;  %v197_v23 = vld [vmem:[%s1665_s28] sm:$0xcc]  ;;  %v1676_v24 = vld [vmem:[%s1665_s28 + $0xc] sm:$0xff]  ;;  %v201_v25 = vld [vmem:[%s1665_s28 + $0x18] sm:$0x33] }
  0x12   : > { %v1158_v27 = vcombine.high %v197_v23, %v1676_v24  ;;  %v1161_v28 = vcombine.high %v201_v25, %v201_v25  ;;  %v1157_v29 = vcombine.low %v197_v23, %v1676_v24  ;;  %v1160_v30 = vcombine.low %v201_v25, %v201_v25  ;;  %v198_v31 = vld [vmem:[%s1665_s28 + $0x8] sm:$0xc]  ;;  %v1686_v32 = vld [vmem:[%s1665_s28 + $0x14] sm:$0xf]  ;;  %v1512_v57 = vld [vmem:[%s1878_s1 + $0x60] sm:$0xff]  }
  0x13   : > { %1392 = vmatpush3.bf16.msra.mxu1 %v1480_v11  ;;  %v1159_v34 = vcombine.low %v198_v31, %v1686_v32  ;;  %v1499_v35 = vld [vmem:[%s1665_s28 + $0x20] ss:$0 sps:$4 sm:$0x33]   ;;  %v1515_v60 = vld [vmem:[%s1878_s1 + $0x68] sm:$0xff]   ;;  %v1518_v2 = vld [vmem:[%s1878_s1 + $0x70] sm:$0xff]  }
  0x14   : > { %1299 = vmatpush3.bf16.msra.mxu0 %v1481_v12  ;;  %1393 = vmatprep.subr.bf16.mxu1 %v1562_v1  ;;  %v277_v36 = vrot.slane %v1158_v27, 2  ;;  %v278_v37 = vrot.slane %v1161_v28, 2  ;;  %v274_v38 = vrot.slane %v1157_v29, 2  ;;  %v275_v39 = vrot.slane %v1160_v30, 2  ;;  %v1513_v58 = vld [vmem:[%s1878_s1 + $0xa0] sm:$0xff]   ;;  %v1516_v61 = vld [vmem:[%s1878_s1 + $0xa8] sm:$0xff]  }
  0x15   : > { %1300 = vmatprep.subr.bf16.mxu0 %v1482_v13  ;;  %v280_v40 = vrot.slane %v1159_v34, 2  ;;  %v281_v41 = vrot.slane %v1499_v35, 2  ;;  %v1514_v59 = vld [vmem:[%s1878_s1 + $0x20] sm:$0xff]   ;;  %v1517_v63 = vld [vmem:[%s1878_s1 + $0x28] sm:$0xff]   ;;  %v1519_v3 = vld [vmem:[%s1878_s1 + $0xb0] sm:$0xff]  }
  0x16   : > { %v279_v42 = vsel %vm273_vm1, %v277_v36, %v278_v37  ;;  %v276_v46 = vsel %vm273_vm1, %v274_v38, %v275_v39  ;;  %v145_v62 = vld [vmem:[%s1665_s28] sm:$0xff]  ;;  %v1520_v4 = vld [vmem:[%s1878_s1 + $0x30] sm:$0xff]   ;;  %v1521_v5 = vld [vmem:[%s1878_s1 + $0x78] sm:$0xff]  }
  0x17   : > { %1394 = vmatpush3.bf16.msra.mxu1 %v1483_v14  ;;  %462 = vmatprep.mubr.bf16.mxu0 %v279_v42  ;;  %v282_v44 = vsel %vm273_vm1, %v280_v40, %v281_v41  ;;  %v1188_v0 = vcombine.high %v145_v62, %v1676_v24  ;;  %v1522_v6 = vld [vmem:[%s1878_s1 + $0xb8] sm:$0xff]   ;;  %v1527_v8 = vld [vmem:[%s1878_s1 + $0x1c0] sm:$0xff]   ;;  %v1526_v9 = vld [vmem:[%s1665_s28 + $0x8] ss:$12 sps:$4 sm:$0xff]   ;;  %v1187_v10 = vcombine.low %v145_v62, %v1676_v24 }
  0x18   : > { %1301 = vmatpush3.bf16.msra.mxu0 %v1484_v15  ;;  %1395 = vmatprep.subr.bf16.mxu1 %v1562_v1  ;;  %v1523_v7 = vld [vmem:[%s1878_s1 + $0x38] sm:$0xff]   ;;  %v1528_v11 = vld [vmem:[%s1878_s1 + $0x200] sm:$0xff]   ;;  %v1530_v13 = vld [vmem:[%s1878_s1 + $0x1c8] sm:$0xff]  }
  0x19   : > { %1302 = vmatprep.subr.bf16.mxu0 %v1485_v16  ;;  %v1529_v12 = vld [vmem:[%s1878_s1 + $0x180] sm:$0xff]   ;;  %v1531_v14 = vld [vmem:[%s1878_s1 + $0x208] sm:$0xff]   ;;  %v1533_v16 = vld [vmem:[%s1878_s1 + $0x1d0] sm:$0xff]  }
  0x1a   : > { %v1532_v15 = vld [vmem:[%s1878_s1 + $0x188] sm:$0xff]   ;;  %v1539_v23 = vld [vmem:[%s1878_s1 + $0x1e0] sm:$0xff]   ;;  %v1546_v34 = vld [vmem:[%s1878_s1 + $0x230] sm:$0xff]  }
  0x1b   : > { %1396 = vmatpush3.bf16.msra.mxu1 %v1486_v17  ;;  %v1534_v17 = vld [vmem:[%s1878_s1 + $0x210] sm:$0xff]   ;;  %v1540_v28 = vld [vmem:[%s1878_s1 + $0x220] sm:$0xff]   ;;  %v1542_v30 = vld [vmem:[%s1878_s1 + $0x1e8] sm:$0xff]  }
  0x1c   : > { %1303 = vmatpush3.bf16.msra.mxu0 %v1487_v18  ;;  %1397 = vmatprep.subr.bf16.mxu1 %v1562_v1  ;;  %v1535_v18 = vld [vmem:[%s1878_s1 + $0x190] sm:$0xff]   ;;  %v1541_v29 = vld [vmem:[%s1878_s1 + $0x1a0] sm:$0xff]   ;;  %v1543_v31 = vld [vmem:[%s1878_s1 + $0x228] sm:$0xff]  }
  0x1d   : > { %1304 = vmatprep.subr.bf16.mxu0 %v1488_v19  ;;  %v1536_v19 = vld [vmem:[%s1878_s1 + $0x1d8] sm:$0xff]   ;;  %v1547_v35 = vld [vmem:[%s1878_s1 + $0x1b0] sm:$0xff]  }
  0x1e   : > { %v1548_v36 = vld [vmem:[%s1878_s1 + $0x1f8] sm:$0xff]  }
  0x1f   : > { %1398 = vmatpush3.bf16.msra.mxu1 %v1489_v20  ;;  %v1537_v20 = vld [vmem:[%s1878_s1 + $0x218] sm:$0xff]  }
  0x20   : > { %1305 = vmatpush3.bf16.msra.mxu0 %v1490_v21  ;;  %1399 = vmatprep.subr.bf16.mxu1 %v1562_v1  ;;  %v1538_v21 = vld [vmem:[%s1878_s1 + $0x198] sm:$0xff]  }
  0x21   : > { %1306 = vmatprep.subr.bf16.mxu0 %v1491_v22  ;;  %v754_v22 = vld [vmem:[%s1665_s28 + $0x18] sm:$0xff] }
  0x22   : > { %v1263_v25 = vcombine.high %v1676_v24, %v754_v22  ;;  %v1549_v37 = vld [vmem:[%s1878_s1 + $0x238] sm:$0xff]   ;;  %v1262_v39 = vcombine.low %v1676_v24, %v754_v22 }
  0x23   : > { %1400 = vmatpush3.bf16.msra.mxu1 %v1492_v26  ;;  %v755_v26 = vld [vmem:[%s1665_s28 + $0x20] sm:$0xf]  ;;  %v1550_v38 = vld [vmem:[%s1878_s1 + $0x1b8] sm:$0xff]  }
  0x24   : > { %1307 = vmatpush3.bf16.msra.mxu0 %v1493_v33  ;;  %1405 = vmatprep.subr.bf16.mxu1 %v1562_v1  ;;  %v1264_v27 = vcombine.low %v1686_v32, %v755_v26  ;;  %v1544_v32 = vld [vmem:[%s1878_s1 + $0x1a8] sm:$0xff]   ;;  %v1545_v33 = vld [vmem:[%s1878_s1 + $0x1f0] sm:$0xff]  }
  0x25   : > { %1323 = vmatprep.subr.bf16.mxu0 %v1500_v43 }
  0x26   : > { %1402 = vmatmul.mubr.bf16.vlgmr.msra.gmra.mrb[0].mxu1 %v282_v44 }
  0x27   : > { %463 = vmatmul.mubr.bf16.vlgmr.msra.gmra.mrb[0].mxu0 %v276_v46  ;;  %1406 = vmatpush3.bf16.msra.mxu1 %v1501_v45 }
  0x28   : > { %1324 = vmatpush3.bf16.msra.mxu0 %v1502_v47  ;;  %1407 = vmatprep.subr.bf16.mxu1 %v1562_v1 }
  0x29   : > { %1325 = vmatprep.subr.bf16.mxu0 %v1503_v48  ;;  %1421 = vmatprep.mubr.msk.bf16.mxu1 %vm1563_vm0, %v1562_v1 }
  0x2a   : > { %704 = vmatprep.mubr.bf16.mxu0 %v1188_v0 }
  0x2b   : > { %1408 = vmatpush3.bf16.msra.mxu1 %v1504_v49 }
  0x2c   : > { %1326 = vmatpush3.bf16.msra.mxu0 %v1505_v50  ;;  %1409 = vmatprep.subr.bf16.mxu1 %v1562_v1 }
  0x2d   : > { %1327 = vmatprep.subr.bf16.mxu0 %v1506_v51 }
  0x2f   : > { %1410 = vmatpush3.bf16.msra.mxu1 %v1507_v52 }
  0x30   : > { %1328 = vmatpush3.bf16.msra.mxu0 %v1508_v53  ;;  %1411 = vmatprep.subr.bf16.mxu1 %v1562_v1 }
  0x31   : > { %1329 = vmatprep.subr.bf16.mxu0 %v1509_v54 }
  0x33   : > { %1412 = vmatpush3.bf16.msra.mxu1 %v1510_v55 }
  0x34   : > { %1330 = vmatpush3.bf16.msra.mxu0 %v1511_v56  ;;  %1413 = vmatprep.subr.bf16.mxu1 %v1562_v1 }
  0x35   : > { %1331 = vmatprep.subr.bf16.mxu0 %v1512_v57 }
  0x37   : > { %1414 = vmatpush3.bf16.msra.mxu1 %v1513_v58 }
  0x38   : > { %1332 = vmatpush3.bf16.msra.mxu0 %v1514_v59  ;;  %1415 = vmatprep.subr.bf16.mxu1 %v1562_v1 }
  0x39   : > { %1333 = vmatprep.subr.bf16.mxu0 %v1515_v60 }
  0x3b   : > { %1416 = vmatpush3.bf16.msra.mxu1 %v1516_v61 }
  0x3c   : > { %1334 = vmatpush3.bf16.msra.mxu0 %v1517_v63  ;;  %1417 = vmatprep.subr.bf16.mxu1 %v1562_v1 }
  0x3d   : > { %1335 = vmatprep.subr.bf16.mxu0 %v1518_v2 }
  0x3f   : > { %1418 = vmatpush3.bf16.msra.mxu1 %v1519_v3 }
  0x40   : > { %1336 = vmatpush3.bf16.msra.mxu0 %v1520_v4  ;;  %1419 = vmatprep.subr.bf16.mxu1 %v1562_v1 }
  0x41   : > { %1337 = vmatprep.subr.bf16.mxu0 %v1521_v5 }
  0x43   : > { %1420 = vmatpush3.bf16.msra.mxu1 %v1522_v6 }
  0x44   : > { %1338 = vmatpush3.bf16.msra.mxu0 %v1523_v7  ;;  %1425 = vmatprep.subr.bf16.mxu1 %v1562_v1 }
  0x45   : > { %1354 = vmatprep.subr.bf16.mxu0 %v1527_v8 }
  0x46   : > { %1422 = vmatmul.mubr.bf16.vlgmr.msra.gmra.mrb[0].mxu1 %v1526_v9 }
  0x47   : > { %705 = vmatmul.mubr.bf16.vlgmr.msra.gmra.mrb[4].mxu0 %v1187_v10  ;;  %1426 = vmatpush3.bf16.msra.mxu1 %v1528_v11 }
  0x48   : > { %1355 = vmatpush3.bf16.msra.mxu0 %v1529_v12  ;;  %1427 = vmatprep.subr.bf16.mxu1 %v1562_v1 }
  0x49   : > { %1356 = vmatprep.subr.bf16.mxu0 %v1530_v13  ;;  %1441 = vmatprep.mubr.msk.bf16.mxu1 %vm1563_vm0, %v1562_v1 }
  0x4a   : > { %992 = vmatprep.mubr.bf16.mxu0 %v1263_v25 }
  0x4b   : > { %1428 = vmatpush3.bf16.msra.mxu1 %v1531_v14 }
  0x4c   : > { %1357 = vmatpush3.bf16.msra.mxu0 %v1532_v15  ;;  %1429 = vmatprep.subr.bf16.mxu1 %v1562_v1 }
  0x4d   : > { %1358 = vmatprep.subr.bf16.mxu0 %v1533_v16 }
  0x4f   : > { %1430 = vmatpush3.bf16.msra.mxu1 %v1534_v17 }
  0x50   : > { %1359 = vmatpush3.bf16.msra.mxu0 %v1535_v18  ;;  %1431 = vmatprep.subr.bf16.mxu1 %v1562_v1 }
  0x51   : > { %1360 = vmatprep.subr.bf16.mxu0 %v1536_v19 }
  0x53   : > { %1432 = vmatpush3.bf16.msra.mxu1 %v1537_v20 }
  0x54   : > { %1361 = vmatpush3.bf16.msra.mxu0 %v1538_v21  ;;  %1433 = vmatprep.subr.bf16.mxu1 %v1562_v1 }
  0x55   : > { %1362 = vmatprep.subr.bf16.mxu0 %v1539_v23 }
  0x57   : > { %1434 = vmatpush3.bf16.msra.mxu1 %v1540_v28 }
  0x58   : > { %1363 = vmatpush3.bf16.msra.mxu0 %v1541_v29  ;;  %1435 = vmatprep.subr.bf16.mxu1 %v1562_v1 }
  0x59   : > { %1364 = vmatprep.subr.bf16.mxu0 %v1542_v30 }
  0x5b   : > { %1436 = vmatpush3.bf16.msra.mxu1 %v1543_v31 }
  0x5c   : > { %1365 = vmatpush3.bf16.msra.mxu0 %v1544_v32  ;;  %1437 = vmatprep.subr.bf16.mxu1 %v1562_v1 }
  0x5d   : > { %1366 = vmatprep.subr.bf16.mxu0 %v1545_v33 }
  0x5f   : > { %1438 = vmatpush3.bf16.msra.mxu1 %v1546_v34 }
  0x60   : > { %1367 = vmatpush3.bf16.msra.mxu0 %v1547_v35  ;;  %1439 = vmatprep.subr.bf16.mxu1 %v1562_v1 }
  0x61   : > { %1368 = vmatprep.subr.bf16.mxu0 %v1548_v36 }
  0x63   : > { %1440 = vmatpush3.bf16.msra.mxu1 %v1549_v37 }
  0x64   : > { %1369 = vmatpush3.bf16.msra.mxu0 %v1550_v38 }
  0x66   : > { %1442 = vmatmul.mubr.bf16.vlgmr.msra.gmra.mrb[0].mxu1 %v1264_v27 }
  0x67   : > { %993 = vmatmul.mubr.bf16.vlgmr.msra.gmra.mrb[8].mxu0 %v1262_v39 }
  0xfa   : > { %v1308_v40 = vpop.f32.mrb[0].mxu0 }
  0xfb   : > { %v1309_v41 = vpop.f32.mrb[1].mxu0 }
  0xfc   : > { %v1310_v42 = vadd.f32 %v1309_v41, %v1308_v40  ;;  %v1311_v43 = vpop.f32.mrb[2].mxu0 }
  0xfd   : > { %v1312_v44 = vpop.f32.mrb[3].mxu0 }
  0xfe   : > { %v1313_v45 = vadd.f32 %v1312_v44, %v1311_v43 }
 0x11a   : > { %v1339_v46 = vpop.f32.mrb[4].mxu0 }
 0x11b   : > { %v1340_v1 = vpop.f32.mrb[5].mxu0 }
 0x11c   : > { %v1341_v47 = vadd.f32 %v1340_v1, %v1339_v46  ;;  %v1342_v48 = vpop.f32.mrb[6].mxu0 }
 0x11d   : > { %v1343_v49 = vpop.f32.mrb[7].mxu0 }
 0x11e   : > { %v1445_v50 = vadd.f32 %v1341_v47, %v1310_v42  ;;  %v1344_v51 = vadd.f32 %v1343_v49, %v1342_v48 }
 0x120   : > { %v1448_v52 = vadd.f32 %v1344_v51, %v1313_v45 }
 0x139   : > { %v1035_v53 = vpop.f32.mrb[0].mxu1 }
 0x13a   : > { %v1370_v24 = vpop.f32.mrb[8].mxu0  ;;  %v1443_v54 = vpop.f32.mrb[1].mxu1 }
 0x13b   : > { %v1371_v55 = vpop.f32.mrb[9].mxu0  ;;  %v1038_v56 = vpop.f32.mrb[2].mxu1 }
 0x13c   : > { %v1372_v57 = vadd.f32 %v1371_v55, %v1370_v24  ;;  %v1373_v58 = vpop.f32.mrb[10].mxu0  ;;  %v1444_v59 = vpop.f32.mrb[3].mxu1 }
 0x13d   : > { %v1374_v60 = vpop.f32.mrb[11].mxu0 }
 0x13e   : > { %v1446_v61 = vadd.f32 %v1445_v50, %v1372_v57  ;;  %v1375_v62 = vadd.f32 %v1374_v60, %v1373_v58 }
 0x140   : > { %v1447_v63 = vadd.f32 %v1446_v61, %v1035_v53  ;;  %v1449_v0 = vadd.f32 %v1448_v52, %v1375_v62 }
 0x142   : > { %1044 = vst [vmem:[%s143_s7] sm:$0xff] %v1447_v63  ;;  %v1450_v2 = vadd.f32 %v1449_v0, %v1038_v56 }
 0x144   : > { %1045 = vst [vmem:[%s143_s7 + $0x8] sm:$0xff] %v1450_v2 }
 0x145 PF: > { %s12_s9 = sadd.s32 1, %s1560_s9  }
 0x146   : > { %p9_p4 = scmp.ge.s32.totalorder %s12_s9, 4  }
 0x148   :  { %11 = sbr.rel (!%p9_p4) target bundleno = 1 (0x1), region = 60 }

// kernel: stylization_forward.87
= control target key start
LH: loop header
LB: loop body
LE: loop exit
PB: predicated region body
PF: predicated region fallthrough
CT: control target
= control target key end

     0   :  { %s1992_s9 = smov 0   ;;  %s2348_s0 = inlined_call_operand.vmem [shape: bf16[2,80,384], index: 0, kind: input, shape index: {}]   ;;  %s2349_s1 = inlined_call_operand.vmem [shape: bf16[3,384,128], index: 1, kind: input, shape index: {}]   ;;  %s2350_s2 = inlined_call_operand.vmem [shape: f32[2,64,128], index: 2, kind: output, shape index: {}]  }
   0x1 LB: > { %s1375_s10 = sadd.s32 4294967295, %s1975_s9   ;;  %p1379_p0 = scmp.ge.s32.totalorder %s1975_s9, 1  ;;  %s1975_s9 = sphi %s1992_s9, %s12_s9  }
   0x2   : > { %p112_p1 = scmp.lt.s32.totalorder %s1975_s9, 3 }
   0x4   : > { %p113_p2 = pnand %p1379_p0, %p112_p1 }
   0x5   : > { %v1867_v0 = vld [vmem:[%s2349_s1 + $0x100] sm:$0xff] (!%p113_p2)   ;;  %v1870_v3 = vld [vmem:[%s2349_s1 + $0x108] sm:$0xff] (!%p113_p2)   ;;  %v1873_v6 = vld [vmem:[%s2349_s1 + $0x110] sm:$0xff] (!%p113_p2)   ;;  %p134_p3 = scmp.lt.s32.totalorder (!%p113_p2), %s1375_s10, 1 }
   0x6   : > { %116 = sbr.rel (%p113_p2) target bundleno = 349 (0x15d), region = 28  ;;  %v1868_v1 = vld [vmem:[%s2349_s1 + $0x140] sm:$0xff] (!%p113_p2)   ;;  %1590 = vmatprep.subr.bf16.mxu0 (!%p113_p2), %v1867_v0  ;;  %v1871_v4 = vld [vmem:[%s2349_s1 + $0x148] sm:$0xff] (!%p113_p2)   ;;  %v1874_v7 = vld [vmem:[%s2349_s1 + $0x150] sm:$0xff] (!%p113_p2)  }
   0x7   : > { %v1869_v2 = vld [vmem:[%s2349_s1 + $0xc0] sm:$0xff] (!%p113_p2)   ;;  %1746 = vmatprep.subr.bf16.mxu1 (!%p113_p2), %v1868_v1  ;;  %v1872_v5 = vld [vmem:[%s2349_s1 + $0xc8] sm:$0xff] (!%p113_p2)   ;;  %v1875_v8 = vld [vmem:[%s2349_s1 + $0xd0] sm:$0xff] (!%p113_p2)  }
   0x8   : > { %1591 = vmatpush3.bf16.msra.mxu0 (!%p113_p2), %v1869_v2  ;;  %1747 = vmatpush3.bf16.msra.mxu1 (!%p113_p2), %v1868_v1  ;;  %v1876_v9 = vld [vmem:[%s2349_s1 + $0x118] sm:$0xff] (!%p113_p2)   ;;  %v1879_v12 = vld [vmem:[%s2349_s1 + $0x120] sm:$0xff] (!%p113_p2)   ;;  %v1882_v15 = vld [vmem:[%s2349_s1 + $0x128] sm:$0xff] (!%p113_p2)  }
   0x9   : > { %1592 = vmatprep.subr.bf16.mxu0 (!%p113_p2), %v1870_v3  ;;  %1748 = vmatprep.subr.bf16.mxu1 (!%p113_p2), %v1871_v4  ;;  %v1877_v10 = vld [vmem:[%s2349_s1 + $0x158] sm:$0xff] (!%p113_p2)   ;;  %v1880_v13 = vld [vmem:[%s2349_s1 + $0x160] sm:$0xff] (!%p113_p2)   ;;  %v1883_v16 = vld [vmem:[%s2349_s1 + $0x168] sm:$0xff] (!%p113_p2)  }
   0xa   : > { %v1878_v11 = vld [vmem:[%s2349_s1 + $0xd8] sm:$0xff] (!%p113_p2)   ;;  %v1881_v14 = vld [vmem:[%s2349_s1 + $0xe0] sm:$0xff] (!%p113_p2)   ;;  %v1884_v17 = vld [vmem:[%s2349_s1 + $0xe8] sm:$0xff] (!%p113_p2)  }
   0xb   : > { %v1885_v18 = vld [vmem:[%s2349_s1 + $0x130] sm:$0xff] (!%p113_p2)   ;;  %v1888_v21 = vld [vmem:[%s2349_s1 + $0x138] sm:$0xff] (!%p113_p2)   ;;  %v1896_v31 = vld [vmem:[%s2349_s1 + $0x40] sm:$0xff] (!%p113_p2)  }
   0xc   : > { %1593 = vmatpush3.bf16.msra.mxu0 (!%p113_p2), %v1872_v5  ;;  %1749 = vmatpush3.bf16.msra.mxu1 (!%p113_p2), %v1871_v4  ;;  %v1886_v19 = vld [vmem:[%s2349_s1 + $0x170] sm:$0xff] (!%p113_p2)   ;;  %v1889_v24 = vld [vmem:[%s2349_s1 + $0x178] sm:$0xff] (!%p113_p2)   ;;  %v1897_v33 = vld [vmem:[%s2349_s1 + $0x80] sm:$0xff] (!%p113_p2)  }
   0xd   : > { %1594 = vmatprep.subr.bf16.mxu0 %v1873_v6  ;;  %1750 = vmatprep.subr.bf16.mxu1 %v1874_v7  ;;  %s2352_s10 = smov (!%p134_p3, %s1375_s10), 1  ;;  %v1887_v20 = vld [vmem:[%s2349_s1 + $0xf0] sm:$0xff]   ;;  %v1890_v28 = vld [vmem:[%s2349_s1 + $0xf8] sm:$0xff]   ;;  %v1899_v36 = vld [vmem:[%s2349_s1] sm:$0xff]  }
   0xe   : > { %s1858_s19 = smul.u32 120, %s2352_s10  ;;  %v1900_v37 = vld [vmem:[%s2349_s1 + $0x48] sm:$0xff]   ;;  %v1905_v43 = vld [vmem:[%s2349_s1 + $0x50] sm:$0xff]   ;;  %v1908_v49 = vld [vmem:[%s2349_s1 + $0x58] sm:$0xff]  }
   0xf   : > { %v1901_v40 = vld [vmem:[%s2349_s1 + $0x88] sm:$0xff]   ;;  %v1906_v44 = vld [vmem:[%s2349_s1 + $0x90] sm:$0xff]   ;;  %v1909_v50 = vld [vmem:[%s2349_s1 + $0x98] sm:$0xff]  }
  0x10   : > { %1595 = vmatpush3.bf16.msra.mxu0 %v1875_v8  ;;  %1751 = vmatpush3.bf16.msra.mxu1 %v1874_v7  ;;  %s2070_s28 = scalar_lea.vmem %s2348_s0, %s1858_s19  ;;  %v1902_v42 = vld [vmem:[%s2349_s1 + $0x8] sm:$0xff]   ;;  %v1907_v45 = vld [vmem:[%s2349_s1 + $0x10] sm:$0xff]   ;;  %v1910_v52 = vld [vmem:[%s2349_s1 + $0x18] sm:$0xff]  }
  0x11   : > { %1596 = vmatprep.subr.bf16.mxu0 %v1876_v9  ;;  %1752 = vmatprep.subr.bf16.mxu1 %v1877_v10  ;;  %v2079_v22 = vld [vmem:[%s2070_s28 + $0xc] sm:$0xff]  ;;  %v2082_v23 = vld [vmem:[%s2070_s28 + $0x18] sm:$0xff]  ;;  %v2090_v26 = vld [vmem:[%s2070_s28 + $0x14] sm:$0xf] }
  0x12   : > { %v1432_v25 = vcombine.high %v2079_v22, %v2082_v23  ;;  %v2093_v27 = vld [vmem:[%s2070_s28 + $0x20] sm:$0xf]  ;;  %v2099_v29 = vld [vmem:[%s2070_s28 + $0x2c] sm:$0xf]  ;;  %v2107_v32 = vld [vmem:[%s2070_s28 + $0x38] sm:$0xf]  ;;  %v1431_v34 = vcombine.low %v2079_v22, %v2082_v23 }
  0x13   : > { %v1433_v30 = vcombine.low %v2090_v26, %v2093_v27  ;;  %v1436_v35 = vcombine.low %v2099_v29, %v2107_v32  ;;  %v2123_v38 = vld [vmem:[%s2070_s28 + $0x24] sm:$0xff]  ;;  %v2126_v39 = vld [vmem:[%s2070_s28 + $0x30] sm:$0xff]  ;;  %v2148_v47 = vld [vmem:[%s2070_s28 + $0x3c] sm:$0xff] }
  0x14   : > { %1597 = vmatpush3.bf16.msra.mxu0 %v1878_v11  ;;  %1753 = vmatpush3.bf16.msra.mxu1 %v1877_v10  ;;  %v1435_v41 = vcombine.high %v2123_v38, %v2126_v39  ;;  %v1434_v46 = vcombine.low %v2123_v38, %v2126_v39  ;;  %v2151_v48 = vld [vmem:[%s2070_s28 + $0x48] sm:$0xff]  ;;  %v1913_v53 = vld [vmem:[%s2349_s1 + $0x60] sm:$0xff]   ;;  %v2175_v57 = vld [vmem:[%s2070_s28 + $0x54] sm:$0xff] }
  0x15   : > { %1598 = vmatprep.subr.bf16.mxu0 %v1879_v12  ;;  %1754 = vmatprep.subr.bf16.mxu1 %v1880_v13  ;;  %v1438_v51 = vcombine.high %v2148_v47, %v2151_v48  ;;  %v1914_v54 = vld [vmem:[%s2349_s1 + $0xa0] sm:$0xff]   ;;  %v146_v55 = vld [vmem:[%s2070_s28 + $0x8] sm:$0xf]  ;;  %v2181_v59 = vld [vmem:[%s2070_s28 + $0x50] sm:$0xf]  ;;  %v1437_v60 = vcombine.low %v2148_v47, %v2151_v48 }
  0x16   : > { %500 = vmatprep.mubr.bf16.mxu0 %v1432_v25  ;;  %1762 = vmatprep.mubr.bf16.mxu1 %v1433_v30  ;;  %v1915_v56 = vld [vmem:[%s2349_s1 + $0x20] sm:$0xff]   ;;  %v1916_v61 = vld [vmem:[%s2349_s1 + $0x68] sm:$0xff]   ;;  %v2197_v1 = vld [vmem:[%s2070_s28 + $0x5c] sm:$0xf]  ;;  %v1469_v5 = vcombine.low %v146_v55, %v2090_v26  ;;  %v2249_v25 = vcombine.high %v2082_v23, %v2123_v38 }
  0x17   : > { %v2178_v58 = vld [vmem:[%s2070_s28 + $0x44] sm:$0xf]  ;;  %v1917_v0 = vld [vmem:[%s2349_s1 + $0xa8] sm:$0xff]   ;;  %v1922_v7 = vld [vmem:[%s2349_s1 + $0x70] sm:$0xff]  }
  0x18   : > { %1599 = vmatpush3.bf16.msra.mxu0 %v1881_v14  ;;  %1755 = vmatpush3.bf16.msra.mxu1 %v1880_v13  ;;  %v2189_v62 = vld [vmem:[%s2070_s28 + $0x60] sm:$0xff]  ;;  %v1439_v63 = vcombine.low %v2178_v58, %v2181_v59  ;;  %v210_v2 = vld [vmem:[%s2070_s28 + $0x68] sm:$0xf]  ;;  %v1923_v8 = vld [vmem:[%s2349_s1 + $0xb0] sm:$0xff]  }
  0x19   : > { %1600 = vmatprep.subr.bf16.mxu0 %v1882_v15  ;;  %1756 = vmatprep.subr.bf16.mxu1 %v1883_v16  ;;  %v1441_v3 = vcombine.high %v2175_v57, %v2189_v62  ;;  %v1442_v4 = vcombine.low %v2197_v1, %v210_v2  ;;  %v1918_v6 = vld [vmem:[%s2349_s1 + $0x28] sm:$0xff]   ;;  %v1925_v9 = vld [vmem:[%s2349_s1 + $0x30] sm:$0xff]   ;;  %v1440_v10 = vcombine.low %v2175_v57, %v2189_v62  ;;  %v145_v11 = vld [vmem:[%s2070_s28] sm:$0xff] }
  0x1a   : > { %v1926_v12 = vld [vmem:[%s2349_s1 + $0x78] sm:$0xff]   ;;  %v1468_v14 = vcombine.high %v145_v11, %v2079_v22  ;;  %v1936_v26 = vld [vmem:[%s2349_s1 + $0x188] sm:$0xff]   ;;  %v1941_v30 = vld [vmem:[%s2349_s1 + $0x190] sm:$0xff]  }
  0x1b   : > { %v1927_v13 = vld [vmem:[%s2349_s1 + $0xb8] sm:$0xff]   ;;  %v1966_v55 = vld [vmem:[%s2070_s28 + $0x68] ss:$12 sps:$4 sm:$0xff]  }
  0x1c   : > { %1601 = vmatpush3.bf16.msra.mxu0 %v1884_v17  ;;  %1757 = vmatpush3.bf16.msra.mxu1 %v1883_v16  ;;  %v1928_v15 = vld [vmem:[%s2349_s1 + $0x38] sm:$0xff]   ;;  %v1931_v16 = vld [vmem:[%s2349_s1 + $0x1c0] sm:$0xff]  }
  0x1d   : > { %1602 = vmatprep.subr.bf16.mxu0 %v1885_v18  ;;  %1758 = vmatprep.subr.bf16.mxu1 %v1886_v19  ;;  %v1932_v17 = vld [vmem:[%s2349_s1 + $0x200] sm:$0xff]   ;;  %v1472_v18 = vcombine.low %v2093_v27, %v2099_v29  ;;  %v1939_v27 = vld [vmem:[%s2349_s1 + $0x1d0] sm:$0xff]   ;;  %v1470_v29 = vcombine.low %v2082_v23, %v2123_v38  ;;  %v1943_v23 = vld [vmem:[%s2349_s1 + $0x218] sm:$0xff]   ;;  %v1473_v38 = vcombine.low %v2126_v39, %v2148_v47 }
  0x20   : > { %1603 = vmatpush3.bf16.msra.mxu0 %v1887_v20  ;;  %1759 = vmatpush3.bf16.msra.mxu1 %v1886_v19  ;;  %v1467_v19 = vcombine.low %v145_v11, %v2079_v22  ;;  %v1933_v20 = vld [vmem:[%s2349_s1 + $0x180] sm:$0xff]   ;;  %v1475_v22 = vcombine.low %v2107_v32, %v2178_v58  ;;  %v1942_v32 = vld [vmem:[%s2349_s1 + $0x1d8] sm:$0xff]  }
  0x21   : > { %1604 = vmatprep.subr.bf16.mxu0 %v1888_v21  ;;  %1760 = vmatprep.subr.bf16.mxu1 %v1889_v24  ;;  %v1934_v21 = vld [vmem:[%s2349_s1 + $0x1c8] sm:$0xff]  }
  0x24   : > { %1605 = vmatpush3.bf16.msra.mxu0 %v1890_v28  ;;  %1761 = vmatpush3.bf16.msra.mxu1 %v1889_v24  ;;  %v1935_v24 = vld [vmem:[%s2349_s1 + $0x208] sm:$0xff]   ;;  %v1940_v28 = vld [vmem:[%s2349_s1 + $0x210] sm:$0xff]  }
  0x25   : > { %1642 = vmatprep.subr.bf16.mxu0 %v1896_v31  ;;  %1770 = vmatprep.subr.bf16.mxu1 %v1897_v33  ;;  %v1478_v31 = vcombine.low %v2181_v59, %v2197_v1 }
  0x27   : > { %501 = vmatmul.mubr.bf16.vlgmr.msra.gmra.mrb[0].mxu0 %v1431_v34  ;;  %1763 = vmatmul.mubr.bf16.vlgmr.msra.gmra.mrb[0].mxu1 %v1436_v35  ;;  %v1944_v34 = vld [vmem:[%s2349_s1 + $0x198] sm:$0xff]   ;;  %v1947_v35 = vld [vmem:[%s2349_s1 + $0x1e0] sm:$0xff]  }
  0x28   : > { %1643 = vmatpush3.bf16.msra.mxu0 %v1899_v36  ;;  %1771 = vmatpush3.bf16.msra.mxu1 %v1897_v33  ;;  %v1474_v33 = vcombine.high %v2126_v39, %v2148_v47  ;;  %v1948_v36 = vld [vmem:[%s2349_s1 + $0x220] sm:$0xff]   ;;  %v915_v39 = vld [vmem:[%s2070_s28 + $0x6c] sm:$0xff] }
  0x29   : > { %1644 = vmatprep.subr.bf16.mxu0 %v1900_v37  ;;  %1772 = vmatprep.subr.bf16.mxu1 %v1901_v40  ;;  %v1963_v37 = vld [vmem:[%s2070_s28 + $0x20] ss:$12 sps:$4 sm:$0xff]   ;;  %v1958_v47 = vld [vmem:[%s2349_s1 + $0x230] sm:$0xff]  }
  0x2a   : > { %508 = vmatprep.mubr.bf16.mxu0 %v1435_v41  ;;  %1766 = vmatprep.mubr.bf16.mxu1 %v1439_v63  ;;  %v1950_v41 = vld [vmem:[%s2349_s1 + $0x1e8] sm:$0xff]  }
  0x2c   : > { %1645 = vmatpush3.bf16.msra.mxu0 %v1902_v42  ;;  %1773 = vmatpush3.bf16.msra.mxu1 %v1901_v40  ;;  %v1949_v40 = vld [vmem:[%s2349_s1 + $0x1a0] sm:$0xff]   ;;  %v1951_v42 = vld [vmem:[%s2349_s1 + $0x228] sm:$0xff]  }
  0x2d   : > { %1646 = vmatprep.subr.bf16.mxu0 %v1905_v43  ;;  %1774 = vmatprep.subr.bf16.mxu1 %v1906_v44  ;;  %v1477_v43 = vcombine.high %v2151_v48, %v2175_v57 }
  0x2f   : > { %509 = vmatmul.mubr.bf16.gmra.mrb[4].mxu0 %v1434_v46  ;;  %1767 = vmatmul.mubr.bf16.gmra.mrb[4].mxu1 %v1442_v4  ;;  %v1957_v46 = vld [vmem:[%s2349_s1 + $0x1f0] sm:$0xff]  }
  0x30   : > { %1647 = vmatpush3.bf16.msra.mxu0 %v1907_v45  ;;  %1775 = vmatpush3.bf16.msra.mxu1 %v1906_v44  ;;  %v1560_v44 = vcombine.low %v2189_v62, %v915_v39  ;;  %v1952_v45 = vld [vmem:[%s2349_s1 + $0x1a8] sm:$0xff]  }
  0x31   : > { %1648 = vmatprep.subr.bf16.mxu0 %v1908_v49  ;;  %1776 = vmatprep.subr.bf16.mxu1 %v1909_v50  ;;  %v1476_v49 = vcombine.low %v2151_v48, %v2175_v57  ;;  %v1962_v48 = vld [vmem:[%s2349_s1 + $0x1b8] sm:$0xff]  }
  0x32   : > { %516 = vmatprep.mubr.bf16.mxu0 %v1438_v51  ;;  %1786 = vmatprep.mubr.bf16.mxu1 %v1469_v5  ;;  %v1960_v51 = vld [vmem:[%s2349_s1 + $0x1f8] sm:$0xff]  }
  0x34   : > { %1649 = vmatpush3.bf16.msra.mxu0 %v1910_v52  ;;  %1777 = vmatpush3.bf16.msra.mxu1 %v1909_v50  ;;  %v1959_v50 = vld [vmem:[%s2349_s1 + $0x1b0] sm:$0xff]   ;;  %v1961_v52 = vld [vmem:[%s2349_s1 + $0x238] sm:$0xff]  }
  0x35   : > { %1650 = vmatprep.subr.bf16.mxu0 %v1913_v53  ;;  %1778 = vmatprep.subr.bf16.mxu1 %v1914_v54  ;;  %v1964_v53 = vld [vmem:[%s2070_s28 + $0x38] ss:$12 sps:$4 sm:$0xff]  }
  0x37   : > { %517 = vmatmul.mubr.bf16.gmra.mrb[8].mxu0 %v1437_v60 }
  0x38   : > { %1651 = vmatpush3.bf16.msra.mxu0 %v1915_v56  ;;  %1779 = vmatpush3.bf16.msra.mxu1 %v1914_v54  ;;  %v1965_v54 = vld [vmem:[%s2070_s28 + $0x50] ss:$12 sps:$4 sm:$0xff]   ;;  %v1561_v56 = vcombine.high %v2189_v62, %v915_v39  ;;  %s1589_s28 = sshll.u32 %s2352_s10, 6 }
  0x39   : > { %1652 = vmatprep.subr.bf16.mxu0 %v1916_v61  ;;  %1780 = vmatprep.subr.bf16.mxu1 %v1917_v0  ;;  %s2335_s7 = scalar_lea.vmem %s2350_s2, %s1589_s28 }
  0x3a   : > { %524 = vmatprep.mubr.bf16.mxu0 %v1441_v3 }
  0x3c   : > { %1653 = vmatpush3.bf16.msra.mxu0 %v1918_v6  ;;  %1781 = vmatpush3.bf16.msra.mxu1 %v1917_v0 }
  0x3d   : > { %1654 = vmatprep.subr.bf16.mxu0 %v1922_v7  ;;  %1782 = vmatprep.subr.bf16.mxu1 %v1923_v8 }
  0x3f   : > { %525 = vmatmul.mubr.bf16.gmra.mrb[12].mxu0 %v1440_v10 }
  0x40   : > { %1655 = vmatpush3.bf16.msra.mxu0 %v1925_v9  ;;  %1783 = vmatpush3.bf16.msra.mxu1 %v1923_v8 }
  0x41   : > { %1656 = vmatprep.subr.bf16.mxu0 %v1926_v12  ;;  %1784 = vmatprep.subr.bf16.mxu1 %v1927_v13 }
  0x42   : > { %803 = vmatprep.mubr.bf16.mxu0 %v1468_v14 }
  0x44   : > { %1657 = vmatpush3.bf16.msra.mxu0 %v1928_v15  ;;  %1785 = vmatpush3.bf16.msra.mxu1 %v1927_v13 }
  0x45   : > { %1694 = vmatprep.subr.bf16.mxu0 %v1931_v16  ;;  %1794 = vmatprep.subr.bf16.mxu1 %v1932_v17 }
  0x47   : > { %804 = vmatmul.mubr.bf16.vlgmr.msra.gmra.mrb[16].mxu0 %v1467_v19  ;;  %1787 = vmatmul.mubr.bf16.vlgmr.msra.gmra.mrb[0].mxu1 %v1472_v18 }
  0x48   : > { %1695 = vmatpush3.bf16.msra.mxu0 %v1933_v20  ;;  %1795 = vmatpush3.bf16.msra.mxu1 %v1932_v17 }
  0x49   : > { %1696 = vmatprep.subr.bf16.mxu0 %v1934_v21  ;;  %1796 = vmatprep.subr.bf16.mxu1 %v1935_v24 }
  0x4a   : > { %811 = vmatprep.mubr.bf16.mxu0 %v2249_v25  ;;  %1790 = vmatprep.mubr.bf16.mxu1 %v1475_v22 }
  0x4c   : > { %1697 = vmatpush3.bf16.msra.mxu0 %v1936_v26  ;;  %1797 = vmatpush3.bf16.msra.mxu1 %v1935_v24 }
  0x4d   : > { %1698 = vmatprep.subr.bf16.mxu0 %v1939_v27  ;;  %1798 = vmatprep.subr.bf16.mxu1 %v1940_v28 }
  0x4f   : > { %812 = vmatmul.mubr.bf16.gmra.mrb[20].mxu0 %v1470_v29  ;;  %1791 = vmatmul.mubr.bf16.gmra.mrb[4].mxu1 %v1478_v31 }
  0x50   : > { %1699 = vmatpush3.bf16.msra.mxu0 %v1941_v30  ;;  %1799 = vmatpush3.bf16.msra.mxu1 %v1940_v28 }
  0x51   : > { %1700 = vmatprep.subr.bf16.mxu0 %v1942_v32  ;;  %1800 = vmatprep.subr.bf16.mxu1 %v1943_v23 }
  0x52   : > { %819 = vmatprep.mubr.bf16.mxu0 %v1474_v33  ;;  %1810 = vmatprep.mubr.bf16.mxu1 %v1963_v37 }
  0x54   : > { %1701 = vmatpush3.bf16.msra.mxu0 %v1944_v34  ;;  %1801 = vmatpush3.bf16.msra.mxu1 %v1943_v23 }
  0x55   : > { %1702 = vmatprep.subr.bf16.mxu0 %v1947_v35  ;;  %1802 = vmatprep.subr.bf16.mxu1 %v1948_v36 }
  0x57   : > { %820 = vmatmul.mubr.bf16.gmra.mrb[24].mxu0 %v1473_v38 }
  0x58   : > { %1703 = vmatpush3.bf16.msra.mxu0 %v1949_v40  ;;  %1803 = vmatpush3.bf16.msra.mxu1 %v1948_v36 }
  0x59   : > { %1704 = vmatprep.subr.bf16.mxu0 %v1950_v41  ;;  %1804 = vmatprep.subr.bf16.mxu1 %v1951_v42 }
  0x5a   : > { %827 = vmatprep.mubr.bf16.mxu0 %v1477_v43 }
  0x5c   : > { %1705 = vmatpush3.bf16.msra.mxu0 %v1952_v45  ;;  %1805 = vmatpush3.bf16.msra.mxu1 %v1951_v42 }
  0x5d   : > { %1706 = vmatprep.subr.bf16.mxu0 %v1957_v46  ;;  %1806 = vmatprep.subr.bf16.mxu1 %v1958_v47 }
  0x5f   : > { %828 = vmatmul.mubr.bf16.gmra.mrb[28].mxu0 %v1476_v49 }
  0x60   : > { %1707 = vmatpush3.bf16.msra.mxu0 %v1959_v50  ;;  %1807 = vmatpush3.bf16.msra.mxu1 %v1958_v47 }
  0x61   : > { %1708 = vmatprep.subr.bf16.mxu0 %v1960_v51  ;;  %1808 = vmatprep.subr.bf16.mxu1 %v1961_v52 }
  0x62   : > { %1206 = vmatprep.mubr.bf16.mxu0 %v2249_v25 }
  0x64   : > { %1709 = vmatpush3.bf16.msra.mxu0 %v1962_v48  ;;  %1809 = vmatpush3.bf16.msra.mxu1 %v1961_v52 }
  0x67   : > { %1207 = vmatmul.mubr.bf16.vlgmr.msra.gmra.mrb[32].mxu0 %v1470_v29  ;;  %1811 = vmatmul.mubr.bf16.vlgmr.msra.gmra.mrb[0].mxu1 %v1964_v53 }
  0x68   : > { %1214 = vmatprep.mubr.bf16.mxu0 %v1474_v33  ;;  %1814 = vmatprep.mubr.bf16.mxu1 %v1965_v54 }
  0x6f   : > { %1215 = vmatmul.mubr.bf16.gmra.mrb[36].mxu0 %v1473_v38  ;;  %1815 = vmatmul.mubr.bf16.gmra.mrb[4].mxu1 %v1966_v55 }
  0x70   : > { %1222 = vmatprep.mubr.bf16.mxu0 %v1477_v43 }
  0x77   : > { %1223 = vmatmul.mubr.bf16.gmra.mrb[40].mxu0 %v1476_v49 }
  0x78   : > { %1230 = vmatprep.mubr.bf16.mxu0 %v1561_v56 }
  0x7f   : > { %1231 = vmatmul.mubr.bf16.gmra.mrb[44].mxu0 %v1560_v44 }
  0xfa   : > { %v1606_v57 = vpop.f32.mrb[0].mxu0 }
  0xfb   : > { %v1607_v58 = vpop.f32.mrb[1].mxu0 }
  0xfc   : > { %v1608_v59 = vadd.f32 %v1607_v58, %v1606_v57  ;;  %v1609_v60 = vpop.f32.mrb[2].mxu0 }
  0xfd   : > { %v1610_v61 = vpop.f32.mrb[3].mxu0 }
  0xfe   : > { %v1611_v63 = vadd.f32 %v1610_v61, %v1609_v60 }
 0x102   : > { %v1612_v0 = vpop.f32.mrb[4].mxu0 }
 0x103   : > { %v1613_v1 = vpop.f32.mrb[5].mxu0 }
 0x104   : > { %v1614_v2 = vadd.f32 %v1613_v1, %v1612_v0  ;;  %v1615_v3 = vpop.f32.mrb[6].mxu0 }
 0x105   : > { %v1616_v4 = vpop.f32.mrb[7].mxu0 }
 0x106   : > { %v1617_v5 = vadd.f32 %v1616_v4, %v1615_v3 }
 0x10a   : > { %v1618_v6 = vpop.f32.mrb[8].mxu0 }
 0x10b   : > { %v1619_v7 = vpop.f32.mrb[9].mxu0 }
 0x10c   : > { %v1620_v8 = vadd.f32 %v1619_v7, %v1618_v6  ;;  %v1621_v9 = vpop.f32.mrb[10].mxu0 }
 0x10d   : > { %v1622_v62 = vpop.f32.mrb[11].mxu0 }
 0x10e   : > { %v1623_v10 = vadd.f32 %v1622_v62, %v1621_v9 }
 0x112   : > { %v1624_v11 = vpop.f32.mrb[12].mxu0 }
 0x113   : > { %v1625_v12 = vpop.f32.mrb[13].mxu0 }
 0x114   : > { %v1626_v13 = vadd.f32 %v1625_v12, %v1624_v11  ;;  %v1627_v14 = vpop.f32.mrb[14].mxu0 }
 0x115   : > { %v1628_v15 = vpop.f32.mrb[15].mxu0 }
 0x116   : > { %v1629_v16 = vadd.f32 %v1628_v15, %v1627_v14 }
 0x11a   : > { %v1658_v17 = vpop.f32.mrb[16].mxu0 }
 0x11b   : > { %v1659_v18 = vpop.f32.mrb[17].mxu0 }
 0x11c   : > { %v1660_v19 = vadd.f32 %v1659_v18, %v1658_v17  ;;  %v1661_v20 = vpop.f32.mrb[18].mxu0 }
 0x11d   : > { %v1662_v21 = vpop.f32.mrb[19].mxu0 }
 0x11e   : > { %v1821_v24 = vadd.f32 %v1660_v19, %v1608_v59  ;;  %v1663_v25 = vadd.f32 %v1662_v21, %v1661_v20 }
 0x120   : > { %v1827_v22 = vadd.f32 %v1663_v25, %v1611_v63 }
 0x122   : > { %v1664_v26 = vpop.f32.mrb[20].mxu0 }
 0x123   : > { %v1665_v27 = vpop.f32.mrb[21].mxu0 }
 0x124   : > { %v1666_v28 = vadd.f32 %v1665_v27, %v1664_v26  ;;  %v1667_v29 = vpop.f32.mrb[22].mxu0 }
 0x125   : > { %v1668_v30 = vpop.f32.mrb[23].mxu0 }
 0x126   : > { %v1818_v31 = vadd.f32 %v1666_v28, %v1614_v2  ;;  %v1669_v32 = vadd.f32 %v1668_v30, %v1667_v29 }
 0x128   : > { %v1824_v23 = vadd.f32 %v1669_v32, %v1617_v5 }
 0x12a   : > { %v1670_v33 = vpop.f32.mrb[24].mxu0 }
 0x12b   : > { %v1671_v34 = vpop.f32.mrb[25].mxu0 }
 0x12c   : > { %v1672_v35 = vadd.f32 %v1671_v34, %v1670_v33  ;;  %v1673_v36 = vpop.f32.mrb[26].mxu0 }
 0x12d   : > { %v1674_v37 = vpop.f32.mrb[27].mxu0 }
 0x12e   : > { %v1833_v38 = vadd.f32 %v1672_v35, %v1620_v8  ;;  %v1675_v40 = vadd.f32 %v1674_v37, %v1673_v36 }
 0x130   : > { %v1839_v41 = vadd.f32 %v1675_v40, %v1623_v10 }
 0x132   : > { %v1676_v42 = vpop.f32.mrb[28].mxu0 }
 0x133   : > { %v1677_v43 = vpop.f32.mrb[29].mxu0 }
 0x134   : > { %v1678_v39 = vadd.f32 %v1677_v43, %v1676_v42  ;;  %v1679_v44 = vpop.f32.mrb[30].mxu0 }
 0x135   : > { %v1680_v45 = vpop.f32.mrb[31].mxu0 }
 0x136   : > { %v1830_v46 = vadd.f32 %v1678_v39, %v1626_v13  ;;  %v1681_v47 = vadd.f32 %v1680_v45, %v1679_v44 }
 0x138   : > { %v1836_v49 = vadd.f32 %v1681_v47, %v1629_v16 }
 0x13a   : > { %v1710_v50 = vpop.f32.mrb[32].mxu0  ;;  %v1812_v51 = vpop.f32.mrb[0].mxu1 }
 0x13b   : > { %v1711_v52 = vpop.f32.mrb[33].mxu0  ;;  %v1273_v48 = vpop.f32.mrb[1].mxu1 }
 0x13c   : > { %v1712_v53 = vadd.f32 %v1711_v52, %v1710_v50  ;;  %v1713_v54 = vpop.f32.mrb[34].mxu0  ;;  %v1813_v55 = vpop.f32.mrb[2].mxu1 }
 0x13d   : > { %v1714_v56 = vpop.f32.mrb[35].mxu0  ;;  %v1276_v57 = vpop.f32.mrb[3].mxu1 }
 0x13e   : > { %v1822_v58 = vadd.f32 %v1821_v24, %v1712_v53  ;;  %v1715_v59 = vadd.f32 %v1714_v56, %v1713_v54 }
 0x140   : > { %v1823_v60 = vadd.f32 %v1822_v58, %v1273_v48  ;;  %v1828_v61 = vadd.f32 %v1827_v22, %v1715_v59 }
 0x142   : > { %1312 = vst [vmem:[%s2335_s7] sm:$0xff] %v1823_v60  ;;  %v1829_v63 = vadd.f32 %v1828_v61, %v1276_v57  ;;  %v1716_v0 = vpop.f32.mrb[36].mxu0  ;;  %v1816_v1 = vpop.f32.mrb[4].mxu1 }
 0x143   : > { %v1717_v2 = vpop.f32.mrb[37].mxu0  ;;  %v1289_v3 = vpop.f32.mrb[5].mxu1 }
 0x144   : > { %1313 = vst [vmem:[%s2335_s7 + $0x8] sm:$0xff] %v1829_v63  ;;  %v1718_v4 = vadd.f32 %v1717_v2, %v1716_v0  ;;  %v1719_v5 = vpop.f32.mrb[38].mxu0  ;;  %v1817_v6 = vpop.f32.mrb[6].mxu1 }
 0x145   : > { %v1720_v7 = vpop.f32.mrb[39].mxu0  ;;  %v1292_v8 = vpop.f32.mrb[7].mxu1 }
 0x146   : > { %v1819_v9 = vadd.f32 %v1818_v31, %v1718_v4  ;;  %v1721_v62 = vadd.f32 %v1720_v7, %v1719_v5 }
 0x148   : > { %v1820_v10 = vadd.f32 %v1819_v9, %v1812_v51  ;;  %v1825_v11 = vadd.f32 %v1824_v23, %v1721_v62 }
 0x14a   : > { %1314 = vst [vmem:[%s2335_s7 + $0x10] sm:$0xff] %v1820_v10  ;;  %v1826_v12 = vadd.f32 %v1825_v11, %v1813_v55  ;;  %v1722_v13 = vpop.f32.mrb[40].mxu0 }
 0x14b   : > { %v1723_v14 = vpop.f32.mrb[41].mxu0 }
 0x14c   : > { %1315 = vst [vmem:[%s2335_s7 + $0x18] sm:$0xff] %v1826_v12  ;;  %v1724_v15 = vadd.f32 %v1723_v14, %v1722_v13  ;;  %v1725_v16 = vpop.f32.mrb[42].mxu0 }
 0x14d   : > { %v1726_v17 = vpop.f32.mrb[43].mxu0 }
 0x14e   : > { %v1834_v18 = vadd.f32 %v1833_v38, %v1724_v15  ;;  %v1727_v19 = vadd.f32 %v1726_v17, %v1725_v16 }
 0x150   : > { %v1835_v20 = vadd.f32 %v1834_v18, %v1289_v3  ;;  %v1840_v21 = vadd.f32 %v1839_v41, %v1727_v19 }
 0x152   : > { %1316 = vst [vmem:[%s2335_s7 + $0x20] sm:$0xff] %v1835_v20  ;;  %v1841_v24 = vadd.f32 %v1840_v21, %v1292_v8  ;;  %v1728_v25 = vpop.f32.mrb[44].mxu0 }
 0x153   : > { %v1729_v22 = vpop.f32.mrb[45].mxu0 }
 0x154   : > { %1317 = vst [vmem:[%s2335_s7 + $0x28] sm:$0xff] %v1841_v24  ;;  %v1730_v26 = vadd.f32 %v1729_v22, %v1728_v25  ;;  %v1731_v27 = vpop.f32.mrb[46].mxu0 }
 0x155   : > { %v1732_v28 = vpop.f32.mrb[47].mxu0 }
 0x156   : > { %v1831_v29 = vadd.f32 %v1830_v46, %v1730_v26  ;;  %v1733_v30 = vadd.f32 %v1732_v28, %v1731_v27 }
 0x158   : > { %v1832_v31 = vadd.f32 %v1831_v29, %v1816_v1  ;;  %v1837_v32 = vadd.f32 %v1836_v49, %v1733_v30 }
 0x15a   : > { %1318 = vst [vmem:[%s2335_s7 + $0x30] sm:$0xff] %v1832_v31  ;;  %v1838_v23 = vadd.f32 %v1837_v32, %v1817_v6 }
 0x15c   : > { %1319 = vst [vmem:[%s2335_s7 + $0x38] sm:$0xff] %v1838_v23 }
 0x15d PF: > { %s12_s9 = sadd.s32 1, %s1975_s9  }
 0x15e   : > { %p9_p4 = scmp.ge.s32.totalorder %s12_s9, 4  }
 0x160   :  { %11 = sbr.rel (!%p9_p4) target bundleno = 1 (0x1), region = 60 }

// kernel: stylization_forward.90
= control target key start
LH: loop header
LB: loop body
LE: loop exit
PB: predicated region body
PF: predicated region fallthrough
CT: control target
= control target key end

     0   :  { %s2204_s9 = smov 0   ;;  %s2668_s0 = inlined_call_operand.vmem [shape: bf16[2,288,256], index: 0, kind: input, shape index: {}]   ;;  %s2669_s1 = inlined_call_operand.vmem [shape: bf16[3,256,128], index: 1, kind: input, shape index: {}]   ;;  %s2670_s2 = inlined_call_operand.vmem [shape: f32[2,256,128], index: 2, kind: output, shape index: {}]  }
   0x1 LB: > { %s1529_s10 = sadd.s32 4294967295, %s2187_s9   ;;  %p1533_p0 = scmp.ge.s32.totalorder %s2187_s9, 1  ;;  %s2187_s9 = sphi %s2204_s9, %s12_s9  }
   0x2   : > { %p112_p1 = scmp.lt.s32.totalorder %s2187_s9, 3 }
   0x4   : > { %p113_p2 = pnand %p1533_p0, %p112_p1 }
   0x5   : > { %v2079_v0 = vld [vmem:[%s2669_s1 + $0xc0] sm:$0xff] (!%p113_p2)   ;;  %v2081_v2 = vld [vmem:[%s2669_s1 + $0xc8] sm:$0xff] (!%p113_p2)   ;;  %p134_p3 = scmp.lt.s32.totalorder (!%p113_p2), %s1529_s10, 1  ;;  %v2083_v4 = vld [vmem:[%s2669_s1 + $0xd0] sm:$0xff] (!%p113_p2)  }
   0x6   : > { %116 = sbr.rel (%p113_p2) target bundleno = 444 (0x1bc), region = 28  ;;  %v2080_v1 = vld [vmem:[%s2669_s1 + $0x80] sm:$0xff] (!%p113_p2)   ;;  %1718 = vmatprep.subr.bf16.mxu0 (!%p113_p2), %v2079_v0  ;;  %2054 = vmatprep.subr.bf16.mxu1 (!%p113_p2), %v2079_v0  ;;  %v2082_v3 = vld [vmem:[%s2669_s1 + $0x88] sm:$0xff] (!%p113_p2)   ;;  %v2084_v5 = vld [vmem:[%s2669_s1 + $0x90] sm:$0xff] (!%p113_p2)  }
   0x7   : > { %1719 = vmatpush3.bf16.msra.mxu0 (!%p113_p2), %v2080_v1  ;;  %2062 = vmatpush3.bf16.msra.mxu1 (!%p113_p2), %v2080_v1  ;;  %v2085_v6 = vld [vmem:[%s2669_s1 + $0xd8] sm:$0xff] (!%p113_p2)   ;;  %v2087_v8 = vld [vmem:[%s2669_s1 + $0xe0] sm:$0xff] (!%p113_p2)   ;;  %v2089_v10 = vld [vmem:[%s2669_s1 + $0xe8] sm:$0xff] (!%p113_p2)  }
   0x8   : > { %1720 = vmatprep.subr.bf16.mxu0 (!%p113_p2), %v2081_v2  ;;  %2055 = vmatprep.subr.bf16.mxu1 (!%p113_p2), %v2081_v2  ;;  %v2086_v7 = vld [vmem:[%s2669_s1 + $0x98] sm:$0xff] (!%p113_p2)   ;;  %v2088_v9 = vld [vmem:[%s2669_s1 + $0xa0] sm:$0xff] (!%p113_p2)   ;;  %v2090_v13 = vld [vmem:[%s2669_s1 + $0xa8] sm:$0xff] (!%p113_p2)  }
   0x9   : > { %v2091_v14 = vld [vmem:[%s2669_s1 + $0xf0] sm:$0xff] (!%p113_p2)   ;;  %v2093_v16 = vld [vmem:[%s2669_s1 + $0xf8] sm:$0xff] (!%p113_p2)   ;;  %v2101_v18 = vld [vmem:[%s2669_s1 + $0x40] sm:$0xff] (!%p113_p2)  }
   0xa   : > { %v2092_v15 = vld [vmem:[%s2669_s1 + $0xb0] sm:$0xff] (!%p113_p2)   ;;  %v2094_v17 = vld [vmem:[%s2669_s1 + $0xb8] sm:$0xff] (!%p113_p2)   ;;  %v2103_v20 = vld [vmem:[%s2669_s1 + $0x140] sm:$0xff] (!%p113_p2)  }
   0xb   : > { %1721 = vmatpush3.bf16.msra.mxu0 (!%p113_p2), %v2082_v3  ;;  %2063 = vmatpush3.bf16.msra.mxu1 (!%p113_p2), %v2082_v3  ;;  %v2102_v22 = vld [vmem:[%s2669_s1] sm:$0xff] (!%p113_p2)   ;;  %v2111_v26 = vld [vmem:[%s2669_s1 + $0x48] sm:$0xff] (!%p113_p2)   ;;  %v2121_v30 = vld [vmem:[%s2669_s1 + $0x50] sm:$0xff] (!%p113_p2)  }
   0xc   : > { %1722 = vmatprep.subr.bf16.mxu0 (!%p113_p2), %v2083_v4  ;;  %2056 = vmatprep.subr.bf16.mxu1 (!%p113_p2), %v2083_v4  ;;  %v2104_v23 = vld [vmem:[%s2669_s1 + $0x100] sm:$0xff] (!%p113_p2)   ;;  %v2112_v27 = vld [vmem:[%s2669_s1 + $0x8] sm:$0xff] (!%p113_p2)   ;;  %v2123_v33 = vld [vmem:[%s2669_s1 + $0x150] sm:$0xff] (!%p113_p2)  }
   0xd   : > { %s2672_s10 = smov (!%p134_p3, %s1529_s10), 1  ;;  %v2113_v28 = vld [vmem:[%s2669_s1 + $0x148] sm:$0xff]   ;;  %v2122_v36 = vld [vmem:[%s2669_s1 + $0x10] sm:$0xff]   ;;  %v2131_v38 = vld [vmem:[%s2669_s1 + $0x58] sm:$0xff]  }
   0xe   : > { %s2070_s25 = smul.u32 288, %s2672_s10  ;;  %v2114_v29 = vld [vmem:[%s2669_s1 + $0x108] sm:$0xff]   ;;  %v2124_v37 = vld [vmem:[%s2669_s1 + $0x110] sm:$0xff]   ;;  %v2133_v39 = vld [vmem:[%s2669_s1 + $0x158] sm:$0xff]  }
   0xf   : > { %1723 = vmatpush3.bf16.msra.mxu0 %v2084_v5  ;;  %2064 = vmatpush3.bf16.msra.mxu1 %v2084_v5  ;;  %v2132_v42 = vld [vmem:[%s2669_s1 + $0x18] sm:$0xff]   ;;  %v2141_v46 = vld [vmem:[%s2669_s1 + $0x60] sm:$0xff]   ;;  %v2151_v52 = vld [vmem:[%s2669_s1 + $0x68] sm:$0xff]  }
  0x10   : > { %1724 = vmatprep.subr.bf16.mxu0 %v2085_v6  ;;  %2057 = vmatprep.subr.bf16.mxu1 %v2085_v6  ;;  %s2245_s4 = scalar_lea.vmem %s2668_s0, %s2070_s25  ;;  %v2134_v43 = vld [vmem:[%s2669_s1 + $0x118] sm:$0xff]   ;;  %v2142_v47 = vld [vmem:[%s2669_s1 + $0x20] sm:$0xff]   ;;  %v2152_v55 = vld [vmem:[%s2669_s1 + $0x28] sm:$0xff]  }
  0x11   : > { %v2254_v11 = vld [vmem:[%s2245_s4 + $0x14] ss:$8 sps:$4 sm:$0xff]   ;;  %v2280_v19 = vld [vmem:[%s2245_s4 + $0x10] ss:$8 sps:$4 sm:$0xff]   ;;  %v2295_v24 = vld [vmem:[%s2245_s4 + $0x24] ss:$8 sps:$4 sm:$0xff]  }
  0x12   : > { %v2257_v12 = vld [vmem:[%s2245_s4 + $0x94] ss:$8 sps:$4 sm:$0xff]   ;;  %532 = vmatprep.mubr.bf16.mxu0 %v2254_v11  ;;  %v2286_v21 = vld [vmem:[%s2245_s4 + $0x90] ss:$8 sps:$4 sm:$0xff]   ;;  %v2298_v25 = vld [vmem:[%s2245_s4 + $0xa4] ss:$8 sps:$4 sm:$0xff]  }
  0x13   : > { %1725 = vmatpush3.bf16.msra.mxu0 %v2086_v7  ;;  %2065 = vmatpush3.bf16.msra.mxu1 %v2086_v7  ;;  %v2320_v31 = vld [vmem:[%s2245_s4 + $0x20] ss:$8 sps:$4 sm:$0xff]   ;;  %v2329_v34 = vld [vmem:[%s2245_s4 + $0x34] ss:$8 sps:$4 sm:$0xff]   ;;  %v2351_v40 = vld [vmem:[%s2245_s4 + $0x30] ss:$8 sps:$4 sm:$0xff]  }
  0x14   : > { %1726 = vmatprep.subr.bf16.mxu0 %v2087_v8  ;;  %2058 = vmatprep.subr.bf16.mxu1 %v2087_v8  ;;  %v2323_v32 = vld [vmem:[%s2245_s4 + $0xa0] ss:$8 sps:$4 sm:$0xff]   ;;  %v2332_v35 = vld [vmem:[%s2245_s4 + $0xb4] ss:$8 sps:$4 sm:$0xff]   ;;  %v2354_v41 = vld [vmem:[%s2245_s4 + $0xb0] ss:$8 sps:$4 sm:$0xff]  }
  0x15   : > { %596 = vmatprep.mubr.bf16.mxu1 %v2257_v12  ;;  %v2363_v44 = vld [vmem:[%s2245_s4 + $0x44] ss:$8 sps:$4 sm:$0xff]   ;;  %v2385_v50 = vld [vmem:[%s2245_s4 + $0x40] ss:$8 sps:$4 sm:$0xff]   ;;  %v2394_v53 = vld [vmem:[%s2245_s4 + $0x54] ss:$8 sps:$4 sm:$0xff]  }
  0x16   : > { %v2366_v45 = vld [vmem:[%s2245_s4 + $0xc4] ss:$8 sps:$4 sm:$0xff]   ;;  %v2388_v51 = vld [vmem:[%s2245_s4 + $0xc0] ss:$8 sps:$4 sm:$0xff]   ;;  %v2397_v54 = vld [vmem:[%s2245_s4 + $0xd4] ss:$8 sps:$4 sm:$0xff]  }
  0x17   : > { %1727 = vmatpush3.bf16.msra.mxu0 %v2088_v9  ;;  %2066 = vmatpush3.bf16.msra.mxu1 %v2088_v9  ;;  %v2143_v48 = vld [vmem:[%s2669_s1 + $0x160] sm:$0xff]   ;;  %v2153_v56 = vld [vmem:[%s2669_s1 + $0x168] sm:$0xff]   ;;  %v2161_v58 = vld [vmem:[%s2669_s1 + $0x70] sm:$0xff]  }
  0x18   : > { %1728 = vmatprep.subr.bf16.mxu0 %v2089_v10  ;;  %2059 = vmatprep.subr.bf16.mxu1 %v2089_v10  ;;  %v2144_v49 = vld [vmem:[%s2669_s1 + $0x120] sm:$0xff]   ;;  %v2154_v57 = vld [vmem:[%s2669_s1 + $0x128] sm:$0xff]   ;;  %v2416_v59 = vld [vmem:[%s2245_s4 + $0x50] ss:$8 sps:$4 sm:$0xff]  }
  0x19   : > { %v2419_v60 = vld [vmem:[%s2245_s4 + $0xd0] ss:$8 sps:$4 sm:$0xff]   ;;  %v2425_v62 = vld [vmem:[%s2245_s4 + $0x64] ss:$8 sps:$4 sm:$0xff]   ;;  %v2149_v6 = vld [vmem:[%s2245_s4 + $0x60] ss:$8 sps:$4 sm:$0xff]  }
  0x1a   : > { %v2162_v61 = vld [vmem:[%s2669_s1 + $0x30] sm:$0xff]   ;;  %v2434_v1 = vld [vmem:[%s2245_s4 + $0xe4] ss:$8 sps:$4 sm:$0xff]   ;;  %v2171_v2 = vld [vmem:[%s2669_s1 + $0x78] sm:$0xff]  }
  0x1b   : > { %1729 = vmatpush3.bf16.msra.mxu0 %v2090_v13  ;;  %2067 = vmatpush3.bf16.msra.mxu1 %v2090_v13  ;;  %v2163_v63 = vld [vmem:[%s2669_s1 + $0x170] sm:$0xff]   ;;  %v2172_v3 = vld [vmem:[%s2669_s1 + $0x38] sm:$0xff]   ;;  %v2454_v7 = vld [vmem:[%s2245_s4 + $0xe0] ss:$8 sps:$4 sm:$0xff]  }
  0x1c   : > { %1730 = vmatprep.subr.bf16.mxu0 %v2091_v14  ;;  %2060 = vmatprep.subr.bf16.mxu1 %v2091_v14  ;;  %v2164_v0 = vld [vmem:[%s2669_s1 + $0x130] sm:$0xff]   ;;  %v2173_v4 = vld [vmem:[%s2669_s1 + $0x178] sm:$0xff]   ;;  %v2165_v14 = vld [vmem:[%s2245_s4 + $0x84] ss:$8 sps:$4 sm:$0xff]  }
  0x1d   : > { %v2174_v5 = vld [vmem:[%s2669_s1 + $0x138] sm:$0xff]  }
  0x1e   : > { %v2155_v8 = vld [vmem:[%s2245_s4 + $0x74] ss:$8 sps:$4 sm:$0xff]   ;;  %v2159_v10 = vld [vmem:[%s2245_s4 + $0x70] ss:$8 sps:$4 sm:$0xff]  }
  0x1f   : > { %1731 = vmatpush3.bf16.msra.mxu0 %v2092_v15  ;;  %2068 = vmatpush3.bf16.msra.mxu1 %v2092_v15  ;;  %v2458_v9 = vld [vmem:[%s2245_s4 + $0xf4] ss:$8 sps:$4 sm:$0xff]   ;;  %v2464_v13 = vld [vmem:[%s2245_s4 + $0xf0] ss:$8 sps:$4 sm:$0xff]   ;;  %v2468_v15 = vld [vmem:[%s2245_s4 + $0x104] ss:$8 sps:$4 sm:$0xff]  }
  0x20   : > { %1732 = vmatprep.subr.bf16.mxu0 %v2093_v16  ;;  %2061 = vmatprep.subr.bf16.mxu1 %v2093_v16  ;;  %v2169_v16 = vld [vmem:[%s2245_s4 + $0x80] ss:$8 sps:$4 sm:$0xff]  }
  0x23   : > { %1733 = vmatpush3.bf16.msra.mxu0 %v2094_v17  ;;  %2069 = vmatpush3.bf16.msra.mxu1 %v2094_v17  ;;  %v2474_v17 = vld [vmem:[%s2245_s4 + $0x100] ss:$8 sps:$4 sm:$0xff]  }
  0x24   : > { %1830 = vmatprep.subr.bf16.mxu1 %v2101_v18  ;;  %1942 = vmatprep.subr.bf16.mxu0 %v2103_v20  ;;  %v2177_v18 = vld [vmem:[%s2245_s4 + $0x4] ss:$8 sps:$4 sm:$0xff]   ;;  %v2175_v20 = vld [vmem:[%s2245_s4] ss:$8 sps:$4 sm:$0xff]  }
  0x26   : > { %533 = vmatmul.mubr.bf16.vlgmr.msra.gmra.mrb[0].mxu0 %v2280_v19  ;;  %597 = vmatmul.mubr.bf16.vlgmr.msra.gmra.mrb[0].mxu1 %v2286_v21 }
  0x27   : > { %1831 = vmatpush3.bf16.msra.mxu1 %v2102_v22  ;;  %1943 = vmatpush3.bf16.msra.mxu0 %v2104_v23 }
  0x28   : > { %540 = vmatprep.mubr.bf16.mxu0 %v2295_v24  ;;  %604 = vmatprep.mubr.bf16.mxu1 %v2298_v25 }
  0x29   : > { %1832 = vmatprep.subr.bf16.mxu1 %v2111_v26  ;;  %1944 = vmatprep.subr.bf16.mxu0 %v2113_v28 }
  0x2b   : > { %1833 = vmatpush3.bf16.msra.mxu1 %v2112_v27  ;;  %1945 = vmatpush3.bf16.msra.mxu0 %v2114_v29 }
  0x2c   : > { %1834 = vmatprep.subr.bf16.mxu1 %v2121_v30  ;;  %1946 = vmatprep.subr.bf16.mxu0 %v2123_v33 }
  0x2e   : > { %541 = vmatmul.mubr.bf16.gmra.mrb[4].mxu0 %v2320_v31  ;;  %605 = vmatmul.mubr.bf16.gmra.mrb[4].mxu1 %v2323_v32 }
  0x2f   : > { %548 = vmatprep.mubr.bf16.mxu0 %v2329_v34  ;;  %612 = vmatprep.mubr.bf16.mxu1 %v2332_v35 }
  0x30   : > { %1835 = vmatpush3.bf16.msra.mxu1 %v2122_v36  ;;  %1947 = vmatpush3.bf16.msra.mxu0 %v2124_v37 }
  0x31   : > { %1836 = vmatprep.subr.bf16.mxu1 %v2131_v38  ;;  %1948 = vmatprep.subr.bf16.mxu0 %v2133_v39 }
  0x34   : > { %1837 = vmatpush3.bf16.msra.mxu1 %v2132_v42  ;;  %1949 = vmatpush3.bf16.msra.mxu0 %v2134_v43 }
  0x35   : > { %1838 = vmatprep.subr.bf16.mxu1 %v2141_v46  ;;  %1950 = vmatprep.subr.bf16.mxu0 %v2143_v48 }
  0x36   : > { %549 = vmatmul.mubr.bf16.gmra.mrb[8].mxu0 %v2351_v40  ;;  %613 = vmatmul.mubr.bf16.gmra.mrb[8].mxu1 %v2354_v41 }
  0x37   : > { %556 = vmatprep.mubr.bf16.mxu0 %v2363_v44  ;;  %620 = vmatprep.mubr.bf16.mxu1 %v2366_v45 }
  0x38   : > { %1839 = vmatpush3.bf16.msra.mxu1 %v2142_v47  ;;  %1951 = vmatpush3.bf16.msra.mxu0 %v2144_v49 }
  0x39   : > { %1840 = vmatprep.subr.bf16.mxu1 %v2151_v52  ;;  %1952 = vmatprep.subr.bf16.mxu0 %v2153_v56 }
  0x3c   : > { %1841 = vmatpush3.bf16.msra.mxu1 %v2152_v55  ;;  %1953 = vmatpush3.bf16.msra.mxu0 %v2154_v57 }
  0x3d   : > { %1842 = vmatprep.subr.bf16.mxu1 %v2161_v58  ;;  %1954 = vmatprep.subr.bf16.mxu0 %v2163_v63 }
  0x3e   : > { %557 = vmatmul.mubr.bf16.gmra.mrb[12].mxu0 %v2385_v50  ;;  %621 = vmatmul.mubr.bf16.gmra.mrb[12].mxu1 %v2388_v51 }
  0x3f   : > { %564 = vmatprep.mubr.bf16.mxu0 %v2394_v53  ;;  %628 = vmatprep.mubr.bf16.mxu1 %v2397_v54 }
  0x40   : > { %1843 = vmatpush3.bf16.msra.mxu1 %v2162_v61  ;;  %1955 = vmatpush3.bf16.msra.mxu0 %v2164_v0 }
  0x41   : > { %1844 = vmatprep.subr.bf16.mxu1 %v2171_v2  ;;  %1956 = vmatprep.subr.bf16.mxu0 %v2173_v4 }
  0x44   : > { %1845 = vmatpush3.bf16.msra.mxu1 %v2172_v3  ;;  %1957 = vmatpush3.bf16.msra.mxu0 %v2174_v5 }
  0x46   : > { %565 = vmatmul.mubr.bf16.gmra.mrb[16].mxu0 %v2416_v59  ;;  %629 = vmatmul.mubr.bf16.gmra.mrb[16].mxu1 %v2419_v60 }
  0x47   : > { %572 = vmatprep.mubr.bf16.mxu0 %v2425_v62  ;;  %636 = vmatprep.mubr.bf16.mxu1 %v2434_v1 }
  0x4e   : > { %573 = vmatmul.mubr.bf16.gmra.mrb[20].mxu0 %v2149_v6  ;;  %637 = vmatmul.mubr.bf16.gmra.mrb[20].mxu1 %v2454_v7 }
  0x4f   : > { %580 = vmatprep.mubr.bf16.mxu0 %v2155_v8  ;;  %644 = vmatprep.mubr.bf16.mxu1 %v2458_v9 }
  0x56   : > { %581 = vmatmul.mubr.bf16.gmra.mrb[24].mxu0 %v2159_v10  ;;  %645 = vmatmul.mubr.bf16.gmra.mrb[24].mxu1 %v2464_v13 }
  0x57   : > { %588 = vmatprep.mubr.bf16.mxu0 %v2165_v14  ;;  %652 = vmatprep.mubr.bf16.mxu1 %v2468_v15 }
  0x5e   : > { %589 = vmatmul.mubr.bf16.gmra.mrb[28].mxu0 %v2169_v16  ;;  %653 = vmatmul.mubr.bf16.gmra.mrb[28].mxu1 %v2474_v17 }
  0x5f   : > { %799 = vmatprep.mubr.bf16.mxu1 %v2177_v18  ;;  %1281 = vmatprep.mubr.bf16.mxu0 %v2295_v24 }
  0x66   : > { %800 = vmatmul.mubr.bf16.vlgmr.msra.gmra.mrb[32].mxu1 %v2175_v20  ;;  %1282 = vmatmul.mubr.bf16.vlgmr.msra.gmra.mrb[32].mxu0 %v2320_v31 }
  0x67   : > { %807 = vmatprep.mubr.bf16.mxu1 %v2254_v11  ;;  %1289 = vmatprep.mubr.bf16.mxu0 %v2329_v34  ;;  %v2178_v11 = vld [vmem:[%s2245_s4 + $0x114] ss:$8 sps:$4 sm:$0xff]  }
  0x6e   : > { %808 = vmatmul.mubr.bf16.gmra.mrb[36].mxu1 %v2280_v19  ;;  %1290 = vmatmul.mubr.bf16.gmra.mrb[36].mxu0 %v2351_v40 }
  0x6f   : > { %815 = vmatprep.mubr.bf16.mxu1 %v2295_v24  ;;  %1297 = vmatprep.mubr.bf16.mxu0 %v2363_v44 }
  0x76   : > { %816 = vmatmul.mubr.bf16.gmra.mrb[40].mxu1 %v2320_v31  ;;  %1298 = vmatmul.mubr.bf16.gmra.mrb[40].mxu0 %v2385_v50 }
  0x77   : > { %823 = vmatprep.mubr.bf16.mxu1 %v2329_v34  ;;  %1305 = vmatprep.mubr.bf16.mxu0 %v2394_v53 }
  0x7e   : > { %824 = vmatmul.mubr.bf16.gmra.mrb[44].mxu1 %v2351_v40  ;;  %1306 = vmatmul.mubr.bf16.gmra.mrb[44].mxu0 %v2416_v59 }
  0x7f   : > { %831 = vmatprep.mubr.bf16.mxu1 %v2363_v44  ;;  %1313 = vmatprep.mubr.bf16.mxu0 %v2425_v62 }
  0x86   : > { %832 = vmatmul.mubr.bf16.gmra.mrb[48].mxu1 %v2385_v50  ;;  %1314 = vmatmul.mubr.bf16.gmra.mrb[48].mxu0 %v2149_v6 }
  0x87   : > { %839 = vmatprep.mubr.bf16.mxu1 %v2394_v53  ;;  %1321 = vmatprep.mubr.bf16.mxu0 %v2155_v8 }
  0x8e   : > { %840 = vmatmul.mubr.bf16.gmra.mrb[52].mxu1 %v2416_v59  ;;  %1322 = vmatmul.mubr.bf16.gmra.mrb[52].mxu0 %v2159_v10 }
  0x8f   : > { %847 = vmatprep.mubr.bf16.mxu1 %v2425_v62  ;;  %1329 = vmatprep.mubr.bf16.mxu0 %v2165_v14 }
  0x96   : > { %848 = vmatmul.mubr.bf16.gmra.mrb[56].mxu1 %v2149_v6  ;;  %1330 = vmatmul.mubr.bf16.gmra.mrb[56].mxu0 %v2169_v16 }
  0x97   : > { %855 = vmatprep.mubr.bf16.mxu1 %v2155_v8  ;;  %1337 = vmatprep.mubr.bf16.mxu0 %v2257_v12 }
  0x9e   : > { %856 = vmatmul.mubr.bf16.gmra.mrb[60].mxu1 %v2159_v10  ;;  %1338 = vmatmul.mubr.bf16.gmra.mrb[60].mxu0 %v2286_v21 }
  0x9f   : > { %863 = vmatprep.mubr.bf16.mxu1 %v2165_v14  ;;  %1345 = vmatprep.mubr.bf16.mxu0 %v2298_v25 }
  0xa6   : > { %864 = vmatmul.mubr.bf16.gmra.mrb[64].mxu1 %v2169_v16  ;;  %1346 = vmatmul.mubr.bf16.gmra.mrb[64].mxu0 %v2323_v32 }
  0xa7   : > { %871 = vmatprep.mubr.bf16.mxu1 %v2257_v12  ;;  %1353 = vmatprep.mubr.bf16.mxu0 %v2332_v35  ;;  %v2180_v12 = vld [vmem:[%s2245_s4 + $0x110] ss:$8 sps:$4 sm:$0xff]   ;;  %s1717_s4 = sshll.u32 %s2672_s10, 8 }
  0xa8   : > { %s2600_s12 = scalar_lea.vmem %s2670_s2, %s1717_s4 }
  0xae   : > { %872 = vmatmul.mubr.bf16.gmra.mrb[68].mxu1 %v2286_v21  ;;  %1354 = vmatmul.mubr.bf16.gmra.mrb[68].mxu0 %v2354_v41 }
  0xaf   : > { %879 = vmatprep.mubr.bf16.mxu1 %v2298_v25  ;;  %1361 = vmatprep.mubr.bf16.mxu0 %v2366_v45 }
  0xb6   : > { %880 = vmatmul.mubr.bf16.gmra.mrb[72].mxu1 %v2323_v32  ;;  %1362 = vmatmul.mubr.bf16.gmra.mrb[72].mxu0 %v2388_v51 }
  0xb7   : > { %887 = vmatprep.mubr.bf16.mxu1 %v2332_v35  ;;  %1369 = vmatprep.mubr.bf16.mxu0 %v2397_v54 }
  0xbe   : > { %888 = vmatmul.mubr.bf16.gmra.mrb[76].mxu1 %v2354_v41  ;;  %1370 = vmatmul.mubr.bf16.gmra.mrb[76].mxu0 %v2419_v60 }
  0xbf   : > { %895 = vmatprep.mubr.bf16.mxu1 %v2366_v45  ;;  %1377 = vmatprep.mubr.bf16.mxu0 %v2434_v1 }
  0xc6   : > { %896 = vmatmul.mubr.bf16.gmra.mrb[80].mxu1 %v2388_v51  ;;  %1378 = vmatmul.mubr.bf16.gmra.mrb[80].mxu0 %v2454_v7 }
  0xc7   : > { %903 = vmatprep.mubr.bf16.mxu1 %v2397_v54  ;;  %1385 = vmatprep.mubr.bf16.mxu0 %v2458_v9 }
  0xce   : > { %904 = vmatmul.mubr.bf16.gmra.mrb[84].mxu1 %v2419_v60  ;;  %1386 = vmatmul.mubr.bf16.gmra.mrb[84].mxu0 %v2464_v13 }
  0xcf   : > { %911 = vmatprep.mubr.bf16.mxu1 %v2434_v1  ;;  %1393 = vmatprep.mubr.bf16.mxu0 %v2468_v15 }
  0xd6   : > { %912 = vmatmul.mubr.bf16.gmra.mrb[88].mxu1 %v2454_v7  ;;  %1394 = vmatmul.mubr.bf16.gmra.mrb[88].mxu0 %v2474_v17 }
  0xd7   : > { %919 = vmatprep.mubr.bf16.mxu1 %v2458_v9  ;;  %1401 = vmatprep.mubr.bf16.mxu0 %v2178_v11 }
  0xde   : > { %920 = vmatmul.mubr.bf16.gmra.mrb[92].mxu1 %v2464_v13  ;;  %1402 = vmatmul.mubr.bf16.gmra.mrb[92].mxu0 %v2180_v12 }
  0xf9   : > { %v1734_v19 = vpop.f32.mrb[0].mxu0  ;;  %v1782_v21 = vpop.f32.mrb[0].mxu1 }
  0xfa   : > { %v1735_v22 = vpop.f32.mrb[1].mxu0  ;;  %v1783_v23 = vpop.f32.mrb[1].mxu1 }
  0xfb   : > { %v2531_v24 = vadd.f32 %v1735_v22, %v1734_v19  ;;  %v2533_v25 = vadd.f32 %v1783_v23, %v1782_v21  ;;  %v1737_v26 = vpop.f32.mrb[2].mxu0  ;;  %v1785_v27 = vpop.f32.mrb[2].mxu1 }
  0xfc   : > { %v1738_v28 = vpop.f32.mrb[3].mxu0  ;;  %v1786_v29 = vpop.f32.mrb[3].mxu1 }
  0xfd   : > { %v2535_v30 = vadd.f32 %v1738_v28, %v1737_v26  ;;  %v2537_v31 = vadd.f32 %v1786_v29, %v1785_v27 }
 0x101   : > { %v1740_v32 = vpop.f32.mrb[4].mxu0  ;;  %v1788_v33 = vpop.f32.mrb[4].mxu1 }
 0x102   : > { %v1741_v34 = vpop.f32.mrb[5].mxu0  ;;  %v1789_v35 = vpop.f32.mrb[5].mxu1 }
 0x103   : > { %v2539_v36 = vadd.f32 %v1741_v34, %v1740_v32  ;;  %v2541_v37 = vadd.f32 %v1789_v35, %v1788_v33  ;;  %v1743_v38 = vpop.f32.mrb[6].mxu0  ;;  %v1791_v39 = vpop.f32.mrb[6].mxu1 }
 0x104   : > { %v1744_v40 = vpop.f32.mrb[7].mxu0  ;;  %v1792_v41 = vpop.f32.mrb[7].mxu1 }
 0x105   : > { %v2543_v42 = vadd.f32 %v1744_v40, %v1743_v38  ;;  %v2545_v43 = vadd.f32 %v1792_v41, %v1791_v39 }
 0x109   : > { %v1746_v44 = vpop.f32.mrb[8].mxu0  ;;  %v1794_v45 = vpop.f32.mrb[8].mxu1 }
 0x10a   : > { %v1747_v46 = vpop.f32.mrb[9].mxu0  ;;  %v1795_v47 = vpop.f32.mrb[9].mxu1 }
 0x10b   : > { %v2547_v48 = vadd.f32 %v1747_v46, %v1746_v44  ;;  %v2549_v49 = vadd.f32 %v1795_v47, %v1794_v45  ;;  %v1749_v50 = vpop.f32.mrb[10].mxu0  ;;  %v1797_v51 = vpop.f32.mrb[10].mxu1 }
 0x10c   : > { %v1750_v52 = vpop.f32.mrb[11].mxu0  ;;  %v1798_v53 = vpop.f32.mrb[11].mxu1 }
 0x10d   : > { %v2551_v54 = vadd.f32 %v1750_v52, %v1749_v50  ;;  %v2553_v55 = vadd.f32 %v1798_v53, %v1797_v51 }
 0x111   : > { %v1752_v56 = vpop.f32.mrb[12].mxu0  ;;  %v1800_v57 = vpop.f32.mrb[12].mxu1 }
 0x112   : > { %v1753_v58 = vpop.f32.mrb[13].mxu0  ;;  %v1801_v59 = vpop.f32.mrb[13].mxu1 }
 0x113   : > { %v2555_v60 = vadd.f32 %v1753_v58, %v1752_v56  ;;  %v2557_v61 = vadd.f32 %v1801_v59, %v1800_v57  ;;  %v1755_v62 = vpop.f32.mrb[14].mxu0  ;;  %v1803_v63 = vpop.f32.mrb[14].mxu1 }
 0x114   : > { %v1756_v0 = vpop.f32.mrb[15].mxu0  ;;  %v1804_v1 = vpop.f32.mrb[15].mxu1 }
 0x115   : > { %v2559_v2 = vadd.f32 %v1756_v0, %v1755_v62  ;;  %v2561_v3 = vadd.f32 %v1804_v1, %v1803_v63 }
 0x119   : > { %v1758_v4 = vpop.f32.mrb[16].mxu0  ;;  %v1806_v5 = vpop.f32.mrb[16].mxu1 }
 0x11a   : > { %v1759_v6 = vpop.f32.mrb[17].mxu0  ;;  %v1807_v7 = vpop.f32.mrb[17].mxu1 }
 0x11b   : > { %v2563_v8 = vadd.f32 %v1759_v6, %v1758_v4  ;;  %v2565_v9 = vadd.f32 %v1807_v7, %v1806_v5  ;;  %v1761_v10 = vpop.f32.mrb[18].mxu0  ;;  %v1809_v13 = vpop.f32.mrb[18].mxu1 }
 0x11c   : > { %v1762_v14 = vpop.f32.mrb[19].mxu0  ;;  %v1810_v15 = vpop.f32.mrb[19].mxu1 }
 0x11d   : > { %v2567_v16 = vadd.f32 %v1762_v14, %v1761_v10  ;;  %v2569_v17 = vadd.f32 %v1810_v15, %v1809_v13 }
 0x121   : > { %v1764_v18 = vpop.f32.mrb[20].mxu0  ;;  %v1812_v20 = vpop.f32.mrb[20].mxu1 }
 0x122   : > { %v1765_v11 = vpop.f32.mrb[21].mxu0  ;;  %v1813_v12 = vpop.f32.mrb[21].mxu1 }
 0x123   : > { %v2571_v19 = vadd.f32 %v1765_v11, %v1764_v18  ;;  %v2573_v21 = vadd.f32 %v1813_v12, %v1812_v20  ;;  %v1767_v22 = vpop.f32.mrb[22].mxu0  ;;  %v1815_v23 = vpop.f32.mrb[22].mxu1 }
 0x124   : > { %v1768_v26 = vpop.f32.mrb[23].mxu0  ;;  %v1816_v27 = vpop.f32.mrb[23].mxu1 }
 0x125   : > { %v2575_v28 = vadd.f32 %v1768_v26, %v1767_v22  ;;  %v2577_v29 = vadd.f32 %v1816_v27, %v1815_v23 }
 0x129   : > { %v1770_v32 = vpop.f32.mrb[24].mxu0  ;;  %v1818_v33 = vpop.f32.mrb[24].mxu1 }
 0x12a   : > { %v1771_v34 = vpop.f32.mrb[25].mxu0  ;;  %v1819_v35 = vpop.f32.mrb[25].mxu1 }
 0x12b   : > { %v2579_v38 = vadd.f32 %v1771_v34, %v1770_v32  ;;  %v2581_v39 = vadd.f32 %v1819_v35, %v1818_v33  ;;  %v1773_v40 = vpop.f32.mrb[26].mxu0  ;;  %v1821_v41 = vpop.f32.mrb[26].mxu1 }
 0x12c   : > { %v1774_v44 = vpop.f32.mrb[27].mxu0  ;;  %v1822_v45 = vpop.f32.mrb[27].mxu1 }
 0x12d   : > { %v2583_v46 = vadd.f32 %v1774_v44, %v1773_v40  ;;  %v2585_v47 = vadd.f32 %v1822_v45, %v1821_v41 }
 0x131   : > { %v1776_v50 = vpop.f32.mrb[28].mxu0  ;;  %v1824_v51 = vpop.f32.mrb[28].mxu1 }
 0x132   : > { %v1777_v52 = vpop.f32.mrb[29].mxu0  ;;  %v1825_v53 = vpop.f32.mrb[29].mxu1 }
 0x133   : > { %v2587_v56 = vadd.f32 %v1777_v52, %v1776_v50  ;;  %v2589_v57 = vadd.f32 %v1825_v53, %v1824_v51  ;;  %v1779_v58 = vpop.f32.mrb[30].mxu0  ;;  %v1827_v59 = vpop.f32.mrb[30].mxu1 }
 0x134   : > { %v1780_v62 = vpop.f32.mrb[31].mxu0  ;;  %v1828_v63 = vpop.f32.mrb[31].mxu1 }
 0x135   : > { %v2591_v0 = vadd.f32 %v1780_v62, %v1779_v58  ;;  %v2593_v1 = vadd.f32 %v1828_v63, %v1827_v59 }
 0x139   : > { %v1846_v4 = vpop.f32.mrb[32].mxu1  ;;  %v1958_v5 = vpop.f32.mrb[32].mxu0 }
 0x13a   : > { %v1847_v6 = vpop.f32.mrb[33].mxu1  ;;  %v1959_v7 = vpop.f32.mrb[33].mxu0 }
 0x13b   : > { %v1848_v10 = vadd.f32 %v1847_v6, %v1846_v4  ;;  %v1960_v13 = vadd.f32 %v1959_v7, %v1958_v5  ;;  %v1849_v14 = vpop.f32.mrb[34].mxu1  ;;  %v1961_v15 = vpop.f32.mrb[34].mxu0 }
 0x13c   : > { %v1850_v18 = vpop.f32.mrb[35].mxu1  ;;  %v1962_v20 = vpop.f32.mrb[35].mxu0 }
 0x13d   : > { %v802_v11 = vadd.f32 %v1848_v10, %v2531_v24  ;;  %v1851_v12 = vadd.f32 %v1850_v18, %v1849_v14  ;;  %v1963_v22 = vadd.f32 %v1962_v20, %v1961_v15 }
 0x13f   : > { %v1410_v23 = vadd.f32 %v1960_v13, %v802_v11  ;;  %v805_v26 = vadd.f32 %v1851_v12, %v2535_v30 }
 0x141   : > { %1442 = vst [vmem:[%s2600_s12] sm:$0xff] %v1410_v23  ;;  %v1411_v27 = vadd.f32 %v1963_v22, %v805_v26  ;;  %v1852_v32 = vpop.f32.mrb[36].mxu1  ;;  %v1964_v33 = vpop.f32.mrb[36].mxu0 }
 0x142   : > { %v1853_v34 = vpop.f32.mrb[37].mxu1  ;;  %v1965_v35 = vpop.f32.mrb[37].mxu0 }
 0x143   : > { %1443 = vst [vmem:[%s2600_s12 + $0x8] sm:$0xff] %v1411_v27  ;;  %v1854_v24 = vadd.f32 %v1853_v34, %v1852_v32  ;;  %v1966_v40 = vadd.f32 %v1965_v35, %v1964_v33  ;;  %v1855_v41 = vpop.f32.mrb[38].mxu1  ;;  %v1967_v44 = vpop.f32.mrb[38].mxu0 }
 0x144   : > { %v1856_v45 = vpop.f32.mrb[39].mxu1  ;;  %v1968_v50 = vpop.f32.mrb[39].mxu0 }
 0x145   : > { %v810_v51 = vadd.f32 %v1854_v24, %v2539_v36  ;;  %v1857_v52 = vadd.f32 %v1856_v45, %v1855_v41  ;;  %v1969_v53 = vadd.f32 %v1968_v50, %v1967_v44 }
 0x147   : > { %v1412_v30 = vadd.f32 %v1966_v40, %v810_v51  ;;  %v813_v58 = vadd.f32 %v1857_v52, %v2543_v42 }
 0x149   : > { %1444 = vst [vmem:[%s2600_s12 + $0x10] sm:$0xff] %v1412_v30  ;;  %v1413_v59 = vadd.f32 %v1969_v53, %v813_v58  ;;  %v1858_v62 = vpop.f32.mrb[40].mxu1  ;;  %v1970_v63 = vpop.f32.mrb[40].mxu0 }
 0x14a   : > { %v1859_v4 = vpop.f32.mrb[41].mxu1  ;;  %v1971_v5 = vpop.f32.mrb[41].mxu0 }
 0x14b   : > { %1445 = vst [vmem:[%s2600_s12 + $0x18] sm:$0xff] %v1413_v59  ;;  %v1860_v6 = vadd.f32 %v1859_v4, %v1858_v62  ;;  %v1972_v7 = vadd.f32 %v1971_v5, %v1970_v63  ;;  %v1861_v10 = vpop.f32.mrb[42].mxu1  ;;  %v1973_v13 = vpop.f32.mrb[42].mxu0 }
 0x14c   : > { %v1862_v14 = vpop.f32.mrb[43].mxu1  ;;  %v1974_v36 = vpop.f32.mrb[43].mxu0 }
 0x14d   : > { %v818_v15 = vadd.f32 %v1860_v6, %v2547_v48  ;;  %v1863_v18 = vadd.f32 %v1862_v14, %v1861_v10  ;;  %v1975_v20 = vadd.f32 %v1974_v36, %v1973_v13 }
 0x14f   : > { %v1414_v42 = vadd.f32 %v1972_v7, %v818_v15  ;;  %v821_v11 = vadd.f32 %v1863_v18, %v2551_v54 }
 0x151   : > { %1446 = vst [vmem:[%s2600_s12 + $0x20] sm:$0xff] %v1414_v42  ;;  %v1415_v12 = vadd.f32 %v1975_v20, %v821_v11  ;;  %v1864_v22 = vpop.f32.mrb[44].mxu1  ;;  %v1976_v23 = vpop.f32.mrb[44].mxu0 }
 0x152   : > { %v1865_v26 = vpop.f32.mrb[45].mxu1  ;;  %v1977_v27 = vpop.f32.mrb[45].mxu0 }
 0x153   : > { %1447 = vst [vmem:[%s2600_s12 + $0x28] sm:$0xff] %v1415_v12  ;;  %v1866_v32 = vadd.f32 %v1865_v26, %v1864_v22  ;;  %v1978_v33 = vadd.f32 %v1977_v27, %v1976_v23  ;;  %v1867_v34 = vpop.f32.mrb[46].mxu1  ;;  %v1979_v35 = vpop.f32.mrb[46].mxu0 }
 0x154   : > { %v1868_v24 = vpop.f32.mrb[47].mxu1  ;;  %v1980_v48 = vpop.f32.mrb[47].mxu0 }
 0x155   : > { %v826_v40 = vadd.f32 %v1866_v32, %v2555_v60  ;;  %v1869_v41 = vadd.f32 %v1868_v24, %v1867_v34  ;;  %v1981_v44 = vadd.f32 %v1980_v48, %v1979_v35 }
 0x157   : > { %v1416_v54 = vadd.f32 %v1978_v33, %v826_v40  ;;  %v829_v45 = vadd.f32 %v1869_v41, %v2559_v2 }
 0x159   : > { %1448 = vst [vmem:[%s2600_s12 + $0x30] sm:$0xff] %v1416_v54  ;;  %v1417_v50 = vadd.f32 %v1981_v44, %v829_v45  ;;  %v1870_v51 = vpop.f32.mrb[48].mxu1  ;;  %v1982_v52 = vpop.f32.mrb[48].mxu0 }
 0x15a   : > { %v1871_v53 = vpop.f32.mrb[49].mxu1  ;;  %v1983_v30 = vpop.f32.mrb[49].mxu0 }
 0x15b   : > { %1449 = vst [vmem:[%s2600_s12 + $0x38] sm:$0xff] %v1417_v50  ;;  %v1872_v58 = vadd.f32 %v1871_v53, %v1870_v51  ;;  %v1984_v59 = vadd.f32 %v1983_v30, %v1982_v52  ;;  %v1873_v62 = vpop.f32.mrb[50].mxu1  ;;  %v1985_v63 = vpop.f32.mrb[50].mxu0 }
 0x15c   : > { %v1874_v4 = vpop.f32.mrb[51].mxu1  ;;  %v1986_v60 = vpop.f32.mrb[51].mxu0 }
 0x15d   : > { %v834_v5 = vadd.f32 %v1872_v58, %v2563_v8  ;;  %v1875_v6 = vadd.f32 %v1874_v4, %v1873_v62  ;;  %v1987_v7 = vadd.f32 %v1986_v60, %v1985_v63 }
 0x15f   : > { %v1418_v2 = vadd.f32 %v1984_v59, %v834_v5  ;;  %v837_v10 = vadd.f32 %v1875_v6, %v2567_v16 }
 0x161   : > { %1450 = vst [vmem:[%s2600_s12 + $0x40] sm:$0xff] %v1418_v2  ;;  %v1419_v13 = vadd.f32 %v1987_v7, %v837_v10  ;;  %v1876_v14 = vpop.f32.mrb[52].mxu1  ;;  %v1988_v36 = vpop.f32.mrb[52].mxu0 }
 0x162   : > { %v1877_v15 = vpop.f32.mrb[53].mxu1  ;;  %v1989_v18 = vpop.f32.mrb[53].mxu0 }
 0x163   : > { %1451 = vst [vmem:[%s2600_s12 + $0x48] sm:$0xff] %v1419_v13  ;;  %v1878_v20 = vadd.f32 %v1877_v15, %v1876_v14  ;;  %v1990_v42 = vadd.f32 %v1989_v18, %v1988_v36  ;;  %v1879_v11 = vpop.f32.mrb[54].mxu1  ;;  %v1991_v12 = vpop.f32.mrb[54].mxu0 }
 0x164   : > { %v1880_v22 = vpop.f32.mrb[55].mxu1  ;;  %v1992_v8 = vpop.f32.mrb[55].mxu0 }
 0x165   : > { %v842_v23 = vadd.f32 %v1878_v20, %v2571_v19  ;;  %v1881_v26 = vadd.f32 %v1880_v22, %v1879_v11  ;;  %v1993_v27 = vadd.f32 %v1992_v8, %v1991_v12 }
 0x167   : > { %v1420_v16 = vadd.f32 %v1990_v42, %v842_v23  ;;  %v845_v32 = vadd.f32 %v1881_v26, %v2575_v28 }
 0x169   : > { %1452 = vst [vmem:[%s2600_s12 + $0x50] sm:$0xff] %v1420_v16  ;;  %v1421_v33 = vadd.f32 %v1993_v27, %v845_v32  ;;  %v1882_v34 = vpop.f32.mrb[56].mxu1  ;;  %v1994_v35 = vpop.f32.mrb[56].mxu0 }
 0x16a   : > { %v1883_v24 = vpop.f32.mrb[57].mxu1  ;;  %v1995_v48 = vpop.f32.mrb[57].mxu0 }
 0x16b   : > { %1453 = vst [vmem:[%s2600_s12 + $0x58] sm:$0xff] %v1421_v33  ;;  %v1884_v40 = vadd.f32 %v1883_v24, %v1882_v34  ;;  %v1996_v41 = vadd.f32 %v1995_v48, %v1994_v35  ;;  %v1885_v44 = vpop.f32.mrb[58].mxu1  ;;  %v1997_v54 = vpop.f32.mrb[58].mxu0 }
 0x16c   : > { %v1886_v45 = vpop.f32.mrb[59].mxu1  ;;  %v1998_v19 = vpop.f32.mrb[59].mxu0 }
 0x16d   : > { %v850_v50 = vadd.f32 %v1884_v40, %v2579_v38  ;;  %v1887_v51 = vadd.f32 %v1886_v45, %v1885_v44  ;;  %v1999_v52 = vadd.f32 %v1998_v19, %v1997_v54 }
 0x16f   : > { %v1422_v28 = vadd.f32 %v1996_v41, %v850_v50  ;;  %v853_v53 = vadd.f32 %v1887_v51, %v2583_v46 }
 0x171   : > { %1454 = vst [vmem:[%s2600_s12 + $0x60] sm:$0xff] %v1422_v28  ;;  %v1423_v30 = vadd.f32 %v1999_v52, %v853_v53  ;;  %v1888_v58 = vpop.f32.mrb[60].mxu1  ;;  %v2000_v59 = vpop.f32.mrb[60].mxu0 }
 0x172   : > { %v1889_v62 = vpop.f32.mrb[61].mxu1  ;;  %v2001_v63 = vpop.f32.mrb[61].mxu0 }
 0x173   : > { %1455 = vst [vmem:[%s2600_s12 + $0x68] sm:$0xff] %v1423_v30  ;;  %v1890_v4 = vadd.f32 %v1889_v62, %v1888_v58  ;;  %v2002_v60 = vadd.f32 %v2001_v63, %v2000_v59  ;;  %v1891_v5 = vpop.f32.mrb[62].mxu1  ;;  %v2003_v6 = vpop.f32.mrb[62].mxu0 }
 0x174   : > { %v1892_v7 = vpop.f32.mrb[63].mxu1  ;;  %v2004_v38 = vpop.f32.mrb[63].mxu0 }
 0x175   : > { %v858_v2 = vadd.f32 %v1890_v4, %v2587_v56  ;;  %v1893_v10 = vadd.f32 %v1892_v7, %v1891_v5  ;;  %v2005_v13 = vadd.f32 %v2004_v38, %v2003_v6 }
 0x177   : > { %v1424_v46 = vadd.f32 %v2002_v60, %v858_v2  ;;  %v861_v14 = vadd.f32 %v1893_v10, %v2591_v0 }
 0x179   : > { %1456 = vst [vmem:[%s2600_s12 + $0x70] sm:$0xff] %v1424_v46  ;;  %v1425_v36 = vadd.f32 %v2005_v13, %v861_v14  ;;  %v1894_v15 = vpop.f32.mrb[64].mxu1  ;;  %v2006_v18 = vpop.f32.mrb[64].mxu0 }
 0x17a   : > { %v1895_v20 = vpop.f32.mrb[65].mxu1  ;;  %v2007_v42 = vpop.f32.mrb[65].mxu0 }
 0x17b   : > { %1457 = vst [vmem:[%s2600_s12 + $0x78] sm:$0xff] %v1425_v36  ;;  %v1896_v11 = vadd.f32 %v1895_v20, %v1894_v15  ;;  %v2008_v12 = vadd.f32 %v2007_v42, %v2006_v18  ;;  %v1897_v22 = vpop.f32.mrb[66].mxu1  ;;  %v2009_v8 = vpop.f32.mrb[66].mxu0 }
 0x17c   : > { %v1898_v23 = vpop.f32.mrb[67].mxu1  ;;  %v2010_v56 = vpop.f32.mrb[67].mxu0 }
 0x17d   : > { %v866_v26 = vadd.f32 %v1896_v11, %v2533_v25  ;;  %v1899_v27 = vadd.f32 %v1898_v23, %v1897_v22  ;;  %v2011_v16 = vadd.f32 %v2010_v56, %v2009_v8 }
 0x17f   : > { %v1426_v0 = vadd.f32 %v2008_v12, %v866_v26  ;;  %v869_v32 = vadd.f32 %v1899_v27, %v2537_v31 }
 0x181   : > { %1458 = vst [vmem:[%s2600_s12 + $0x80] sm:$0xff] %v1426_v0  ;;  %v1427_v33 = vadd.f32 %v2011_v16, %v869_v32  ;;  %v1900_v34 = vpop.f32.mrb[68].mxu1  ;;  %v2012_v35 = vpop.f32.mrb[68].mxu0 }
 0x182   : > { %v1901_v24 = vpop.f32.mrb[69].mxu1  ;;  %v2013_v48 = vpop.f32.mrb[69].mxu0 }
 0x183   : > { %1459 = vst [vmem:[%s2600_s12 + $0x88] sm:$0xff] %v1427_v33  ;;  %v1902_v40 = vadd.f32 %v1901_v24, %v1900_v34  ;;  %v2014_v41 = vadd.f32 %v2013_v48, %v2012_v35  ;;  %v1903_v44 = vpop.f32.mrb[70].mxu1  ;;  %v2015_v54 = vpop.f32.mrb[70].mxu0 }
 0x184   : > { %v1904_v45 = vpop.f32.mrb[71].mxu1  ;;  %v2016_v25 = vpop.f32.mrb[71].mxu0 }
 0x185   : > { %v874_v19 = vadd.f32 %v1902_v40, %v2541_v37  ;;  %v1905_v50 = vadd.f32 %v1904_v45, %v1903_v44  ;;  %v2017_v51 = vadd.f32 %v2016_v25, %v2015_v54 }
 0x187   : > { %v1428_v31 = vadd.f32 %v2014_v41, %v874_v19  ;;  %v877_v52 = vadd.f32 %v1905_v50, %v2545_v43 }
 0x189   : > { %1460 = vst [vmem:[%s2600_s12 + $0x90] sm:$0xff] %v1428_v31  ;;  %v1429_v28 = vadd.f32 %v2017_v51, %v877_v52  ;;  %v1906_v53 = vpop.f32.mrb[72].mxu1  ;;  %v2018_v30 = vpop.f32.mrb[72].mxu0 }
 0x18a   : > { %v1907_v58 = vpop.f32.mrb[73].mxu1  ;;  %v2019_v59 = vpop.f32.mrb[73].mxu0 }
 0x18b   : > { %1461 = vst [vmem:[%s2600_s12 + $0x98] sm:$0xff] %v1429_v28  ;;  %v1908_v62 = vadd.f32 %v1907_v58, %v1906_v53  ;;  %v2020_v63 = vadd.f32 %v2019_v59, %v2018_v30  ;;  %v1909_v4 = vpop.f32.mrb[74].mxu1  ;;  %v2021_v60 = vpop.f32.mrb[74].mxu0 }
 0x18c   : > { %v1910_v5 = vpop.f32.mrb[75].mxu1  ;;  %v2022_v37 = vpop.f32.mrb[75].mxu0 }
 0x18d   : > { %v882_v6 = vadd.f32 %v1908_v62, %v2549_v49  ;;  %v1911_v7 = vadd.f32 %v1910_v5, %v1909_v4  ;;  %v2023_v38 = vadd.f32 %v2022_v37, %v2021_v60 }
 0x18f   : > { %v1430_v43 = vadd.f32 %v2020_v63, %v882_v6  ;;  %v885_v2 = vadd.f32 %v1911_v7, %v2553_v55 }
 0x191   : > { %1462 = vst [vmem:[%s2600_s12 + $0xa0] sm:$0xff] %v1430_v43  ;;  %v1431_v10 = vadd.f32 %v2023_v38, %v885_v2  ;;  %v1912_v13 = vpop.f32.mrb[76].mxu1  ;;  %v2024_v46 = vpop.f32.mrb[76].mxu0 }
 0x192   : > { %v1913_v14 = vpop.f32.mrb[77].mxu1  ;;  %v2025_v36 = vpop.f32.mrb[77].mxu0 }
 0x193   : > { %1463 = vst [vmem:[%s2600_s12 + $0xa8] sm:$0xff] %v1431_v10  ;;  %v1914_v15 = vadd.f32 %v1913_v14, %v1912_v13  ;;  %v2026_v18 = vadd.f32 %v2025_v36, %v2024_v46  ;;  %v1915_v20 = vpop.f32.mrb[78].mxu1  ;;  %v2027_v42 = vpop.f32.mrb[78].mxu0 }
 0x194   : > { %v1916_v11 = vpop.f32.mrb[79].mxu1  ;;  %v2028_v49 = vpop.f32.mrb[79].mxu0 }
 0x195   : > { %v890_v12 = vadd.f32 %v1914_v15, %v2557_v61  ;;  %v1917_v22 = vadd.f32 %v1916_v11, %v1915_v20  ;;  %v2029_v8 = vadd.f32 %v2028_v49, %v2027_v42 }
 0x197   : > { %v1432_v55 = vadd.f32 %v2026_v18, %v890_v12  ;;  %v893_v23 = vadd.f32 %v1917_v22, %v2561_v3 }
 0x199   : > { %1464 = vst [vmem:[%s2600_s12 + $0xb0] sm:$0xff] %v1432_v55  ;;  %v1433_v56 = vadd.f32 %v2029_v8, %v893_v23  ;;  %v1918_v26 = vpop.f32.mrb[80].mxu1  ;;  %v2030_v27 = vpop.f32.mrb[80].mxu0 }
 0x19a   : > { %v1919_v16 = vpop.f32.mrb[81].mxu1  ;;  %v2031_v0 = vpop.f32.mrb[81].mxu0 }
 0x19b   : > { %1465 = vst [vmem:[%s2600_s12 + $0xb8] sm:$0xff] %v1433_v56  ;;  %v1920_v32 = vadd.f32 %v1919_v16, %v1918_v26  ;;  %v2032_v33 = vadd.f32 %v2031_v0, %v2030_v27  ;;  %v1921_v34 = vpop.f32.mrb[82].mxu1  ;;  %v2033_v35 = vpop.f32.mrb[82].mxu0 }
 0x19c   : > { %v1922_v24 = vpop.f32.mrb[83].mxu1  ;;  %v2034_v61 = vpop.f32.mrb[83].mxu0 }
 0x19d   : > { %v898_v48 = vadd.f32 %v1920_v32, %v2565_v9  ;;  %v1923_v40 = vadd.f32 %v1922_v24, %v1921_v34  ;;  %v2035_v41 = vadd.f32 %v2034_v61, %v2033_v35 }
 0x19f   : > { %v1434_v3 = vadd.f32 %v2032_v33, %v898_v48  ;;  %v901_v44 = vadd.f32 %v1923_v40, %v2569_v17 }
 0x1a1   : > { %1466 = vst [vmem:[%s2600_s12 + $0xc0] sm:$0xff] %v1434_v3  ;;  %v1435_v54 = vadd.f32 %v2035_v41, %v901_v44  ;;  %v1924_v45 = vpop.f32.mrb[84].mxu1  ;;  %v2036_v25 = vpop.f32.mrb[84].mxu0 }
 0x1a2   : > { %v1925_v19 = vpop.f32.mrb[85].mxu1  ;;  %v2037_v50 = vpop.f32.mrb[85].mxu0 }
 0x1a3   : > { %1467 = vst [vmem:[%s2600_s12 + $0xc8] sm:$0xff] %v1435_v54  ;;  %v1926_v51 = vadd.f32 %v1925_v19, %v1924_v45  ;;  %v2038_v31 = vadd.f32 %v2037_v50, %v2036_v25  ;;  %v1927_v52 = vpop.f32.mrb[86].mxu1  ;;  %v2039_v28 = vpop.f32.mrb[86].mxu0 }
 0x1a4   : > { %v1928_v53 = vpop.f32.mrb[87].mxu1  ;;  %v2040_v9 = vpop.f32.mrb[87].mxu0 }
 0x1a5   : > { %v906_v30 = vadd.f32 %v1926_v51, %v2573_v21  ;;  %v1929_v58 = vadd.f32 %v1928_v53, %v1927_v52  ;;  %v2041_v59 = vadd.f32 %v2040_v9, %v2039_v28 }
 0x1a7   : > { %v1436_v17 = vadd.f32 %v2038_v31, %v906_v30  ;;  %v909_v62 = vadd.f32 %v1929_v58, %v2577_v29 }
 0x1a9   : > { %1468 = vst [vmem:[%s2600_s12 + $0xd0] sm:$0xff] %v1436_v17  ;;  %v1437_v63 = vadd.f32 %v2041_v59, %v909_v62  ;;  %v1930_v4 = vpop.f32.mrb[88].mxu1  ;;  %v2042_v60 = vpop.f32.mrb[88].mxu0 }
 0x1aa   : > { %v1931_v5 = vpop.f32.mrb[89].mxu1  ;;  %v2043_v37 = vpop.f32.mrb[89].mxu0 }
 0x1ab   : > { %1469 = vst [vmem:[%s2600_s12 + $0xd8] sm:$0xff] %v1437_v63  ;;  %v1932_v6 = vadd.f32 %v1931_v5, %v1930_v4  ;;  %v2044_v7 = vadd.f32 %v2043_v37, %v2042_v60  ;;  %v1933_v38 = vpop.f32.mrb[90].mxu1  ;;  %v2045_v43 = vpop.f32.mrb[90].mxu0 }
 0x1ac   : > { %v1934_v2 = vpop.f32.mrb[91].mxu1  ;;  %v2046_v21 = vpop.f32.mrb[91].mxu0 }
 0x1ad   : > { %v914_v10 = vadd.f32 %v1932_v6, %v2581_v39  ;;  %v1935_v13 = vadd.f32 %v1934_v2, %v1933_v38  ;;  %v2047_v46 = vadd.f32 %v2046_v21, %v2045_v43 }
 0x1af   : > { %v1438_v29 = vadd.f32 %v2044_v7, %v914_v10  ;;  %v917_v14 = vadd.f32 %v1935_v13, %v2585_v47 }
 0x1b1   : > { %1470 = vst [vmem:[%s2600_s12 + $0xe0] sm:$0xff] %v1438_v29  ;;  %v1439_v36 = vadd.f32 %v2047_v46, %v917_v14  ;;  %v1936_v15 = vpop.f32.mrb[92].mxu1  ;;  %v2048_v18 = vpop.f32.mrb[92].mxu0 }
 0x1b2   : > { %v1937_v20 = vpop.f32.mrb[93].mxu1  ;;  %v2049_v42 = vpop.f32.mrb[93].mxu0 }
 0x1b3   : > { %1471 = vst [vmem:[%s2600_s12 + $0xe8] sm:$0xff] %v1439_v36  ;;  %v1938_v11 = vadd.f32 %v1937_v20, %v1936_v15  ;;  %v2050_v49 = vadd.f32 %v2049_v42, %v2048_v18  ;;  %v1939_v12 = vpop.f32.mrb[94].mxu1  ;;  %v2051_v22 = vpop.f32.mrb[94].mxu0 }
 0x1b4   : > { %v1940_v8 = vpop.f32.mrb[95].mxu1  ;;  %v2052_v39 = vpop.f32.mrb[95].mxu0 }
 0x1b5   : > { %v922_v55 = vadd.f32 %v1938_v11, %v2589_v57  ;;  %v1941_v23 = vadd.f32 %v1940_v8, %v1939_v12  ;;  %v2053_v56 = vadd.f32 %v2052_v39, %v2051_v22 }
 0x1b7   : > { %v1440_v47 = vadd.f32 %v2050_v49, %v922_v55  ;;  %v925_v26 = vadd.f32 %v1941_v23, %v2593_v1 }
 0x1b9   : > { %1472 = vst [vmem:[%s2600_s12 + $0xf0] sm:$0xff] %v1440_v47  ;;  %v1441_v27 = vadd.f32 %v2053_v56, %v925_v26 }
 0x1bb   : > { %1473 = vst [vmem:[%s2600_s12 + $0xf8] sm:$0xff] %v1441_v27 }
 0x1bc PF: > { %s12_s9 = sadd.s32 1, %s2187_s9  }
 0x1bd   : > { %p9_p4 = scmp.ge.s32.totalorder %s12_s9, 4  }
 0x1bf   :  { %11 = sbr.rel (!%p9_p4) target bundleno = 1 (0x1), region = 60 }

// kernel: stylization_forward.95
= control target key start
LH: loop header
LB: loop body
LE: loop exit
PB: predicated region body
PF: predicated region fallthrough
CT: control target
= control target key end

     0   :  { %s789_s15 = smov 0   ;;  %s791_s16 = smov 0   ;;  %s1135_s0 = inlined_call_operand.vmem [shape: f32[2,256,128], index: 0, kind: input, shape index: {}]   ;;  %s1136_s1 = inlined_call_operand.vmem [shape: f32[2,8,128], index: 1, kind: input, shape index: {}]   ;;  %s1137_s2 = inlined_call_operand.vmem [shape: f32[1,128], index: 2, kind: input, shape index: {}]   ;;  %s1138_s3 = inlined_call_operand.vmem [shape: f32[1,128], index: 3, kind: input, shape index: {}]   ;;  %s1139_s4 = inlined_call_operand.vmem [shape: f32[2,256,128], index: 4, kind: output, shape index: {}]  }
   0x1   :  { %s793_s17 = smov 0  }
   0x2 LB: > { %s26_s18 = sadd.s32 1, %s758_s16  ;;  %p639_p0 = scmp.ge.s32.totalorder %s762_s17, 1  ;;  %s762_s17 = sphi %s793_s17, %s14_s17   ;;  %s758_s16 = sphi %s791_s16, %s1141_s16   ;;  %s754_s15 = sphi %s789_s15, %s1140_s15  }
   0x3   : > { %p28_p1 = scmp.ge.s32.totalorder %s26_s18, 2  ;;  %p192_p2 = scmp.lt.s32.totalorder %s762_s17, 3 }
   0x5   : > { %s1143_s18 = smov (%p28_p1, %s26_s18), 0  ;;  %p193_p3 = pnand %p639_p0, %p192_p2 }
   0x6   : > { %p231_p4 = scmp.lt.s32.totalorder (!%p193_p3), %s754_s15, 1  ;;  %v297_v4 = vlaneseq (!%p193_p3)  ;;  %v295_v22 = vld [vmem:[%s1137_s2] sm:$0x1] (!%p193_p3) }
   0x7   : > { %196 = sbr.rel (%p193_p3) target bundleno = 94 (0x5e), region = 36 }
   0x8   : > { %v298_v7 = vshrl.u32 (!%p193_p3), %v297_v4, 7 }
   0xa   : > { %v299_v10 = vsub.s32 (!%p193_p3), 0, %v298_v7 }
   0xe   : > { %s1145_s15 = smov (!%p231_p4, %s754_s15), 1 }
   0xf   : > { %s642_s19 = sshll.u32 %s1145_s15, 3  ;;  %s648_s23 = sshll.u32 %s1145_s15, 8 }
  0x10   : > { %s243_s22 = scalar_lea.vmem %s1136_s1, %s642_s19  ;;  %s819_s26 = scalar_lea.vmem %s1135_s0, %s648_s23 }
  0x11   : > { %v286_v0 = vld [vmem:[%s243_s22] sm:$0x1]  ;;  %v288_v1 = vld [vmem:[%s243_s22 + $0x1] sm:$0x1]  ;;  %v827_v13 = vld [vmem:[%s819_s26 + $0x8] sm:$0xff]  ;;  %s1057_s7 = scalar_lea.vmem %s1139_s4, %s648_s23 }
  0x12   : > { %v287_v2 = vmul.f32 0.00390625, %v286_v0  ;;  %v289_v3 = vmul.f32 0.00390625, %v288_v1  ;;  %v822_v11 = vld [vmem:[%s819_s26] sm:$0xff]  ;;  %v830_v14 = vld [vmem:[%s819_s26 + $0x10] sm:$0xff]  ;;  %v833_v15 = vld [vmem:[%s819_s26 + $0x18] sm:$0xff] }
  0x13   : > { %v836_v16 = vld [vmem:[%s819_s26 + $0x20] sm:$0xff]  ;;  %v839_v17 = vld [vmem:[%s819_s26 + $0x28] sm:$0xff]  ;;  %v842_v18 = vld [vmem:[%s819_s26 + $0x30] sm:$0xff] }
  0x14   : > { %v290_v5 = vmul.f32 %v287_v2, %v287_v2  ;;  %v824_v12 = vrot.slane %v287_v2, %v299_v10  ;;  %v845_v19 = vld [vmem:[%s819_s26 + $0x38] sm:$0xff]  ;;  %v848_v20 = vld [vmem:[%s819_s26 + $0x40] sm:$0xff]  ;;  %v851_v21 = vld [vmem:[%s819_s26 + $0x48] sm:$0xff] }
  0x15   : > { %v857_v23 = vld [vmem:[%s819_s26 + $0x50] sm:$0xff]  ;;  %v860_v24 = vld [vmem:[%s819_s26 + $0x58] sm:$0xff]  ;;  %v863_v25 = vld [vmem:[%s819_s26 + $0x60] sm:$0xff] }
  0x16   : > { %v291_v6 = vsub.f32 %v289_v3, %v290_v5  ;;  %v301_v26 = vsub.f32 %v822_v11, %v824_v12  ;;  %v302_v27 = vsub.f32 %v827_v13, %v824_v12  ;;  %v870_v28 = vld [vmem:[%s819_s26 + $0x68] sm:$0xff]  ;;  %v873_v29 = vld [vmem:[%s819_s26 + $0x70] sm:$0xff]  ;;  %v876_v30 = vld [vmem:[%s819_s26 + $0x78] sm:$0xff]  ;;  %v303_v31 = vsub.f32 %v830_v14, %v824_v12 }
  0x17   : > { %v304_v32 = vsub.f32 %v833_v15, %v824_v12  ;;  %v305_v33 = vsub.f32 %v836_v16, %v824_v12  ;;  %v306_v34 = vsub.f32 %v839_v17, %v824_v12  ;;  %v887_v35 = vld [vmem:[%s819_s26 + $0x80] sm:$0xff]  ;;  %v890_v36 = vld [vmem:[%s819_s26 + $0x88] sm:$0xff]  ;;  %v893_v37 = vld [vmem:[%s819_s26 + $0x90] sm:$0xff]  ;;  %v307_v38 = vsub.f32 %v842_v18, %v824_v12 }
  0x18   : > { %v292_v8 = vmax.f32 %v291_v6, 0.0  ;;  %v308_v39 = vsub.f32 %v845_v19, %v824_v12  ;;  %v309_v40 = vsub.f32 %v848_v20, %v824_v12  ;;  %v310_v41 = vsub.f32 %v851_v21, %v824_v12  ;;  %v904_v42 = vld [vmem:[%s819_s26 + $0x98] sm:$0xff]  ;;  %v907_v43 = vld [vmem:[%s819_s26 + $0xa0] sm:$0xff]  ;;  %v910_v44 = vld [vmem:[%s819_s26 + $0xa8] sm:$0xff] }
  0x19   : > { %v311_v46 = vsub.f32 %v857_v23, %v824_v12  ;;  %v312_v47 = vsub.f32 %v860_v24, %v824_v12  ;;  %v313_v48 = vsub.f32 %v863_v25, %v824_v12  ;;  %v314_v49 = vsub.f32 %v870_v28, %v824_v12  ;;  %v921_v50 = vld [vmem:[%s819_s26 + $0xb0] sm:$0xff]  ;;  %v924_v51 = vld [vmem:[%s819_s26 + $0xb8] sm:$0xff]  ;;  %v927_v52 = vld [vmem:[%s819_s26 + $0xc0] sm:$0xff] }
  0x1a   : > { %v293_v9 = vadd.f32 1e-05, %v292_v8  ;;  %v315_v54 = vsub.f32 %v873_v29, %v824_v12  ;;  %v316_v55 = vsub.f32 %v876_v30, %v824_v12  ;;  %v317_v56 = vsub.f32 %v887_v35, %v824_v12  ;;  %v936_v57 = vld [vmem:[%s819_s26 + $0xc8] sm:$0xff]  ;;  %v939_v58 = vld [vmem:[%s819_s26 + $0xd0] sm:$0xff]  ;;  %v942_v59 = vld [vmem:[%s819_s26 + $0xd8] sm:$0xff] }
  0x1b   : > { %v318_v60 = vsub.f32 %v890_v36, %v824_v12  ;;  %v319_v61 = vsub.f32 %v893_v37, %v824_v12  ;;  %v320_v62 = vsub.f32 %v904_v42, %v824_v12  ;;  %v321_v63 = vsub.f32 %v907_v43, %v824_v12  ;;  %v961_v4 = vld [vmem:[%s819_s26 + $0xe0] sm:$0xff]  ;;  %v981_v15 = vld [vmem:[%s819_s26 + $0xe8] sm:$0xff]  ;;  %v984_v16 = vld [vmem:[%s819_s26 + $0xf0] sm:$0xff] }
  0x1c   : > { %674 = vrsqrt.f32 %v293_v9  ;;  %v322_v1 = vsub.f32 %v910_v44, %v824_v12  ;;  %v323_v2 = vsub.f32 %v921_v50, %v824_v12  ;;  %v324_v3 = vsub.f32 %v924_v51, %v824_v12  ;;  %v966_v5 = vld [vmem:[%s1138_s3] ss:$0 sm:$0xff]  ;;  %v996_v25 = vld [vmem:[%s819_s26 + $0xf8] sm:$0xff] }
  0x1d   : > { %v325_v6 = vsub.f32 %v927_v52, %v824_v12  ;;  %v326_v7 = vsub.f32 %v936_v57, %v824_v12  ;;  %v327_v8 = vsub.f32 %v939_v58, %v824_v12  ;;  %v328_v9 = vsub.f32 %v942_v59, %v824_v12 }
  0x1e   : > { %v329_v20 = vsub.f32 %v961_v4, %v824_v12  ;;  %v330_v28 = vsub.f32 %v981_v15, %v824_v12  ;;  %v331_v29 = vsub.f32 %v984_v16, %v824_v12  ;;  %v332_v35 = vsub.f32 %v996_v25, %v824_v12 }
  0x26   : > { %v675_v45 = vpop.eup %674 }
  0x27   : > { %v296_v53 = vmul.f32 %v675_v45, %v295_v22 }
  0x29   : > { %v952_v0 = vrot.slane %v296_v53, %v299_v10 }
  0x2b   : > { %v337_v10 = vmul.f32 %v952_v0, %v301_v26  ;;  %v338_v11 = vmul.f32 %v952_v0, %v302_v27  ;;  %v339_v13 = vmul.f32 %v952_v0, %v303_v31  ;;  %v340_v14 = vmul.f32 %v952_v0, %v304_v32 }
  0x2c   : > { %v341_v17 = vmul.f32 %v952_v0, %v305_v33  ;;  %v342_v18 = vmul.f32 %v952_v0, %v306_v34  ;;  %v343_v19 = vmul.f32 %v952_v0, %v307_v38  ;;  %v344_v24 = vmul.f32 %v952_v0, %v308_v39 }
  0x2d   : > { %v376_v21 = vadd.f32 %v966_v5, %v337_v10  ;;  %v377_v22 = vadd.f32 %v966_v5, %v338_v11  ;;  %v378_v23 = vadd.f32 %v966_v5, %v339_v13  ;;  %v379_v26 = vadd.f32 %v966_v5, %v340_v14 }
  0x2e   : > { %v380_v27 = vadd.f32 %v966_v5, %v341_v17  ;;  %v345_v30 = vmul.f32 %v952_v0, %v309_v40  ;;  %v346_v31 = vmul.f32 %v952_v0, %v310_v41  ;;  %v347_v32 = vmul.f32 %v952_v0, %v311_v46 }
  0x2f   : > { %676 = vtanh.f32 %v376_v21  ;;  %v381_v33 = vadd.f32 %v966_v5, %v342_v18  ;;  %v348_v34 = vmul.f32 %v952_v0, %v312_v47  ;;  %v382_v36 = vadd.f32 %v966_v5, %v343_v19 }
  0x30   : > { %678 = vtanh.f32 %v377_v22  ;;  %v383_v37 = vadd.f32 %v966_v5, %v344_v24  ;;  %v349_v38 = vmul.f32 %v952_v0, %v313_v48  ;;  %v384_v39 = vadd.f32 %v966_v5, %v345_v30 }
  0x31   : > { %680 = vtanh.f32 %v378_v23  ;;  %v385_v40 = vadd.f32 %v966_v5, %v346_v31  ;;  %v350_v41 = vmul.f32 %v952_v0, %v314_v49  ;;  %v386_v42 = vadd.f32 %v966_v5, %v347_v32 }
  0x32   : > { %682 = vtanh.f32 %v379_v26  ;;  %v351_v44 = vmul.f32 %v952_v0, %v315_v54  ;;  %v352_v45 = vmul.f32 %v952_v0, %v316_v55  ;;  %v387_v46 = vadd.f32 %v966_v5, %v348_v34 }
  0x33   : > { %684 = vtanh.f32 %v380_v27  ;;  %v353_v47 = vmul.f32 %v952_v0, %v317_v56  ;;  %v354_v48 = vmul.f32 %v952_v0, %v318_v60  ;;  %v388_v50 = vadd.f32 %v966_v5, %v349_v38 }
  0x34   : > { %686 = vtanh.f32 %v381_v33  ;;  %v355_v53 = vmul.f32 %v952_v0, %v319_v61  ;;  %v356_v49 = vmul.f32 %v952_v0, %v320_v62  ;;  %v389_v10 = vadd.f32 %v966_v5, %v350_v41 }
  0x35   : > { %688 = vtanh.f32 %v382_v36  ;;  %v390_v54 = vadd.f32 %v966_v5, %v351_v44  ;;  %v391_v55 = vadd.f32 %v966_v5, %v352_v45  ;;  %v357_v56 = vmul.f32 %v952_v0, %v321_v63 }
  0x36   : > { %690 = vtanh.f32 %v383_v37  ;;  %v358_v60 = vmul.f32 %v952_v0, %v322_v1  ;;  %v359_v11 = vmul.f32 %v952_v0, %v323_v2  ;;  %v392_v61 = vadd.f32 %v966_v5, %v353_v47 }
  0x37   : > { %692 = vtanh.f32 %v384_v39  ;;  %v393_v62 = vadd.f32 %v966_v5, %v354_v48  ;;  %v360_v13 = vmul.f32 %v952_v0, %v324_v3  ;;  %v394_v43 = vadd.f32 %v966_v5, %v355_v53 }
  0x38   : > { %694 = vtanh.f32 %v385_v40  ;;  %v395_v63 = vadd.f32 %v966_v5, %v356_v49  ;;  %v361_v1 = vmul.f32 %v952_v0, %v325_v6  ;;  %v396_v18 = vadd.f32 %v966_v5, %v357_v56 }
  0x39   : > { %v677_v14 = vpop.eup %676  ;;  %696 = vtanh.f32 %v386_v42  ;;  %v362_v51 = vmul.f32 %v952_v0, %v326_v7  ;;  %v397_v6 = vadd.f32 %v966_v5, %v358_v60  ;;  %v398_v19 = vadd.f32 %v966_v5, %v359_v11 }
  0x3a   : > { %v679_v2 = vpop.eup %678  ;;  %v440_v17 = vmul.f32 0.5, %v677_v14  ;;  %698 = vtanh.f32 %v387_v46  ;;  %v399_v7 = vadd.f32 %v966_v5, %v360_v13  ;;  %v363_v27 = vmul.f32 %v952_v0, %v327_v8 }
  0x3b   : > { %v681_v3 = vpop.eup %680  ;;  %v441_v52 = vmul.f32 0.5, %v679_v2  ;;  %700 = vtanh.f32 %v388_v50  ;;  %v364_v33 = vmul.f32 %v952_v0, %v328_v9  ;;  %v400_v58 = vadd.f32 %v966_v5, %v361_v1 }
  0x3c   : > { %v683_v21 = vpop.eup %682  ;;  %v472_v22 = vadd.f32 0.5, %v440_v17  ;;  %v442_v57 = vmul.f32 0.5, %v681_v3  ;;  %702 = vtanh.f32 %v389_v10  ;;  %v401_v40 = vadd.f32 %v966_v5, %v362_v51 }
  0x3d   : > { %v685_v23 = vpop.eup %684  ;;  %v473_v24 = vadd.f32 0.5, %v441_v52  ;;  %v443_v26 = vmul.f32 0.5, %v683_v21  ;;  %704 = vtanh.f32 %v390_v54  ;;  %v402_v42 = vadd.f32 %v966_v5, %v363_v27 }
  0x3e   : > { %v687_v30 = vpop.eup %686  ;;  %504 = vst [vmem:[%s1057_s7] sm:$0xff] %v472_v22  ;;  %v474_v31 = vadd.f32 0.5, %v442_v57  ;;  %v444_v32 = vmul.f32 0.5, %v685_v23  ;;  %706 = vtanh.f32 %v391_v55  ;;  %v403_v47 = vadd.f32 %v966_v5, %v364_v33 }
  0x3f   : > { %v689_v34 = vpop.eup %688  ;;  %505 = vst [vmem:[%s1057_s7 + $0x8] sm:$0xff] %v473_v24  ;;  %v475_v36 = vadd.f32 0.5, %v443_v26  ;;  %v445_v37 = vmul.f32 0.5, %v687_v30  ;;  %708 = vtanh.f32 %v392_v61  ;;  %v365_v49 = vmul.f32 %v952_v0, %v329_v20 }
  0x40   : > { %v691_v8 = vpop.eup %690  ;;  %506 = vst [vmem:[%s1057_s7 + $0x10] sm:$0xff] %v474_v31  ;;  %v476_v38 = vadd.f32 0.5, %v444_v32  ;;  %v446_v39 = vmul.f32 0.5, %v689_v34  ;;  %710 = vtanh.f32 %v393_v62  ;;  %v366_v56 = vmul.f32 %v952_v0, %v330_v28 }
  0x41   : > { %v693_v41 = vpop.eup %692  ;;  %507 = vst [vmem:[%s1057_s7 + $0x18] sm:$0xff] %v475_v36  ;;  %v477_v59 = vadd.f32 0.5, %v445_v37  ;;  %v447_v9 = vmul.f32 0.5, %v691_v8  ;;  %712 = vtanh.f32 %v394_v43  ;;  %v367_v4 = vmul.f32 %v952_v0, %v331_v29 }
  0x42   : > { %v695_v44 = vpop.eup %694  ;;  %508 = vst [vmem:[%s1057_s7 + $0x20] sm:$0xff] %v476_v38  ;;  %v478_v45 = vadd.f32 0.5, %v446_v39  ;;  %v448_v46 = vmul.f32 0.5, %v693_v41  ;;  %714 = vtanh.f32 %v395_v63  ;;  %v368_v15 = vmul.f32 %v952_v0, %v332_v35 }
  0x43   : > { %v697_v48 = vpop.eup %696  ;;  %509 = vst [vmem:[%s1057_s7 + $0x28] sm:$0xff] %v477_v59  ;;  %v479_v50 = vadd.f32 0.5, %v447_v9  ;;  %v449_v53 = vmul.f32 0.5, %v695_v44  ;;  %716 = vtanh.f32 %v396_v18  ;;  %v404_v16 = vadd.f32 %v966_v5, %v365_v49 }
  0x44   : > { %v699_v10 = vpop.eup %698  ;;  %510 = vst [vmem:[%s1057_s7 + $0x30] sm:$0xff] %v478_v45  ;;  %v480_v54 = vadd.f32 0.5, %v448_v46  ;;  %v450_v55 = vmul.f32 0.5, %v697_v48  ;;  %718 = vtanh.f32 %v397_v6  ;;  %v405_v2 = vadd.f32 %v966_v5, %v366_v56 }
  0x45   : > { %v701_v60 = vpop.eup %700  ;;  %511 = vst [vmem:[%s1057_s7 + $0x38] sm:$0xff] %v479_v50  ;;  %v481_v11 = vadd.f32 0.5, %v449_v53  ;;  %v451_v61 = vmul.f32 0.5, %v699_v10  ;;  %720 = vtanh.f32 %v398_v19  ;;  %v406_v25 = vadd.f32 %v966_v5, %v367_v4 }
  0x46   : > { %v703_v20 = vpop.eup %702  ;;  %512 = vst [vmem:[%s1057_s7 + $0x40] sm:$0xff] %v480_v54  ;;  %v482_v62 = vadd.f32 0.5, %v450_v55  ;;  %v452_v13 = vmul.f32 0.5, %v701_v60  ;;  %722 = vtanh.f32 %v399_v7  ;;  %v407_v3 = vadd.f32 %v966_v5, %v368_v15 }
  0x47   : > { %v705_v28 = vpop.eup %704  ;;  %513 = vst [vmem:[%s1057_s7 + $0x48] sm:$0xff] %v481_v11  ;;  %v483_v14 = vadd.f32 0.5, %v451_v61  ;;  %v453_v43 = vmul.f32 0.5, %v703_v20  ;;  %724 = vtanh.f32 %v400_v58 }
  0x48   : > { %v707_v29 = vpop.eup %706  ;;  %514 = vst [vmem:[%s1057_s7 + $0x50] sm:$0xff] %v482_v62  ;;  %v484_v63 = vadd.f32 0.5, %v452_v13  ;;  %v454_v1 = vmul.f32 0.5, %v705_v28  ;;  %726 = vtanh.f32 %v401_v40 }
  0x49   : > { %v709_v17 = vpop.eup %708  ;;  %515 = vst [vmem:[%s1057_s7 + $0x58] sm:$0xff] %v483_v14  ;;  %v485_v12 = vadd.f32 0.5, %v453_v43  ;;  %v455_v0 = vmul.f32 0.5, %v707_v29  ;;  %728 = vtanh.f32 %v402_v42 }
  0x4a   : > { %v711_v35 = vpop.eup %710  ;;  %516 = vst [vmem:[%s1057_s7 + $0x60] sm:$0xff] %v484_v63  ;;  %v486_v18 = vadd.f32 0.5, %v454_v1  ;;  %v456_v51 = vmul.f32 0.5, %v709_v17  ;;  %730 = vtanh.f32 %v403_v47 }
  0x4b   : > { %v713_v52 = vpop.eup %712  ;;  %517 = vst [vmem:[%s1057_s7 + $0x68] sm:$0xff] %v485_v12  ;;  %v487_v6 = vadd.f32 0.5, %v455_v0  ;;  %v457_v19 = vmul.f32 0.5, %v711_v35  ;;  %732 = vtanh.f32 %v404_v16 }
  0x4c   : > { %v715_v21 = vpop.eup %714  ;;  %518 = vst [vmem:[%s1057_s7 + $0x70] sm:$0xff] %v486_v18  ;;  %v488_v22 = vadd.f32 0.5, %v456_v51  ;;  %v458_v57 = vmul.f32 0.5, %v713_v52  ;;  %734 = vtanh.f32 %v405_v2 }
  0x4d   : > { %v717_v7 = vpop.eup %716  ;;  %519 = vst [vmem:[%s1057_s7 + $0x78] sm:$0xff] %v487_v6  ;;  %v489_v23 = vadd.f32 0.5, %v457_v19  ;;  %v459_v24 = vmul.f32 0.5, %v715_v21  ;;  %736 = vtanh.f32 %v406_v25 }
  0x4e   : > { %v719_v5 = vpop.eup %718  ;;  %520 = vst [vmem:[%s1057_s7 + $0x80] sm:$0xff] %v488_v22  ;;  %v490_v26 = vadd.f32 0.5, %v458_v57  ;;  %v460_v27 = vmul.f32 0.5, %v717_v7  ;;  %738 = vtanh.f32 %v407_v3 }
  0x4f   : > { %v721_v30 = vpop.eup %720  ;;  %521 = vst [vmem:[%s1057_s7 + $0x88] sm:$0xff] %v489_v23  ;;  %v491_v31 = vadd.f32 0.5, %v459_v24  ;;  %v461_v32 = vmul.f32 0.5, %v719_v5 }
  0x50   : > { %v723_v33 = vpop.eup %722  ;;  %522 = vst [vmem:[%s1057_s7 + $0x90] sm:$0xff] %v490_v26  ;;  %v492_v34 = vadd.f32 0.5, %v460_v27  ;;  %v462_v36 = vmul.f32 0.5, %v721_v30 }
  0x51   : > { %v725_v37 = vpop.eup %724  ;;  %523 = vst [vmem:[%s1057_s7 + $0x98] sm:$0xff] %v491_v31  ;;  %v493_v58 = vadd.f32 0.5, %v461_v32  ;;  %v463_v8 = vmul.f32 0.5, %v723_v33 }
  0x52   : > { %v727_v38 = vpop.eup %726  ;;  %524 = vst [vmem:[%s1057_s7 + $0xa0] sm:$0xff] %v492_v34  ;;  %v494_v39 = vadd.f32 0.5, %v462_v36  ;;  %v464_v40 = vmul.f32 0.5, %v725_v37 }
  0x53   : > { %v729_v41 = vpop.eup %728  ;;  %525 = vst [vmem:[%s1057_s7 + $0xa8] sm:$0xff] %v493_v58  ;;  %v495_v59 = vadd.f32 0.5, %v463_v8  ;;  %v465_v9 = vmul.f32 0.5, %v727_v38 }
  0x54   : > { %v731_v42 = vpop.eup %730  ;;  %526 = vst [vmem:[%s1057_s7 + $0xb0] sm:$0xff] %v494_v39  ;;  %v496_v44 = vadd.f32 0.5, %v464_v40  ;;  %v466_v45 = vmul.f32 0.5, %v729_v41 }
  0x55   : > { %v733_v46 = vpop.eup %732  ;;  %527 = vst [vmem:[%s1057_s7 + $0xb8] sm:$0xff] %v495_v59  ;;  %v497_v47 = vadd.f32 0.5, %v465_v9  ;;  %v467_v48 = vmul.f32 0.5, %v731_v42 }
  0x56   : > { %v735_v50 = vpop.eup %734  ;;  %528 = vst [vmem:[%s1057_s7 + $0xc0] sm:$0xff] %v496_v44  ;;  %v498_v53 = vadd.f32 0.5, %v466_v45  ;;  %v468_v49 = vmul.f32 0.5, %v733_v46 }
  0x57   : > { %v737_v10 = vpop.eup %736  ;;  %529 = vst [vmem:[%s1057_s7 + $0xc8] sm:$0xff] %v497_v47  ;;  %v499_v54 = vadd.f32 0.5, %v467_v48  ;;  %v469_v55 = vmul.f32 0.5, %v735_v50 }
  0x58   : > { %v739_v56 = vpop.eup %738  ;;  %530 = vst [vmem:[%s1057_s7 + $0xd0] sm:$0xff] %v498_v53  ;;  %v500_v60 = vadd.f32 0.5, %v468_v49  ;;  %v470_v11 = vmul.f32 0.5, %v737_v10 }
  0x59   : > { %531 = vst [vmem:[%s1057_s7 + $0xd8] sm:$0xff] %v499_v54  ;;  %v501_v61 = vadd.f32 0.5, %v469_v55  ;;  %v471_v4 = vmul.f32 0.5, %v739_v56 }
  0x5a   : > { %532 = vst [vmem:[%s1057_s7 + $0xe0] sm:$0xff] %v500_v60  ;;  %v502_v20 = vadd.f32 0.5, %v470_v11 }
  0x5b   : > { %533 = vst [vmem:[%s1057_s7 + $0xe8] sm:$0xff] %v501_v61  ;;  %v503_v62 = vadd.f32 0.5, %v471_v4 }
  0x5c   : > { %534 = vst [vmem:[%s1057_s7 + $0xf0] sm:$0xff] %v502_v20 }
  0x5d   : > { %535 = vst [vmem:[%s1057_s7 + $0xf8] sm:$0xff] %v503_v62 }
  0x5e PF: > { %s14_s17 = sadd.s32 1, %s762_s17   ;;  %s1140_s15 = smov %s758_s16 }
  0x5f   : > { %p11_p5 = scmp.ge.s32.totalorder %s14_s17, 4   ;;  %s1141_s16 = smov %s1143_s18 }
  0x61   :  { %13 = sbr.rel (!%p11_p5) target bundleno = 2 (0x2), region = 69 }

// kernel: stylization_forward.93
= control target key start
LH: loop header
LB: loop body
LE: loop exit
PB: predicated region body
PF: predicated region fallthrough
CT: control target
= control target key end

     0   :  { %s11528_s9 = smov 0   ;;  %s13471_s0 = inlined_call_operand.vmem [shape: bf16[2,384,384], index: 0, kind: input, shape index: {}]   ;;  %s13472_s1 = inlined_call_operand.vmem [shape: bf16[9,384,128], index: 1, kind: input, shape index: {}]   ;;  %s13473_s2 = inlined_call_operand.vmem [shape: f32[2,256,128], index: 2, kind: output, shape index: {}]  }
   0x1 LB: > { %s7670_s10 = sadd.s32 4294967295, %s11511_s9   ;;  %p7674_p0 = scmp.ge.s32.totalorder %s11511_s9, 1  ;;  %s11511_s9 = sphi %s11528_s9, %s12_s9  }
   0x2   : > { %p112_p1 = scmp.lt.s32.totalorder %s11511_s9, 3 }
   0x4   : > { %p113_p2 = pnand %p7674_p0, %p112_p1 }
   0x6   : > { %116 = sbr.rel (%p113_p2) target bundleno = 1124 (0x464), region = 28 }
   0xd   : > { %v10893_v0 = vld [vmem:[%s13472_s1 + $0x100] sm:$0xff]   ;;  %v10895_v2 = vld [vmem:[%s13472_s1 + $0x108] sm:$0xff]   ;;  %p134_p3 = scmp.lt.s32.totalorder %s7670_s10, 1  ;;  %v10897_v4 = vld [vmem:[%s13472_s1 + $0x110] sm:$0xff]  }
   0xe   : > { %v10894_v1 = vld [vmem:[%s13472_s1 + $0xc0] sm:$0xff]   ;;  %8668 = vmatprep.subr.bf16.mxu0 %v10893_v0  ;;  %10324 = vmatprep.subr.bf16.mxu1 %v10893_v0  ;;  %v10896_v3 = vld [vmem:[%s13472_s1 + $0xc8] sm:$0xff]   ;;  %v10898_v5 = vld [vmem:[%s13472_s1 + $0xd0] sm:$0xff]  }
   0xf   : > { %8669 = vmatpush3.bf16.msra.mxu0 %v10894_v1  ;;  %10332 = vmatpush3.bf16.msra.mxu1 %v10894_v1  ;;  %s13495_s10 = smov (!%p134_p3, %s7670_s10), 1  ;;  %v10899_v6 = vld [vmem:[%s13472_s1 + $0x118] sm:$0xff]   ;;  %v10901_v8 = vld [vmem:[%s13472_s1 + $0x120] sm:$0xff]   ;;  %v10903_v10 = vld [vmem:[%s13472_s1 + $0x128] sm:$0xff]  }
  0x10   : > { %8670 = vmatprep.subr.bf16.mxu0 %v10895_v2  ;;  %10325 = vmatprep.subr.bf16.mxu1 %v10895_v2  ;;  %s10884_s25 = smul.u32 576, %s13495_s10  ;;  %v10900_v7 = vld [vmem:[%s13472_s1 + $0xd8] sm:$0xff]   ;;  %v10902_v9 = vld [vmem:[%s13472_s1 + $0xe0] sm:$0xff]   ;;  %v10904_v13 = vld [vmem:[%s13472_s1 + $0xe8] sm:$0xff]  }
  0x11   : > { %v10905_v14 = vld [vmem:[%s13472_s1 + $0x130] sm:$0xff]   ;;  %v10907_v16 = vld [vmem:[%s13472_s1 + $0x138] sm:$0xff]   ;;  %v10915_v18 = vld [vmem:[%s13472_s1 + $0x140] sm:$0xff]  }
  0x12   : > { %s11569_s4 = scalar_lea.vmem %s13471_s0, %s10884_s25  ;;  %v10906_v15 = vld [vmem:[%s13472_s1 + $0xf0] sm:$0xff]   ;;  %v10908_v17 = vld [vmem:[%s13472_s1 + $0xf8] sm:$0xff]   ;;  %v10916_v19 = vld [vmem:[%s13472_s1 + $0x1c0] sm:$0xff]  }
  0x13   : > { %8671 = vmatpush3.bf16.msra.mxu0 %v10896_v3  ;;  %10333 = vmatpush3.bf16.msra.mxu1 %v10896_v3  ;;  %v11578_v11 = vld [vmem:[%s11569_s4 + $0x1c] ss:$12 sps:$4 sm:$0xff]   ;;  %v11604_v20 = vld [vmem:[%s11569_s4 + $0x18] ss:$12 sps:$4 sm:$0xff]   ;;  %v11614_v24 = vld [vmem:[%s11569_s4 + $0x34] ss:$12 sps:$4 sm:$0xff]  }
  0x14   : > { %8672 = vmatprep.subr.bf16.mxu0 %v10897_v4  ;;  %10326 = vmatprep.subr.bf16.mxu1 %v10897_v4  ;;  %v10914_v12 = vld [vmem:[%s11569_s4 + $0x13c] ss:$12 sps:$4 sm:$0xff]   ;;  %v10912_v21 = vld [vmem:[%s11569_s4 + $0x138] ss:$12 sps:$4 sm:$0xff]   ;;  %v10921_v25 = vld [vmem:[%s11569_s4 + $0x154] ss:$12 sps:$4 sm:$0xff]  }
  0x15   : > { %742 = vmatprep.mubr.bf16.mxu0 %v11578_v11  ;;  %838 = vmatprep.mubr.bf16.mxu1 %v10914_v12  ;;  %v10917_v22 = vld [vmem:[%s13472_s1 + $0x180] sm:$0xff]   ;;  %v10918_v23 = vld [vmem:[%s13472_s1 + $0x148] sm:$0xff]   ;;  %v11626_v28 = vld [vmem:[%s11569_s4 + $0x30] ss:$12 sps:$4 sm:$0xff]  }
  0x16   : > { %v10927_v26 = vld [vmem:[%s13472_s1 + $0x1c8] sm:$0xff]   ;;  %v10925_v29 = vld [vmem:[%s13472_s1 + $0x150] sm:$0xff]   ;;  %v10926_v31 = vld [vmem:[%s13472_s1 + $0x158] sm:$0xff]  }
  0x17   : > { %8673 = vmatpush3.bf16.msra.mxu0 %v10898_v5  ;;  %10334 = vmatpush3.bf16.msra.mxu1 %v10898_v5  ;;  %v10928_v27 = vld [vmem:[%s13472_s1 + $0x188] sm:$0xff]   ;;  %v10924_v30 = vld [vmem:[%s11569_s4 + $0x150] ss:$12 sps:$4 sm:$0xff]   ;;  %v10935_v38 = vld [vmem:[%s13472_s1 + $0x160] sm:$0xff]  }
  0x18   : > { %8674 = vmatprep.subr.bf16.mxu0 %v10899_v6  ;;  %10327 = vmatprep.subr.bf16.mxu1 %v10899_v6  ;;  %v10944_v32 = vld [vmem:[%s13472_s1 + $0x1d0] sm:$0xff]   ;;  %v11639_v33 = vld [vmem:[%s11569_s4 + $0x4c] ss:$12 sps:$4 sm:$0xff]   ;;  %v11680_v48 = vld [vmem:[%s11569_s4 + $0x7c] ss:$12 sps:$4 sm:$0xff]  }
  0x19   : > { %v10931_v34 = vld [vmem:[%s11569_s4 + $0x16c] ss:$12 sps:$4 sm:$0xff]   ;;  %v10945_v35 = vld [vmem:[%s13472_s1 + $0x190] sm:$0xff]   ;;  %v10968_v50 = vld [vmem:[%s13472_s1 + $0x1e0] sm:$0xff]  }
  0x1a   : > { %v11648_v36 = vld [vmem:[%s11569_s4 + $0x48] ss:$12 sps:$4 sm:$0xff]   ;;  %v10953_v39 = vld [vmem:[%s13472_s1 + $0x1d8] sm:$0xff]   ;;  %v11661_v41 = vld [vmem:[%s11569_s4 + $0x64] ss:$12 sps:$4 sm:$0xff]  }
  0x1b   : > { %8675 = vmatpush3.bf16.msra.mxu0 %v10900_v7  ;;  %10335 = vmatpush3.bf16.msra.mxu1 %v10900_v7  ;;  %v10934_v37 = vld [vmem:[%s11569_s4 + $0x168] ss:$12 sps:$4 sm:$0xff]   ;;  %v10955_v42 = vld [vmem:[%s13472_s1 + $0x198] sm:$0xff]   ;;  %v10939_v43 = vld [vmem:[%s11569_s4 + $0x184] ss:$12 sps:$4 sm:$0xff]  }
  0x1c   : > { %8676 = vmatprep.subr.bf16.mxu0 %v10901_v8  ;;  %10328 = vmatprep.subr.bf16.mxu1 %v10901_v8  ;;  %v10936_v40 = vld [vmem:[%s13472_s1 + $0x168] sm:$0xff]   ;;  %v10943_v44 = vld [vmem:[%s13472_s1 + $0x170] sm:$0xff]   ;;  %v10946_v47 = vld [vmem:[%s13472_s1 + $0x178] sm:$0xff]  }
  0x1d   : > { %v11673_v45 = vld [vmem:[%s11569_s4 + $0x60] ss:$12 sps:$4 sm:$0xff]   ;;  %v11692_v52 = vld [vmem:[%s11569_s4 + $0x78] ss:$12 sps:$4 sm:$0xff]   ;;  %v10958_v57 = vld [vmem:[%s11569_s4 + $0x50] ss:$12 sps:$4 sm:$0xff]  }
  0x1e   : > { %v10942_v46 = vld [vmem:[%s11569_s4 + $0x180] ss:$12 sps:$4 sm:$0xff]   ;;  %v10951_v54 = vld [vmem:[%s11569_s4 + $0x38] ss:$12 sps:$4 sm:$0xff]   ;;  %v11720_v62 = vld [vmem:[%s11569_s4 + $0x90] ss:$12 sps:$4 sm:$0xff]  }
  0x1f   : > { %8677 = vmatpush3.bf16.msra.mxu0 %v10902_v9  ;;  %10336 = vmatpush3.bf16.msra.mxu1 %v10902_v9  ;;  %v10949_v49 = vld [vmem:[%s11569_s4 + $0x20] ss:$12 sps:$4 sm:$0xff]   ;;  %v10970_v63 = vld [vmem:[%s13472_s1 + $0x50] sm:$0xff]   ;;  %v10977_v4 = vld [vmem:[%s13472_s1 + $0x58] sm:$0xff]  }
  0x20   : > { %8678 = vmatprep.subr.bf16.mxu0 %v10903_v10  ;;  %10329 = vmatprep.subr.bf16.mxu1 %v10903_v10  ;;  %v10969_v51 = vld [vmem:[%s13472_s1 + $0x1a0] sm:$0xff]   ;;  %v10961_v58 = vld [vmem:[%s13472_s1 + $0x48] sm:$0xff]   ;;  %v10971_v3 = vld [vmem:[%s13472_s1 + $0x10] sm:$0xff]  }
  0x21   : > { %v10952_v53 = vld [vmem:[%s13472_s1 + $0x40] sm:$0xff]   ;;  %v10978_v59 = vld [vmem:[%s13472_s1 + $0x1e8] sm:$0xff]   ;;  %v10979_v5 = vld [vmem:[%s13472_s1 + $0x18] sm:$0xff]  }
  0x22   : > { %v10954_v55 = vld [vmem:[%s13472_s1] sm:$0xff]   ;;  %v10962_v60 = vld [vmem:[%s13472_s1 + $0x8] sm:$0xff]   ;;  %v10993_v10 = vld [vmem:[%s13472_s1 + $0x1f0] sm:$0xff]  }
  0x23   : > { %8679 = vmatpush3.bf16.msra.mxu0 %v10904_v13  ;;  %10337 = vmatpush3.bf16.msra.mxu1 %v10904_v13  ;;  %v11702_v56 = vld [vmem:[%s11569_s4 + $0x94] ss:$12 sps:$4 sm:$0xff]   ;;  %v10980_v61 = vld [vmem:[%s13472_s1 + $0x1a8] sm:$0xff]   ;;  %v10967_v7 = vld [vmem:[%s11569_s4 + $0x98] ss:$12 sps:$4 sm:$0xff]  }
  0x24   : > { %8680 = vmatprep.subr.bf16.mxu0 %v10905_v14  ;;  %10330 = vmatprep.subr.bf16.mxu1 %v10905_v14  ;;  %v10960_v0 = vld [vmem:[%s11569_s4 + $0x68] ss:$12 sps:$4 sm:$0xff]   ;;  %v11727_v1 = vld [vmem:[%s11569_s4 + $0xac] ss:$12 sps:$4 sm:$0xff]   ;;  %v10986_v8 = vld [vmem:[%s13472_s1 + $0x60] sm:$0xff]  }
  0x25   : > { %v10965_v2 = vld [vmem:[%s11569_s4 + $0x80] ss:$12 sps:$4 sm:$0xff]   ;;  %v11742_v6 = vld [vmem:[%s11569_s4 + $0xa8] ss:$12 sps:$4 sm:$0xff]   ;;  %v11749_v9 = vld [vmem:[%s11569_s4 + $0xc4] ss:$12 sps:$4 sm:$0xff]  }
  0x26   : > { %v10994_v12 = vld [vmem:[%s13472_s1 + $0x1b0] sm:$0xff]   ;;  %v10987_v14 = vld [vmem:[%s13472_s1 + $0x20] sm:$0xff]  }
  0x27   : > { %8681 = vmatpush3.bf16.msra.mxu0 %v10906_v15  ;;  %10338 = vmatpush3.bf16.msra.mxu1 %v10906_v15  ;;  %v10974_v13 = vld [vmem:[%s11569_s4 + $0xb0] ss:$12 sps:$4 sm:$0xff]   ;;  %v10995_v15 = vld [vmem:[%s13472_s1 + $0x68] sm:$0xff]  }
  0x28   : > { %8682 = vmatprep.subr.bf16.mxu0 %v10907_v16  ;;  %10331 = vmatprep.subr.bf16.mxu1 %v10907_v16  ;;  %v10996_v16 = vld [vmem:[%s13472_s1 + $0x28] sm:$0xff]  }
  0x2b   : > { %8683 = vmatpush3.bf16.msra.mxu0 %v10908_v17  ;;  %10339 = vmatpush3.bf16.msra.mxu1 %v10908_v17  ;;  %v11770_v17 = vld [vmem:[%s11569_s4 + $0xc0] ss:$12 sps:$4 sm:$0xff]  }
  0x2c   : > { %9892 = vmatprep.subr.bf16.mxu1 %v10915_v18  ;;  %8940 = vmatprep.subr.bf16.mxu0 %v10916_v19  ;;  %v11002_v19 = vld [vmem:[%s13472_s1 + $0x70] sm:$0xff]  }
  0x2e   : > { %743 = vmatmul.mubr.bf16.vlgmr.msra.gmra.mrb[0].mxu0 %v11604_v20  ;;  %839 = vmatmul.mubr.bf16.vlgmr.msra.gmra.mrb[0].mxu1 %v10912_v21  ;;  %v11777_v21 = vld [vmem:[%s11569_s4 + $0xdc] ss:$12 sps:$4 sm:$0xff]  }
  0x2f   : > { %9893 = vmatpush3.bf16.msra.mxu1 %v10915_v18  ;;  %8941 = vmatpush3.bf16.msra.mxu0 %v10917_v22  ;;  %v10976_v18 = vld [vmem:[%s11569_s4 + $0xc8] ss:$12 sps:$4 sm:$0xff]   ;;  %v11003_v22 = vld [vmem:[%s13472_s1 + $0x1f8] sm:$0xff]  }
  0x30   : > { %9894 = vmatprep.subr.bf16.mxu1 %v10918_v23  ;;  %750 = vmatprep.mubr.bf16.mxu0 %v11614_v24 }
  0x31   : > { %846 = vmatprep.mubr.bf16.mxu1 %v10921_v25  ;;  %8942 = vmatprep.subr.bf16.mxu0 %v10927_v26  ;;  %v11005_v25 = vld [vmem:[%s13472_s1 + $0x1b8] sm:$0xff]   ;;  %v11004_v26 = vld [vmem:[%s13472_s1 + $0x30] sm:$0xff]  }
  0x33   : > { %9895 = vmatpush3.bf16.msra.mxu1 %v10918_v23  ;;  %8943 = vmatpush3.bf16.msra.mxu0 %v10928_v27  ;;  %v10983_v23 = vld [vmem:[%s11569_s4 + $0xe0] ss:$12 sps:$4 sm:$0xff]   ;;  %v11792_v27 = vld [vmem:[%s11569_s4 + $0xd8] ss:$12 sps:$4 sm:$0xff]  }
  0x34   : > { %9896 = vmatprep.subr.bf16.mxu1 %v10925_v29  ;;  %8944 = vmatprep.subr.bf16.mxu0 %v10944_v32  ;;  %v11802_v32 = vld [vmem:[%s11569_s4 + $0xf4] ss:$12 sps:$4 sm:$0xff]  }
  0x36   : > { %751 = vmatmul.mubr.bf16.gmra.mrb[4].mxu0 %v11626_v28  ;;  %847 = vmatmul.mubr.bf16.gmra.mrb[4].mxu1 %v10924_v30  ;;  %v11011_v30 = vld [vmem:[%s13472_s1 + $0x78] sm:$0xff]  }
  0x37   : > { %9897 = vmatpush3.bf16.msra.mxu1 %v10925_v29  ;;  %758 = vmatprep.mubr.bf16.mxu0 %v11639_v33  ;;  %v10985_v29 = vld [vmem:[%s11569_s4 + $0xf8] ss:$12 sps:$4 sm:$0xff]  }
  0x38   : > { %9898 = vmatprep.subr.bf16.mxu1 %v10926_v31  ;;  %854 = vmatprep.mubr.bf16.mxu1 %v10931_v34  ;;  %v10990_v34 = vld [vmem:[%s11569_s4 + $0x110] ss:$12 sps:$4 sm:$0xff]  }
  0x39   : > { %8945 = vmatpush3.bf16.msra.mxu0 %v10945_v35  ;;  %v11016_v35 = vld [vmem:[%s13472_s1 + $0x280] sm:$0xff]  }
  0x3a   : > { %8946 = vmatprep.subr.bf16.mxu0 %v10953_v39  ;;  %v10992_v39 = vld [vmem:[%s11569_s4 + $0x128] ss:$12 sps:$4 sm:$0xff]  }
  0x3b   : > { %9899 = vmatpush3.bf16.msra.mxu1 %v10926_v31  ;;  %v11012_v31 = vld [vmem:[%s13472_s1 + $0x38] sm:$0xff]  }
  0x3c   : > { %9900 = vmatprep.subr.bf16.mxu1 %v10935_v38 }
  0x3d   : > { %8947 = vmatpush3.bf16.msra.mxu0 %v10955_v42  ;;  %v10999_v42 = vld [vmem:[%s11569_s4 + $0x140] ss:$12 sps:$4 sm:$0xff]  }
  0x3e   : > { %759 = vmatmul.mubr.bf16.gmra.mrb[8].mxu0 %v11648_v36  ;;  %855 = vmatmul.mubr.bf16.gmra.mrb[8].mxu1 %v10934_v37  ;;  %v11018_v37 = vld [vmem:[%s13472_s1 + $0x80] sm:$0xff]  }
  0x3f   : > { %9901 = vmatpush3.bf16.msra.mxu1 %v10935_v38  ;;  %766 = vmatprep.mubr.bf16.mxu0 %v11661_v41  ;;  %v11814_v38 = vld [vmem:[%s11569_s4 + $0xf0] ss:$12 sps:$4 sm:$0xff]  }
  0x40   : > { %9902 = vmatprep.subr.bf16.mxu1 %v10936_v40  ;;  %862 = vmatprep.mubr.bf16.mxu1 %v10939_v43  ;;  %v11824_v43 = vld [vmem:[%s11569_s4 + $0x108] ss:$12 sps:$4 sm:$0xff]  }
  0x41   : > { %8948 = vmatprep.subr.bf16.mxu0 %v10968_v50  ;;  %v11010_v50 = vld [vmem:[%s11569_s4 + $0x188] ss:$12 sps:$4 sm:$0xff]  }
  0x42   : > { %8949 = vmatpush3.bf16.msra.mxu0 %v10969_v51  ;;  %v11015_v51 = vld [vmem:[%s11569_s4 + $0x4] ss:$12 sps:$4 sm:$0xff]  }
  0x43   : > { %9903 = vmatpush3.bf16.msra.mxu1 %v10936_v40  ;;  %8950 = vmatprep.subr.bf16.mxu0 %v10978_v59  ;;  %v11818_v40 = vld [vmem:[%s11569_s4 + $0x10c] ss:$12 sps:$4 sm:$0xff]   ;;  %v11022_v59 = vld [vmem:[%s13472_s1 + $0x290] sm:$0xff]  }
  0x44   : > { %9904 = vmatprep.subr.bf16.mxu1 %v10943_v44 }
  0x46   : > { %767 = vmatmul.mubr.bf16.gmra.mrb[12].mxu0 %v11673_v45  ;;  %863 = vmatmul.mubr.bf16.gmra.mrb[12].mxu1 %v10942_v46  ;;  %v11828_v46 = vld [vmem:[%s11569_s4 + $0x124] ss:$12 sps:$4 sm:$0xff]  }
  0x47   : > { %9905 = vmatpush3.bf16.msra.mxu1 %v10943_v44  ;;  %774 = vmatprep.mubr.bf16.mxu0 %v11680_v48  ;;  %v11001_v44 = vld [vmem:[%s11569_s4 + $0x158] ss:$12 sps:$4 sm:$0xff]  }
  0x48   : > { %9906 = vmatprep.subr.bf16.mxu1 %v10946_v47  ;;  %9908 = vmatprep.mubr.bf16.mxu1 %v10949_v49  ;;  %v11834_v49 = vld [vmem:[%s11569_s4 + $0x120] ss:$12 sps:$4 sm:$0xff]  }
  0x49   : > { %8951 = vmatpush3.bf16.msra.mxu0 %v10980_v61  ;;  %v11023_v61 = vld [vmem:[%s13472_s1 + $0x250] sm:$0xff]  }
  0x4a   : > { %8952 = vmatprep.subr.bf16.mxu0 %v10993_v10  ;;  %v11039_v10 = vld [vmem:[%s13472_s1 + $0xb8] sm:$0xff]  }
  0x4b   : > { %9907 = vmatpush3.bf16.msra.mxu1 %v10946_v47  ;;  %v11008_v47 = vld [vmem:[%s11569_s4 + $0x170] ss:$12 sps:$4 sm:$0xff]  }
  0x4c   : > { %8804 = vmatprep.subr.bf16.mxu1 %v10952_v53  ;;  %v11013_v53 = vld [vmem:[%s11569_s4] ss:$12 sps:$4 sm:$0xff]  }
  0x4d   : > { %8953 = vmatpush3.bf16.msra.mxu0 %v10994_v12  ;;  %v11038_v12 = vld [vmem:[%s13472_s1 + $0x278] sm:$0xff]  }
  0x4e   : > { %775 = vmatmul.mubr.bf16.gmra.mrb[16].mxu0 %v11692_v52  ;;  %9909 = vmatmul.mubr.bf16.vlgmr.msra.gmra.mrb[16].mxu1 %v10951_v54  ;;  %v11017_v54 = vld [vmem:[%s13472_s1 + $0x240] sm:$0xff]  }
  0x4f   : > { %8805 = vmatpush3.bf16.msra.mxu1 %v10954_v55  ;;  %782 = vmatprep.mubr.bf16.mxu0 %v11702_v56  ;;  %v11019_v55 = vld [vmem:[%s13472_s1 + $0x288] sm:$0xff]  }
  0x50   : > { %9912 = vmatprep.mubr.bf16.mxu1 %v10958_v57  ;;  %8806 = vmatprep.subr.bf16.mxu1 %v10961_v58  ;;  %v11021_v57 = vld [vmem:[%s13472_s1 + $0x88] sm:$0xff]  }
  0x51   : > { %8954 = vmatprep.subr.bf16.mxu0 %v11003_v22  ;;  %v11020_v58 = vld [vmem:[%s13472_s1 + $0x248] sm:$0xff]  }
  0x52   : > { %8955 = vmatpush3.bf16.msra.mxu0 %v11005_v25  ;;  %v11043_v25 = vld [vmem:[%s11569_s4 + $0x8] ss:$12 sps:$4 sm:$0xff]  }
  0x53   : > { %8807 = vmatpush3.bf16.msra.mxu1 %v10962_v60  ;;  %9076 = vmatprep.subr.bf16.mxu0 %v11016_v35  ;;  %v11024_v60 = vld [vmem:[%s13472_s1 + $0x90] sm:$0xff]  }
  0x54   : > { %8808 = vmatprep.subr.bf16.mxu1 %v10970_v63  ;;  %v11025_v63 = vld [vmem:[%s13472_s1 + $0x298] sm:$0xff]  }
  0x56   : > { %783 = vmatmul.mubr.bf16.gmra.mrb[20].mxu0 %v11720_v62  ;;  %9913 = vmatmul.mubr.bf16.gmra.mrb[20].mxu1 %v10960_v0  ;;  %v11026_v0 = vld [vmem:[%s13472_s1 + $0x258] sm:$0xff]  }
  0x57   : > { %790 = vmatprep.mubr.bf16.mxu0 %v11727_v1  ;;  %9916 = vmatprep.mubr.bf16.mxu1 %v10965_v2  ;;  %v11028_v2 = vld [vmem:[%s13472_s1 + $0x2a0] sm:$0xff]  }
  0x58   : > { %8809 = vmatpush3.bf16.msra.mxu1 %v10971_v3  ;;  %v11030_v3 = vld [vmem:[%s13472_s1 + $0xa0] sm:$0xff]  }
  0x59   : > { %8810 = vmatprep.subr.bf16.mxu1 %v10977_v4  ;;  %v11033_v4 = vld [vmem:[%s13472_s1 + $0xa8] sm:$0xff]  }
  0x5c   : > { %8811 = vmatpush3.bf16.msra.mxu1 %v10979_v5  ;;  %v11032_v5 = vld [vmem:[%s13472_s1 + $0x268] sm:$0xff]  }
  0x5d   : > { %8812 = vmatprep.subr.bf16.mxu1 %v10986_v8  ;;  %v11036_v8 = vld [vmem:[%s13472_s1 + $0xb0] sm:$0xff]  }
  0x5e   : > { %791 = vmatmul.mubr.bf16.gmra.mrb[24].mxu0 %v11742_v6  ;;  %9917 = vmatmul.mubr.bf16.gmra.mrb[24].mxu1 %v10967_v7  ;;  %v11034_v7 = vld [vmem:[%s13472_s1 + $0x2b0] sm:$0xff]  }
  0x5f   : > { %798 = vmatprep.mubr.bf16.mxu0 %v11749_v9  ;;  %9920 = vmatprep.mubr.bf16.mxu1 %v10974_v13  ;;  %v11047_v13 = vld [vmem:[%s13472_s1 + $0x340] sm:$0xff]  }
  0x60   : > { %8813 = vmatpush3.bf16.msra.mxu1 %v10987_v14  ;;  %v11928_v14 = vld [vmem:[%s13472_s1 + $0x200] sm:$0xff]  }
  0x61   : > { %8814 = vmatprep.subr.bf16.mxu1 %v10995_v15 }
  0x64   : > { %8815 = vmatpush3.bf16.msra.mxu1 %v10996_v16  ;;  %v11042_v16 = vld [vmem:[%s11569_s4 + $0x198] ss:$12 sps:$4 sm:$0xff]  }
  0x65   : > { %8816 = vmatprep.subr.bf16.mxu1 %v11002_v19 }
  0x66   : > { %799 = vmatmul.mubr.bf16.gmra.mrb[28].mxu0 %v11770_v17  ;;  %9921 = vmatmul.mubr.bf16.gmra.mrb[28].mxu1 %v10976_v18 }
  0x67   : > { %806 = vmatprep.mubr.bf16.mxu0 %v11777_v21  ;;  %9924 = vmatprep.mubr.bf16.mxu1 %v10983_v23 }
  0x68   : > { %8817 = vmatpush3.bf16.msra.mxu1 %v11004_v26  ;;  %v11046_v26 = vld [vmem:[%s11569_s4 + $0x4c] ss:$12 sps:$4 sm:$0xff]  }
  0x69   : > { %8818 = vmatprep.subr.bf16.mxu1 %v11011_v30 }
  0x6c   : > { %8819 = vmatpush3.bf16.msra.mxu1 %v11012_v31 }
  0x6d   : > { %9940 = vmatprep.subr.bf16.mxu1 %v11018_v37 }
  0x6e   : > { %807 = vmatmul.mubr.bf16.gmra.mrb[32].mxu0 %v11792_v27  ;;  %9925 = vmatmul.mubr.bf16.gmra.mrb[32].mxu1 %v10985_v29 }
  0x6f   : > { %814 = vmatprep.mubr.bf16.mxu0 %v11802_v32  ;;  %9928 = vmatprep.mubr.bf16.mxu1 %v10990_v34 }
  0x76   : > { %815 = vmatmul.mubr.bf16.gmra.mrb[36].mxu0 %v11814_v38  ;;  %9929 = vmatmul.mubr.bf16.gmra.mrb[36].mxu1 %v10992_v39 }
  0x77   : > { %822 = vmatprep.mubr.bf16.mxu0 %v11818_v40  ;;  %9932 = vmatprep.mubr.bf16.mxu1 %v10999_v42 }
  0x7e   : > { %823 = vmatmul.mubr.bf16.gmra.mrb[40].mxu0 %v11824_v43  ;;  %9933 = vmatmul.mubr.bf16.gmra.mrb[40].mxu1 %v11001_v44 }
  0x7f   : > { %830 = vmatprep.mubr.bf16.mxu0 %v11828_v46  ;;  %9936 = vmatprep.mubr.bf16.mxu1 %v11008_v47 }
  0x86   : > { %831 = vmatmul.mubr.bf16.gmra.mrb[44].mxu0 %v11834_v49  ;;  %9937 = vmatmul.mubr.bf16.gmra.mrb[44].mxu1 %v11010_v50  ;;  %v11053_v50 = vld [vmem:[%s13472_s1 + $0x208] sm:$0xff]  }
  0x87   : > { %1224 = vmatprep.mubr.bf16.mxu1 %v11015_v51  ;;  %2059 = vmatprep.mubr.bf16.mxu0 %v11614_v24  ;;  %v11057_v51 = vld [vmem:[%s13472_s1 + $0x348] sm:$0xff]  }
  0x8e   : > { %1225 = vmatmul.mubr.bf16.vlgmr.msra.gmra.mrb[48].mxu1 %v11013_v53  ;;  %2060 = vmatmul.mubr.bf16.vlgmr.msra.gmra.mrb[48].mxu0 %v11626_v28 }
  0x8f   : > { %9077 = vmatpush3.bf16.msra.mxu0 %v11017_v54  ;;  %9941 = vmatpush3.bf16.msra.mxu1 %v11018_v37  ;;  %v11048_v37 = vld [vmem:[%s13472_s1 + $0x300] sm:$0xff]  }
  0x90   : > { %1232 = vmatprep.mubr.bf16.mxu1 %v11578_v11  ;;  %2067 = vmatprep.mubr.bf16.mxu0 %v11639_v33  ;;  %v11027_v11 = vld [vmem:[%s13472_s1 + $0x98] sm:$0xff]  }
  0x91   : > { %9078 = vmatprep.subr.bf16.mxu0 %v11019_v55  ;;  %9942 = vmatprep.subr.bf16.mxu1 %v11021_v57  ;;  %v11058_v55 = vld [vmem:[%s13472_s1 + $0x308] sm:$0xff]  }
  0x93   : > { %9079 = vmatpush3.bf16.msra.mxu0 %v11020_v58  ;;  %9943 = vmatpush3.bf16.msra.mxu1 %v11021_v57  ;;  %v11480_v57 = vld [vmem:[%s11569_s4 + $0x20] ss:$12 sps:$4 sm:$0xff]   ;;  %v11059_v58 = vld [vmem:[%s13472_s1 + $0x210] sm:$0xff]  }
  0x94   : > { %9080 = vmatprep.subr.bf16.mxu0 %v11022_v59  ;;  %9944 = vmatprep.subr.bf16.mxu1 %v11024_v60  ;;  %v11067_v59 = vld [vmem:[%s13472_s1 + $0x350] sm:$0xff]  }
  0x96   : > { %1233 = vmatmul.mubr.bf16.gmra.mrb[52].mxu1 %v11604_v20  ;;  %2068 = vmatmul.mubr.bf16.gmra.mrb[52].mxu0 %v11648_v36  ;;  %v11029_v20 = vld [vmem:[%s13472_s1 + $0x260] sm:$0xff]  }
  0x97   : > { %1240 = vmatprep.mubr.bf16.mxu1 %v11614_v24  ;;  %2075 = vmatprep.mubr.bf16.mxu0 %v11661_v41  ;;  %v11031_v24 = vld [vmem:[%s13472_s1 + $0x2a8] sm:$0xff]  }
  0x98   : > { %9081 = vmatpush3.bf16.msra.mxu0 %v11023_v61  ;;  %9945 = vmatpush3.bf16.msra.mxu1 %v11024_v60  ;;  %v11481_v60 = vld [vmem:[%s11569_s4 + $0x38] ss:$12 sps:$4 sm:$0xff]   ;;  %v11052_v61 = vld [vmem:[%s11569_s4 + $0x60] ss:$12 sps:$4 sm:$0xff]  }
  0x99   : > { %9082 = vmatprep.subr.bf16.mxu0 %v11025_v63  ;;  %9946 = vmatprep.subr.bf16.mxu1 %v11027_v11 }
  0x9c   : > { %9083 = vmatpush3.bf16.msra.mxu0 %v11026_v0  ;;  %9947 = vmatpush3.bf16.msra.mxu1 %v11027_v11  ;;  %v11054_v0 = vld [vmem:[%s11569_s4 + $0x7c] ss:$12 sps:$4 sm:$0xff]  }
  0x9d   : > { %9084 = vmatprep.subr.bf16.mxu0 %v11028_v2  ;;  %9948 = vmatprep.subr.bf16.mxu1 %v11030_v3 }
  0x9e   : > { %1241 = vmatmul.mubr.bf16.gmra.mrb[56].mxu1 %v11626_v28  ;;  %2076 = vmatmul.mubr.bf16.gmra.mrb[56].mxu0 %v11673_v45  ;;  %v11035_v28 = vld [vmem:[%s13472_s1 + $0x270] sm:$0xff]  }
  0x9f   : > { %1248 = vmatprep.mubr.bf16.mxu1 %v11639_v33  ;;  %2083 = vmatprep.mubr.bf16.mxu0 %v11680_v48  ;;  %v11037_v33 = vld [vmem:[%s13472_s1 + $0x2b8] sm:$0xff]  }
  0xa0   : > { %9085 = vmatpush3.bf16.msra.mxu0 %v11029_v20  ;;  %9949 = vmatpush3.bf16.msra.mxu1 %v11030_v3 }
  0xa1   : > { %9086 = vmatprep.subr.bf16.mxu0 %v11031_v24  ;;  %9950 = vmatprep.subr.bf16.mxu1 %v11033_v4 }
  0xa4   : > { %9087 = vmatpush3.bf16.msra.mxu0 %v11032_v5  ;;  %9951 = vmatpush3.bf16.msra.mxu1 %v11033_v4 }
  0xa5   : > { %9088 = vmatprep.subr.bf16.mxu0 %v11034_v7  ;;  %9952 = vmatprep.subr.bf16.mxu1 %v11036_v8  ;;  %v11063_v7 = vld [vmem:[%s13472_s1 + $0x218] sm:$0xff]  }
  0xa6   : > { %1249 = vmatmul.mubr.bf16.gmra.mrb[60].mxu1 %v11648_v36  ;;  %2084 = vmatmul.mubr.bf16.gmra.mrb[60].mxu0 %v11692_v52  ;;  %v11472_v36 = vld [vmem:[%s11569_s4 + $0x13c] ss:$12 sps:$4 sm:$0xff]  }
  0xa7   : > { %1256 = vmatprep.mubr.bf16.mxu1 %v11661_v41  ;;  %2091 = vmatprep.mubr.bf16.mxu0 %v11702_v56  ;;  %v11473_v41 = vld [vmem:[%s11569_s4 + $0x138] ss:$12 sps:$4 sm:$0xff]  }
  0xa8   : > { %9089 = vmatpush3.bf16.msra.mxu0 %v11035_v28  ;;  %9953 = vmatpush3.bf16.msra.mxu1 %v11036_v8 }
  0xa9   : > { %9090 = vmatprep.subr.bf16.mxu0 %v11037_v33  ;;  %9954 = vmatprep.subr.bf16.mxu1 %v11039_v10  ;;  %v11068_v33 = vld [vmem:[%s13472_s1 + $0x310] sm:$0xff]  }
  0xac   : > { %9091 = vmatpush3.bf16.msra.mxu0 %v11038_v12  ;;  %9955 = vmatpush3.bf16.msra.mxu1 %v11039_v10  ;;  %v11077_v10 = vld [vmem:[%s13472_s1 + $0x358] sm:$0xff]  }
  0xad   : > { %9212 = vmatprep.subr.bf16.mxu0 %v11047_v13  ;;  %9988 = vmatprep.subr.bf16.mxu1 %v11928_v14 }
  0xae   : > { %1257 = vmatmul.mubr.bf16.gmra.mrb[64].mxu1 %v11673_v45  ;;  %2092 = vmatmul.mubr.bf16.gmra.mrb[64].mxu0 %v11720_v62  ;;  %v11474_v45 = vld [vmem:[%s11569_s4 + $0x154] ss:$12 sps:$4 sm:$0xff]  }
  0xaf   : > { %1264 = vmatprep.mubr.bf16.mxu1 %v11680_v48  ;;  %2099 = vmatprep.mubr.bf16.mxu0 %v11727_v1  ;;  %v11475_v48 = vld [vmem:[%s11569_s4 + $0x150] ss:$12 sps:$4 sm:$0xff]  }
  0xb6   : > { %1265 = vmatmul.mubr.bf16.gmra.mrb[68].mxu1 %v11692_v52  ;;  %2100 = vmatmul.mubr.bf16.gmra.mrb[68].mxu0 %v11742_v6  ;;  %v11476_v52 = vld [vmem:[%s11569_s4 + $0x16c] ss:$12 sps:$4 sm:$0xff]  }
  0xb7   : > { %1272 = vmatprep.mubr.bf16.mxu1 %v11702_v56  ;;  %2107 = vmatprep.mubr.bf16.mxu0 %v11749_v9  ;;  %v11477_v56 = vld [vmem:[%s11569_s4 + $0x168] ss:$12 sps:$4 sm:$0xff]  }
  0xbe   : > { %1273 = vmatmul.mubr.bf16.gmra.mrb[72].mxu1 %v11720_v62  ;;  %2108 = vmatmul.mubr.bf16.gmra.mrb[72].mxu0 %v11770_v17  ;;  %v11478_v62 = vld [vmem:[%s11569_s4 + $0x184] ss:$12 sps:$4 sm:$0xff]  }
  0xbf   : > { %1280 = vmatprep.mubr.bf16.mxu1 %v11727_v1  ;;  %2115 = vmatprep.mubr.bf16.mxu0 %v11777_v21  ;;  %v11040_v1 = vld [vmem:[%s11569_s4 + $0x19c] ss:$12 sps:$4 sm:$0xff]  }
  0xc6   : > { %1281 = vmatmul.mubr.bf16.gmra.mrb[76].mxu1 %v11742_v6  ;;  %2116 = vmatmul.mubr.bf16.gmra.mrb[76].mxu0 %v11792_v27  ;;  %v11479_v6 = vld [vmem:[%s11569_s4 + $0x180] ss:$12 sps:$4 sm:$0xff]  }
  0xc7   : > { %1288 = vmatprep.mubr.bf16.mxu1 %v11749_v9  ;;  %2123 = vmatprep.mubr.bf16.mxu0 %v11802_v32 }
  0xce   : > { %1289 = vmatmul.mubr.bf16.gmra.mrb[80].mxu1 %v11770_v17  ;;  %2124 = vmatmul.mubr.bf16.gmra.mrb[80].mxu0 %v11814_v38 }
  0xcf   : > { %1296 = vmatprep.mubr.bf16.mxu1 %v11777_v21  ;;  %2131 = vmatprep.mubr.bf16.mxu0 %v11818_v40 }
  0xd6   : > { %1297 = vmatmul.mubr.bf16.gmra.mrb[84].mxu1 %v11792_v27  ;;  %2132 = vmatmul.mubr.bf16.gmra.mrb[84].mxu0 %v11824_v43 }
  0xd7   : > { %1304 = vmatprep.mubr.bf16.mxu1 %v11802_v32  ;;  %2139 = vmatprep.mubr.bf16.mxu0 %v11828_v46  ;;  %v11044_v32 = vld [vmem:[%s11569_s4 + $0x48] ss:$12 sps:$4 sm:$0xff]  }
  0xde   : > { %1305 = vmatmul.mubr.bf16.gmra.mrb[88].mxu1 %v11814_v38  ;;  %2140 = vmatmul.mubr.bf16.gmra.mrb[88].mxu0 %v11834_v49 }
  0xdf   : > { %1312 = vmatprep.mubr.bf16.mxu1 %v11818_v40  ;;  %2147 = vmatprep.mubr.bf16.mxu0 %v11472_v36 }
  0xe6   : > { %1313 = vmatmul.mubr.bf16.gmra.mrb[92].mxu1 %v11824_v43  ;;  %2148 = vmatmul.mubr.bf16.gmra.mrb[92].mxu0 %v11473_v41 }
  0xe7   : > { %1320 = vmatprep.mubr.bf16.mxu1 %v11828_v46  ;;  %2155 = vmatprep.mubr.bf16.mxu0 %v11474_v45  ;;  %v11050_v46 = vld [vmem:[%s11569_s4 + $0x64] ss:$12 sps:$4 sm:$0xff]  }
  0xee   : > { %1321 = vmatmul.mubr.bf16.gmra.mrb[96].mxu1 %v11834_v49  ;;  %2156 = vmatmul.mubr.bf16.gmra.mrb[96].mxu0 %v11475_v48 }
  0xef   : > { %1328 = vmatprep.mubr.bf16.mxu1 %v11472_v36  ;;  %2163 = vmatprep.mubr.bf16.mxu0 %v11476_v52  ;;  %v11078_v36 = vld [vmem:[%s13472_s1 + $0x318] sm:$0xff]  }
  0xf6   : > { %1329 = vmatmul.mubr.bf16.gmra.mrb[100].mxu1 %v11473_v41  ;;  %2164 = vmatmul.mubr.bf16.gmra.mrb[100].mxu0 %v11477_v56  ;;  %v11483_v41 = vld [vmem:[%s11569_s4 + $0x68] ss:$12 sps:$4 sm:$0xff]  }
  0xf7   : > { %1336 = vmatprep.mubr.bf16.mxu1 %v11474_v45  ;;  %2171 = vmatprep.mubr.bf16.mxu0 %v11478_v62  ;;  %v11069_v45 = vld [vmem:[%s13472_s1 + $0x220] sm:$0xff]  }
  0xfe   : > { %1337 = vmatmul.mubr.bf16.gmra.mrb[104].mxu1 %v11475_v48  ;;  %2172 = vmatmul.mubr.bf16.gmra.mrb[104].mxu0 %v11479_v6  ;;  %v11089_v48 = vld [vmem:[%s13472_s1 + $0x360] sm:$0xff]  }
  0xff   : > { %1344 = vmatprep.mubr.bf16.mxu1 %v11476_v52  ;;  %2179 = vmatprep.mubr.bf16.mxu0 %v11040_v1  ;;  %v11056_v52 = vld [vmem:[%s11569_s4 + $0x78] ss:$12 sps:$4 sm:$0xff]   ;;  %v11060_v1 = vld [vmem:[%s11569_s4 + $0x94] ss:$12 sps:$4 sm:$0xff]  }
 0x101   : > { %v8684_v9 = vpop.f32.mrb[0].mxu0  ;;  %v8756_v15 = vpop.f32.mrb[0].mxu1 }
 0x102   : > { %v8685_v17 = vpop.f32.mrb[1].mxu0  ;;  %v8757_v18 = vpop.f32.mrb[1].mxu1 }
 0x103   : > { %v11971_v19 = vadd.f32 %v8685_v17, %v8684_v9  ;;  %v8687_v21 = vpop.f32.mrb[2].mxu0  ;;  %v11973_v22 = vadd.f32 %v8757_v18, %v8756_v15  ;;  %v8759_v23 = vpop.f32.mrb[2].mxu1 }
 0x104   : > { %v8688_v27 = vpop.f32.mrb[3].mxu0  ;;  %v8760_v29 = vpop.f32.mrb[3].mxu1 }
 0x105   : > { %v11977_v30 = vadd.f32 %v8688_v27, %v8687_v21  ;;  %v11979_v31 = vadd.f32 %v8760_v29, %v8759_v23  ;;  %v11073_v21 = vld [vmem:[%s13472_s1 + $0x228] sm:$0xff]  }
 0x106   : > { %1345 = vmatmul.mubr.bf16.gmra.mrb[108].mxu1 %v11477_v56  ;;  %2180 = vmatmul.mubr.bf16.gmra.mrb[108].mxu0 %v11042_v16  ;;  %v11103_v27 = vld [vmem:[%s13472_s1 + $0x368] sm:$0xff]  }
 0x107   : > { %9956 = vmatprep.mubr.bf16.mxu1 %v11043_v25  ;;  %2926 = vmatprep.mubr.bf16.mxu0 %v11046_v26  ;;  %v11090_v26 = vld [vmem:[%s13472_s1 + $0x320] sm:$0xff]  }
 0x109   : > { %v8690_v34 = vpop.f32.mrb[4].mxu0  ;;  %v8762_v35 = vpop.f32.mrb[4].mxu1 }
 0x10a   : > { %v8691_v38 = vpop.f32.mrb[5].mxu0  ;;  %v8763_v39 = vpop.f32.mrb[5].mxu1 }
 0x10b   : > { %v11985_v40 = vadd.f32 %v8691_v38, %v8690_v34  ;;  %v8693_v42 = vpop.f32.mrb[6].mxu0  ;;  %v11987_v43 = vadd.f32 %v8763_v39, %v8762_v35  ;;  %v8765_v44 = vpop.f32.mrb[6].mxu1  ;;  %v11484_v34 = vld [vmem:[%s11569_s4 + $0x80] ss:$12 sps:$4 sm:$0xff]   ;;  %v11485_v35 = vld [vmem:[%s11569_s4 + $0x98] ss:$12 sps:$4 sm:$0xff]  }
 0x10c   : > { %v8694_v47 = vpop.f32.mrb[7].mxu0  ;;  %v8766_v49 = vpop.f32.mrb[7].mxu1  ;;  %v11062_v38 = vld [vmem:[%s11569_s4 + $0x90] ss:$12 sps:$4 sm:$0xff]  }
 0x10d   : > { %v11996_v53 = vadd.f32 %v8694_v47, %v8693_v42  ;;  %v11998_v54 = vadd.f32 %v8766_v49, %v8765_v44  ;;  %v11064_v42 = vld [vmem:[%s11569_s4 + $0xac] ss:$12 sps:$4 sm:$0xff]   ;;  %v11079_v44 = vld [vmem:[%s13472_s1 + $0x230] sm:$0xff]  }
 0x10e   : > { %9957 = vmatmul.mubr.bf16.vlgmr.msra.gmra.mrb[16].mxu1 %v11480_v57  ;;  %2927 = vmatmul.mubr.bf16.vlgmr.msra.gmra.mrb[112].mxu0 %v11044_v32 }
 0x10f   : > { %9213 = vmatpush3.bf16.msra.mxu0 %v11048_v37  ;;  %9989 = vmatpush3.bf16.msra.mxu1 %v11928_v14  ;;  %v11482_v14 = vld [vmem:[%s11569_s4 + $0x50] ss:$12 sps:$4 sm:$0xff]   ;;  %v11104_v37 = vld [vmem:[%s13472_s1 + $0x328] sm:$0xff]  }
 0x110   : > { %9960 = vmatprep.mubr.bf16.mxu1 %v11481_v60  ;;  %2934 = vmatprep.mubr.bf16.mxu0 %v11050_v46  ;;  %v11117_v46 = vld [vmem:[%s13472_s1 + $0x370] sm:$0xff]  }
 0x111   : > { %v8696_v63 = vpop.f32.mrb[8].mxu0  ;;  %v8768_v11 = vpop.f32.mrb[8].mxu1  ;;  %9990 = vmatprep.subr.bf16.mxu1 %v11053_v50  ;;  %9214 = vmatprep.subr.bf16.mxu0 %v11057_v51  ;;  %v11083_v51 = vld [vmem:[%s13472_s1 + $0x238] sm:$0xff]  }
 0x112   : > { %v8697_v2 = vpop.f32.mrb[9].mxu0  ;;  %v8769_v3 = vpop.f32.mrb[9].mxu1  ;;  %v11486_v60 = vld [vmem:[%s11569_s4 + $0xb0] ss:$12 sps:$4 sm:$0xff]  }
 0x113   : > { %v12014_v20 = vadd.f32 %v8697_v2, %v8696_v63  ;;  %v8699_v24 = vpop.f32.mrb[10].mxu0  ;;  %v12016_v4 = vadd.f32 %v8769_v3, %v8768_v11  ;;  %v8771_v5 = vpop.f32.mrb[10].mxu1  ;;  %9991 = vmatpush3.bf16.msra.mxu1 %v11053_v50  ;;  %9215 = vmatpush3.bf16.msra.mxu0 %v11058_v55  ;;  %v11118_v55 = vld [vmem:[%s13472_s1 + $0x330] sm:$0xff]   ;;  %v12095_v11 = vld [vmem:[%s13472_s1 + $0x2c0] sm:$0xff]  }
 0x114   : > { %v8700_v8 = vpop.f32.mrb[11].mxu0  ;;  %v8772_v28 = vpop.f32.mrb[11].mxu1  ;;  %9992 = vmatprep.subr.bf16.mxu1 %v11059_v58  ;;  %9216 = vmatprep.subr.bf16.mxu0 %v11067_v59  ;;  %v11487_v63 = vld [vmem:[%s11569_s4 + $0xc8] ss:$12 sps:$4 sm:$0xff]  }
 0x115   : > { %v12027_v12 = vadd.f32 %v8700_v8, %v8699_v24  ;;  %v12029_v13 = vadd.f32 %v8772_v28, %v8771_v5  ;;  %v11066_v2 = vld [vmem:[%s11569_s4 + $0xa8] ss:$12 sps:$4 sm:$0xff]   ;;  %v11070_v8 = vld [vmem:[%s11569_s4 + $0xc4] ss:$12 sps:$4 sm:$0xff]  }
 0x116   : > { %9961 = vmatmul.mubr.bf16.gmra.mrb[20].mxu1 %v11482_v14  ;;  %2935 = vmatmul.mubr.bf16.gmra.mrb[116].mxu0 %v11052_v61  ;;  %v11129_v61 = vld [vmem:[%s13472_s1 + $0x338] sm:$0xff]  }
 0x117   : > { %9964 = vmatprep.mubr.bf16.mxu1 %v11483_v41  ;;  %2942 = vmatprep.mubr.bf16.mxu0 %v11054_v0  ;;  %v11139_v0 = vld [vmem:[%s13472_s1 + $0x4c0] sm:$0xff]  }
 0x118   : > { %9993 = vmatpush3.bf16.msra.mxu1 %v11059_v58  ;;  %9217 = vmatpush3.bf16.msra.mxu0 %v11068_v33  ;;  %v11128_v58 = vld [vmem:[%s13472_s1 + $0x378] sm:$0xff]   ;;  %v11072_v41 = vld [vmem:[%s11569_s4 + $0xc0] ss:$12 sps:$4 sm:$0xff]  }
 0x119   : > { %v8702_v56 = vpop.f32.mrb[12].mxu0  ;;  %v8774_v62 = vpop.f32.mrb[12].mxu1  ;;  %9994 = vmatprep.subr.bf16.mxu1 %v11063_v7  ;;  %9218 = vmatprep.subr.bf16.mxu0 %v11077_v10  ;;  %v11488_v10 = vld [vmem:[%s11569_s4 + $0xe0] ss:$12 sps:$4 sm:$0xff]   ;;  %v11489_v14 = vld [vmem:[%s11569_s4 + $0xf8] ss:$12 sps:$4 sm:$0xff]  }
 0x11a   : > { %v8703_v6 = vpop.f32.mrb[13].mxu0  ;;  %v8775_v9 = vpop.f32.mrb[13].mxu1 }
 0x11b   : > { %v12044_v15 = vadd.f32 %v8703_v6, %v8702_v56  ;;  %v8705_v16 = vpop.f32.mrb[14].mxu0  ;;  %v12046_v17 = vadd.f32 %v8775_v9, %v8774_v62  ;;  %v8777_v18 = vpop.f32.mrb[14].mxu1  ;;  %v11074_v56 = vld [vmem:[%s11569_s4 + $0xdc] ss:$12 sps:$4 sm:$0xff]  }
 0x11c   : > { %v8706_v23 = vpop.f32.mrb[15].mxu0  ;;  %v8778_v25 = vpop.f32.mrb[15].mxu1  ;;  %9995 = vmatpush3.bf16.msra.mxu1 %v11063_v7  ;;  %9219 = vmatpush3.bf16.msra.mxu0 %v11078_v36  ;;  %v11490_v6 = vld [vmem:[%s11569_s4 + $0x110] ss:$12 sps:$4 sm:$0xff]   ;;  %v11491_v9 = vld [vmem:[%s11569_s4 + $0x128] ss:$12 sps:$4 sm:$0xff]  }
 0x11d   : > { %v12057_v29 = vadd.f32 %v8706_v23, %v8705_v16  ;;  %v12059_v32 = vadd.f32 %v8778_v25, %v8777_v18  ;;  %9996 = vmatprep.subr.bf16.mxu1 %v11069_v45  ;;  %9220 = vmatprep.subr.bf16.mxu0 %v11089_v48  ;;  %v11076_v16 = vld [vmem:[%s11569_s4 + $0xd8] ss:$12 sps:$4 sm:$0xff]  }
 0x11e   : > { %9965 = vmatmul.mubr.bf16.gmra.mrb[24].mxu1 %v11484_v34  ;;  %2943 = vmatmul.mubr.bf16.gmra.mrb[120].mxu0 %v11056_v52 }
 0x11f   : > { %9968 = vmatprep.mubr.bf16.mxu1 %v11485_v35  ;;  %2950 = vmatprep.mubr.bf16.mxu0 %v11060_v1  ;;  %v11492_v35 = vld [vmem:[%s11569_s4 + $0x140] ss:$12 sps:$4 sm:$0xff]  }
 0x120   : > { %9997 = vmatpush3.bf16.msra.mxu1 %v11069_v45  ;;  %9221 = vmatpush3.bf16.msra.mxu0 %v11090_v26  ;;  %v11080_v26 = vld [vmem:[%s11569_s4 + $0xf4] ss:$12 sps:$4 sm:$0xff]  }
 0x121   : > { %v8708_v39 = vpop.f32.mrb[16].mxu0  ;;  %9998 = vmatprep.subr.bf16.mxu1 %v11073_v21  ;;  %9222 = vmatprep.subr.bf16.mxu0 %v11103_v27 }
 0x122   : > { %v8709_v47 = vpop.f32.mrb[17].mxu0 }
 0x123   : > { %v12074_v49 = vadd.f32 %v8709_v47, %v8708_v39  ;;  %v8711_v50 = vpop.f32.mrb[18].mxu0  ;;  %v11082_v39 = vld [vmem:[%s11569_s4 + $0xf0] ss:$12 sps:$4 sm:$0xff]   ;;  %v11084_v47 = vld [vmem:[%s11569_s4 + $0x38] ss:$12 sps:$4 sm:$0xff]  }
 0x124   : > { %v8712_v57 = vpop.f32.mrb[19].mxu0  ;;  %9999 = vmatpush3.bf16.msra.mxu1 %v11073_v21  ;;  %9223 = vmatpush3.bf16.msra.mxu0 %v11104_v37  ;;  %v11493_v37 = vld [vmem:[%s11569_s4 + $0x158] ss:$12 sps:$4 sm:$0xff]  }
 0x125   : > { %v12085_v59 = vadd.f32 %v8712_v57, %v8711_v50  ;;  %10000 = vmatprep.subr.bf16.mxu1 %v11079_v44  ;;  %9224 = vmatprep.subr.bf16.mxu0 %v11117_v46  ;;  %v11085_v50 = vld [vmem:[%s11569_s4 + $0x10c] ss:$12 sps:$4 sm:$0xff]   ;;  %v11494_v57 = vld [vmem:[%s11569_s4 + $0x170] ss:$12 sps:$4 sm:$0xff]  }
 0x126   : > { %9969 = vmatmul.mubr.bf16.gmra.mrb[28].mxu1 %v11486_v60  ;;  %2951 = vmatmul.mubr.bf16.gmra.mrb[124].mxu0 %v11062_v38  ;;  %v11088_v60 = vld [vmem:[%s11569_s4 + $0x108] ss:$12 sps:$4 sm:$0xff]  }
 0x127   : > { %9972 = vmatprep.mubr.bf16.mxu1 %v11487_v63  ;;  %2958 = vmatprep.mubr.bf16.mxu0 %v11064_v42 }
 0x128   : > { %10001 = vmatpush3.bf16.msra.mxu1 %v11079_v44  ;;  %9225 = vmatpush3.bf16.msra.mxu0 %v11118_v55 }
 0x129   : > { %v8714_v3 = vpop.f32.mrb[20].mxu0  ;;  %10002 = vmatprep.subr.bf16.mxu1 %v11083_v51  ;;  %9226 = vmatprep.subr.bf16.mxu0 %v11128_v58  ;;  %v11087_v58 = vld [vmem:[%s11569_s4 + $0x50] ss:$12 sps:$4 sm:$0xff]  }
 0x12a   : > { %v8715_v24 = vpop.f32.mrb[21].mxu0 }
 0x12b   : > { %v12101_v5 = vadd.f32 %v8715_v24, %v8714_v3  ;;  %v8717_v7 = vpop.f32.mrb[22].mxu0  ;;  %v11092_v3 = vld [vmem:[%s11569_s4 + $0x68] ss:$12 sps:$4 sm:$0xff]  }
 0x12c   : > { %v8718_v28 = vpop.f32.mrb[23].mxu0  ;;  %10003 = vmatpush3.bf16.msra.mxu1 %v11083_v51  ;;  %9227 = vmatpush3.bf16.msra.mxu0 %v11129_v61 }
 0x12d   : > { %v12104_v33 = vadd.f32 %v8718_v28, %v8717_v7  ;;  %10036 = vmatprep.subr.bf16.mxu1 %v12095_v11  ;;  %9484 = vmatprep.subr.bf16.mxu0 %v11139_v0  ;;  %v11093_v7 = vld [vmem:[%s11569_s4 + $0x124] ss:$12 sps:$4 sm:$0xff]  }
 0x12e   : > { %9973 = vmatmul.mubr.bf16.gmra.mrb[32].mxu1 %v11488_v10  ;;  %2959 = vmatmul.mubr.bf16.gmra.mrb[128].mxu0 %v11066_v2  ;;  %v11105_v10 = vld [vmem:[%s13472_s1 + $0x2d0] sm:$0xff]  }
 0x12f   : > { %9976 = vmatprep.mubr.bf16.mxu1 %v11489_v14  ;;  %2966 = vmatprep.mubr.bf16.mxu0 %v11070_v8  ;;  %v11097_v8 = vld [vmem:[%s13472_s1 + $0x2c8] sm:$0xff]  }
 0x130   : > { %v11095_v14 = vld [vmem:[%s11569_s4 + $0x80] ss:$12 sps:$4 sm:$0xff]  }
 0x131   : > { %v8720_v36 = vpop.f32.mrb[24].mxu0 }
 0x132   : > { %v8721_v45 = vpop.f32.mrb[25].mxu0 }
 0x133   : > { %v12110_v48 = vadd.f32 %v8721_v45, %v8720_v36  ;;  %v8723_v52 = vpop.f32.mrb[26].mxu0 }
 0x134   : > { %v8724_v62 = vpop.f32.mrb[27].mxu0 }
 0x135   : > { %v12113_v1 = vadd.f32 %v8724_v62, %v8723_v52  ;;  %v11098_v62 = vld [vmem:[%s11569_s4 + $0x98] ss:$12 sps:$4 sm:$0xff]  }
 0x136   : > { %9977 = vmatmul.mubr.bf16.gmra.mrb[36].mxu1 %v11490_v6  ;;  %2967 = vmatmul.mubr.bf16.gmra.mrb[132].mxu0 %v11072_v41  ;;  %v11096_v41 = vld [vmem:[%s11569_s4 + $0x120] ss:$12 sps:$4 sm:$0xff]   ;;  %v11099_v6 = vld [vmem:[%s11569_s4 + $0x13c] ss:$12 sps:$4 sm:$0xff]  }
 0x137   : > { %9980 = vmatprep.mubr.bf16.mxu1 %v11491_v9  ;;  %2974 = vmatprep.mubr.bf16.mxu0 %v11074_v56 }
 0x139   : > { %v8726_v18 = vpop.f32.mrb[28].mxu0 }
 0x13a   : > { %v8727_v21 = vpop.f32.mrb[29].mxu0 }
 0x13b   : > { %v12118_v23 = vadd.f32 %v8727_v21, %v8726_v18  ;;  %v8729_v25 = vpop.f32.mrb[30].mxu0  ;;  %v11119_v18 = vld [vmem:[%s13472_s1 + $0x2e0] sm:$0xff]   ;;  %v11101_v21 = vld [vmem:[%s11569_s4 + $0xb0] ss:$12 sps:$4 sm:$0xff]  }
 0x13c   : > { %v8730_v27 = vpop.f32.mrb[31].mxu0 }
 0x13d   : > { %v12121_v34 = vadd.f32 %v8730_v27, %v8729_v25  ;;  %v11102_v25 = vld [vmem:[%s11569_s4 + $0x138] ss:$12 sps:$4 sm:$0xff]  }
 0x13e   : > { %9981 = vmatmul.mubr.bf16.gmra.mrb[40].mxu1 %v11492_v35  ;;  %2975 = vmatmul.mubr.bf16.gmra.mrb[136].mxu0 %v11076_v16 }
 0x13f   : > { %9984 = vmatprep.mubr.bf16.mxu1 %v11493_v37  ;;  %2982 = vmatprep.mubr.bf16.mxu0 %v11080_v26 }
 0x141   : > { %v8732_v38 = vpop.f32.mrb[32].mxu0 }
 0x142   : > { %v8733_v42 = vpop.f32.mrb[33].mxu0 }
 0x143   : > { %v12126_v44 = vadd.f32 %v8733_v42, %v8732_v38  ;;  %v8735_v46 = vpop.f32.mrb[34].mxu0  ;;  %v11106_v38 = vld [vmem:[%s11569_s4 + $0xc8] ss:$12 sps:$4 sm:$0xff]  }
 0x144   : > { %v8736_v51 = vpop.f32.mrb[35].mxu0 }
 0x145   : > { %v12130_v55 = vadd.f32 %v8736_v51, %v8735_v46  ;;  %v11125_v46 = vld [vmem:[%s13472_s1 + $0x2e8] sm:$0xff]   ;;  %v11110_v51 = vld [vmem:[%s11569_s4 + $0x150] ss:$12 sps:$4 sm:$0xff]  }
 0x146   : > { %9985 = vmatmul.mubr.bf16.gmra.mrb[44].mxu1 %v11494_v57  ;;  %2983 = vmatmul.mubr.bf16.gmra.mrb[140].mxu0 %v11082_v39  ;;  %v11107_v39 = vld [vmem:[%s11569_s4 + $0x154] ss:$12 sps:$4 sm:$0xff]  }
 0x147   : > { %10004 = vmatprep.mubr.bf16.mxu1 %v11084_v47  ;;  %2990 = vmatprep.mubr.bf16.mxu0 %v11085_v50  ;;  %v11109_v50 = vld [vmem:[%s11569_s4 + $0xe0] ss:$12 sps:$4 sm:$0xff]  }
 0x149   : > { %v8738_v61 = vpop.f32.mrb[36].mxu0 }
 0x14a   : > { %v8739_v63 = vpop.f32.mrb[37].mxu0 }
 0x14b   : > { %v12135_v0 = vadd.f32 %v8739_v63, %v8738_v61  ;;  %v8741_v2 = vpop.f32.mrb[38].mxu0 }
 0x14c   : > { %v8742_v24 = vpop.f32.mrb[39].mxu0 }
 0x14d   : > { %v12142_v28 = vadd.f32 %v8742_v24, %v8741_v2 }
 0x14e   : > { %10005 = vmatmul.mubr.bf16.vlgmr.msra.gmra.mrb[16].mxu1 %v11087_v58  ;;  %2991 = vmatmul.mubr.bf16.gmra.mrb[144].mxu0 %v11088_v60  ;;  %v11130_v60 = vld [vmem:[%s13472_s1 + $0x2f0] sm:$0xff]  }
 0x14f   : > { %10037 = vmatpush3.bf16.msra.mxu1 %v12095_v11  ;;  %10008 = vmatprep.mubr.bf16.mxu1 %v11092_v3  ;;  %v11111_v11 = vld [vmem:[%s13472_s1 + $0x2d8] sm:$0xff]  }
 0x150   : > { %2998 = vmatprep.mubr.bf16.mxu0 %v11093_v7  ;;  %10038 = vmatprep.subr.bf16.mxu1 %v11097_v8 }
 0x151   : > { %v8744_v36 = vpop.f32.mrb[40].mxu0 }
 0x152   : > { %v8745_v45 = vpop.f32.mrb[41].mxu0 }
 0x153   : > { %v12150_v52 = vadd.f32 %v8745_v45, %v8744_v36  ;;  %v8747_v56 = vpop.f32.mrb[42].mxu0  ;;  %10039 = vmatpush3.bf16.msra.mxu1 %v11097_v8  ;;  %v11112_v8 = vld [vmem:[%s11569_s4 + $0xf8] ss:$12 sps:$4 sm:$0xff]  }
 0x154   : > { %v8748_v9 = vpop.f32.mrb[43].mxu0  ;;  %10040 = vmatprep.subr.bf16.mxu1 %v11105_v10 }
 0x155   : > { %v12157_v16 = vadd.f32 %v8748_v9, %v8747_v56 }
 0x156   : > { %10009 = vmatmul.mubr.bf16.gmra.mrb[20].mxu1 %v11095_v14  ;;  %2999 = vmatmul.mubr.bf16.gmra.mrb[148].mxu0 %v11096_v41 }
 0x157   : > { %10012 = vmatprep.mubr.bf16.mxu1 %v11098_v62  ;;  %3006 = vmatprep.mubr.bf16.mxu0 %v11099_v6  ;;  %v11136_v62 = vld [vmem:[%s13472_s1 + $0x2f8] sm:$0xff]  }
 0x158   : > { %10041 = vmatpush3.bf16.msra.mxu1 %v11105_v10  ;;  %v11113_v10 = vld [vmem:[%s11569_s4 + $0x16c] ss:$12 sps:$4 sm:$0xff]  }
 0x159   : > { %v8750_v26 = vpop.f32.mrb[44].mxu0  ;;  %10042 = vmatprep.subr.bf16.mxu1 %v11111_v11 }
 0x15a   : > { %v8751_v27 = vpop.f32.mrb[45].mxu0 }
 0x15b   : > { %v12164_v35 = vadd.f32 %v8751_v27, %v8750_v26  ;;  %v8753_v37 = vpop.f32.mrb[46].mxu0 }
 0x15c   : > { %v8754_v42 = vpop.f32.mrb[47].mxu0  ;;  %10043 = vmatpush3.bf16.msra.mxu1 %v11111_v11  ;;  %v11115_v11 = vld [vmem:[%s11569_s4 + $0x110] ss:$12 sps:$4 sm:$0xff]  }
 0x15d   : > { %v12171_v47 = vadd.f32 %v8754_v42, %v8753_v37  ;;  %10044 = vmatprep.subr.bf16.mxu1 %v11119_v18 }
 0x15e   : > { %10013 = vmatmul.mubr.bf16.gmra.mrb[24].mxu1 %v11101_v21  ;;  %3007 = vmatmul.mubr.bf16.gmra.mrb[152].mxu0 %v11102_v25 }
 0x15f   : > { %10016 = vmatprep.mubr.bf16.mxu1 %v11106_v38  ;;  %3014 = vmatprep.mubr.bf16.mxu0 %v11107_v39 }
 0x160   : > { %10045 = vmatpush3.bf16.msra.mxu1 %v11119_v18  ;;  %v11116_v18 = vld [vmem:[%s11569_s4 + $0x168] ss:$12 sps:$4 sm:$0xff]  }
 0x161   : > { %v8820_v57 = vpop.f32.mrb[48].mxu1  ;;  %v8956_v58 = vpop.f32.mrb[48].mxu0  ;;  %10046 = vmatprep.subr.bf16.mxu1 %v11125_v46 }
 0x162   : > { %v8821_v61 = vpop.f32.mrb[49].mxu1  ;;  %v8957_v63 = vpop.f32.mrb[49].mxu0 }
 0x163   : > { %v8822_v2 = vadd.f32 %v8821_v61, %v8820_v57  ;;  %v8958_v3 = vadd.f32 %v8957_v63, %v8956_v58  ;;  %v8823_v24 = vpop.f32.mrb[50].mxu1  ;;  %v8959_v7 = vpop.f32.mrb[50].mxu0 }
 0x164   : > { %v8824_v14 = vpop.f32.mrb[51].mxu1  ;;  %v8960_v36 = vpop.f32.mrb[51].mxu0  ;;  %10047 = vmatpush3.bf16.msra.mxu1 %v11125_v46  ;;  %v11120_v46 = vld [vmem:[%s11569_s4 + $0x128] ss:$12 sps:$4 sm:$0xff]  }
 0x165   : > { %v10349_v41 = vadd.f32 %v8822_v2, %v11971_v19  ;;  %v8825_v45 = vadd.f32 %v8824_v14, %v8823_v24  ;;  %v8961_v56 = vadd.f32 %v8960_v36, %v8959_v7  ;;  %10048 = vmatprep.subr.bf16.mxu1 %v11130_v60  ;;  %v12190_v19 = vld [vmem:[%s13472_s1 + $0x380] sm:$0xff]  }
 0x166   : > { %10017 = vmatmul.mubr.bf16.gmra.mrb[28].mxu1 %v11109_v50  ;;  %3015 = vmatmul.mubr.bf16.gmra.mrb[156].mxu0 %v11110_v51  ;;  %v11121_v50 = vld [vmem:[%s11569_s4 + $0x184] ss:$12 sps:$4 sm:$0xff]   ;;  %v11124_v24 = vld [vmem:[%s11569_s4 + $0x180] ss:$12 sps:$4 sm:$0xff]  }
 0x167   : > { %v12184_v6 = vadd.f32 %v10349_v41, %v8958_v3  ;;  %v10367_v9 = vadd.f32 %v8825_v45, %v11977_v30  ;;  %10020 = vmatprep.mubr.bf16.mxu1 %v11112_v8  ;;  %3022 = vmatprep.mubr.bf16.mxu0 %v11113_v10  ;;  %v11123_v3 = vld [vmem:[%s11569_s4 + $0x140] ss:$12 sps:$4 sm:$0xff]  }
 0x168   : > { %10049 = vmatpush3.bf16.msra.mxu1 %v11130_v60 }
 0x169   : > { %v12194_v21 = vadd.f32 %v10367_v9, %v8961_v56  ;;  %v8826_v25 = vpop.f32.mrb[52].mxu1  ;;  %v8962_v26 = vpop.f32.mrb[52].mxu0  ;;  %10050 = vmatprep.subr.bf16.mxu1 %v11136_v62 }
 0x16a   : > { %v8827_v27 = vpop.f32.mrb[53].mxu1  ;;  %v8963_v37 = vpop.f32.mrb[53].mxu0 }
 0x16b   : > { %v8828_v30 = vadd.f32 %v8827_v27, %v8826_v25  ;;  %v8964_v38 = vadd.f32 %v8963_v37, %v8962_v26  ;;  %v8829_v39 = vpop.f32.mrb[54].mxu1  ;;  %v8965_v42 = vpop.f32.mrb[54].mxu0  ;;  %v11495_v37 = vld [vmem:[%s11569_s4 + $0x19c] ss:$12 sps:$4 sm:$0xff]  }
 0x16c   : > { %v8830_v51 = vpop.f32.mrb[55].mxu1  ;;  %v8966_v57 = vpop.f32.mrb[55].mxu0  ;;  %10051 = vmatpush3.bf16.msra.mxu1 %v11136_v62  ;;  %v11126_v62 = vld [vmem:[%s11569_s4 + $0x158] ss:$12 sps:$4 sm:$0xff]  }
 0x16d   : > { %v10340_v58 = vadd.f32 %v8828_v30, %v11985_v40  ;;  %v8831_v60 = vadd.f32 %v8830_v51, %v8829_v39  ;;  %v8967_v61 = vadd.f32 %v8966_v57, %v8965_v42  ;;  %10084 = vmatprep.subr.bf16.mxu1 %v12190_v19  ;;  %v11127_v30 = vld [vmem:[%s11569_s4 + $0x170] ss:$12 sps:$4 sm:$0xff]  }
 0x16e   : > { %10021 = vmatmul.mubr.bf16.gmra.mrb[32].mxu1 %v11115_v11  ;;  %3023 = vmatmul.mubr.bf16.gmra.mrb[160].mxu0 %v11116_v18 }
 0x16f   : > { %v12200_v63 = vadd.f32 %v10340_v58, %v8964_v38  ;;  %v10358_v2 = vadd.f32 %v8831_v60, %v11996_v53  ;;  %10024 = vmatprep.mubr.bf16.mxu1 %v11120_v46  ;;  %3030 = vmatprep.mubr.bf16.mxu0 %v11121_v50  ;;  %v11131_v60 = vld [vmem:[%s11569_s4 + $0x188] ss:$12 sps:$4 sm:$0xff]  }
 0x171   : > { %v12205_v7 = vadd.f32 %v10358_v2, %v8967_v61  ;;  %v8832_v8 = vpop.f32.mrb[56].mxu1  ;;  %v8968_v10 = vpop.f32.mrb[56].mxu0  ;;  %v11132_v61 = vld [vmem:[%s11569_s4 + $0x1b4] ss:$12 sps:$4 sm:$0xff]  }
 0x172   : > { %v8833_v40 = vpop.f32.mrb[57].mxu1  ;;  %v8969_v14 = vpop.f32.mrb[57].mxu0 }
 0x173   : > { %v8834_v36 = vadd.f32 %v8833_v40, %v8832_v8  ;;  %v8970_v41 = vadd.f32 %v8969_v14, %v8968_v10  ;;  %v8835_v45 = vpop.f32.mrb[58].mxu1  ;;  %v8971_v56 = vpop.f32.mrb[58].mxu0  ;;  %v11496_v10 = vld [vmem:[%s11569_s4 + $0x198] ss:$12 sps:$4 sm:$0xff]  }
 0x174   : > { %v8836_v9 = vpop.f32.mrb[59].mxu1  ;;  %v8972_v11 = vpop.f32.mrb[59].mxu0 }
 0x175   : > { %v10385_v53 = vadd.f32 %v8834_v36, %v12014_v20  ;;  %v8837_v18 = vadd.f32 %v8836_v9, %v8835_v45  ;;  %v8973_v25 = vadd.f32 %v8972_v11, %v8971_v56  ;;  %v11134_v36 = vld [vmem:[%s11569_s4 + $0x1a0] ss:$12 sps:$4 sm:$0xff]  }
 0x176   : > { %10025 = vmatmul.mubr.bf16.gmra.mrb[36].mxu1 %v11123_v3  ;;  %3031 = vmatmul.mubr.bf16.gmra.mrb[164].mxu0 %v11124_v24 }
 0x177   : > { %v12209_v26 = vadd.f32 %v10385_v53, %v8970_v41  ;;  %v10403_v27 = vadd.f32 %v8837_v18, %v12027_v12  ;;  %10028 = vmatprep.mubr.bf16.mxu1 %v11126_v62  ;;  %3038 = vmatprep.mubr.bf16.mxu0 %v11495_v37  ;;  %v11135_v41 = vld [vmem:[%s11569_s4 + $0x1b0] ss:$12 sps:$4 sm:$0xff]  }
 0x179   : > { %v12214_v38 = vadd.f32 %v10403_v27, %v8973_v25  ;;  %v8838_v39 = vpop.f32.mrb[60].mxu1  ;;  %v8974_v42 = vpop.f32.mrb[60].mxu0  ;;  %v11137_v27 = vld [vmem:[%s11569_s4 + $0x50] ss:$12 sps:$4 sm:$0xff]  }
 0x17a   : > { %v8839_v20 = vpop.f32.mrb[61].mxu1  ;;  %v8975_v46 = vpop.f32.mrb[61].mxu0 }
 0x17b   : > { %v8840_v50 = vadd.f32 %v8839_v20, %v8838_v39  ;;  %v8976_v51 = vadd.f32 %v8975_v46, %v8974_v42  ;;  %v8841_v57 = vpop.f32.mrb[62].mxu1  ;;  %v8977_v58 = vpop.f32.mrb[62].mxu0 }
 0x17c   : > { %v8842_v12 = vpop.f32.mrb[63].mxu1  ;;  %v8978_v2 = vpop.f32.mrb[63].mxu0 }
 0x17d   : > { %v10376_v3 = vadd.f32 %v8840_v50, %v12044_v15  ;;  %v8843_v24 = vadd.f32 %v8842_v12, %v8841_v57  ;;  %v8979_v8 = vadd.f32 %v8978_v2, %v8977_v58  ;;  %v11497_v50 = vld [vmem:[%s11569_s4 + $0x64] ss:$12 sps:$4 sm:$0xff]  }
 0x17e   : > { %10029 = vmatmul.mubr.bf16.gmra.mrb[40].mxu1 %v11127_v30  ;;  %3039 = vmatmul.mubr.bf16.gmra.mrb[168].mxu0 %v11496_v10 }
 0x17f   : > { %v12220_v40 = vadd.f32 %v10376_v3, %v8976_v51  ;;  %v10394_v14 = vadd.f32 %v8843_v24, %v12057_v29  ;;  %10032 = vmatprep.mubr.bf16.mxu1 %v11131_v60  ;;  %3046 = vmatprep.mubr.bf16.mxu0 %v11132_v61  ;;  %v11138_v51 = vld [vmem:[%s11569_s4 + $0x68] ss:$12 sps:$4 sm:$0xff]  }
 0x181   : > { %v12225_v45 = vadd.f32 %v10394_v14, %v8979_v8  ;;  %v8844_v56 = vpop.f32.mrb[64].mxu1  ;;  %v8980_v62 = vpop.f32.mrb[64].mxu0  ;;  %v11142_v14 = vld [vmem:[%s11569_s4 + $0x80] ss:$12 sps:$4 sm:$0xff]  }
 0x182   : > { %v8845_v9 = vpop.f32.mrb[65].mxu1  ;;  %v8981_v15 = vpop.f32.mrb[65].mxu0 }
 0x183   : > { %v8846_v11 = vadd.f32 %v8845_v9, %v8844_v56  ;;  %v8982_v53 = vadd.f32 %v8981_v15, %v8980_v62  ;;  %v8847_v18 = vpop.f32.mrb[66].mxu1  ;;  %v8983_v25 = vpop.f32.mrb[66].mxu0  ;;  %v11148_v15 = vld [vmem:[%s13472_s1 + $0x488] sm:$0xff]  }
 0x184   : > { %v8848_v37 = vpop.f32.mrb[67].mxu1  ;;  %v8984_v30 = vpop.f32.mrb[67].mxu0 }
 0x185   : > { %v10421_v29 = vadd.f32 %v8846_v11, %v12074_v49  ;;  %v8849_v39 = vadd.f32 %v8848_v37, %v8847_v18  ;;  %v8985_v42 = vadd.f32 %v8984_v30, %v8983_v25  ;;  %v11498_v11 = vld [vmem:[%s11569_s4 + $0x60] ss:$12 sps:$4 sm:$0xff]   ;;  %v11158_v18 = vld [vmem:[%s13472_s1 + $0x4d0] sm:$0xff]   ;;  %v11143_v37 = vld [vmem:[%s11569_s4 + $0x98] ss:$12 sps:$4 sm:$0xff]  }
 0x186   : > { %10033 = vmatmul.mubr.bf16.gmra.mrb[44].mxu1 %v11134_v36  ;;  %3047 = vmatmul.mubr.bf16.gmra.mrb[172].mxu0 %v11135_v41  ;;  %v11144_v36 = vld [vmem:[%s13472_s1 + $0x388] sm:$0xff]  }
 0x187   : > { %v12229_v20 = vadd.f32 %v10421_v29, %v8982_v53  ;;  %v10439_v46 = vadd.f32 %v8849_v39, %v12085_v59  ;;  %10052 = vmatprep.mubr.bf16.mxu1 %v11137_v27  ;;  %3793 = vmatprep.mubr.bf16.mxu0 %v11497_v50  ;;  %v11140_v59 = vld [vmem:[%s13472_s1 + $0x480] sm:$0xff]   ;;  %v11147_v41 = vld [vmem:[%s13472_s1 + $0x4c8] sm:$0xff]   ;;  %v11149_v53 = vld [vmem:[%s13472_s1 + $0x390] sm:$0xff]  }
 0x188   : > { %v11499_v27 = vld [vmem:[%s11569_s4 + $0x7c] ss:$12 sps:$4 sm:$0xff]  }
 0x189   : > { %v12234_v57 = vadd.f32 %v10439_v46, %v8985_v42  ;;  %v8850_v58 = vpop.f32.mrb[68].mxu1  ;;  %v8986_v60 = vpop.f32.mrb[68].mxu0 }
 0x18a   : > { %v8851_v61 = vpop.f32.mrb[69].mxu1  ;;  %v8987_v12 = vpop.f32.mrb[69].mxu0 }
 0x18b   : > { %v8852_v49 = vadd.f32 %v8851_v61, %v8850_v58  ;;  %v8988_v2 = vadd.f32 %v8987_v12, %v8986_v60  ;;  %v8853_v3 = vpop.f32.mrb[70].mxu1  ;;  %v8989_v24 = vpop.f32.mrb[70].mxu0  ;;  %v11152_v60 = vld [vmem:[%s13472_s1 + $0x398] sm:$0xff]  }
 0x18c   : > { %v8854_v8 = vpop.f32.mrb[71].mxu1  ;;  %v8990_v10 = vpop.f32.mrb[71].mxu0 }
 0x18d   : > { %v10412_v56 = vadd.f32 %v8852_v49, %v12101_v5  ;;  %v8855_v62 = vadd.f32 %v8854_v8, %v8853_v3  ;;  %v8991_v9 = vadd.f32 %v8990_v10, %v8989_v24  ;;  %v11159_v49 = vld [vmem:[%s13472_s1 + $0x490] sm:$0xff]   ;;  %v11500_v8 = vld [vmem:[%s11569_s4 + $0x78] ss:$12 sps:$4 sm:$0xff]  }
 0x18e   : > { %10053 = vmatmul.mubr.bf16.vlgmr.msra.gmra.mrb[16].mxu1 %v11138_v51  ;;  %3794 = vmatmul.mubr.bf16.vlgmr.msra.gmra.mrb[176].mxu0 %v11498_v11 }
 0x18f   : > { %v12257_v25 = vadd.f32 %v10412_v56, %v8988_v2  ;;  %v10430_v5 = vadd.f32 %v8855_v62, %v12104_v33  ;;  %9485 = vmatpush3.bf16.msra.mxu0 %v11140_v59  ;;  %10085 = vmatpush3.bf16.msra.mxu1 %v12190_v19  ;;  %v11145_v19 = vld [vmem:[%s11569_s4 + $0xb0] ss:$12 sps:$4 sm:$0xff]  }
 0x190   : > { %10056 = vmatprep.mubr.bf16.mxu1 %v11142_v14  ;;  %3801 = vmatprep.mubr.bf16.mxu0 %v11499_v27  ;;  %v11172_v2 = vld [vmem:[%s13472_s1 + $0x4d8] sm:$0xff]  }
 0x191   : > { %v12263_v30 = vadd.f32 %v10430_v5, %v8991_v9  ;;  %v8856_v29 = vpop.f32.mrb[72].mxu1  ;;  %v8992_v39 = vpop.f32.mrb[72].mxu0  ;;  %10086 = vmatprep.subr.bf16.mxu1 %v11144_v36  ;;  %9486 = vmatprep.subr.bf16.mxu0 %v11147_v41  ;;  %v11186_v9 = vld [vmem:[%s13472_s1 + $0x4e0] sm:$0xff]  }
 0x192   : > { %v8857_v42 = vpop.f32.mrb[73].mxu1  ;;  %v8993_v46 = vpop.f32.mrb[73].mxu0 }
 0x193   : > { %v8858_v50 = vadd.f32 %v8857_v42, %v8856_v29  ;;  %v8994_v51 = vadd.f32 %v8993_v46, %v8992_v39  ;;  %v8859_v58 = vpop.f32.mrb[74].mxu1  ;;  %v8995_v33 = vpop.f32.mrb[74].mxu0  ;;  %10087 = vmatpush3.bf16.msra.mxu1 %v11144_v36  ;;  %9487 = vmatpush3.bf16.msra.mxu0 %v11148_v15  ;;  %v11501_v36 = vld [vmem:[%s11569_s4 + $0x94] ss:$12 sps:$4 sm:$0xff]  }
 0x194   : > { %v8860_v61 = vpop.f32.mrb[75].mxu1  ;;  %v8996_v12 = vpop.f32.mrb[75].mxu0  ;;  %10088 = vmatprep.subr.bf16.mxu1 %v11149_v53  ;;  %9488 = vmatprep.subr.bf16.mxu0 %v11158_v18  ;;  %v11150_v29 = vld [vmem:[%s11569_s4 + $0xe0] ss:$12 sps:$4 sm:$0xff]  }
 0x195   : > { %v10457_v3 = vadd.f32 %v8858_v50, %v12110_v48  ;;  %v8861_v24 = vadd.f32 %v8860_v61, %v8859_v58  ;;  %v8997_v59 = vadd.f32 %v8996_v12, %v8995_v33  ;;  %v11173_v48 = vld [vmem:[%s13472_s1 + $0x498] sm:$0xff]   ;;  %v11187_v46 = vld [vmem:[%s13472_s1 + $0x4a0] sm:$0xff]   ;;  %v11166_v33 = vld [vmem:[%s13472_s1 + $0x3a8] sm:$0xff]  }
 0x196   : > { %10057 = vmatmul.mubr.bf16.gmra.mrb[20].mxu1 %v11143_v37  ;;  %3802 = vmatmul.mubr.bf16.gmra.mrb[180].mxu0 %v11500_v8 }
 0x197   : > { %v12277_v10 = vadd.f32 %v10457_v3, %v8994_v51  ;;  %v10475_v14 = vadd.f32 %v8861_v24, %v12113_v1  ;;  %10060 = vmatprep.mubr.bf16.mxu1 %v11145_v19  ;;  %3809 = vmatprep.mubr.bf16.mxu0 %v11501_v36  ;;  %v11160_v1 = vld [vmem:[%s13472_s1 + $0x3a0] sm:$0xff]   ;;  %v11202_v19 = vld [vmem:[%s13472_s1 + $0x4e8] sm:$0xff]  }
 0x198   : > { %10089 = vmatpush3.bf16.msra.mxu1 %v11149_v53  ;;  %9489 = vmatpush3.bf16.msra.mxu0 %v11159_v49  ;;  %v11146_v53 = vld [vmem:[%s11569_s4 + $0xc8] ss:$12 sps:$4 sm:$0xff]   ;;  %v11151_v36 = vld [vmem:[%s11569_s4 + $0xf8] ss:$12 sps:$4 sm:$0xff]  }
 0x199   : > { %v12284_v41 = vadd.f32 %v10475_v14, %v8997_v59  ;;  %v8862_v56 = vpop.f32.mrb[76].mxu1  ;;  %v8998_v62 = vpop.f32.mrb[76].mxu0  ;;  %10090 = vmatprep.subr.bf16.mxu1 %v11152_v60  ;;  %9490 = vmatprep.subr.bf16.mxu0 %v11172_v2  ;;  %v11203_v49 = vld [vmem:[%s13472_s1 + $0x4a8] sm:$0xff]   ;;  %v11218_v59 = vld [vmem:[%s13472_s1 + $0x4f0] sm:$0xff]  }
 0x19a   : > { %v8863_v15 = vpop.f32.mrb[77].mxu1  ;;  %v8999_v11 = vpop.f32.mrb[77].mxu0 }
 0x19b   : > { %v8864_v18 = vadd.f32 %v8863_v15, %v8862_v56  ;;  %v9000_v5 = vadd.f32 %v8999_v11, %v8998_v62  ;;  %v8865_v27 = vpop.f32.mrb[78].mxu1  ;;  %v9001_v37 = vpop.f32.mrb[78].mxu0  ;;  %v12323_v15 = vld [vmem:[%s11569_s4 + $0xc4] ss:$12 sps:$4 sm:$0xff]  }
 0x19c   : > { %v8866_v39 = vpop.f32.mrb[79].mxu1  ;;  %v9002_v42 = vpop.f32.mrb[79].mxu0  ;;  %10091 = vmatpush3.bf16.msra.mxu1 %v11152_v60  ;;  %9491 = vmatpush3.bf16.msra.mxu0 %v11173_v48  ;;  %v11502_v60 = vld [vmem:[%s11569_s4 + $0x90] ss:$12 sps:$4 sm:$0xff]  }
 0x19d   : > { %v10448_v50 = vadd.f32 %v8864_v18, %v12118_v23  ;;  %v8867_v51 = vadd.f32 %v8866_v39, %v8865_v27  ;;  %v9003_v58 = vadd.f32 %v9002_v42, %v9001_v37  ;;  %10092 = vmatprep.subr.bf16.mxu1 %v11160_v1  ;;  %9492 = vmatprep.subr.bf16.mxu0 %v11186_v9  ;;  %v11503_v23 = vld [vmem:[%s11569_s4 + $0xac] ss:$12 sps:$4 sm:$0xff]   ;;  %v11153_v9 = vld [vmem:[%s11569_s4 + $0x110] ss:$12 sps:$4 sm:$0xff]   ;;  %v11504_v42 = vld [vmem:[%s11569_s4 + $0xa8] ss:$12 sps:$4 sm:$0xff]  }
 0x19e   : > { %10061 = vmatmul.mubr.bf16.gmra.mrb[24].mxu1 %v11146_v53  ;;  %3810 = vmatmul.mubr.bf16.gmra.mrb[184].mxu0 %v11502_v60  ;;  %v11219_v18 = vld [vmem:[%s13472_s1 + $0x4b0] sm:$0xff]   ;;  %v11234_v39 = vld [vmem:[%s13472_s1 + $0x4f8] sm:$0xff]  }
 0x19f   : > { %v12305_v61 = vadd.f32 %v10448_v50, %v9000_v5  ;;  %v10466_v12 = vadd.f32 %v8867_v51, %v12121_v34  ;;  %10064 = vmatprep.mubr.bf16.mxu1 %v11150_v29  ;;  %3817 = vmatprep.mubr.bf16.mxu0 %v11503_v23  ;;  %v11174_v34 = vld [vmem:[%s13472_s1 + $0x3b0] sm:$0xff]   ;;  %v11180_v29 = vld [vmem:[%s13472_s1 + $0x3b8] sm:$0xff]  }
 0x1a0   : > { %10093 = vmatpush3.bf16.msra.mxu1 %v11160_v1  ;;  %9493 = vmatpush3.bf16.msra.mxu0 %v11187_v46  ;;  %v11235_v50 = vld [vmem:[%s13472_s1 + $0x4b8] sm:$0xff]   ;;  %v11156_v23 = vld [vmem:[%s11569_s4 + $0x128] ss:$12 sps:$4 sm:$0xff]  }
 0x1a1   : > { %v12312_v2 = vadd.f32 %v10466_v12, %v9003_v58  ;;  %v8868_v3 = vpop.f32.mrb[80].mxu1  ;;  %v9004_v24 = vpop.f32.mrb[80].mxu0  ;;  %10094 = vmatprep.subr.bf16.mxu1 %v11166_v33  ;;  %9494 = vmatprep.subr.bf16.mxu0 %v11202_v19  ;;  %v11251_v19 = vld [vmem:[%s13472_s1 + $0x580] sm:$0xff]  }
 0x1a2   : > { %v8869_v8 = vpop.f32.mrb[81].mxu1  ;;  %v9005_v14 = vpop.f32.mrb[81].mxu0 }
 0x1a3   : > { %v8870_v48 = vadd.f32 %v8869_v8, %v8868_v3  ;;  %v9006_v56 = vadd.f32 %v9005_v14, %v9004_v24  ;;  %v8871_v62 = vpop.f32.mrb[82].mxu1  ;;  %v9007_v1 = vpop.f32.mrb[82].mxu0  ;;  %v11161_v8 = vld [vmem:[%s11569_s4 + $0x140] ss:$12 sps:$4 sm:$0xff]   ;;  %v12357_v14 = vld [vmem:[%s11569_s4 + $0xdc] ss:$12 sps:$4 sm:$0xff]  }
 0x1a4   : > { %v8872_v11 = vpop.f32.mrb[83].mxu1  ;;  %v9008_v53 = vpop.f32.mrb[83].mxu0  ;;  %10095 = vmatpush3.bf16.msra.mxu1 %v11166_v33  ;;  %9495 = vmatpush3.bf16.msra.mxu0 %v11203_v49  ;;  %v12353_v49 = vld [vmem:[%s11569_s4 + $0xc0] ss:$12 sps:$4 sm:$0xff]  }
 0x1a5   : > { %v10493_v5 = vadd.f32 %v8870_v48, %v12126_v44  ;;  %v8873_v27 = vadd.f32 %v8872_v11, %v8871_v62  ;;  %v9009_v37 = vadd.f32 %v9008_v53, %v9007_v1  ;;  %10096 = vmatprep.subr.bf16.mxu1 %v11174_v34  ;;  %9496 = vmatprep.subr.bf16.mxu0 %v11218_v59 }
 0x1a6   : > { %10065 = vmatmul.mubr.bf16.gmra.mrb[28].mxu1 %v11151_v36  ;;  %3818 = vmatmul.mubr.bf16.gmra.mrb[188].mxu0 %v11504_v42 }
 0x1a7   : > { %v12336_v46 = vadd.f32 %v10493_v5, %v9006_v56  ;;  %v10511_v44 = vadd.f32 %v8873_v27, %v12130_v55  ;;  %10068 = vmatprep.mubr.bf16.mxu1 %v11153_v9  ;;  %3825 = vmatprep.mubr.bf16.mxu0 %v12323_v15  ;;  %v11188_v55 = vld [vmem:[%s13472_s1 + $0x400] sm:$0xff]  }
 0x1a8   : > { %10097 = vmatpush3.bf16.msra.mxu1 %v11174_v34  ;;  %9497 = vmatpush3.bf16.msra.mxu0 %v11219_v18 }
 0x1a9   : > { %v12343_v51 = vadd.f32 %v10511_v44, %v9009_v37  ;;  %v8874_v58 = vpop.f32.mrb[84].mxu1  ;;  %v9010_v33 = vpop.f32.mrb[84].mxu0  ;;  %10098 = vmatprep.subr.bf16.mxu1 %v11180_v29  ;;  %9498 = vmatprep.subr.bf16.mxu0 %v11234_v39  ;;  %v11164_v37 = vld [vmem:[%s11569_s4 + $0x158] ss:$12 sps:$4 sm:$0xff]  }
 0x1aa   : > { %v8875_v60 = vpop.f32.mrb[85].mxu1  ;;  %v9011_v12 = vpop.f32.mrb[85].mxu0 }
 0x1ab   : > { %v8876_v3 = vadd.f32 %v8875_v60, %v8874_v58  ;;  %v9012_v24 = vadd.f32 %v9011_v12, %v9010_v33  ;;  %v8877_v34 = vpop.f32.mrb[86].mxu1  ;;  %v9013_v59 = vpop.f32.mrb[86].mxu0  ;;  %v11167_v58 = vld [vmem:[%s11569_s4 + $0x170] ss:$12 sps:$4 sm:$0xff]   ;;  %v12373_v33 = vld [vmem:[%s11569_s4 + $0xf4] ss:$12 sps:$4 sm:$0xff]  }
 0x1ac   : > { %v8878_v36 = vpop.f32.mrb[87].mxu1  ;;  %v9014_v48 = vpop.f32.mrb[87].mxu0  ;;  %10099 = vmatpush3.bf16.msra.mxu1 %v11180_v29  ;;  %9499 = vmatpush3.bf16.msra.mxu0 %v11235_v50  ;;  %v12369_v29 = vld [vmem:[%s11569_s4 + $0xd8] ss:$12 sps:$4 sm:$0xff]  }
 0x1ad   : > { %v10484_v56 = vadd.f32 %v8876_v3, %v12135_v0  ;;  %v8879_v62 = vadd.f32 %v8878_v36, %v8877_v34  ;;  %v9015_v1 = vadd.f32 %v9014_v48, %v9013_v59  ;;  %9348 = vmatprep.subr.bf16.mxu1 %v11188_v55  ;;  %9620 = vmatprep.subr.bf16.mxu0 %v11251_v19  ;;  %v11170_v36 = vld [vmem:[%s11569_s4 + $0x188] ss:$12 sps:$4 sm:$0xff]   ;;  %v12385_v48 = vld [vmem:[%s11569_s4 + $0xf0] ss:$12 sps:$4 sm:$0xff]  }
 0x1ae   : > { %10069 = vmatmul.mubr.bf16.gmra.mrb[32].mxu1 %v11156_v23  ;;  %3826 = vmatmul.mubr.bf16.gmra.mrb[192].mxu0 %v12353_v49 }
 0x1af   : > { %v12361_v9 = vadd.f32 %v10484_v56, %v9012_v24  ;;  %v10502_v11 = vadd.f32 %v8879_v62, %v12142_v28  ;;  %10072 = vmatprep.mubr.bf16.mxu1 %v11161_v8  ;;  %3833 = vmatprep.mubr.bf16.mxu0 %v12357_v14 }
 0x1b1   : > { %v12365_v53 = vadd.f32 %v10502_v11, %v9015_v1  ;;  %v8880_v0 = vpop.f32.mrb[88].mxu1  ;;  %v9016_v18 = vpop.f32.mrb[88].mxu0 }
 0x1b2   : > { %v8881_v5 = vpop.f32.mrb[89].mxu1  ;;  %v9017_v27 = vpop.f32.mrb[89].mxu0 }
 0x1b3   : > { %v8882_v39 = vadd.f32 %v8881_v5, %v8880_v0  ;;  %v9018_v42 = vadd.f32 %v9017_v27, %v9016_v18  ;;  %v8883_v44 = vpop.f32.mrb[90].mxu1  ;;  %v9019_v50 = vpop.f32.mrb[90].mxu0  ;;  %v11175_v0 = vld [vmem:[%s11569_s4 + $0x1a0] ss:$12 sps:$4 sm:$0xff]  }
 0x1b4   : > { %v8884_v28 = vpop.f32.mrb[91].mxu1  ;;  %v9020_v55 = vpop.f32.mrb[91].mxu0  ;;  %v12389_v18 = vld [vmem:[%s11569_s4 + $0x10c] ss:$12 sps:$4 sm:$0xff]  }
 0x1b5   : > { %v10529_v19 = vadd.f32 %v8882_v39, %v12150_v52  ;;  %v8885_v60 = vadd.f32 %v8884_v28, %v8883_v44  ;;  %v9021_v12 = vadd.f32 %v9020_v55, %v9019_v50 }
 0x1b6   : > { %10073 = vmatmul.mubr.bf16.gmra.mrb[36].mxu1 %v11164_v37  ;;  %3834 = vmatmul.mubr.bf16.gmra.mrb[196].mxu0 %v12369_v29 }
 0x1b7   : > { %v12377_v23 = vadd.f32 %v10529_v19, %v9018_v42  ;;  %v10547_v3 = vadd.f32 %v8885_v60, %v12157_v16  ;;  %10076 = vmatprep.mubr.bf16.mxu1 %v11167_v58  ;;  %3841 = vmatprep.mubr.bf16.mxu0 %v12373_v33  ;;  %v11178_v19 = vld [vmem:[%s11569_s4 + $0x1b8] ss:$12 sps:$4 sm:$0xff]   ;;  %v12401_v60 = vld [vmem:[%s11569_s4 + $0x108] ss:$12 sps:$4 sm:$0xff]  }
 0x1b9   : > { %v12381_v24 = vadd.f32 %v10547_v3, %v9021_v12  ;;  %v8886_v34 = vpop.f32.mrb[92].mxu1  ;;  %v9022_v59 = vpop.f32.mrb[92].mxu0 }
 0x1ba   : > { %v8887_v8 = vpop.f32.mrb[93].mxu1  ;;  %v9023_v52 = vpop.f32.mrb[93].mxu0 }
 0x1bb   : > { %v8888_v56 = vadd.f32 %v8887_v8, %v8886_v34  ;;  %v9024_v62 = vadd.f32 %v9023_v52, %v9022_v59  ;;  %v8889_v1 = vpop.f32.mrb[94].mxu1  ;;  %v9025_v11 = vpop.f32.mrb[94].mxu0  ;;  %v12404_v8 = vld [vmem:[%s11569_s4 + $0x124] ss:$12 sps:$4 sm:$0xff]   ;;  %v11183_v52 = vld [vmem:[%s11569_s4 + $0x68] ss:$12 sps:$4 sm:$0xff]  }
 0x1bc   : > { %v8890_v16 = vpop.f32.mrb[95].mxu1  ;;  %v9026_v5 = vpop.f32.mrb[95].mxu0 }
 0x1bd   : > { %v10520_v27 = vadd.f32 %v8888_v56, %v12164_v35  ;;  %v8891_v37 = vadd.f32 %v8890_v16, %v8889_v1  ;;  %v9027_v39 = vadd.f32 %v9026_v5, %v9025_v11 }
 0x1be   : > { %10077 = vmatmul.mubr.bf16.gmra.mrb[40].mxu1 %v11170_v36  ;;  %3842 = vmatmul.mubr.bf16.gmra.mrb[200].mxu0 %v12385_v48 }
 0x1bf   : > { %v12393_v42 = vadd.f32 %v10520_v27, %v9024_v62  ;;  %v10538_v44 = vadd.f32 %v8891_v37, %v12171_v47  ;;  %10080 = vmatprep.mubr.bf16.mxu1 %v11175_v0  ;;  %3849 = vmatprep.mubr.bf16.mxu0 %v12389_v18 }
 0x1c1   : > { %v12397_v50 = vadd.f32 %v10538_v44, %v9027_v39  ;;  %v8892_v58 = vpop.f32.mrb[96].mxu1  ;;  %v9028_v28 = vpop.f32.mrb[96].mxu0  ;;  %v12416_v39 = vld [vmem:[%s11569_s4 + $0x120] ss:$12 sps:$4 sm:$0xff]  }
 0x1c2   : > { %v8893_v55 = vpop.f32.mrb[97].mxu1  ;;  %v9029_v35 = vpop.f32.mrb[97].mxu0  ;;  %v11185_v44 = vld [vmem:[%s11569_s4 + $0x80] ss:$12 sps:$4 sm:$0xff]  }
 0x1c3   : > { %v8894_v12 = vadd.f32 %v8893_v55, %v8892_v58  ;;  %v9030_v3 = vadd.f32 %v9029_v35, %v9028_v28  ;;  %v8895_v34 = vpop.f32.mrb[98].mxu1  ;;  %v9031_v59 = vpop.f32.mrb[98].mxu0 }
 0x1c4   : > { %v8896_v47 = vpop.f32.mrb[99].mxu1  ;;  %v9032_v36 = vpop.f32.mrb[99].mxu0 }
 0x1c5   : > { %v10565_v56 = vadd.f32 %v8894_v12, %v11973_v22  ;;  %v8897_v62 = vadd.f32 %v8896_v47, %v8895_v34  ;;  %v9033_v1 = vadd.f32 %v9032_v36, %v9031_v59  ;;  %v11192_v34 = vld [vmem:[%s11569_s4 + $0x98] ss:$12 sps:$4 sm:$0xff]   ;;  %v11195_v59 = vld [vmem:[%s13472_s1 + $0x408] sm:$0xff]  }
 0x1c6   : > { %10081 = vmatmul.mubr.bf16.gmra.mrb[44].mxu1 %v11178_v19  ;;  %3850 = vmatmul.mubr.bf16.gmra.mrb[204].mxu0 %v12401_v60  ;;  %v12423_v19 = vld [vmem:[%s11569_s4 + $0x13c] ss:$12 sps:$4 sm:$0xff]  }
 0x1c7   : > { %v12409_v11 = vadd.f32 %v10565_v56, %v9030_v3  ;;  %v10583_v0 = vadd.f32 %v8897_v62, %v11979_v31  ;;  %3857 = vmatprep.mubr.bf16.mxu0 %v12404_v8  ;;  %10100 = vmatprep.mubr.bf16.mxu1 %v11183_v52  ;;  %v11189_v31 = vld [vmem:[%s13472_s1 + $0x3c0] sm:$0xff]  }
 0x1c9   : > { %v12413_v16 = vadd.f32 %v10583_v0, %v9033_v1  ;;  %v8898_v5 = vpop.f32.mrb[100].mxu1  ;;  %v9034_v27 = vpop.f32.mrb[100].mxu0  ;;  %v11196_v1 = vld [vmem:[%s13472_s1 + $0x3c8] sm:$0xff]  }
 0x1ca   : > { %v8899_v37 = vpop.f32.mrb[101].mxu1  ;;  %v9035_v22 = vpop.f32.mrb[101].mxu0 }
 0x1cb   : > { %v8900_v58 = vadd.f32 %v8899_v37, %v8898_v5  ;;  %v9036_v28 = vadd.f32 %v9035_v22, %v9034_v27  ;;  %v8901_v55 = vpop.f32.mrb[102].mxu1  ;;  %v9037_v35 = vpop.f32.mrb[102].mxu0  ;;  %v12444_v22 = vld [vmem:[%s11569_s4 + $0x138] ss:$12 sps:$4 sm:$0xff]  }
 0x1cc   : > { %v8902_v12 = vpop.f32.mrb[103].mxu1  ;;  %v9038_v3 = vpop.f32.mrb[103].mxu0 }
 0x1cd   : > { %v10556_v52 = vadd.f32 %v8900_v58, %v11987_v43  ;;  %v8903_v47 = vadd.f32 %v8902_v12, %v8901_v55  ;;  %v9039_v36 = vadd.f32 %v9038_v3, %v9037_v35  ;;  %v11204_v43 = vld [vmem:[%s13472_s1 + $0x410] sm:$0xff]  }
 0x1ce   : > { %3858 = vmatmul.mubr.bf16.gmra.mrb[208].mxu0 %v12416_v39  ;;  %10101 = vmatmul.mubr.bf16.vlgmr.msra.gmra.mrb[16].mxu1 %v11185_v44  ;;  %v11194_v44 = vld [vmem:[%s11569_s4 + $0xb0] ss:$12 sps:$4 sm:$0xff]   ;;  %v11199_v12 = vld [vmem:[%s11569_s4 + $0xc8] ss:$12 sps:$4 sm:$0xff]  }
 0x1cf   : > { %v12431_v56 = vadd.f32 %v10556_v52, %v9036_v28  ;;  %v10574_v62 = vadd.f32 %v8903_v47, %v11998_v54  ;;  %9349 = vmatpush3.bf16.msra.mxu1 %v11189_v31  ;;  %3865 = vmatprep.mubr.bf16.mxu0 %v12423_v19  ;;  %v12448_v31 = vld [vmem:[%s11569_s4 + $0x154] ss:$12 sps:$4 sm:$0xff]  }
 0x1d0   : > { %10104 = vmatprep.mubr.bf16.mxu1 %v11192_v34  ;;  %9350 = vmatprep.subr.bf16.mxu1 %v11195_v59  ;;  %v11205_v59 = vld [vmem:[%s13472_s1 + $0x3d0] sm:$0xff]  }
 0x1d1   : > { %v12441_v0 = vadd.f32 %v10574_v62, %v9039_v36  ;;  %v8904_v5 = vpop.f32.mrb[104].mxu1  ;;  %v9040_v27 = vpop.f32.mrb[104].mxu0  ;;  %v11211_v62 = vld [vmem:[%s13472_s1 + $0x418] sm:$0xff]  }
 0x1d2   : > { %v8905_v54 = vpop.f32.mrb[105].mxu1  ;;  %v9041_v37 = vpop.f32.mrb[105].mxu0 }
 0x1d3   : > { %v8906_v58 = vadd.f32 %v8905_v54, %v8904_v5  ;;  %v9042_v28 = vadd.f32 %v9041_v37, %v9040_v27  ;;  %v8907_v55 = vpop.f32.mrb[106].mxu1  ;;  %v9043_v35 = vpop.f32.mrb[106].mxu0  ;;  %9351 = vmatpush3.bf16.msra.mxu1 %v11196_v1  ;;  %v11220_v37 = vld [vmem:[%s13472_s1 + $0x420] sm:$0xff]  }
 0x1d4   : > { %v8908_v3 = vpop.f32.mrb[107].mxu1  ;;  %v9044_v34 = vpop.f32.mrb[107].mxu0  ;;  %9352 = vmatprep.subr.bf16.mxu1 %v11204_v43 }
 0x1d5   : > { %v10601_v52 = vadd.f32 %v8906_v58, %v12016_v4  ;;  %v8909_v47 = vadd.f32 %v8908_v3, %v8907_v55  ;;  %v9045_v36 = vadd.f32 %v9044_v34, %v9043_v35  ;;  %v11212_v4 = vld [vmem:[%s13472_s1 + $0x3d8] sm:$0xff]  }
 0x1d6   : > { %3866 = vmatmul.mubr.bf16.gmra.mrb[212].mxu0 %v12444_v22  ;;  %10105 = vmatmul.mubr.bf16.gmra.mrb[20].mxu1 %v11194_v44  ;;  %v12472_v58 = vld [vmem:[%s11569_s4 + $0x150] ss:$12 sps:$4 sm:$0xff]   ;;  %v12476_v34 = vld [vmem:[%s11569_s4 + $0x16c] ss:$12 sps:$4 sm:$0xff]  }
 0x1d7   : > { %v12459_v1 = vadd.f32 %v10601_v52, %v9042_v28  ;;  %v10619_v43 = vadd.f32 %v8909_v47, %v12029_v13  ;;  %3873 = vmatprep.mubr.bf16.mxu0 %v12448_v31  ;;  %10108 = vmatprep.mubr.bf16.mxu1 %v11199_v12  ;;  %v11201_v28 = vld [vmem:[%s11569_s4 + $0xe0] ss:$12 sps:$4 sm:$0xff]  }
 0x1d8   : > { %9353 = vmatpush3.bf16.msra.mxu1 %v11205_v59  ;;  %v11208_v59 = vld [vmem:[%s11569_s4 + $0xf8] ss:$12 sps:$4 sm:$0xff]  }
 0x1d9   : > { %v12466_v5 = vadd.f32 %v10619_v43, %v9045_v36  ;;  %v8910_v27 = vpop.f32.mrb[108].mxu1  ;;  %v9046_v54 = vpop.f32.mrb[108].mxu0  ;;  %9354 = vmatprep.subr.bf16.mxu1 %v11211_v62  ;;  %v11221_v36 = vld [vmem:[%s13472_s1 + $0x3e0] sm:$0xff]  }
 0x1da   : > { %v8911_v13 = vpop.f32.mrb[109].mxu1  ;;  %v9047_v44 = vpop.f32.mrb[109].mxu0 }
 0x1db   : > { %13478 = vst [vmem:[#allocation2_spill] sm:$0xff] %v12466_v5  ;;  %v8912_v55 = vadd.f32 %v8911_v13, %v8910_v27  ;;  %v9048_v35 = vadd.f32 %v9047_v44, %v9046_v54  ;;  %v8913_v12 = vpop.f32.mrb[110].mxu1  ;;  %v9049_v3 = vpop.f32.mrb[110].mxu0  ;;  %v11227_v27 = vld [vmem:[%s13472_s1 + $0x428] sm:$0xff]   ;;  %v11236_v44 = vld [vmem:[%s13472_s1 + $0x430] sm:$0xff]  }
 0x1dc   : > { %v8914_v52 = vpop.f32.mrb[111].mxu1  ;;  %v9050_v47 = vpop.f32.mrb[111].mxu0  ;;  %9355 = vmatpush3.bf16.msra.mxu1 %v11212_v4 }
 0x1dd   : > { %v10592_v62 = vadd.f32 %v8912_v55, %v12046_v17  ;;  %v8915_v43 = vadd.f32 %v8914_v52, %v8913_v12  ;;  %v9051_v5 = vadd.f32 %v9050_v47, %v9049_v3  ;;  %9356 = vmatprep.subr.bf16.mxu1 %v11220_v37  ;;  %v11228_v17 = vld [vmem:[%s13472_s1 + $0x3e8] sm:$0xff]   ;;  %v12504_v3 = vld [vmem:[%s11569_s4 + $0x184] ss:$12 sps:$4 sm:$0xff]  }
 0x1de   : > { %3874 = vmatmul.mubr.bf16.gmra.mrb[216].mxu0 %v12472_v58  ;;  %10109 = vmatmul.mubr.bf16.gmra.mrb[24].mxu1 %v11201_v28  ;;  %v12500_v55 = vld [vmem:[%s11569_s4 + $0x168] ss:$12 sps:$4 sm:$0xff]  }
 0x1df   : > { %v12487_v4 = vadd.f32 %v10592_v62, %v9048_v35  ;;  %v10610_v54 = vadd.f32 %v8915_v43, %v12059_v32  ;;  %3881 = vmatprep.mubr.bf16.mxu0 %v12476_v34  ;;  %10112 = vmatprep.mubr.bf16.mxu1 %v11208_v59  ;;  %v11210_v32 = vld [vmem:[%s11569_s4 + $0x110] ss:$12 sps:$4 sm:$0xff]   ;;  %v11215_v59 = vld [vmem:[%s11569_s4 + $0x128] ss:$12 sps:$4 sm:$0xff]  }
 0x1e0   : > { %9357 = vmatpush3.bf16.msra.mxu1 %v11221_v36  ;;  %v11243_v36 = vld [vmem:[%s13472_s1 + $0x438] sm:$0xff]  }
 0x1e1   : > { %v12494_v37 = vadd.f32 %v10610_v54, %v9051_v5  ;;  %v9092_v13 = vpop.f32.mrb[112].mxu0  ;;  %9358 = vmatprep.subr.bf16.mxu1 %v11227_v27  ;;  %v11237_v5 = vld [vmem:[%s13472_s1 + $0x3f0] sm:$0xff]   ;;  %v11244_v27 = vld [vmem:[%s13472_s1 + $0x3f8] sm:$0xff]  }
 0x1e2   : > { %v9093_v28 = vpop.f32.mrb[113].mxu0 }
 0x1e3   : > { %v9094_v35 = vadd.f32 %v9093_v28, %v9092_v13  ;;  %v9095_v12 = vpop.f32.mrb[114].mxu0  ;;  %v12530_v13 = vld [vmem:[%s11569_s4 + $0x180] ss:$12 sps:$4 sm:$0xff]  }
 0x1e4   : > { %v9096_v52 = vpop.f32.mrb[115].mxu0  ;;  %9359 = vmatpush3.bf16.msra.mxu1 %v11228_v17 }
 0x1e5   : > { %v9097_v47 = vadd.f32 %v9096_v52, %v9095_v12  ;;  %9360 = vmatprep.subr.bf16.mxu1 %v11236_v44  ;;  %v12514_v62 = vadd.f32 %v12184_v6, %v9094_v35  ;;  %v12527_v6 = vld [vmem:[%s13472_s1 + $0x440] sm:$0xff]  }
 0x1e6   : > { %3882 = vmatmul.mubr.bf16.gmra.mrb[220].mxu0 %v12500_v55  ;;  %10113 = vmatmul.mubr.bf16.gmra.mrb[28].mxu1 %v11210_v32  ;;  %v11217_v44 = vld [vmem:[%s11569_s4 + $0x140] ss:$12 sps:$4 sm:$0xff]   ;;  %v12534_v32 = vld [vmem:[%s11569_s4 + $0x19c] ss:$12 sps:$4 sm:$0xff]   ;;  %v11224_v35 = vld [vmem:[%s11569_s4 + $0x158] ss:$12 sps:$4 sm:$0xff]  }
 0x1e7   : > { %3889 = vmatprep.mubr.bf16.mxu0 %v12504_v3  ;;  %10116 = vmatprep.mubr.bf16.mxu1 %v11215_v59  ;;  %v12519_v43 = vadd.f32 %v12194_v21, %v9097_v47 }
 0x1e8   : > { %9361 = vmatpush3.bf16.msra.mxu1 %v11237_v5 }
 0x1e9   : > { %v9098_v54 = vpop.f32.mrb[116].mxu0  ;;  %9362 = vmatprep.subr.bf16.mxu1 %v11243_v36 }
 0x1ea   : > { %v9099_v17 = vpop.f32.mrb[117].mxu0 }
 0x1eb   : > { %v9100_v28 = vadd.f32 %v9099_v17, %v9098_v54  ;;  %v9101_v21 = vpop.f32.mrb[118].mxu0  ;;  %v12547_v54 = vld [vmem:[%s11569_s4 + $0x198] ss:$12 sps:$4 sm:$0xff]  }
 0x1ec   : > { %v9102_v12 = vpop.f32.mrb[119].mxu0  ;;  %9363 = vmatpush3.bf16.msra.mxu1 %v11244_v27  ;;  %v11226_v27 = vld [vmem:[%s11569_s4 + $0x170] ss:$12 sps:$4 sm:$0xff]  }
 0x1ed   : > { %v9103_v59 = vadd.f32 %v9102_v12, %v9101_v21  ;;  %10132 = vmatprep.subr.bf16.mxu1 %v12527_v6  ;;  %v12539_v52 = vadd.f32 %v12200_v63, %v9100_v28  ;;  %v12551_v63 = vld [vmem:[%s11569_s4 + $0x1b4] ss:$12 sps:$4 sm:$0xff]  }
 0x1ee   : > { %3890 = vmatmul.mubr.bf16.gmra.mrb[224].mxu0 %v12530_v13  ;;  %10117 = vmatmul.mubr.bf16.gmra.mrb[32].mxu1 %v11217_v44  ;;  %v11231_v28 = vld [vmem:[%s11569_s4 + $0x188] ss:$12 sps:$4 sm:$0xff]  }
 0x1ef   : > { %3897 = vmatprep.mubr.bf16.mxu0 %v12534_v32  ;;  %10120 = vmatprep.mubr.bf16.mxu1 %v11224_v35  ;;  %v12544_v5 = vadd.f32 %v12205_v7, %v9103_v59 }
 0x1f1   : > { %13479 = vst [vmem:[#allocation3_spill] sm:$0xff] %v12544_v5  ;;  %v9104_v47 = vpop.f32.mrb[120].mxu0  ;;  %v11233_v5 = vld [vmem:[%s11569_s4 + $0x1a0] ss:$12 sps:$4 sm:$0xff]  }
 0x1f2   : > { %v9105_v36 = vpop.f32.mrb[121].mxu0 }
 0x1f3   : > { %v9106_v17 = vadd.f32 %v9105_v36, %v9104_v47  ;;  %v9107_v21 = vpop.f32.mrb[122].mxu0  ;;  %v12563_v36 = vld [vmem:[%s11569_s4 + $0x1b0] ss:$12 sps:$4 sm:$0xff]  }
 0x1f4   : > { %v9108_v44 = vpop.f32.mrb[123].mxu0  ;;  %13482 = vst [vmem:[#allocation6_spill] sm:$0xff] %v12563_v36 }
 0x1f5   : > { %v9109_v12 = vadd.f32 %v9108_v44, %v9107_v21  ;;  %v12555_v35 = vadd.f32 %v12209_v26, %v9106_v17  ;;  %v12567_v26 = vld [vmem:[%s11569_s4 + $0x1cc] ss:$12 sps:$4 sm:$0xff]  }
 0x1f6   : > { %3898 = vmatmul.mubr.bf16.gmra.mrb[228].mxu0 %v12547_v54  ;;  %10121 = vmatmul.mubr.bf16.gmra.mrb[36].mxu1 %v11226_v27  ;;  %13483 = vst [vmem:[#allocation7_spill] sm:$0xff] %v12567_v26  ;;  %v11240_v17 = vld [vmem:[%s11569_s4 + $0x1b8] ss:$12 sps:$4 sm:$0xff]  }
 0x1f7   : > { %13480 = vst [vmem:[#allocation4_spill] sm:$0xff] %v12555_v35  ;;  %3905 = vmatprep.mubr.bf16.mxu0 %v12551_v63  ;;  %10124 = vmatprep.mubr.bf16.mxu1 %v11231_v28  ;;  %v12560_v7 = vadd.f32 %v12214_v38, %v9109_v12 }
 0x1f9   : > { %13481 = vst [vmem:[#allocation5_spill] sm:$0xff] %v12560_v7  ;;  %v9110_v59 = vpop.f32.mrb[124].mxu0  ;;  %v11242_v7 = vld [vmem:[%s11569_s4 + $0x1d0] ss:$12 sps:$4 sm:$0xff]  }
 0x1fa   : > { %v9111_v47 = vpop.f32.mrb[125].mxu0 }
 0x1fb   : > { %v9112_v21 = vadd.f32 %v9111_v47, %v9110_v59  ;;  %v9113_v44 = vpop.f32.mrb[126].mxu0  ;;  %v12579_v47 = vld [vmem:[%s11569_s4 + $0x1c8] ss:$12 sps:$4 sm:$0xff]  }
 0x1fc   : > { %v9114_v27 = vpop.f32.mrb[127].mxu0 }
 0x1fd   : > { %v9115_v35 = vadd.f32 %v9114_v27, %v9113_v44  ;;  %v12571_v28 = vadd.f32 %v12220_v40, %v9112_v21  ;;  %v11247_v40 = vld [vmem:[%s11569_s4 + $0x7c] ss:$12 sps:$4 sm:$0xff]   ;;  %v11250_v21 = vld [vmem:[%s11569_s4 + $0x94] ss:$12 sps:$4 sm:$0xff]  }
 0x1fe   : > { %3906 = vmatmul.mubr.bf16.gmra.mrb[232].mxu0 %v12563_v36  ;;  %10125 = vmatmul.mubr.bf16.gmra.mrb[40].mxu1 %v11233_v5 }
 0x1ff   : > { %13484 = vst [vmem:[#allocation8_spill] sm:$0xff] %v12571_v28  ;;  %3913 = vmatprep.mubr.bf16.mxu0 %v12567_v26  ;;  %10128 = vmatprep.mubr.bf16.mxu1 %v11240_v17  ;;  %v12576_v38 = vadd.f32 %v12225_v45, %v9115_v35 }
 0x201   : > { %13485 = vst [vmem:[#allocation9_spill] sm:$0xff] %v12576_v38  ;;  %v9116_v12 = vpop.f32.mrb[128].mxu0 }
 0x202   : > { %v9117_v59 = vpop.f32.mrb[129].mxu0 }
 0x203   : > { %v9118_v44 = vadd.f32 %v9117_v59, %v9116_v12  ;;  %v9119_v27 = vpop.f32.mrb[130].mxu0  ;;  %v11245_v12 = vld [vmem:[%s11569_s4 + $0x78] ss:$12 sps:$4 sm:$0xff]   ;;  %v11248_v59 = vld [vmem:[%s11569_s4 + $0x90] ss:$12 sps:$4 sm:$0xff]  }
 0x204   : > { %v9120_v28 = vpop.f32.mrb[131].mxu0 }
 0x205   : > { %v9121_v5 = vadd.f32 %v9120_v28, %v9119_v27  ;;  %v12585_v26 = vadd.f32 %v12229_v20, %v9118_v44  ;;  %v11252_v28 = vld [vmem:[%s13472_s1 + $0x540] sm:$0xff]   ;;  %v12597_v44 = vld [vmem:[%s11569_s4 + $0xac] ss:$12 sps:$4 sm:$0xff]  }
 0x206   : > { %3914 = vmatmul.mubr.bf16.gmra.mrb[236].mxu0 %v12579_v47  ;;  %10129 = vmatmul.mubr.bf16.gmra.mrb[44].mxu1 %v11242_v7  ;;  %v11257_v7 = vld [vmem:[%s13472_s1 + $0x588] sm:$0xff]  }
 0x207   : > { %4660 = vmatprep.mubr.bf16.mxu1 %v11247_v40  ;;  %5527 = vmatprep.mubr.bf16.mxu0 %v11250_v21  ;;  %v12589_v45 = vadd.f32 %v12234_v57, %v9121_v5  ;;  %v11259_v57 = vld [vmem:[%s13472_s1 + $0x448] sm:$0xff]  }
 0x209   : > { %v9122_v35 = vpop.f32.mrb[132].mxu0 }
 0x20a   : > { %v9123_v17 = vpop.f32.mrb[133].mxu0 }
 0x20b   : > { %v9124_v38 = vadd.f32 %v9123_v17, %v9122_v35  ;;  %v9125_v36 = vpop.f32.mrb[134].mxu0  ;;  %v12623_v17 = vld [vmem:[%s11569_s4 + $0xa8] ss:$12 sps:$4 sm:$0xff]  }
 0x20c   : > { %v9126_v20 = vpop.f32.mrb[135].mxu0 }
 0x20d   : > { %v9127_v27 = vadd.f32 %v9126_v20, %v9125_v36  ;;  %v12606_v40 = vadd.f32 %v12257_v25, %v9124_v38  ;;  %v11258_v36 = vld [vmem:[%s13472_s1 + $0x548] sm:$0xff]   ;;  %v11260_v25 = vld [vmem:[%s13472_s1 + $0x590] sm:$0xff]  }
 0x20e   : > { %4661 = vmatmul.mubr.bf16.vlgmr.msra.gmra.mrb[112].mxu1 %v11245_v12  ;;  %5528 = vmatmul.mubr.bf16.vlgmr.msra.gmra.mrb[240].mxu0 %v11248_v59  ;;  %v11262_v38 = vld [vmem:[%s13472_s1 + $0x450] sm:$0xff]  }
 0x20f   : > { %9621 = vmatpush3.bf16.msra.mxu0 %v11252_v28  ;;  %10133 = vmatpush3.bf16.msra.mxu1 %v12527_v6  ;;  %v12613_v5 = vadd.f32 %v12263_v30, %v9127_v27  ;;  %v11261_v28 = vld [vmem:[%s13472_s1 + $0x550] sm:$0xff]   ;;  %v11263_v27 = vld [vmem:[%s13472_s1 + $0x598] sm:$0xff]  }
 0x210   : > { %4668 = vmatprep.mubr.bf16.mxu1 %v11250_v21  ;;  %5535 = vmatprep.mubr.bf16.mxu0 %v12597_v44 }
 0x211   : > { %v9128_v35 = vpop.f32.mrb[136].mxu0  ;;  %9622 = vmatprep.subr.bf16.mxu0 %v11257_v7  ;;  %10134 = vmatprep.subr.bf16.mxu1 %v11259_v57  ;;  %v11265_v7 = vld [vmem:[%s13472_s1 + $0x458] sm:$0xff]  }
 0x212   : > { %v9129_v6 = vpop.f32.mrb[137].mxu0 }
 0x213   : > { %v9130_v12 = vadd.f32 %v9129_v6, %v9128_v35  ;;  %v9131_v30 = vpop.f32.mrb[138].mxu0  ;;  %9623 = vmatpush3.bf16.msra.mxu0 %v11258_v36  ;;  %10135 = vmatpush3.bf16.msra.mxu1 %v11259_v57  ;;  %v11264_v36 = vld [vmem:[%s13472_s1 + $0x558] sm:$0xff]  }
 0x214   : > { %v9132_v21 = vpop.f32.mrb[139].mxu0  ;;  %9624 = vmatprep.subr.bf16.mxu0 %v11260_v25  ;;  %10136 = vmatprep.subr.bf16.mxu1 %v11262_v38 }
 0x215   : > { %v9133_v20 = vadd.f32 %v9132_v21, %v9131_v30  ;;  %v12635_v35 = vadd.f32 %v12277_v10, %v9130_v12  ;;  %v11266_v10 = vld [vmem:[%s13472_s1 + $0x5a0] sm:$0xff]  }
 0x216   : > { %4669 = vmatmul.mubr.bf16.gmra.mrb[116].mxu1 %v11248_v59  ;;  %5536 = vmatmul.mubr.bf16.gmra.mrb[244].mxu0 %v12623_v17  ;;  %v11268_v59 = vld [vmem:[%s13472_s1 + $0x460] sm:$0xff]  }
 0x217   : > { %4676 = vmatprep.mubr.bf16.mxu1 %v12597_v44  ;;  %5543 = vmatprep.mubr.bf16.mxu0 %v12323_v15  ;;  %v12641_v57 = vadd.f32 %v12284_v41, %v9133_v20  ;;  %v11271_v20 = vld [vmem:[%s13472_s1 + $0x468] sm:$0xff]  }
 0x218   : > { %9625 = vmatpush3.bf16.msra.mxu0 %v11261_v28  ;;  %10137 = vmatpush3.bf16.msra.mxu1 %v11262_v38  ;;  %v11267_v38 = vld [vmem:[%s13472_s1 + $0x560] sm:$0xff]   ;;  %v11269_v28 = vld [vmem:[%s13472_s1 + $0x5a8] sm:$0xff]  }
 0x219   : > { %v9134_v25 = vpop.f32.mrb[140].mxu0  ;;  %9626 = vmatprep.subr.bf16.mxu0 %v11263_v27  ;;  %10138 = vmatprep.subr.bf16.mxu1 %v11265_v7 }
 0x21a   : > { %v9135_v6 = vpop.f32.mrb[141].mxu0 }
 0x21b   : > { %v9136_v41 = vadd.f32 %v9135_v6, %v9134_v25  ;;  %v9137_v12 = vpop.f32.mrb[142].mxu0 }
 0x21c   : > { %v9138_v30 = vpop.f32.mrb[143].mxu0  ;;  %9627 = vmatpush3.bf16.msra.mxu0 %v11264_v36  ;;  %10139 = vmatpush3.bf16.msra.mxu1 %v11265_v7  ;;  %v11270_v36 = vld [vmem:[%s13472_s1 + $0x568] sm:$0xff]  }
 0x21d   : > { %v9139_v21 = vadd.f32 %v9138_v30, %v9137_v12  ;;  %9628 = vmatprep.subr.bf16.mxu0 %v11266_v10  ;;  %10140 = vmatprep.subr.bf16.mxu1 %v11268_v59  ;;  %v12662_v27 = vadd.f32 %v12305_v61, %v9136_v41  ;;  %v11272_v61 = vld [vmem:[%s13472_s1 + $0x5b0] sm:$0xff]   ;;  %v11278_v30 = vld [vmem:[%s13472_s1 + $0x5b8] sm:$0xff]  }
 0x21e   : > { %4677 = vmatmul.mubr.bf16.gmra.mrb[120].mxu1 %v12623_v17  ;;  %5544 = vmatmul.mubr.bf16.gmra.mrb[248].mxu0 %v12353_v49 }
 0x21f   : > { %4684 = vmatprep.mubr.bf16.mxu1 %v12323_v15  ;;  %5551 = vmatprep.mubr.bf16.mxu0 %v12357_v14  ;;  %v12669_v7 = vadd.f32 %v12312_v2, %v9139_v21  ;;  %v11274_v15 = vld [vmem:[%s13472_s1 + $0x470] sm:$0xff]  }
 0x220   : > { %9629 = vmatpush3.bf16.msra.mxu0 %v11267_v38  ;;  %10141 = vmatpush3.bf16.msra.mxu1 %v11268_v59  ;;  %v11273_v59 = vld [vmem:[%s13472_s1 + $0x570] sm:$0xff]   ;;  %v11280_v38 = vld [vmem:[%s13472_s1 + $0x478] sm:$0xff]  }
 0x221   : > { %v9140_v25 = vpop.f32.mrb[144].mxu0  ;;  %9630 = vmatprep.subr.bf16.mxu0 %v11269_v28  ;;  %10142 = vmatprep.subr.bf16.mxu1 %v11271_v20 }
 0x222   : > { %v9141_v10 = vpop.f32.mrb[145].mxu0 }
 0x223   : > { %v9142_v2 = vadd.f32 %v9141_v10, %v9140_v25  ;;  %v9143_v6 = vpop.f32.mrb[146].mxu0 }
 0x224   : > { %v9144_v41 = vpop.f32.mrb[147].mxu0  ;;  %9631 = vmatpush3.bf16.msra.mxu0 %v11270_v36  ;;  %10143 = vmatpush3.bf16.msra.mxu1 %v11271_v20  ;;  %v11279_v20 = vld [vmem:[%s13472_s1 + $0x578] sm:$0xff]  }
 0x225   : > { %v9145_v12 = vadd.f32 %v9144_v41, %v9143_v6  ;;  %9632 = vmatprep.subr.bf16.mxu0 %v11272_v61  ;;  %10144 = vmatprep.subr.bf16.mxu1 %v11274_v15  ;;  %v12690_v21 = vadd.f32 %v12336_v46, %v9142_v2  ;;  %v11286_v46 = vld [vmem:[%s13472_s1 + $0x640] sm:$0xff]  }
 0x226   : > { %4685 = vmatmul.mubr.bf16.gmra.mrb[124].mxu1 %v12353_v49  ;;  %5552 = vmatmul.mubr.bf16.gmra.mrb[252].mxu0 %v12369_v29  ;;  %v12708_v49 = vld [vmem:[%s13472_s1 + $0x500] sm:$0xff]  }
 0x227   : > { %4692 = vmatprep.mubr.bf16.mxu1 %v12357_v14  ;;  %5559 = vmatprep.mubr.bf16.mxu0 %v12373_v33  ;;  %v12697_v28 = vadd.f32 %v12343_v51, %v9145_v12 }
 0x228   : > { %9633 = vmatpush3.bf16.msra.mxu0 %v11273_v59  ;;  %10145 = vmatpush3.bf16.msra.mxu1 %v11274_v15 }
 0x229   : > { %v9146_v36 = vpop.f32.mrb[148].mxu0  ;;  %9634 = vmatprep.subr.bf16.mxu0 %v11278_v30  ;;  %10146 = vmatprep.subr.bf16.mxu1 %v11280_v38 }
 0x22a   : > { %v9147_v51 = vpop.f32.mrb[149].mxu0 }
 0x22b   : > { %v9148_v14 = vadd.f32 %v9147_v51, %v9146_v36  ;;  %v9149_v25 = vpop.f32.mrb[150].mxu0 }
 0x22c   : > { %v9150_v61 = vpop.f32.mrb[151].mxu0  ;;  %9635 = vmatpush3.bf16.msra.mxu0 %v11279_v20  ;;  %10147 = vmatpush3.bf16.msra.mxu1 %v11280_v38 }
 0x22d   : > { %v9151_v15 = vadd.f32 %v9150_v61, %v9149_v25  ;;  %9756 = vmatprep.subr.bf16.mxu0 %v11286_v46  ;;  %10180 = vmatprep.subr.bf16.mxu1 %v12708_v49  ;;  %v12712_v10 = vadd.f32 %v12361_v9, %v9148_v14 }
 0x22e   : > { %4693 = vmatmul.mubr.bf16.gmra.mrb[128].mxu1 %v12369_v29  ;;  %5560 = vmatmul.mubr.bf16.gmra.mrb[0].mxu0 %v12385_v48 }
 0x22f   : > { %4700 = vmatprep.mubr.bf16.mxu1 %v12373_v33  ;;  %5567 = vmatprep.mubr.bf16.mxu0 %v12389_v18  ;;  %v12719_v2 = vadd.f32 %v12365_v53, %v9151_v15 }
 0x231   : > { %v9152_v6 = vpop.f32.mrb[152].mxu0 }
 0x232   : > { %v9153_v41 = vpop.f32.mrb[153].mxu0 }
 0x233   : > { %v9154_v59 = vadd.f32 %v9153_v41, %v9152_v6  ;;  %v9155_v12 = vpop.f32.mrb[154].mxu0 }
 0x234   : > { %v9156_v30 = vpop.f32.mrb[155].mxu0 }
 0x235   : > { %v9157_v38 = vadd.f32 %v9156_v30, %v9155_v12  ;;  %v12722_v9 = vadd.f32 %v12377_v23, %v9154_v59 }
 0x236   : > { %4701 = vmatmul.mubr.bf16.gmra.mrb[132].mxu1 %v12385_v48  ;;  %5568 = vmatmul.mubr.bf16.gmra.mrb[4].mxu0 %v12401_v60 }
 0x237   : > { %4708 = vmatprep.mubr.bf16.mxu1 %v12389_v18  ;;  %5575 = vmatprep.mubr.bf16.mxu0 %v12404_v8  ;;  %v12729_v53 = vadd.f32 %v12381_v24, %v9157_v38 }
 0x239   : > { %v9158_v29 = vpop.f32.mrb[156].mxu0 }
 0x23a   : > { %v9159_v33 = vpop.f32.mrb[157].mxu0 }
 0x23b   : > { %v9160_v20 = vadd.f32 %v9159_v33, %v9158_v29  ;;  %v9161_v36 = vpop.f32.mrb[158].mxu0 }
 0x23c   : > { %v9162_v46 = vpop.f32.mrb[159].mxu0 }
 0x23d   : > { %v9163_v51 = vadd.f32 %v9162_v46, %v9161_v36  ;;  %v12732_v23 = vadd.f32 %v12393_v42, %v9160_v20 }
 0x23e   : > { %4709 = vmatmul.mubr.bf16.gmra.mrb[136].mxu1 %v12401_v60  ;;  %5576 = vmatmul.mubr.bf16.gmra.mrb[8].mxu0 %v12416_v39 }
 0x23f   : > { %4716 = vmatprep.mubr.bf16.mxu1 %v12404_v8  ;;  %5583 = vmatprep.mubr.bf16.mxu0 %v12423_v19  ;;  %v12739_v24 = vadd.f32 %v12397_v50, %v9163_v51 }
 0x241   : > { %v9164_v48 = vpop.f32.mrb[160].mxu0 }
 0x242   : > { %v9165_v18 = vpop.f32.mrb[161].mxu0 }
 0x243   : > { %v9166_v14 = vadd.f32 %v9165_v18, %v9164_v48  ;;  %v9167_v25 = vpop.f32.mrb[162].mxu0 }
 0x244   : > { %v9168_v61 = vpop.f32.mrb[163].mxu0 }
 0x245   : > { %v9169_v15 = vadd.f32 %v9168_v61, %v9167_v25  ;;  %v12742_v42 = vadd.f32 %v12409_v11, %v9166_v14 }
 0x246   : > { %4717 = vmatmul.mubr.bf16.gmra.mrb[140].mxu1 %v12416_v39  ;;  %5584 = vmatmul.mubr.bf16.gmra.mrb[12].mxu0 %v12444_v22 }
 0x247   : > { %4724 = vmatprep.mubr.bf16.mxu1 %v12423_v19  ;;  %5591 = vmatprep.mubr.bf16.mxu0 %v12448_v31  ;;  %v12749_v50 = vadd.f32 %v12413_v16, %v9169_v15 }
 0x249   : > { %v9170_v60 = vpop.f32.mrb[164].mxu0 }
 0x24a   : > { %v9171_v8 = vpop.f32.mrb[165].mxu0 }
 0x24b   : > { %v9172_v6 = vadd.f32 %v9171_v8, %v9170_v60  ;;  %v9173_v41 = vpop.f32.mrb[166].mxu0 }
 0x24c   : > { %v9174_v59 = vpop.f32.mrb[167].mxu0 }
 0x24d   : > { %v9175_v12 = vadd.f32 %v9174_v59, %v9173_v41  ;;  %v12752_v11 = vadd.f32 %v12431_v56, %v9172_v6 }
 0x24e   : > { %4725 = vmatmul.mubr.bf16.gmra.mrb[144].mxu1 %v12444_v22  ;;  %5592 = vmatmul.mubr.bf16.gmra.mrb[16].mxu0 %v12472_v58  ;;  %v13486_v22 = vld [vmem:[#allocation2_spill] sm:$0xff] }
 0x24f   : > { %4732 = vmatprep.mubr.bf16.mxu1 %v12448_v31  ;;  %5599 = vmatprep.mubr.bf16.mxu0 %v12476_v34  ;;  %v12759_v16 = vadd.f32 %v12441_v0, %v9175_v12 }
 0x251   : > { %v9176_v39 = vpop.f32.mrb[168].mxu0 }
 0x252   : > { %v9177_v19 = vpop.f32.mrb[169].mxu0 }
 0x253   : > { %v9178_v30 = vadd.f32 %v9177_v19, %v9176_v39  ;;  %v9179_v38 = vpop.f32.mrb[170].mxu0 }
 0x254   : > { %v9180_v29 = vpop.f32.mrb[171].mxu0 }
 0x255   : > { %v9181_v33 = vadd.f32 %v9180_v29, %v9179_v38  ;;  %v12762_v56 = vadd.f32 %v12459_v1, %v9178_v30  ;;  %v13490_v29 = vld [vmem:[#allocation4_spill] sm:$0xff] }
 0x256   : > { %4733 = vmatmul.mubr.bf16.gmra.mrb[148].mxu1 %v12472_v58  ;;  %5600 = vmatmul.mubr.bf16.gmra.mrb[20].mxu0 %v12500_v55 }
 0x257   : > { %4740 = vmatprep.mubr.bf16.mxu1 %v12476_v34  ;;  %5607 = vmatprep.mubr.bf16.mxu0 %v12504_v3  ;;  %v12769_v0 = vadd.f32 %v13486_v22, %v9181_v33 }
 0x259   : > { %v9182_v31 = vpop.f32.mrb[172].mxu0 }
 0x25a   : > { %v9183_v20 = vpop.f32.mrb[173].mxu0 }
 0x25b   : > { %v9184_v36 = vadd.f32 %v9183_v20, %v9182_v31  ;;  %v9185_v46 = vpop.f32.mrb[174].mxu0 }
 0x25c   : > { %v9186_v51 = vpop.f32.mrb[175].mxu0 }
 0x25d   : > { %v9187_v48 = vadd.f32 %v9186_v51, %v9185_v46  ;;  %v12772_v1 = vadd.f32 %v12487_v4, %v9184_v36  ;;  %v12815_v36 = vld [vmem:[%s11569_s4 + $0x1e0] ss:$12 sps:$4 sm:$0xff]  }
 0x25e   : > { %4741 = vmatmul.mubr.bf16.gmra.mrb[152].mxu1 %v12500_v55  ;;  %5608 = vmatmul.mubr.bf16.gmra.mrb[24].mxu0 %v12530_v13 }
 0x25f   : > { %4748 = vmatprep.mubr.bf16.mxu1 %v12504_v3  ;;  %5615 = vmatprep.mubr.bf16.mxu0 %v12534_v32  ;;  %v12779_v58 = vadd.f32 %v12494_v37, %v9187_v48  ;;  %v12818_v48 = vld [vmem:[%s11569_s4 + $0x1fc] ss:$12 sps:$4 sm:$0xff]  }
 0x261   : > { %v9228_v34 = vpop.f32.mrb[176].mxu0 }
 0x262   : > { %v9229_v18 = vpop.f32.mrb[177].mxu0 }
 0x263   : > { %v9230_v14 = vadd.f32 %v9229_v18, %v9228_v34  ;;  %v9231_v25 = vpop.f32.mrb[178].mxu0  ;;  %v13492_v18 = vld [vmem:[#allocation8_spill] sm:$0xff] }
 0x264   : > { %v9232_v61 = vpop.f32.mrb[179].mxu0 }
 0x265   : > { %v12782_v15 = vadd.f32 %v12514_v62, %v9230_v14  ;;  %v9233_v4 = vadd.f32 %v9232_v61, %v9231_v25  ;;  %v13493_v61 = vld [vmem:[#allocation9_spill] sm:$0xff] }
 0x266   : > { %4749 = vmatmul.mubr.bf16.gmra.mrb[156].mxu1 %v12530_v13  ;;  %5616 = vmatmul.mubr.bf16.gmra.mrb[28].mxu0 %v12547_v54  ;;  %v13487_v13 = vld [vmem:[#allocation6_spill] sm:$0xff] }
 0x267   : > { %v12787_v55 = vadd.f32 %v12519_v43, %v9233_v4  ;;  %4756 = vmatprep.mubr.bf16.mxu1 %v12534_v32  ;;  %5623 = vmatprep.mubr.bf16.mxu0 %v12551_v63  ;;  %v13488_v43 = vld [vmem:[#allocation3_spill] sm:$0xff] }
 0x268   : > { %v13489_v32 = vld [vmem:[#allocation7_spill] sm:$0xff] }
 0x269   : > { %v9234_v37 = vpop.f32.mrb[180].mxu0 }
 0x26a   : > { %v9235_v3 = vpop.f32.mrb[181].mxu0 }
 0x26b   : > { %v9236_v60 = vadd.f32 %v9235_v3, %v9234_v37  ;;  %v9237_v8 = vpop.f32.mrb[182].mxu0 }
 0x26c   : > { %v9238_v6 = vpop.f32.mrb[183].mxu0 }
 0x26d   : > { %v12792_v62 = vadd.f32 %v12539_v52, %v9236_v60  ;;  %v9239_v41 = vadd.f32 %v9238_v6, %v9237_v8  ;;  %v12802_v52 = vld [vmem:[%s11569_s4 + $0x1e4] ss:$12 sps:$4 sm:$0xff]  }
 0x26e   : > { %4757 = vmatmul.mubr.bf16.gmra.mrb[160].mxu1 %v12547_v54  ;;  %5624 = vmatmul.mubr.bf16.gmra.mrb[32].mxu0 %v13487_v13  ;;  %v12831_v60 = vld [vmem:[%s11569_s4 + $0x1f8] ss:$12 sps:$4 sm:$0xff]  }
 0x26f   : > { %v12797_v59 = vadd.f32 %v13488_v43, %v9239_v41  ;;  %4764 = vmatprep.mubr.bf16.mxu1 %v12551_v63  ;;  %5631 = vmatprep.mubr.bf16.mxu0 %v13489_v32  ;;  %v13491_v63 = vld [vmem:[#allocation5_spill] sm:$0xff]  ;;  %v11284_v41 = vld [vmem:[%s11569_s4 + $0x80] ss:$12 sps:$4 sm:$0xff]  }
 0x271   : > { %v9240_v12 = vpop.f32.mrb[184].mxu0 }
 0x272   : > { %v9241_v39 = vpop.f32.mrb[185].mxu0 }
 0x273   : > { %v9242_v19 = vadd.f32 %v9241_v39, %v9240_v12  ;;  %v9243_v30 = vpop.f32.mrb[186].mxu0 }
 0x274   : > { %v9244_v38 = vpop.f32.mrb[187].mxu0 }
 0x275   : > { %v12805_v54 = vadd.f32 %v13490_v29, %v9242_v19  ;;  %v9245_v33 = vadd.f32 %v9244_v38, %v9243_v30  ;;  %v11285_v19 = vld [vmem:[%s11569_s4 + $0x98] ss:$12 sps:$4 sm:$0xff]  }
 0x276   : > { %4765 = vmatmul.mubr.bf16.gmra.mrb[164].mxu1 %v13487_v13  ;;  %5632 = vmatmul.mubr.bf16.gmra.mrb[36].mxu0 %v12579_v47 }
 0x277   : > { %v12810_v22 = vadd.f32 %v13491_v63, %v9245_v33  ;;  %4772 = vmatprep.mubr.bf16.mxu1 %v13489_v32  ;;  %5639 = vmatprep.mubr.bf16.mxu0 %v12802_v52  ;;  %v11289_v33 = vld [vmem:[%s11569_s4 + $0xb0] ss:$12 sps:$4 sm:$0xff]  }
 0x278   : > { %v11292_v63 = vld [vmem:[%s11569_s4 + $0xc4] ss:$12 sps:$4 sm:$0xff]  }
 0x279   : > { %v9246_v31 = vpop.f32.mrb[188].mxu0 }
 0x27a   : > { %v9247_v20 = vpop.f32.mrb[189].mxu0 }
 0x27b   : > { %v9248_v46 = vadd.f32 %v9247_v20, %v9246_v31  ;;  %v9249_v51 = vpop.f32.mrb[190].mxu0  ;;  %v11300_v20 = vld [vmem:[%s13472_s1 + $0x648] sm:$0xff]  }
 0x27c   : > { %v9250_v34 = vpop.f32.mrb[191].mxu0 }
 0x27d   : > { %v12821_v14 = vadd.f32 %v13492_v18, %v9248_v46  ;;  %v9251_v25 = vadd.f32 %v9250_v34, %v9249_v51  ;;  %v11302_v51 = vld [vmem:[%s13472_s1 + $0x510] sm:$0xff]  }
 0x27e   : > { %4773 = vmatmul.mubr.bf16.gmra.mrb[168].mxu1 %v12579_v47  ;;  %5640 = vmatmul.mubr.bf16.gmra.mrb[40].mxu0 %v12815_v36  ;;  %v11293_v18 = vld [vmem:[%s11569_s4 + $0xc8] ss:$12 sps:$4 sm:$0xff]  }
 0x27f   : > { %v12826_v4 = vadd.f32 %v13493_v61, %v9251_v25  ;;  %4780 = vmatprep.mubr.bf16.mxu1 %v12802_v52  ;;  %5647 = vmatprep.mubr.bf16.mxu0 %v12818_v48 }
 0x281   : > { %v9252_v37 = vpop.f32.mrb[192].mxu0 }
 0x282   : > { %v9253_v3 = vpop.f32.mrb[193].mxu0 }
 0x283   : > { %v9254_v8 = vadd.f32 %v9253_v3, %v9252_v37  ;;  %v9255_v6 = vpop.f32.mrb[194].mxu0  ;;  %v11295_v37 = vld [vmem:[%s11569_s4 + $0xe0] ss:$12 sps:$4 sm:$0xff]   ;;  %v11298_v3 = vld [vmem:[%s11569_s4 + $0xdc] ss:$12 sps:$4 sm:$0xff]  }
 0x284   : > { %v9256_v13 = vpop.f32.mrb[195].mxu0 }
 0x285   : > { %v12835_v47 = vadd.f32 %v12585_v26, %v9254_v8  ;;  %v9257_v43 = vadd.f32 %v9256_v13, %v9255_v6  ;;  %v11287_v26 = vld [vmem:[%s13472_s1 + $0x600] sm:$0xff]   ;;  %v11315_v6 = vld [vmem:[%s13472_s1 + $0x610] sm:$0xff]  }
 0x286   : > { %4781 = vmatmul.mubr.bf16.gmra.mrb[172].mxu1 %v12815_v36  ;;  %5648 = vmatmul.mubr.bf16.gmra.mrb[44].mxu0 %v12831_v60 }
 0x287   : > { %v12840_v32 = vadd.f32 %v12589_v45, %v9257_v43  ;;  %10148 = vmatprep.mubr.bf16.mxu1 %v11284_v41  ;;  %6394 = vmatprep.mubr.bf16.mxu0 %v12597_v44  ;;  %v11294_v44 = vld [vmem:[%s13472_s1 + $0x508] sm:$0xff]   ;;  %v11308_v43 = vld [vmem:[%s13472_s1 + $0x518] sm:$0xff]  }
 0x289   : > { %v9258_v12 = vpop.f32.mrb[196].mxu0 }
 0x28a   : > { %v9259_v39 = vpop.f32.mrb[197].mxu0 }
 0x28b   : > { %v9260_v30 = vadd.f32 %v9259_v39, %v9258_v12  ;;  %v9261_v38 = vpop.f32.mrb[198].mxu0  ;;  %v11328_v12 = vld [vmem:[%s13472_s1 + $0x658] sm:$0xff]  }
 0x28c   : > { %v9262_v29 = vpop.f32.mrb[199].mxu0 }
 0x28d   : > { %v12850_v31 = vadd.f32 %v12606_v40, %v9260_v30  ;;  %v9263_v45 = vadd.f32 %v9262_v29, %v9261_v38  ;;  %v11301_v40 = vld [vmem:[%s13472_s1 + $0x608] sm:$0xff]   ;;  %v11316_v30 = vld [vmem:[%s13472_s1 + $0x520] sm:$0xff]  }
 0x28e   : > { %10149 = vmatmul.mubr.bf16.vlgmr.msra.gmra.mrb[16].mxu1 %v11285_v19  ;;  %6395 = vmatmul.mubr.bf16.vlgmr.msra.gmra.mrb[48].mxu0 %v12623_v17  ;;  %v11299_v29 = vld [vmem:[%s11569_s4 + $0xf8] ss:$12 sps:$4 sm:$0xff]  }
 0x28f   : > { %v12860_v46 = vadd.f32 %v12613_v5, %v9263_v45  ;;  %9757 = vmatpush3.bf16.msra.mxu0 %v11287_v26  ;;  %10181 = vmatpush3.bf16.msra.mxu1 %v12708_v49  ;;  %v11314_v5 = vld [vmem:[%s13472_s1 + $0x650] sm:$0xff]   ;;  %v11290_v49 = vld [vmem:[%s11569_s4 + $0xc0] ss:$12 sps:$4 sm:$0xff]   ;;  %v11296_v26 = vld [vmem:[%s11569_s4 + $0xd8] ss:$12 sps:$4 sm:$0xff]  }
 0x290   : > { %10152 = vmatprep.mubr.bf16.mxu1 %v11289_v33  ;;  %6402 = vmatprep.mubr.bf16.mxu0 %v11292_v63  ;;  %v11303_v45 = vld [vmem:[%s11569_s4 + $0x110] ss:$12 sps:$4 sm:$0xff]  }
 0x291   : > { %v9264_v17 = vpop.f32.mrb[200].mxu0  ;;  %10182 = vmatprep.subr.bf16.mxu1 %v11294_v44  ;;  %9758 = vmatprep.subr.bf16.mxu0 %v11300_v20 }
 0x292   : > { %v9265_v34 = vpop.f32.mrb[201].mxu0 }
 0x293   : > { %v9266_v25 = vadd.f32 %v9265_v34, %v9264_v17  ;;  %v9267_v61 = vpop.f32.mrb[202].mxu0  ;;  %10183 = vmatpush3.bf16.msra.mxu1 %v11294_v44  ;;  %9759 = vmatpush3.bf16.msra.mxu0 %v11301_v40  ;;  %v11306_v44 = vld [vmem:[%s11569_s4 + $0xf4] ss:$12 sps:$4 sm:$0xff]   ;;  %v11322_v17 = vld [vmem:[%s13472_s1 + $0x528] sm:$0xff]  }
 0x294   : > { %v9268_v8 = vpop.f32.mrb[203].mxu0  ;;  %10184 = vmatprep.subr.bf16.mxu1 %v11302_v51  ;;  %9760 = vmatprep.subr.bf16.mxu0 %v11314_v5  ;;  %v11343_v40 = vld [vmem:[%s13472_s1 + $0x620] sm:$0xff]   ;;  %v11356_v34 = vld [vmem:[%s13472_s1 + $0x668] sm:$0xff]  }
 0x295   : > { %v12880_v41 = vadd.f32 %v12635_v35, %v9266_v25  ;;  %v9269_v13 = vadd.f32 %v9268_v8, %v9267_v61  ;;  %v11329_v35 = vld [vmem:[%s13472_s1 + $0x618] sm:$0xff]   ;;  %v11330_v25 = vld [vmem:[%s13472_s1 + $0x530] sm:$0xff]  }
 0x296   : > { %10153 = vmatmul.mubr.bf16.gmra.mrb[20].mxu1 %v11293_v18  ;;  %6403 = vmatmul.mubr.bf16.gmra.mrb[52].mxu0 %v11290_v49 }
 0x297   : > { %v12889_v39 = vadd.f32 %v12641_v57, %v9269_v13  ;;  %10156 = vmatprep.mubr.bf16.mxu1 %v11295_v37  ;;  %6410 = vmatprep.mubr.bf16.mxu0 %v11298_v3  ;;  %v11342_v57 = vld [vmem:[%s13472_s1 + $0x660] sm:$0xff]   ;;  %v11304_v37 = vld [vmem:[%s11569_s4 + $0xf0] ss:$12 sps:$4 sm:$0xff]   ;;  %v11307_v3 = vld [vmem:[%s11569_s4 + $0x128] ss:$12 sps:$4 sm:$0xff]  }
 0x298   : > { %10185 = vmatpush3.bf16.msra.mxu1 %v11302_v51  ;;  %9761 = vmatpush3.bf16.msra.mxu0 %v11315_v6  ;;  %v11309_v13 = vld [vmem:[%s11569_s4 + $0x140] ss:$12 sps:$4 sm:$0xff]  }
 0x299   : > { %v9270_v19 = vpop.f32.mrb[204].mxu0  ;;  %10186 = vmatprep.subr.bf16.mxu1 %v11308_v43  ;;  %9762 = vmatprep.subr.bf16.mxu0 %v11328_v12 }
 0x29a   : > { %v9271_v38 = vpop.f32.mrb[205].mxu0 }
 0x29b   : > { %v9272_v33 = vadd.f32 %v9271_v38, %v9270_v19  ;;  %v9273_v63 = vpop.f32.mrb[206].mxu0  ;;  %v11378_v38 = vld [vmem:[%s13472_s1 + $0x678] sm:$0xff]  }
 0x29c   : > { %v9274_v20 = vpop.f32.mrb[207].mxu0  ;;  %10187 = vmatpush3.bf16.msra.mxu1 %v11308_v43  ;;  %9763 = vmatpush3.bf16.msra.mxu0 %v11329_v35  ;;  %v11312_v43 = vld [vmem:[%s11569_s4 + $0x10c] ss:$12 sps:$4 sm:$0xff]   ;;  %v11371_v35 = vld [vmem:[%s13472_s1 + $0x630] sm:$0xff]  }
 0x29d   : > { %v12908_v51 = vadd.f32 %v12662_v27, %v9272_v33  ;;  %v9275_v5 = vadd.f32 %v9274_v20, %v9273_v63  ;;  %10188 = vmatprep.subr.bf16.mxu1 %v11316_v30  ;;  %9764 = vmatprep.subr.bf16.mxu0 %v11342_v57  ;;  %v11357_v27 = vld [vmem:[%s13472_s1 + $0x628] sm:$0xff]   ;;  %v11336_v57 = vld [vmem:[%s13472_s1 + $0x538] sm:$0xff]   ;;  %v12953_v33 = vld [vmem:[%s13472_s1 + $0x5c0] sm:$0xff]  }
 0x29e   : > { %10157 = vmatmul.mubr.bf16.gmra.mrb[24].mxu1 %v11299_v29  ;;  %6411 = vmatmul.mubr.bf16.gmra.mrb[56].mxu0 %v11296_v26 }
 0x29f   : > { %v12917_v49 = vadd.f32 %v12669_v7, %v9275_v5  ;;  %10160 = vmatprep.mubr.bf16.mxu1 %v11303_v45  ;;  %6418 = vmatprep.mubr.bf16.mxu0 %v11306_v44  ;;  %v11370_v7 = vld [vmem:[%s13472_s1 + $0x670] sm:$0xff]   ;;  %v11313_v45 = vld [vmem:[%s11569_s4 + $0x158] ss:$12 sps:$4 sm:$0xff]  }
 0x2a0   : > { %10189 = vmatpush3.bf16.msra.mxu1 %v11316_v30  ;;  %9765 = vmatpush3.bf16.msra.mxu0 %v11343_v40  ;;  %v11317_v40 = vld [vmem:[%s11569_s4 + $0x170] ss:$12 sps:$4 sm:$0xff]  }
 0x2a1   : > { %v9276_v18 = vpop.f32.mrb[208].mxu0  ;;  %10190 = vmatprep.subr.bf16.mxu1 %v11322_v17  ;;  %9766 = vmatprep.subr.bf16.mxu0 %v11356_v34  ;;  %v11320_v5 = vld [vmem:[%s11569_s4 + $0x124] ss:$12 sps:$4 sm:$0xff]  }
 0x2a2   : > { %v9277_v61 = vpop.f32.mrb[209].mxu0 }
 0x2a3   : > { %v9278_v8 = vadd.f32 %v9277_v61, %v9276_v18  ;;  %v9279_v6 = vpop.f32.mrb[210].mxu0  ;;  %v11318_v61 = vld [vmem:[%s11569_s4 + $0x120] ss:$12 sps:$4 sm:$0xff]  }
 0x2a4   : > { %v9280_v12 = vpop.f32.mrb[211].mxu0  ;;  %10191 = vmatpush3.bf16.msra.mxu1 %v11322_v17  ;;  %9767 = vmatpush3.bf16.msra.mxu0 %v11357_v27 }
 0x2a5   : > { %v12936_v19 = vadd.f32 %v12690_v21, %v9278_v8  ;;  %v9281_v30 = vadd.f32 %v9280_v12, %v9279_v6  ;;  %10192 = vmatprep.subr.bf16.mxu1 %v11330_v25  ;;  %9768 = vmatprep.subr.bf16.mxu0 %v11370_v7  ;;  %v11379_v21 = vld [vmem:[%s13472_s1 + $0x638] sm:$0xff]  }
 0x2a6   : > { %10161 = vmatmul.mubr.bf16.gmra.mrb[28].mxu1 %v11307_v3  ;;  %6419 = vmatmul.mubr.bf16.gmra.mrb[60].mxu0 %v11304_v37  ;;  %v11321_v37 = vld [vmem:[%s11569_s4 + $0x188] ss:$12 sps:$4 sm:$0xff]  }
 0x2a7   : > { %v12945_v26 = vadd.f32 %v12697_v28, %v9281_v30  ;;  %10164 = vmatprep.mubr.bf16.mxu1 %v11309_v13  ;;  %6426 = vmatprep.mubr.bf16.mxu0 %v11312_v43  ;;  %v11310_v28 = vld [vmem:[%s11569_s4 + $0x108] ss:$12 sps:$4 sm:$0xff]  }
 0x2a8   : > { %10193 = vmatpush3.bf16.msra.mxu1 %v11330_v25  ;;  %9769 = vmatpush3.bf16.msra.mxu0 %v11371_v35  ;;  %v11326_v6 = vld [vmem:[%s11569_s4 + $0x13c] ss:$12 sps:$4 sm:$0xff]  }
 0x2a9   : > { %v9282_v29 = vpop.f32.mrb[212].mxu0  ;;  %10194 = vmatprep.subr.bf16.mxu1 %v11336_v57  ;;  %9770 = vmatprep.subr.bf16.mxu0 %v11378_v38  ;;  %v11327_v38 = vld [vmem:[%s11569_s4 + $0x1b8] ss:$12 sps:$4 sm:$0xff]  }
 0x2aa   : > { %v9283_v63 = vpop.f32.mrb[213].mxu0 }
 0x2ab   : > { %v9284_v44 = vadd.f32 %v9283_v63, %v9282_v29  ;;  %v9285_v20 = vpop.f32.mrb[214].mxu0  ;;  %v11331_v63 = vld [vmem:[%s11569_s4 + $0x1d0] ss:$12 sps:$4 sm:$0xff]  }
 0x2ac   : > { %v9286_v17 = vpop.f32.mrb[215].mxu0  ;;  %10195 = vmatpush3.bf16.msra.mxu1 %v11336_v57  ;;  %9771 = vmatpush3.bf16.msra.mxu0 %v11379_v21  ;;  %v11324_v57 = vld [vmem:[%s11569_s4 + $0x138] ss:$12 sps:$4 sm:$0xff]  }
 0x2ad   : > { %v12960_v34 = vadd.f32 %v12712_v10, %v9284_v44  ;;  %v9287_v27 = vadd.f32 %v9286_v17, %v9285_v20  ;;  %10228 = vmatprep.subr.bf16.mxu1 %v12953_v33  ;;  %v11323_v10 = vld [vmem:[%s11569_s4 + $0x1a0] ss:$12 sps:$4 sm:$0xff]   ;;  %v11335_v17 = vld [vmem:[%s11569_s4 + $0x1e8] ss:$12 sps:$4 sm:$0xff]  }
 0x2ae   : > { %10165 = vmatmul.mubr.bf16.gmra.mrb[32].mxu1 %v11313_v45  ;;  %6427 = vmatmul.mubr.bf16.gmra.mrb[64].mxu0 %v11310_v28 }
 0x2af   : > { %v12964_v18 = vadd.f32 %v12719_v2, %v9287_v27  ;;  %10168 = vmatprep.mubr.bf16.mxu1 %v11317_v40  ;;  %6434 = vmatprep.mubr.bf16.mxu0 %v11320_v5  ;;  %v11332_v5 = vld [vmem:[%s11569_s4 + $0x150] ss:$12 sps:$4 sm:$0xff]  }
 0x2b1   : > { %v9288_v25 = vpop.f32.mrb[216].mxu0 }
 0x2b2   : > { %v9289_v7 = vpop.f32.mrb[217].mxu0 }
 0x2b3   : > { %v9290_v3 = vadd.f32 %v9289_v7, %v9288_v25  ;;  %v9291_v8 = vpop.f32.mrb[218].mxu0  ;;  %v11337_v7 = vld [vmem:[%s11569_s4 + $0x98] ss:$12 sps:$4 sm:$0xff]  }
 0x2b4   : > { %v9292_v13 = vpop.f32.mrb[219].mxu0 }
 0x2b5   : > { %v12971_v43 = vadd.f32 %v12722_v9, %v9290_v3  ;;  %v9293_v2 = vadd.f32 %v9292_v13, %v9291_v8  ;;  %v11334_v9 = vld [vmem:[%s11569_s4 + $0x154] ss:$12 sps:$4 sm:$0xff]   ;;  %v11341_v13 = vld [vmem:[%s11569_s4 + $0xb0] ss:$12 sps:$4 sm:$0xff]  }
 0x2b6   : > { %10169 = vmatmul.mubr.bf16.gmra.mrb[36].mxu1 %v11321_v37  ;;  %6435 = vmatmul.mubr.bf16.gmra.mrb[68].mxu0 %v11318_v61 }
 0x2b7   : > { %v12974_v12 = vadd.f32 %v12729_v53, %v9293_v2  ;;  %10172 = vmatprep.mubr.bf16.mxu1 %v11323_v10  ;;  %6442 = vmatprep.mubr.bf16.mxu0 %v11326_v6  ;;  %v11338_v6 = vld [vmem:[%s11569_s4 + $0x168] ss:$12 sps:$4 sm:$0xff]  }
 0x2b9   : > { %v9294_v35 = vpop.f32.mrb[220].mxu0 }
 0x2ba   : > { %v9295_v30 = vpop.f32.mrb[221].mxu0 }
 0x2bb   : > { %v9296_v21 = vadd.f32 %v9295_v30, %v9294_v35  ;;  %v9297_v29 = vpop.f32.mrb[222].mxu0  ;;  %v11345_v30 = vld [vmem:[%s11569_s4 + $0xc8] ss:$12 sps:$4 sm:$0xff]  }
 0x2bc   : > { %v9298_v28 = vpop.f32.mrb[223].mxu0 }
 0x2bd   : > { %v12981_v45 = vadd.f32 %v12732_v23, %v9296_v21  ;;  %v9299_v53 = vadd.f32 %v9298_v28, %v9297_v29  ;;  %v11340_v23 = vld [vmem:[%s11569_s4 + $0x16c] ss:$12 sps:$4 sm:$0xff]  }
 0x2be   : > { %10173 = vmatmul.mubr.bf16.gmra.mrb[40].mxu1 %v11327_v38  ;;  %6443 = vmatmul.mubr.bf16.gmra.mrb[72].mxu0 %v11324_v57  ;;  %v11350_v38 = vld [vmem:[%s13472_s1 + $0x5c8] sm:$0xff]  }
 0x2bf   : > { %v12984_v44 = vadd.f32 %v12739_v24, %v9299_v53  ;;  %10176 = vmatprep.mubr.bf16.mxu1 %v11331_v63  ;;  %6450 = vmatprep.mubr.bf16.mxu0 %v11334_v9  ;;  %v11358_v63 = vld [vmem:[%s13472_s1 + $0x5d0] sm:$0xff]   ;;  %v11346_v28 = vld [vmem:[%s11569_s4 + $0x180] ss:$12 sps:$4 sm:$0xff]  }
 0x2c0   : > { %v11349_v53 = vld [vmem:[%s11569_s4 + $0xe0] ss:$12 sps:$4 sm:$0xff]  }
 0x2c1   : > { %v9300_v20 = vpop.f32.mrb[224].mxu0 }
 0x2c2   : > { %v9301_v40 = vpop.f32.mrb[225].mxu0 }
 0x2c3   : > { %v9302_v27 = vadd.f32 %v9301_v40, %v9300_v20  ;;  %v9303_v25 = vpop.f32.mrb[226].mxu0 }
 0x2c4   : > { %v9304_v61 = vpop.f32.mrb[227].mxu0 }
 0x2c5   : > { %v12991_v37 = vadd.f32 %v12742_v42, %v9302_v27  ;;  %v9305_v24 = vadd.f32 %v9304_v61, %v9303_v25  ;;  %v11348_v42 = vld [vmem:[%s11569_s4 + $0x184] ss:$12 sps:$4 sm:$0xff]   ;;  %v11364_v25 = vld [vmem:[%s13472_s1 + $0x5d8] sm:$0xff]  }
 0x2c6   : > { %10177 = vmatmul.mubr.bf16.gmra.mrb[44].mxu1 %v11335_v17  ;;  %6451 = vmatmul.mubr.bf16.gmra.mrb[76].mxu0 %v11332_v5  ;;  %v11351_v5 = vld [vmem:[%s11569_s4 + $0xf8] ss:$12 sps:$4 sm:$0xff]   ;;  %v11354_v17 = vld [vmem:[%s11569_s4 + $0x19c] ss:$12 sps:$4 sm:$0xff]  }
 0x2c7   : > { %v12994_v3 = vadd.f32 %v12749_v50, %v9305_v24  ;;  %10196 = vmatprep.mubr.bf16.mxu1 %v11337_v7  ;;  %6458 = vmatprep.mubr.bf16.mxu0 %v11340_v23  ;;  %v11352_v24 = vld [vmem:[%s11569_s4 + $0x198] ss:$12 sps:$4 sm:$0xff]  }
 0x2c9   : > { %v9306_v8 = vpop.f32.mrb[228].mxu0 }
 0x2ca   : > { %v9307_v10 = vpop.f32.mrb[229].mxu0 }
 0x2cb   : > { %v9308_v2 = vadd.f32 %v9307_v10, %v9306_v8  ;;  %v9309_v35 = vpop.f32.mrb[230].mxu0  ;;  %v11355_v8 = vld [vmem:[%s11569_s4 + $0x110] ss:$12 sps:$4 sm:$0xff]  }
 0x2cc   : > { %v9310_v57 = vpop.f32.mrb[231].mxu0 }
 0x2cd   : > { %v13004_v50 = vadd.f32 %v12752_v11, %v9308_v2  ;;  %v9311_v21 = vadd.f32 %v9310_v57, %v9309_v35  ;;  %v11362_v2 = vld [vmem:[%s11569_s4 + $0x1b4] ss:$12 sps:$4 sm:$0xff]   ;;  %v11375_v57 = vld [vmem:[%s13472_s1 + $0x5e8] sm:$0xff]  }
 0x2ce   : > { %10197 = vmatmul.mubr.bf16.vlgmr.msra.gmra.mrb[16].mxu1 %v11341_v13  ;;  %6459 = vmatmul.mubr.bf16.gmra.mrb[80].mxu0 %v11338_v6  ;;  %v11359_v13 = vld [vmem:[%s11569_s4 + $0x128] ss:$12 sps:$4 sm:$0xff]  }
 0x2cf   : > { %v13007_v29 = vadd.f32 %v12759_v16, %v9311_v21  ;;  %10229 = vmatpush3.bf16.msra.mxu1 %v12953_v33  ;;  %10200 = vmatprep.mubr.bf16.mxu1 %v11345_v30  ;;  %v11380_v21 = vld [vmem:[%s13472_s1 + $0x5f0] sm:$0xff]  }
 0x2d0   : > { %6466 = vmatprep.mubr.bf16.mxu0 %v11348_v42  ;;  %10230 = vmatprep.subr.bf16.mxu1 %v11350_v38 }
 0x2d1   : > { %v9312_v9 = vpop.f32.mrb[232].mxu0 }
 0x2d2   : > { %v9313_v11 = vpop.f32.mrb[233].mxu0 }
 0x2d3   : > { %v9314_v20 = vadd.f32 %v9313_v11, %v9312_v9  ;;  %v9315_v40 = vpop.f32.mrb[234].mxu0  ;;  %10231 = vmatpush3.bf16.msra.mxu1 %v11350_v38  ;;  %v11360_v11 = vld [vmem:[%s11569_s4 + $0x1b0] ss:$12 sps:$4 sm:$0xff]  }
 0x2d4   : > { %v9316_v16 = vpop.f32.mrb[235].mxu0  ;;  %10232 = vmatprep.subr.bf16.mxu1 %v11358_v63 }
 0x2d5   : > { %v13018_v33 = vadd.f32 %v12762_v56, %v9314_v20  ;;  %v9317_v27 = vadd.f32 %v9316_v16, %v9315_v40  ;;  %v11372_v56 = vld [vmem:[%s13472_s1 + $0x5e0] sm:$0xff]  }
 0x2d6   : > { %10201 = vmatmul.mubr.bf16.gmra.mrb[20].mxu1 %v11349_v53  ;;  %6467 = vmatmul.mubr.bf16.gmra.mrb[84].mxu0 %v11346_v28  ;;  %v11363_v28 = vld [vmem:[%s11569_s4 + $0x140] ss:$12 sps:$4 sm:$0xff]  }
 0x2d7   : > { %v13024_v7 = vadd.f32 %v12769_v0, %v9317_v27  ;;  %10204 = vmatprep.mubr.bf16.mxu1 %v11351_v5  ;;  %6474 = vmatprep.mubr.bf16.mxu0 %v11354_v17  ;;  %v11365_v5 = vld [vmem:[%s11569_s4 + $0x158] ss:$12 sps:$4 sm:$0xff]  }
 0x2d8   : > { %10233 = vmatpush3.bf16.msra.mxu1 %v11358_v63  ;;  %v11368_v17 = vld [vmem:[%s11569_s4 + $0x1cc] ss:$12 sps:$4 sm:$0xff]  }
 0x2d9   : > { %v9318_v23 = vpop.f32.mrb[236].mxu0  ;;  %10234 = vmatprep.subr.bf16.mxu1 %v11364_v25 }
 0x2da   : > { %v9319_v61 = vpop.f32.mrb[237].mxu0 }
 0x2db   : > { %v9320_v10 = vadd.f32 %v9319_v61, %v9318_v23  ;;  %v9321_v6 = vpop.f32.mrb[238].mxu0  ;;  %v11386_v61 = vld [vmem:[%s13472_s1 + $0x5f8] sm:$0xff]  }
 0x2dc   : > { %v9322_v35 = vpop.f32.mrb[239].mxu0  ;;  %10235 = vmatpush3.bf16.msra.mxu1 %v11364_v25 }
 0x2dd   : > { %v13034_v0 = vadd.f32 %v12772_v1, %v9320_v10  ;;  %v9323_v30 = vadd.f32 %v9322_v35, %v9321_v6  ;;  %10236 = vmatprep.subr.bf16.mxu1 %v11372_v56 }
 0x2de   : > { %10205 = vmatmul.mubr.bf16.gmra.mrb[24].mxu1 %v11355_v8  ;;  %6475 = vmatmul.mubr.bf16.gmra.mrb[88].mxu0 %v11352_v24 }
 0x2df   : > { %v13040_v42 = vadd.f32 %v12779_v58, %v9323_v30  ;;  %10208 = vmatprep.mubr.bf16.mxu1 %v11359_v13  ;;  %6482 = vmatprep.mubr.bf16.mxu0 %v11362_v2  ;;  %v13061_v13 = vld [vmem:[%s13472_s1 + $0x680] sm:$0xff]   ;;  %v11366_v30 = vld [vmem:[%s11569_s4 + $0x1c8] ss:$12 sps:$4 sm:$0xff]  }
 0x2e0   : > { %10237 = vmatpush3.bf16.msra.mxu1 %v11372_v56 }
 0x2e1   : > { %v9364_v1 = vpop.f32.mrb[112].mxu1  ;;  %v9500_v38 = vpop.f32.mrb[240].mxu0  ;;  %10238 = vmatprep.subr.bf16.mxu1 %v11375_v57 }
 0x2e2   : > { %v9365_v63 = vpop.f32.mrb[113].mxu1  ;;  %v9501_v9 = vpop.f32.mrb[241].mxu0 }
 0x2e3   : > { %v9366_v53 = vadd.f32 %v9365_v63, %v9364_v1  ;;  %v9502_v20 = vadd.f32 %v9501_v9, %v9500_v38  ;;  %v9367_v58 = vpop.f32.mrb[114].mxu1  ;;  %v9503_v40 = vpop.f32.mrb[242].mxu0  ;;  %v11373_v9 = vld [vmem:[%s11569_s4 + $0x188] ss:$12 sps:$4 sm:$0xff]  }
 0x2e4   : > { %v9368_v16 = vpop.f32.mrb[115].mxu1  ;;  %v9504_v27 = vpop.f32.mrb[243].mxu0  ;;  %10239 = vmatpush3.bf16.msra.mxu1 %v11375_v57  ;;  %v11369_v57 = vld [vmem:[%s11569_s4 + $0x170] ss:$12 sps:$4 sm:$0xff]  }
 0x2e5   : > { %v10353_v25 = vadd.f32 %v12782_v15, %v9366_v53  ;;  %v9369_v23 = vadd.f32 %v9368_v16, %v9367_v58  ;;  %v9505_v56 = vadd.f32 %v9504_v27, %v9503_v40  ;;  %10240 = vmatprep.subr.bf16.mxu1 %v11380_v21 }
 0x2e6   : > { %10209 = vmatmul.mubr.bf16.gmra.mrb[28].mxu1 %v11363_v28  ;;  %6483 = vmatmul.mubr.bf16.gmra.mrb[92].mxu0 %v11360_v11 }
 0x2e7   : > { %v13053_v24 = vadd.f32 %v10353_v25, %v9502_v20  ;;  %v10371_v8 = vadd.f32 %v12787_v55, %v9369_v23  ;;  %10212 = vmatprep.mubr.bf16.mxu1 %v11365_v5  ;;  %6490 = vmatprep.mubr.bf16.mxu0 %v11368_v17  ;;  %v11374_v25 = vld [vmem:[%s11569_s4 + $0x1a0] ss:$12 sps:$4 sm:$0xff]  }
 0x2e8   : > { %10241 = vmatpush3.bf16.msra.mxu1 %v11380_v21 }
 0x2e9   : > { %v13056_v15 = vadd.f32 %v10371_v8, %v9505_v56  ;;  %v9370_v10 = vpop.f32.mrb[116].mxu1  ;;  %v9506_v6 = vpop.f32.mrb[244].mxu0  ;;  %10242 = vmatprep.subr.bf16.mxu1 %v11386_v61 }
 0x2ea   : > { %v9371_v2 = vpop.f32.mrb[117].mxu1  ;;  %v9507_v35 = vpop.f32.mrb[245].mxu0 }
 0x2eb   : > { %v9372_v1 = vadd.f32 %v9371_v2, %v9370_v10  ;;  %v9508_v55 = vadd.f32 %v9507_v35, %v9506_v6  ;;  %v9373_v38 = vpop.f32.mrb[118].mxu1  ;;  %v9509_v63 = vpop.f32.mrb[246].mxu0  ;;  %v11376_v10 = vld [vmem:[%s11569_s4 + $0x1b8] ss:$12 sps:$4 sm:$0xff]  }
 0x2ec   : > { %v9374_v21 = vpop.f32.mrb[119].mxu1  ;;  %v9510_v11 = vpop.f32.mrb[247].mxu0  ;;  %10243 = vmatpush3.bf16.msra.mxu1 %v11386_v61 }
 0x2ed   : > { %v10344_v28 = vadd.f32 %v12792_v62, %v9372_v1  ;;  %v9375_v53 = vadd.f32 %v9374_v21, %v9373_v38  ;;  %v9511_v20 = vadd.f32 %v9510_v11, %v9509_v63  ;;  %10276 = vmatprep.subr.bf16.mxu1 %v13061_v13 }
 0x2ee   : > { %10213 = vmatmul.mubr.bf16.gmra.mrb[32].mxu1 %v11369_v57  ;;  %6491 = vmatmul.mubr.bf16.gmra.mrb[96].mxu0 %v11366_v30 }
 0x2ef   : > { %v13068_v58 = vadd.f32 %v10344_v28, %v9508_v55  ;;  %v10362_v40 = vadd.f32 %v12797_v59, %v9375_v53  ;;  %10216 = vmatprep.mubr.bf16.mxu1 %v11373_v9  ;;  %6498 = vmatprep.mubr.bf16.mxu0 %v12802_v52  ;;  %v11377_v9 = vld [vmem:[%s11569_s4 + $0x1d0] ss:$12 sps:$4 sm:$0xff]  }
 0x2f1   : > { %v13072_v5 = vadd.f32 %v10362_v40, %v9511_v20  ;;  %v9376_v17 = vpop.f32.mrb[120].mxu1  ;;  %v9512_v16 = vpop.f32.mrb[248].mxu0  ;;  %v13087_v20 = vld [vmem:[%s11569_s4 + $0x214] ss:$12 sps:$4 sm:$0xff]  }
 0x2f2   : > { %v9377_v27 = vpop.f32.mrb[121].mxu1  ;;  %v9513_v62 = vpop.f32.mrb[249].mxu0 }
 0x2f3   : > { %v9378_v23 = vadd.f32 %v9377_v27, %v9376_v17  ;;  %v9514_v56 = vadd.f32 %v9513_v62, %v9512_v16  ;;  %v9379_v61 = vpop.f32.mrb[122].mxu1  ;;  %v9515_v8 = vpop.f32.mrb[250].mxu0 }
 0x2f4   : > { %v9380_v6 = vpop.f32.mrb[123].mxu1  ;;  %v9516_v2 = vpop.f32.mrb[251].mxu0 }
 0x2f5   : > { %v10389_v59 = vadd.f32 %v12805_v54, %v9378_v23  ;;  %v9381_v35 = vadd.f32 %v9380_v6, %v9379_v61  ;;  %v9517_v30 = vadd.f32 %v9516_v2, %v9515_v8  ;;  %v13098_v8 = vld [vmem:[%s11569_s4 + $0x210] ss:$12 sps:$4 sm:$0xff]  }
 0x2f6   : > { %10217 = vmatmul.mubr.bf16.gmra.mrb[36].mxu1 %v11374_v25  ;;  %6499 = vmatmul.mubr.bf16.gmra.mrb[100].mxu0 %v12815_v36  ;;  %v11381_v36 = vld [vmem:[%s11569_s4 + $0x1e8] ss:$12 sps:$4 sm:$0xff]  }
 0x2f7   : > { %v13078_v52 = vadd.f32 %v10389_v59, %v9514_v56  ;;  %v10407_v57 = vadd.f32 %v12810_v22, %v9381_v35  ;;  %10220 = vmatprep.mubr.bf16.mxu1 %v11376_v10  ;;  %6506 = vmatprep.mubr.bf16.mxu0 %v12818_v48  ;;  %v11385_v10 = vld [vmem:[%s11569_s4 + $0x200] ss:$12 sps:$4 sm:$0xff]   ;;  %v11387_v35 = vld [vmem:[%s11569_s4 + $0xb0] ss:$12 sps:$4 sm:$0xff]  }
 0x2f9   : > { %v13082_v1 = vadd.f32 %v10407_v57, %v9517_v30  ;;  %v9382_v55 = vpop.f32.mrb[124].mxu1  ;;  %v9518_v38 = vpop.f32.mrb[252].mxu0  ;;  %v11390_v30 = vld [vmem:[%s11569_s4 + $0xc4] ss:$12 sps:$4 sm:$0xff]  }
 0x2fa   : > { %v9383_v63 = vpop.f32.mrb[125].mxu1  ;;  %v9519_v54 = vpop.f32.mrb[253].mxu0 }
 0x2fb   : > { %v9384_v21 = vadd.f32 %v9383_v63, %v9382_v55  ;;  %v9520_v11 = vadd.f32 %v9519_v54, %v9518_v38  ;;  %v9385_v28 = vpop.f32.mrb[126].mxu1  ;;  %v9521_v53 = vpop.f32.mrb[254].mxu0 }
 0x2fc   : > { %v9386_v40 = vpop.f32.mrb[127].mxu1  ;;  %v9522_v22 = vpop.f32.mrb[255].mxu0 }
 0x2fd   : > { %v10380_v48 = vadd.f32 %v12821_v14, %v9384_v21  ;;  %v9387_v17 = vadd.f32 %v9386_v40, %v9385_v28  ;;  %v9523_v16 = vadd.f32 %v9522_v22, %v9521_v53  ;;  %v11391_v40 = vld [vmem:[%s11569_s4 + $0xc8] ss:$12 sps:$4 sm:$0xff]  }
 0x2fe   : > { %10221 = vmatmul.mubr.bf16.gmra.mrb[40].mxu1 %v11377_v9  ;;  %6507 = vmatmul.mubr.bf16.gmra.mrb[104].mxu0 %v12831_v60 }
 0x2ff   : > { %v13091_v27 = vadd.f32 %v10380_v48, %v9520_v11  ;;  %v10398_v62 = vadd.f32 %v12826_v4, %v9387_v17  ;;  %10224 = vmatprep.mubr.bf16.mxu1 %v11381_v36  ;;  %6514 = vmatprep.mubr.bf16.mxu0 %v13087_v20 }
 0x301   : > { %v13095_v25 = vadd.f32 %v10398_v62, %v9523_v16  ;;  %v9388_v23 = vpop.f32.mrb[128].mxu1  ;;  %v9524_v56 = vpop.f32.mrb[0].mxu0  ;;  %v11393_v62 = vld [vmem:[%s11569_s4 + $0xe0] ss:$12 sps:$4 sm:$0xff]  }
 0x302   : > { %v9389_v61 = vpop.f32.mrb[129].mxu1  ;;  %v9525_v14 = vpop.f32.mrb[1].mxu0 }
 0x303   : > { %v9390_v6 = vadd.f32 %v9389_v61, %v9388_v23  ;;  %v9526_v60 = vadd.f32 %v9525_v14, %v9524_v56  ;;  %v9391_v2 = vpop.f32.mrb[130].mxu1  ;;  %v9527_v59 = vpop.f32.mrb[2].mxu0  ;;  %v11396_v61 = vld [vmem:[%s11569_s4 + $0xdc] ss:$12 sps:$4 sm:$0xff]  }
 0x304   : > { %v9392_v57 = vpop.f32.mrb[131].mxu1  ;;  %v9528_v4 = vpop.f32.mrb[3].mxu0 }
 0x305   : > { %v10425_v55 = vadd.f32 %v12835_v47, %v9390_v6  ;;  %v9393_v38 = vadd.f32 %v9392_v57, %v9391_v2  ;;  %v9529_v63 = vadd.f32 %v9528_v4, %v9527_v59  ;;  %v11388_v47 = vld [vmem:[%s11569_s4 + $0xc0] ss:$12 sps:$4 sm:$0xff]  }
 0x306   : > { %10225 = vmatmul.mubr.bf16.gmra.mrb[44].mxu1 %v11385_v10  ;;  %6515 = vmatmul.mubr.bf16.gmra.mrb[108].mxu0 %v13098_v8 }
 0x307   : > { %v13105_v54 = vadd.f32 %v10425_v55, %v9526_v60  ;;  %v10443_v9 = vadd.f32 %v12840_v32, %v9393_v38  ;;  %10244 = vmatprep.mubr.bf16.mxu1 %v11387_v35  ;;  %7261 = vmatprep.mubr.bf16.mxu0 %v11390_v30  ;;  %v11398_v32 = vld [vmem:[%s13472_s1 + $0x688] sm:$0xff]   ;;  %v11394_v55 = vld [vmem:[%s11569_s4 + $0xd8] ss:$12 sps:$4 sm:$0xff]  }
 0x308   : > { %v11397_v38 = vld [vmem:[%s11569_s4 + $0xf8] ss:$12 sps:$4 sm:$0xff]  }
 0x309   : > { %v13108_v21 = vadd.f32 %v10443_v9, %v9529_v63  ;;  %v9394_v11 = vpop.f32.mrb[132].mxu1  ;;  %v9530_v28 = vpop.f32.mrb[4].mxu0 }
 0x30a   : > { %v9395_v53 = vpop.f32.mrb[133].mxu1  ;;  %v9531_v36 = vpop.f32.mrb[5].mxu0 }
 0x30b   : > { %v9396_v22 = vadd.f32 %v9395_v53, %v9394_v11  ;;  %v9532_v48 = vadd.f32 %v9531_v36, %v9530_v28  ;;  %v9397_v17 = vpop.f32.mrb[134].mxu1  ;;  %v9533_v16 = vpop.f32.mrb[6].mxu0  ;;  %v11399_v11 = vld [vmem:[%s11569_s4 + $0x110] ss:$12 sps:$4 sm:$0xff]   ;;  %v11402_v28 = vld [vmem:[%s11569_s4 + $0xf4] ss:$12 sps:$4 sm:$0xff]  }
 0x30c   : > { %v9398_v23 = vpop.f32.mrb[135].mxu1  ;;  %v9534_v56 = vpop.f32.mrb[7].mxu0 }
 0x30d   : > { %v10416_v14 = vadd.f32 %v12850_v31, %v9396_v22  ;;  %v9399_v10 = vadd.f32 %v9398_v23, %v9397_v17  ;;  %v9535_v6 = vadd.f32 %v9534_v56, %v9533_v16  ;;  %v11404_v31 = vld [vmem:[%s13472_s1 + $0x690] sm:$0xff]   ;;  %v11416_v56 = vld [vmem:[%s13472_s1 + $0x6a0] sm:$0xff]  }
 0x30e   : > { %10245 = vmatmul.mubr.bf16.vlgmr.msra.gmra.mrb[16].mxu1 %v11391_v40  ;;  %7262 = vmatmul.mubr.bf16.vlgmr.msra.gmra.mrb[112].mxu0 %v11388_v47 }
 0x30f   : > { %v13118_v60 = vadd.f32 %v10416_v14, %v9532_v48  ;;  %v10434_v2 = vadd.f32 %v12860_v46, %v9399_v10  ;;  %10277 = vmatpush3.bf16.msra.mxu1 %v13061_v13  ;;  %10248 = vmatprep.mubr.bf16.mxu1 %v11393_v62  ;;  %v11410_v48 = vld [vmem:[%s13472_s1 + $0x698] sm:$0xff]   ;;  %v11403_v10 = vld [vmem:[%s11569_s4 + $0x128] ss:$12 sps:$4 sm:$0xff]  }
 0x310   : > { %7269 = vmatprep.mubr.bf16.mxu0 %v11396_v61  ;;  %10278 = vmatprep.subr.bf16.mxu1 %v11398_v32  ;;  %v11400_v14 = vld [vmem:[%s11569_s4 + $0xf0] ss:$12 sps:$4 sm:$0xff]  }
 0x311   : > { %v13125_v59 = vadd.f32 %v10434_v2, %v9535_v6  ;;  %v9400_v35 = vpop.f32.mrb[136].mxu1  ;;  %v9536_v30 = vpop.f32.mrb[8].mxu0 }
 0x312   : > { %v9401_v57 = vpop.f32.mrb[137].mxu1  ;;  %v9537_v4 = vpop.f32.mrb[9].mxu0 }
 0x313   : > { %v9402_v46 = vadd.f32 %v9401_v57, %v9400_v35  ;;  %v9538_v63 = vadd.f32 %v9537_v4, %v9536_v30  ;;  %v9403_v13 = vpop.f32.mrb[138].mxu1  ;;  %v9539_v9 = vpop.f32.mrb[10].mxu0  ;;  %10279 = vmatpush3.bf16.msra.mxu1 %v11398_v32  ;;  %v11405_v30 = vld [vmem:[%s11569_s4 + $0x140] ss:$12 sps:$4 sm:$0xff]  }
 0x314   : > { %v9404_v53 = vpop.f32.mrb[139].mxu1  ;;  %v9540_v36 = vpop.f32.mrb[11].mxu0  ;;  %10280 = vmatprep.subr.bf16.mxu1 %v11404_v31  ;;  %v11408_v57 = vld [vmem:[%s11569_s4 + $0x10c] ss:$12 sps:$4 sm:$0xff]  }
 0x315   : > { %v10461_v47 = vadd.f32 %v12880_v41, %v9402_v46  ;;  %v9405_v40 = vadd.f32 %v9404_v53, %v9403_v13  ;;  %v9541_v22 = vadd.f32 %v9540_v36, %v9539_v9  ;;  %v11428_v53 = vld [vmem:[%s13472_s1 + $0x6b0] sm:$0xff]  }
 0x316   : > { %10249 = vmatmul.mubr.bf16.gmra.mrb[20].mxu1 %v11397_v38  ;;  %7270 = vmatmul.mubr.bf16.gmra.mrb[116].mxu0 %v11394_v55 }
 0x317   : > { %v13135_v17 = vadd.f32 %v10461_v47, %v9538_v63  ;;  %v10479_v16 = vadd.f32 %v12889_v39, %v9405_v40  ;;  %10252 = vmatprep.mubr.bf16.mxu1 %v11399_v11  ;;  %7277 = vmatprep.mubr.bf16.mxu0 %v11402_v28  ;;  %v11422_v63 = vld [vmem:[%s13472_s1 + $0x6a8] sm:$0xff]  }
 0x318   : > { %10281 = vmatpush3.bf16.msra.mxu1 %v11404_v31  ;;  %v11406_v40 = vld [vmem:[%s11569_s4 + $0x108] ss:$12 sps:$4 sm:$0xff]  }
 0x319   : > { %v13138_v41 = vadd.f32 %v10479_v16, %v9541_v22  ;;  %v9406_v62 = vpop.f32.mrb[140].mxu1  ;;  %v9542_v23 = vpop.f32.mrb[12].mxu0  ;;  %10282 = vmatprep.subr.bf16.mxu1 %v11410_v48  ;;  %v11409_v22 = vld [vmem:[%s11569_s4 + $0x158] ss:$12 sps:$4 sm:$0xff]  }
 0x31a   : > { %v9407_v61 = vpop.f32.mrb[141].mxu1  ;;  %v9543_v32 = vpop.f32.mrb[13].mxu0 }
 0x31b   : > { %v9408_v6 = vadd.f32 %v9407_v61, %v9406_v62  ;;  %v9544_v39 = vadd.f32 %v9543_v32, %v9542_v23  ;;  %v9409_v2 = vpop.f32.mrb[142].mxu1  ;;  %v9545_v35 = vpop.f32.mrb[14].mxu0  ;;  %v11411_v23 = vld [vmem:[%s11569_s4 + $0x170] ss:$12 sps:$4 sm:$0xff]  }
 0x31c   : > { %v9410_v31 = vpop.f32.mrb[143].mxu1  ;;  %v9546_v4 = vpop.f32.mrb[15].mxu0  ;;  %10283 = vmatpush3.bf16.msra.mxu1 %v11410_v48  ;;  %v11414_v61 = vld [vmem:[%s11569_s4 + $0x124] ss:$12 sps:$4 sm:$0xff]  }
 0x31d   : > { %v10452_v55 = vadd.f32 %v12908_v51, %v9408_v6  ;;  %v9411_v38 = vadd.f32 %v9410_v31, %v9409_v2  ;;  %v9547_v46 = vadd.f32 %v9546_v4, %v9545_v35  ;;  %10284 = vmatprep.subr.bf16.mxu1 %v11416_v56 }
 0x31e   : > { %10253 = vmatmul.mubr.bf16.gmra.mrb[24].mxu1 %v11403_v10  ;;  %7278 = vmatmul.mubr.bf16.gmra.mrb[120].mxu0 %v11400_v14 }
 0x31f   : > { %v13151_v13 = vadd.f32 %v10452_v55, %v9544_v39  ;;  %v10470_v9 = vadd.f32 %v12917_v49, %v9411_v38  ;;  %10256 = vmatprep.mubr.bf16.mxu1 %v11405_v30  ;;  %7285 = vmatprep.mubr.bf16.mxu0 %v11408_v57  ;;  %v11434_v39 = vld [vmem:[%s13472_s1 + $0x6b8] sm:$0xff]   ;;  %v11412_v55 = vld [vmem:[%s11569_s4 + $0x120] ss:$12 sps:$4 sm:$0xff]   ;;  %v11415_v38 = vld [vmem:[%s11569_s4 + $0x188] ss:$12 sps:$4 sm:$0xff]  }
 0x320   : > { %10285 = vmatpush3.bf16.msra.mxu1 %v11416_v56 }
 0x321   : > { %v13154_v51 = vadd.f32 %v10470_v9, %v9547_v46  ;;  %v9412_v11 = vpop.f32.mrb[144].mxu1  ;;  %v9548_v28 = vpop.f32.mrb[16].mxu0  ;;  %10286 = vmatprep.subr.bf16.mxu1 %v11422_v63 }
 0x322   : > { %v9413_v36 = vpop.f32.mrb[145].mxu1  ;;  %v9549_v47 = vpop.f32.mrb[17].mxu0 }
 0x323   : > { %v9414_v48 = vadd.f32 %v9413_v36, %v9412_v11  ;;  %v9550_v49 = vadd.f32 %v9549_v47, %v9548_v28  ;;  %v9415_v16 = vpop.f32.mrb[146].mxu1  ;;  %v9551_v62 = vpop.f32.mrb[18].mxu0  ;;  %v11417_v28 = vld [vmem:[%s11569_s4 + $0x1a0] ss:$12 sps:$4 sm:$0xff]  }
 0x324   : > { %v9416_v56 = vpop.f32.mrb[147].mxu1  ;;  %v9552_v32 = vpop.f32.mrb[19].mxu0  ;;  %10287 = vmatpush3.bf16.msra.mxu1 %v11422_v63 }
 0x325   : > { %v10497_v14 = vadd.f32 %v12936_v19, %v9414_v48  ;;  %v9417_v10 = vadd.f32 %v9416_v56, %v9415_v16  ;;  %v9553_v6 = vadd.f32 %v9552_v32, %v9551_v62  ;;  %10288 = vmatprep.subr.bf16.mxu1 %v11428_v53  ;;  %v11418_v32 = vld [vmem:[%s11569_s4 + $0x138] ss:$12 sps:$4 sm:$0xff]  }
 0x326   : > { %10257 = vmatmul.mubr.bf16.gmra.mrb[28].mxu1 %v11409_v22  ;;  %7286 = vmatmul.mubr.bf16.gmra.mrb[124].mxu0 %v11406_v40 }
 0x327   : > { %v13167_v2 = vadd.f32 %v10497_v14, %v9550_v49  ;;  %v10515_v35 = vadd.f32 %v12945_v26, %v9417_v10  ;;  %10260 = vmatprep.mubr.bf16.mxu1 %v11411_v23  ;;  %7293 = vmatprep.mubr.bf16.mxu0 %v11414_v61  ;;  %v11420_v26 = vld [vmem:[%s11569_s4 + $0x13c] ss:$12 sps:$4 sm:$0xff]  }
 0x328   : > { %10289 = vmatpush3.bf16.msra.mxu1 %v11428_v53 }
 0x329   : > { %v13170_v19 = vadd.f32 %v10515_v35, %v9553_v6  ;;  %v9418_v30 = vpop.f32.mrb[148].mxu1  ;;  %v9554_v57 = vpop.f32.mrb[20].mxu0  ;;  %10290 = vmatprep.subr.bf16.mxu1 %v11434_v39  ;;  %v11423_v35 = vld [vmem:[%s11569_s4 + $0x1d0] ss:$12 sps:$4 sm:$0xff]  }
 0x32a   : > { %v9419_v31 = vpop.f32.mrb[149].mxu1  ;;  %v9555_v4 = vpop.f32.mrb[21].mxu0 }
 0x32b   : > { %v9420_v46 = vadd.f32 %v9419_v31, %v9418_v30  ;;  %v9556_v63 = vadd.f32 %v9555_v4, %v9554_v57  ;;  %v9421_v9 = vpop.f32.mrb[150].mxu1  ;;  %v9557_v11 = vpop.f32.mrb[22].mxu0  ;;  %v11426_v30 = vld [vmem:[%s11569_s4 + $0x154] ss:$12 sps:$4 sm:$0xff]  }
 0x32c   : > { %v9422_v36 = vpop.f32.mrb[151].mxu1  ;;  %v9558_v47 = vpop.f32.mrb[23].mxu0  ;;  %10291 = vmatpush3.bf16.msra.mxu1 %v11434_v39 }
 0x32d   : > { %v10488_v53 = vadd.f32 %v12960_v34, %v9420_v46  ;;  %v9423_v40 = vadd.f32 %v9422_v36, %v9421_v9  ;;  %v9559_v22 = vadd.f32 %v9558_v47, %v9557_v11  ;;  %v11421_v34 = vld [vmem:[%s11569_s4 + $0x1b8] ss:$12 sps:$4 sm:$0xff]   ;;  %v11424_v36 = vld [vmem:[%s11569_s4 + $0x150] ss:$12 sps:$4 sm:$0xff]  }
 0x32e   : > { %10261 = vmatmul.mubr.bf16.gmra.mrb[32].mxu1 %v11415_v38  ;;  %7294 = vmatmul.mubr.bf16.gmra.mrb[128].mxu0 %v11412_v55 }
 0x32f   : > { %v13177_v48 = vadd.f32 %v10488_v53, %v9556_v63  ;;  %v10506_v49 = vadd.f32 %v12964_v18, %v9423_v40  ;;  %10264 = vmatprep.mubr.bf16.mxu1 %v11417_v28  ;;  %7301 = vmatprep.mubr.bf16.mxu0 %v11420_v26 }
 0x331   : > { %v13180_v16 = vadd.f32 %v10506_v49, %v9559_v22  ;;  %v9424_v62 = vpop.f32.mrb[152].mxu1  ;;  %v9560_v23 = vpop.f32.mrb[24].mxu0  ;;  %v11429_v49 = vld [vmem:[%s11569_s4 + $0x200] ss:$12 sps:$4 sm:$0xff]  }
 0x332   : > { %v9425_v61 = vpop.f32.mrb[153].mxu1  ;;  %v9561_v56 = vpop.f32.mrb[25].mxu0 }
 0x333   : > { %v9426_v14 = vadd.f32 %v9425_v61, %v9424_v62  ;;  %v9562_v10 = vadd.f32 %v9561_v56, %v9560_v23  ;;  %v9427_v6 = vpop.f32.mrb[154].mxu1  ;;  %v9563_v39 = vpop.f32.mrb[26].mxu0  ;;  %v11432_v62 = vld [vmem:[%s11569_s4 + $0x16c] ss:$12 sps:$4 sm:$0xff]  }
 0x334   : > { %v9428_v57 = vpop.f32.mrb[155].mxu1  ;;  %v9564_v31 = vpop.f32.mrb[27].mxu0 }
 0x335   : > { %v10533_v18 = vadd.f32 %v12971_v43, %v9426_v14  ;;  %v9429_v4 = vadd.f32 %v9428_v57, %v9427_v6  ;;  %v9565_v55 = vadd.f32 %v9564_v31, %v9563_v39  ;;  %v11427_v43 = vld [vmem:[%s11569_s4 + $0x1e8] ss:$12 sps:$4 sm:$0xff]  }
 0x336   : > { %10265 = vmatmul.mubr.bf16.gmra.mrb[36].mxu1 %v11421_v34  ;;  %7302 = vmatmul.mubr.bf16.gmra.mrb[132].mxu0 %v11418_v32  ;;  %v11430_v57 = vld [vmem:[%s11569_s4 + $0x168] ss:$12 sps:$4 sm:$0xff]  }
 0x337   : > { %v13187_v38 = vadd.f32 %v10533_v18, %v9562_v10  ;;  %v10551_v46 = vadd.f32 %v12974_v12, %v9429_v4  ;;  %10268 = vmatprep.mubr.bf16.mxu1 %v11423_v35  ;;  %7309 = vmatprep.mubr.bf16.mxu0 %v11426_v30 }
 0x339   : > { %v13190_v63 = vadd.f32 %v10551_v46, %v9565_v55  ;;  %v9430_v9 = vpop.f32.mrb[156].mxu1  ;;  %v9566_v11 = vpop.f32.mrb[28].mxu0  ;;  %v11437_v46 = vld [vmem:[%s11569_s4 + $0x184] ss:$12 sps:$4 sm:$0xff]  }
 0x33a   : > { %v9431_v28 = vpop.f32.mrb[157].mxu1  ;;  %v9567_v26 = vpop.f32.mrb[29].mxu0 }
 0x33b   : > { %v9432_v47 = vadd.f32 %v9431_v28, %v9430_v9  ;;  %v9568_v53 = vadd.f32 %v9567_v26, %v9566_v11  ;;  %v9433_v40 = vpop.f32.mrb[158].mxu1  ;;  %v9569_v22 = vpop.f32.mrb[30].mxu0  ;;  %v11438_v9 = vld [vmem:[%s11569_s4 + $0xc8] ss:$12 sps:$4 sm:$0xff]  }
 0x33c   : > { %v9434_v23 = vpop.f32.mrb[159].mxu1  ;;  %v9570_v61 = vpop.f32.mrb[31].mxu0 }
 0x33d   : > { %v10524_v12 = vadd.f32 %v12981_v45, %v9432_v47  ;;  %v9435_v56 = vadd.f32 %v9434_v23, %v9433_v40  ;;  %v9571_v32 = vadd.f32 %v9570_v61, %v9569_v22  ;;  %v11433_v45 = vld [vmem:[%s11569_s4 + $0x218] ss:$12 sps:$4 sm:$0xff]   ;;  %v11435_v23 = vld [vmem:[%s11569_s4 + $0x180] ss:$12 sps:$4 sm:$0xff]  }
 0x33e   : > { %10269 = vmatmul.mubr.bf16.gmra.mrb[40].mxu1 %v11427_v43  ;;  %7310 = vmatmul.mubr.bf16.gmra.mrb[136].mxu0 %v11424_v36 }
 0x33f   : > { %v13197_v34 = vadd.f32 %v10524_v12, %v9568_v53  ;;  %v10542_v14 = vadd.f32 %v12984_v44, %v9435_v56  ;;  %10272 = vmatprep.mubr.bf16.mxu1 %v11429_v49  ;;  %7317 = vmatprep.mubr.bf16.mxu0 %v11432_v62 }
 0x341   : > { %v13200_v10 = vadd.f32 %v10542_v14, %v9571_v32  ;;  %v9436_v6 = vpop.f32.mrb[160].mxu1  ;;  %v9572_v39 = vpop.f32.mrb[32].mxu0  ;;  %v11442_v14 = vld [vmem:[%s11569_s4 + $0x19c] ss:$12 sps:$4 sm:$0xff]  }
 0x342   : > { %v9437_v35 = vpop.f32.mrb[161].mxu1  ;;  %v9573_v30 = vpop.f32.mrb[33].mxu0 }
 0x343   : > { %v9438_v31 = vadd.f32 %v9437_v35, %v9436_v6  ;;  %v9574_v18 = vadd.f32 %v9573_v30, %v9572_v39  ;;  %v9439_v4 = vpop.f32.mrb[162].mxu1  ;;  %v9575_v55 = vpop.f32.mrb[34].mxu0  ;;  %v11443_v6 = vld [vmem:[%s11569_s4 + $0xf8] ss:$12 sps:$4 sm:$0xff]  }
 0x344   : > { %v9440_v11 = vpop.f32.mrb[163].mxu1  ;;  %v9576_v28 = vpop.f32.mrb[35].mxu0 }
 0x345   : > { %v10569_v44 = vadd.f32 %v12991_v37, %v9438_v31  ;;  %v9441_v26 = vadd.f32 %v9440_v11, %v9439_v4  ;;  %v9577_v36 = vadd.f32 %v9576_v28, %v9575_v55  ;;  %v11439_v37 = vld [vmem:[%s11569_s4 + $0xe0] ss:$12 sps:$4 sm:$0xff]   ;;  %v11440_v11 = vld [vmem:[%s11569_s4 + $0x198] ss:$12 sps:$4 sm:$0xff]  }
 0x346   : > { %10273 = vmatmul.mubr.bf16.gmra.mrb[44].mxu1 %v11433_v45  ;;  %7318 = vmatmul.mubr.bf16.gmra.mrb[140].mxu0 %v11430_v57 }
 0x347   : > { %v13207_v43 = vadd.f32 %v10569_v44, %v9574_v18  ;;  %v10587_v47 = vadd.f32 %v12994_v3, %v9441_v26  ;;  %7325 = vmatprep.mubr.bf16.mxu0 %v11437_v46  ;;  %10292 = vmatprep.mubr.bf16.mxu1 %v11438_v9 }
 0x349   : > { %v13210_v53 = vadd.f32 %v10587_v47, %v9577_v36  ;;  %v9442_v40 = vpop.f32.mrb[164].mxu1  ;;  %v9578_v22 = vpop.f32.mrb[36].mxu0  ;;  %v11447_v47 = vld [vmem:[%s11569_s4 + $0x1b4] ss:$12 sps:$4 sm:$0xff]  }
 0x34a   : > { %v9443_v49 = vpop.f32.mrb[165].mxu1  ;;  %v9579_v62 = vpop.f32.mrb[37].mxu0 }
 0x34b   : > { %v9444_v61 = vadd.f32 %v9443_v49, %v9442_v40  ;;  %v9580_v12 = vadd.f32 %v9579_v62, %v9578_v22  ;;  %v9445_v56 = vpop.f32.mrb[166].mxu1  ;;  %v9581_v32 = vpop.f32.mrb[38].mxu0  ;;  %v11448_v40 = vld [vmem:[%s11569_s4 + $0x128] ss:$12 sps:$4 sm:$0xff]  }
 0x34c   : > { %v9446_v39 = vpop.f32.mrb[167].mxu1  ;;  %v9582_v35 = vpop.f32.mrb[39].mxu0 }
 0x34d   : > { %v10560_v3 = vadd.f32 %v13004_v50, %v9444_v61  ;;  %v9447_v30 = vadd.f32 %v9446_v39, %v9445_v56  ;;  %v9583_v57 = vadd.f32 %v9582_v35, %v9581_v32  ;;  %v11444_v50 = vld [vmem:[%s11569_s4 + $0x110] ss:$12 sps:$4 sm:$0xff]  }
 0x34e   : > { %7326 = vmatmul.mubr.bf16.gmra.mrb[144].mxu0 %v11435_v23  ;;  %10293 = vmatmul.mubr.bf16.vlgmr.msra.gmra.mrb[16].mxu1 %v11439_v37  ;;  %v11445_v39 = vld [vmem:[%s11569_s4 + $0x1b0] ss:$12 sps:$4 sm:$0xff]  }
 0x34f   : > { %v13217_v45 = vadd.f32 %v10560_v3, %v9580_v12  ;;  %v10578_v31 = vadd.f32 %v13007_v29, %v9447_v30  ;;  %7333 = vmatprep.mubr.bf16.mxu0 %v11442_v14  ;;  %10296 = vmatprep.mubr.bf16.mxu1 %v11443_v6 }
 0x351   : > { %v13220_v18 = vadd.f32 %v10578_v31, %v9583_v57  ;;  %v9448_v4 = vpop.f32.mrb[168].mxu1  ;;  %v9584_v55 = vpop.f32.mrb[40].mxu0  ;;  %v11452_v31 = vld [vmem:[%s11569_s4 + $0x1cc] ss:$12 sps:$4 sm:$0xff]  }
 0x352   : > { %v9449_v46 = vpop.f32.mrb[169].mxu1  ;;  %v9585_v9 = vpop.f32.mrb[41].mxu0 }
 0x353   : > { %v9450_v28 = vadd.f32 %v9449_v46, %v9448_v4  ;;  %v9586_v44 = vadd.f32 %v9585_v9, %v9584_v55  ;;  %v9451_v26 = vpop.f32.mrb[170].mxu1  ;;  %v9587_v36 = vpop.f32.mrb[42].mxu0  ;;  %v11453_v4 = vld [vmem:[%s11569_s4 + $0x158] ss:$12 sps:$4 sm:$0xff]  }
 0x354   : > { %v9452_v22 = vpop.f32.mrb[171].mxu1  ;;  %v9588_v49 = vpop.f32.mrb[43].mxu0 }
 0x355   : > { %v10605_v29 = vadd.f32 %v13018_v33, %v9450_v28  ;;  %v9453_v62 = vadd.f32 %v9452_v22, %v9451_v26  ;;  %v9589_v23 = vadd.f32 %v9588_v49, %v9587_v36  ;;  %v11449_v33 = vld [vmem:[%s11569_s4 + $0x140] ss:$12 sps:$4 sm:$0xff]   ;;  %v11457_v49 = vld [vmem:[%s11569_s4 + $0x1e4] ss:$12 sps:$4 sm:$0xff]  }
 0x356   : > { %7334 = vmatmul.mubr.bf16.gmra.mrb[148].mxu0 %v11440_v11  ;;  %10297 = vmatmul.mubr.bf16.gmra.mrb[20].mxu1 %v11444_v50 }
 0x357   : > { %v13227_v37 = vadd.f32 %v10605_v29, %v9586_v44  ;;  %v10623_v61 = vadd.f32 %v13024_v7, %v9453_v62  ;;  %7341 = vmatprep.mubr.bf16.mxu0 %v11447_v47  ;;  %10300 = vmatprep.mubr.bf16.mxu1 %v11448_v40  ;;  %v11450_v47 = vld [vmem:[%s11569_s4 + $0x1c8] ss:$12 sps:$4 sm:$0xff]   ;;  %v11454_v40 = vld [vmem:[%s11569_s4 + $0x170] ss:$12 sps:$4 sm:$0xff]  }
 0x358   : > { %v11458_v29 = vld [vmem:[%s11569_s4 + $0x188] ss:$12 sps:$4 sm:$0xff]  }
 0x359   : > { %v13230_v12 = vadd.f32 %v10623_v61, %v9589_v23  ;;  %v9454_v56 = vpop.f32.mrb[172].mxu1  ;;  %v9590_v32 = vpop.f32.mrb[44].mxu0 }
 0x35a   : > { %v9455_v14 = vpop.f32.mrb[173].mxu1  ;;  %v9591_v6 = vpop.f32.mrb[45].mxu0 }
 0x35b   : > { %v9456_v35 = vadd.f32 %v9455_v14, %v9454_v56  ;;  %v9592_v3 = vadd.f32 %v9591_v6, %v9590_v32  ;;  %v9457_v30 = vpop.f32.mrb[174].mxu1  ;;  %v9593_v57 = vpop.f32.mrb[46].mxu0  ;;  %v11455_v14 = vld [vmem:[%s11569_s4 + $0x1e0] ss:$12 sps:$4 sm:$0xff]  }
 0x35c   : > { %v9458_v55 = vpop.f32.mrb[175].mxu1  ;;  %v9594_v7 = vpop.f32.mrb[47].mxu0  ;;  %v11459_v6 = vld [vmem:[%s11569_s4 + $0x1a0] ss:$12 sps:$4 sm:$0xff]  }
 0x35d   : > { %v10596_v46 = vadd.f32 %v13034_v0, %v9456_v35  ;;  %v9459_v9 = vadd.f32 %v9458_v55, %v9457_v30  ;;  %v9595_v11 = vadd.f32 %v9594_v7, %v9593_v57  ;;  %v11462_v35 = vld [vmem:[%s11569_s4 + $0x1fc] ss:$12 sps:$4 sm:$0xff]   ;;  %v11460_v55 = vld [vmem:[%s11569_s4 + $0x1f8] ss:$12 sps:$4 sm:$0xff]  }
 0x35e   : > { %7342 = vmatmul.mubr.bf16.gmra.mrb[152].mxu0 %v11445_v39  ;;  %10301 = vmatmul.mubr.bf16.gmra.mrb[24].mxu1 %v11449_v33  ;;  %v11464_v7 = vld [vmem:[%s11569_s4 + $0x1d0] ss:$12 sps:$4 sm:$0xff]  }
 0x35f   : > { %v13237_v50 = vadd.f32 %v10596_v46, %v9592_v3  ;;  %v10614_v28 = vadd.f32 %v13040_v42, %v9459_v9  ;;  %7349 = vmatprep.mubr.bf16.mxu0 %v11452_v31  ;;  %10304 = vmatprep.mubr.bf16.mxu1 %v11453_v4 }
 0x361   : > { %v13240_v44 = vadd.f32 %v10614_v28, %v9595_v11  ;;  %v9636_v26 = vpop.f32.mrb[48].mxu0  ;;  %v11465_v11 = vld [vmem:[%s11569_s4 + $0x1e8] ss:$12 sps:$4 sm:$0xff]  }
 0x362   : > { %v9637_v36 = vpop.f32.mrb[49].mxu0 }
 0x363   : > { %v9638_v0 = vadd.f32 %v9637_v36, %v9636_v26  ;;  %v9639_v22 = vpop.f32.mrb[50].mxu0 }
 0x364   : > { %v9640_v62 = vpop.f32.mrb[51].mxu0 }
 0x365   : > { %v13247_v23 = vadd.f32 %v13053_v24, %v9638_v0  ;;  %v9641_v42 = vadd.f32 %v9640_v62, %v9639_v22  ;;  %v11463_v24 = vld [vmem:[%s11569_s4 + $0x1b8] ss:$12 sps:$4 sm:$0xff]  }
 0x366   : > { %7350 = vmatmul.mubr.bf16.gmra.mrb[156].mxu0 %v11450_v47  ;;  %10305 = vmatmul.mubr.bf16.gmra.mrb[28].mxu1 %v11454_v40  ;;  %v11466_v40 = vld [vmem:[%s11569_s4 + $0x200] ss:$12 sps:$4 sm:$0xff]  }
 0x367   : > { %v13250_v61 = vadd.f32 %v13056_v15, %v9641_v42  ;;  %7357 = vmatprep.mubr.bf16.mxu0 %v11457_v49  ;;  %10308 = vmatprep.mubr.bf16.mxu1 %v11458_v29  ;;  %v11469_v49 = vld [vmem:[%s11569_s4 + $0x22c] ss:$12 sps:$4 sm:$0xff]  }
 0x368   : > { %v11470_v29 = vld [vmem:[%s11569_s4 + $0x218] ss:$12 sps:$4 sm:$0xff]  }
 0x369   : > { %v9642_v56 = vpop.f32.mrb[52].mxu0 }
 0x36a   : > { %v9643_v32 = vpop.f32.mrb[53].mxu0 }
 0x36b   : > { %v9644_v39 = vadd.f32 %v9643_v32, %v9642_v56  ;;  %v9645_v33 = vpop.f32.mrb[54].mxu0  ;;  %v11467_v32 = vld [vmem:[%s11569_s4 + $0x228] ss:$12 sps:$4 sm:$0xff]  }
 0x36c   : > { %v9646_v3 = vpop.f32.mrb[55].mxu0 }
 0x36d   : > { %v13257_v30 = vadd.f32 %v13068_v58, %v9644_v39  ;;  %v9647_v57 = vadd.f32 %v9646_v3, %v9645_v33 }
 0x36e   : > { %7358 = vmatmul.mubr.bf16.gmra.mrb[160].mxu0 %v11455_v14  ;;  %10309 = vmatmul.mubr.bf16.gmra.mrb[32].mxu1 %v11459_v6  ;;  %v11471_v14 = vld [vmem:[%s11569_s4 + $0x230] ss:$12 sps:$4 sm:$0xff]   ;;  %s8667_s4 = sshll.u32 %s13495_s10, 8 }
 0x36f   : > { %v13260_v15 = vadd.f32 %v13072_v5, %v9647_v57  ;;  %7365 = vmatprep.mubr.bf16.mxu0 %v11462_v35  ;;  %10312 = vmatprep.mubr.bf16.mxu1 %v11463_v24  ;;  %s13400_s23 = scalar_lea.vmem %s13473_s2, %s8667_s4 }
 0x371   : > { %v9648_v31 = vpop.f32.mrb[56].mxu0 }
 0x372   : > { %v9649_v4 = vpop.f32.mrb[57].mxu0 }
 0x373   : > { %v9650_v46 = vadd.f32 %v9649_v4, %v9648_v31  ;;  %v9651_v9 = vpop.f32.mrb[58].mxu0 }
 0x374   : > { %v9652_v58 = vpop.f32.mrb[59].mxu0 }
 0x375   : > { %v13266_v28 = vadd.f32 %v13078_v52, %v9650_v46  ;;  %v9653_v26 = vadd.f32 %v9652_v58, %v9651_v9 }
 0x376   : > { %7366 = vmatmul.mubr.bf16.gmra.mrb[164].mxu0 %v11460_v55  ;;  %10313 = vmatmul.mubr.bf16.gmra.mrb[36].mxu1 %v11464_v7 }
 0x377   : > { %v13269_v5 = vadd.f32 %v13082_v1, %v9653_v26  ;;  %7373 = vmatprep.mubr.bf16.mxu0 %v13087_v20  ;;  %10316 = vmatprep.mubr.bf16.mxu1 %v11465_v11 }
 0x379   : > { %v9654_v36 = vpop.f32.mrb[60].mxu0 }
 0x37a   : > { %v9655_v47 = vpop.f32.mrb[61].mxu0 }
 0x37b   : > { %v9656_v0 = vadd.f32 %v9655_v47, %v9654_v36  ;;  %v9657_v22 = vpop.f32.mrb[62].mxu0 }
 0x37c   : > { %v9658_v52 = vpop.f32.mrb[63].mxu0 }
 0x37d   : > { %v13276_v62 = vadd.f32 %v13091_v27, %v9656_v0  ;;  %v9659_v42 = vadd.f32 %v9658_v52, %v9657_v22 }
 0x37e   : > { %7374 = vmatmul.mubr.bf16.gmra.mrb[168].mxu0 %v13098_v8  ;;  %10317 = vmatmul.mubr.bf16.gmra.mrb[40].mxu1 %v11466_v40 }
 0x37f   : > { %v13280_v1 = vadd.f32 %v13095_v25, %v9659_v42  ;;  %7381 = vmatprep.mubr.bf16.mxu0 %v11469_v49  ;;  %10320 = vmatprep.mubr.bf16.mxu1 %v11470_v29 }
 0x381   : > { %v9660_v20 = vpop.f32.mrb[64].mxu0 }
 0x382   : > { %v9661_v56 = vpop.f32.mrb[65].mxu0 }
 0x383   : > { %v9662_v6 = vadd.f32 %v9661_v56, %v9660_v20  ;;  %v9663_v39 = vpop.f32.mrb[66].mxu0 }
 0x384   : > { %v9664_v33 = vpop.f32.mrb[67].mxu0 }
 0x385   : > { %v13285_v35 = vadd.f32 %v13105_v54, %v9662_v6  ;;  %v9665_v27 = vadd.f32 %v9664_v33, %v9663_v39 }
 0x386   : > { %7382 = vmatmul.mubr.bf16.gmra.mrb[172].mxu0 %v11467_v32  ;;  %10321 = vmatmul.mubr.bf16.gmra.mrb[44].mxu1 %v11471_v14 }
 0x387   : > { %v13288_v8 = vadd.f32 %v13108_v21, %v9665_v27 }
 0x389   : > { %v9666_v25 = vpop.f32.mrb[68].mxu0 }
 0x38a   : > { %v9667_v24 = vpop.f32.mrb[69].mxu0 }
 0x38b   : > { %v9668_v3 = vadd.f32 %v9667_v24, %v9666_v25  ;;  %v9669_v57 = vpop.f32.mrb[70].mxu0 }
 0x38c   : > { %v9670_v31 = vpop.f32.mrb[71].mxu0 }
 0x38d   : > { %v13291_v4 = vadd.f32 %v13118_v60, %v9668_v3  ;;  %v9671_v55 = vadd.f32 %v9670_v31, %v9669_v57 }
 0x38f   : > { %v13294_v7 = vadd.f32 %v13125_v59, %v9671_v55 }
 0x391   : > { %v9672_v54 = vpop.f32.mrb[72].mxu0 }
 0x392   : > { %v9673_v46 = vpop.f32.mrb[73].mxu0 }
 0x393   : > { %v9674_v9 = vadd.f32 %v9673_v46, %v9672_v54  ;;  %v9675_v11 = vpop.f32.mrb[74].mxu0 }
 0x394   : > { %v9676_v58 = vpop.f32.mrb[75].mxu0 }
 0x395   : > { %v13297_v21 = vadd.f32 %v13135_v17, %v9674_v9  ;;  %v9677_v26 = vadd.f32 %v9676_v58, %v9675_v11 }
 0x397   : > { %v13300_v36 = vadd.f32 %v13138_v41, %v9677_v26 }
 0x399   : > { %v9678_v47 = vpop.f32.mrb[76].mxu0 }
 0x39a   : > { %v9679_v40 = vpop.f32.mrb[77].mxu0 }
 0x39b   : > { %v9680_v60 = vadd.f32 %v9679_v40, %v9678_v47  ;;  %v9681_v0 = vpop.f32.mrb[78].mxu0 }
 0x39c   : > { %v9682_v22 = vpop.f32.mrb[79].mxu0 }
 0x39d   : > { %v13303_v59 = vadd.f32 %v13151_v13, %v9680_v60  ;;  %v9683_v49 = vadd.f32 %v9682_v22, %v9681_v0 }
 0x39f   : > { %v13306_v29 = vadd.f32 %v13154_v51, %v9683_v49 }
 0x3a1   : > { %v9684_v52 = vpop.f32.mrb[80].mxu0 }
 0x3a2   : > { %v9685_v42 = vpop.f32.mrb[81].mxu0 }
 0x3a3   : > { %v9686_v17 = vadd.f32 %v9685_v42, %v9684_v52  ;;  %v9687_v20 = vpop.f32.mrb[82].mxu0 }
 0x3a4   : > { %v9688_v56 = vpop.f32.mrb[83].mxu0 }
 0x3a5   : > { %v13309_v41 = vadd.f32 %v13167_v2, %v9686_v17  ;;  %v9689_v32 = vadd.f32 %v9688_v56, %v9687_v20 }
 0x3a7   : > { %v13312_v14 = vadd.f32 %v13170_v19, %v9689_v32 }
 0x3a9   : > { %v9690_v6 = vpop.f32.mrb[84].mxu0 }
 0x3aa   : > { %v9691_v39 = vpop.f32.mrb[85].mxu0 }
 0x3ab   : > { %v9692_v13 = vadd.f32 %v9691_v39, %v9690_v6  ;;  %v9693_v33 = vpop.f32.mrb[86].mxu0 }
 0x3ac   : > { %v9694_v27 = vpop.f32.mrb[87].mxu0 }
 0x3ad   : > { %v13315_v51 = vadd.f32 %v13177_v48, %v9692_v13  ;;  %v9695_v25 = vadd.f32 %v9694_v27, %v9693_v33 }
 0x3af   : > { %v13318_v24 = vadd.f32 %v13180_v16, %v9695_v25 }
 0x3b1   : > { %v9696_v3 = vpop.f32.mrb[88].mxu0 }
 0x3b2   : > { %v9697_v57 = vpop.f32.mrb[89].mxu0 }
 0x3b3   : > { %v9698_v2 = vadd.f32 %v9697_v57, %v9696_v3  ;;  %v9699_v31 = vpop.f32.mrb[90].mxu0 }
 0x3b4   : > { %v9700_v55 = vpop.f32.mrb[91].mxu0 }
 0x3b5   : > { %v13321_v19 = vadd.f32 %v13187_v38, %v9698_v2  ;;  %v9701_v54 = vadd.f32 %v9700_v55, %v9699_v31 }
 0x3b7   : > { %v13324_v46 = vadd.f32 %v13190_v63, %v9701_v54 }
 0x3b9   : > { %v9702_v9 = vpop.f32.mrb[92].mxu0 }
 0x3ba   : > { %v9703_v11 = vpop.f32.mrb[93].mxu0 }
 0x3bb   : > { %v9704_v48 = vadd.f32 %v9703_v11, %v9702_v9  ;;  %v9705_v58 = vpop.f32.mrb[94].mxu0 }
 0x3bc   : > { %v9706_v26 = vpop.f32.mrb[95].mxu0 }
 0x3bd   : > { %v13327_v16 = vadd.f32 %v13197_v34, %v9704_v48  ;;  %v9707_v47 = vadd.f32 %v9706_v26, %v9705_v58 }
 0x3bf   : > { %v13330_v40 = vadd.f32 %v13200_v10, %v9707_v47 }
 0x3c1   : > { %v9708_v60 = vpop.f32.mrb[96].mxu0 }
 0x3c2   : > { %v9709_v0 = vpop.f32.mrb[97].mxu0 }
 0x3c3   : > { %v9710_v38 = vadd.f32 %v9709_v0, %v9708_v60  ;;  %v9711_v22 = vpop.f32.mrb[98].mxu0 }
 0x3c4   : > { %v9712_v49 = vpop.f32.mrb[99].mxu0 }
 0x3c5   : > { %v13333_v63 = vadd.f32 %v13207_v43, %v9710_v38  ;;  %v9713_v52 = vadd.f32 %v9712_v49, %v9711_v22 }
 0x3c7   : > { %v13336_v42 = vadd.f32 %v13210_v53, %v9713_v52 }
 0x3c9   : > { %v9714_v17 = vpop.f32.mrb[100].mxu0 }
 0x3ca   : > { %v9715_v20 = vpop.f32.mrb[101].mxu0 }
 0x3cb   : > { %v9716_v34 = vadd.f32 %v9715_v20, %v9714_v17  ;;  %v9717_v56 = vpop.f32.mrb[102].mxu0 }
 0x3cc   : > { %v9718_v32 = vpop.f32.mrb[103].mxu0 }
 0x3cd   : > { %v13339_v10 = vadd.f32 %v13217_v45, %v9716_v34  ;;  %v9719_v6 = vadd.f32 %v9718_v32, %v9717_v56 }
 0x3cf   : > { %v13342_v39 = vadd.f32 %v13220_v18, %v9719_v6 }
 0x3d1   : > { %v9720_v13 = vpop.f32.mrb[104].mxu0 }
 0x3d2   : > { %v9721_v33 = vpop.f32.mrb[105].mxu0 }
 0x3d3   : > { %v9722_v43 = vadd.f32 %v9721_v33, %v9720_v13  ;;  %v9723_v27 = vpop.f32.mrb[106].mxu0 }
 0x3d4   : > { %v9724_v25 = vpop.f32.mrb[107].mxu0 }
 0x3d5   : > { %v13345_v53 = vadd.f32 %v13227_v37, %v9722_v43  ;;  %v9725_v3 = vadd.f32 %v9724_v25, %v9723_v27 }
 0x3d7   : > { %v13348_v57 = vadd.f32 %v13230_v12, %v9725_v3 }
 0x3d9   : > { %v9726_v2 = vpop.f32.mrb[108].mxu0 }
 0x3da   : > { %v9727_v31 = vpop.f32.mrb[109].mxu0 }
 0x3db   : > { %v9728_v45 = vadd.f32 %v9727_v31, %v9726_v2  ;;  %v9729_v55 = vpop.f32.mrb[110].mxu0 }
 0x3dc   : > { %v9730_v54 = vpop.f32.mrb[111].mxu0 }
 0x3dd   : > { %v13351_v18 = vadd.f32 %v13237_v50, %v9728_v45  ;;  %v9731_v9 = vadd.f32 %v9730_v54, %v9729_v55 }
 0x3df   : > { %v13354_v11 = vadd.f32 %v13240_v44, %v9731_v9 }
 0x3e1   : > { %v9772_v48 = vpop.f32.mrb[112].mxu0 }
 0x3e2   : > { %v9773_v58 = vpop.f32.mrb[113].mxu0 }
 0x3e3   : > { %v9774_v37 = vadd.f32 %v9773_v58, %v9772_v48  ;;  %v9775_v26 = vpop.f32.mrb[114].mxu0 }
 0x3e4   : > { %v9776_v47 = vpop.f32.mrb[115].mxu0 }
 0x3e5   : > { %v9777_v60 = vadd.f32 %v9776_v47, %v9775_v26  ;;  %v13357_v12 = vadd.f32 %v13247_v23, %v9774_v37 }
 0x3e7   : > { %v13360_v0 = vadd.f32 %v13250_v61, %v9777_v60 }
 0x3e9   : > { %v9778_v38 = vpop.f32.mrb[116].mxu0 }
 0x3ea   : > { %v9779_v22 = vpop.f32.mrb[117].mxu0 }
 0x3eb   : > { %v9780_v50 = vadd.f32 %v9779_v22, %v9778_v38  ;;  %v9781_v49 = vpop.f32.mrb[118].mxu0 }
 0x3ec   : > { %v9782_v52 = vpop.f32.mrb[119].mxu0 }
 0x3ed   : > { %v9783_v17 = vadd.f32 %v9782_v52, %v9781_v49  ;;  %v10347_v44 = vadd.f32 %v13257_v30, %v9780_v50 }
 0x3ef   : > { %v10365_v20 = vadd.f32 %v13260_v15, %v9783_v17 }
 0x3f1   : > { %v9784_v34 = vpop.f32.mrb[120].mxu0 }
 0x3f2   : > { %v9785_v56 = vpop.f32.mrb[121].mxu0 }
 0x3f3   : > { %v9786_v32 = vadd.f32 %v9785_v56, %v9784_v34  ;;  %v9787_v6 = vpop.f32.mrb[122].mxu0 }
 0x3f4   : > { %v9788_v13 = vpop.f32.mrb[123].mxu0 }
 0x3f5   : > { %v9789_v23 = vadd.f32 %v9788_v13, %v9787_v6  ;;  %v13365_v33 = vadd.f32 %v13266_v28, %v9786_v32 }
 0x3f7   : > { %v13368_v61 = vadd.f32 %v13269_v5, %v9789_v23 }
 0x3f9   : > { %v9790_v43 = vpop.f32.mrb[124].mxu0 }
 0x3fa   : > { %v9791_v27 = vpop.f32.mrb[125].mxu0 }
 0x3fb   : > { %v9792_v25 = vadd.f32 %v9791_v27, %v9790_v43  ;;  %v9793_v3 = vpop.f32.mrb[126].mxu0 }
 0x3fc   : > { %v9794_v2 = vpop.f32.mrb[127].mxu0 }
 0x3fd   : > { %v9795_v30 = vadd.f32 %v9794_v2, %v9793_v3  ;;  %v10383_v15 = vadd.f32 %v13276_v62, %v9792_v25 }
 0x3ff   : > { %v13372_v31 = vadd.f32 %v13280_v1, %v9795_v30 }
 0x401   : > { %v9796_v45 = vpop.f32.mrb[128].mxu0 }
 0x402   : > { %v9797_v55 = vpop.f32.mrb[129].mxu0 }
 0x403   : > { %v9798_v54 = vadd.f32 %v9797_v55, %v9796_v45  ;;  %v9799_v9 = vpop.f32.mrb[130].mxu0 }
 0x404   : > { %v9800_v28 = vpop.f32.mrb[131].mxu0 }
 0x405   : > { %v9801_v48 = vadd.f32 %v9800_v28, %v9799_v9  ;;  %v13375_v5 = vadd.f32 %v13285_v35, %v9798_v54 }
 0x407   : > { %v13378_v58 = vadd.f32 %v13288_v8, %v9801_v48 }
 0x409   : > { %v9802_v37 = vpop.f32.mrb[132].mxu0 }
 0x40a   : > { %v9803_v26 = vpop.f32.mrb[133].mxu0 }
 0x40b   : > { %v9804_v47 = vadd.f32 %v9803_v26, %v9802_v37  ;;  %v9805_v60 = vpop.f32.mrb[134].mxu0 }
 0x40c   : > { %v9806_v62 = vpop.f32.mrb[135].mxu0 }
 0x40d   : > { %v9807_v38 = vadd.f32 %v9806_v62, %v9805_v60  ;;  %v10419_v1 = vadd.f32 %v13291_v4, %v9804_v47 }
 0x40f   : > { %v13382_v22 = vadd.f32 %v13294_v7, %v9807_v38 }
 0x411   : > { %v9808_v50 = vpop.f32.mrb[136].mxu0 }
 0x412   : > { %v9809_v49 = vpop.f32.mrb[137].mxu0 }
 0x413   : > { %v9810_v52 = vadd.f32 %v9809_v49, %v9808_v50  ;;  %v9811_v35 = vpop.f32.mrb[138].mxu0 }
 0x414   : > { %v9812_v17 = vpop.f32.mrb[139].mxu0 }
 0x415   : > { %v9813_v34 = vadd.f32 %v9812_v17, %v9811_v35  ;;  %v13385_v8 = vadd.f32 %v13297_v21, %v9810_v52 }
 0x417   : > { %v13388_v56 = vadd.f32 %v13300_v36, %v9813_v34 }
 0x419   : > { %v9814_v32 = vpop.f32.mrb[140].mxu0 }
 0x41a   : > { %v9815_v6 = vpop.f32.mrb[141].mxu0 }
 0x41b   : > { %v9816_v13 = vadd.f32 %v9815_v6, %v9814_v32  ;;  %v9817_v4 = vpop.f32.mrb[142].mxu0 }
 0x41c   : > { %v9818_v23 = vpop.f32.mrb[143].mxu0 }
 0x41d   : > { %v9819_v7 = vadd.f32 %v9818_v23, %v9817_v4  ;;  %v13391_v43 = vadd.f32 %v13303_v59, %v9816_v13 }
 0x41f   : > { %v13395_v27 = vadd.f32 %v13306_v29, %v9819_v7 }
 0x421   : > { %v9820_v25 = vpop.f32.mrb[144].mxu0  ;;  %v10294_v21 = vpop.f32.mrb[16].mxu1 }
 0x422   : > { %v10348_v36 = vadd.f32 %v10347_v44, %v10294_v21  ;;  %v9821_v3 = vpop.f32.mrb[145].mxu0  ;;  %v7424_v2 = vpop.f32.mrb[17].mxu1 }
 0x423   : > { %v9822_v59 = vadd.f32 %v9821_v3, %v9820_v25  ;;  %v10357_v30 = vadd.f32 %v13357_v12, %v7424_v2  ;;  %v9823_v45 = vpop.f32.mrb[146].mxu0  ;;  %v10295_v29 = vpop.f32.mrb[18].mxu1 }
 0x424   : > { %7585 = vst [vmem:[%s13400_s23 + $0x10] sm:$0xff] %v10348_v36  ;;  %v10366_v55 = vadd.f32 %v10365_v20, %v10295_v29  ;;  %v9824_v54 = vpop.f32.mrb[147].mxu0  ;;  %v7427_v9 = vpop.f32.mrb[19].mxu1 }
 0x425   : > { %7583 = vst [vmem:[%s13400_s23] sm:$0xff] %v10357_v30  ;;  %v9825_v28 = vadd.f32 %v9824_v54, %v9823_v45  ;;  %v10375_v48 = vadd.f32 %v13360_v0, %v7427_v9  ;;  %v13407_v37 = vadd.f32 %v13309_v41, %v9822_v59 }
 0x426   : > { %7586 = vst [vmem:[%s13400_s23 + $0x18] sm:$0xff] %v10366_v55 }
 0x427   : > { %7584 = vst [vmem:[%s13400_s23 + $0x8] sm:$0xff] %v10375_v48  ;;  %v13412_v44 = vadd.f32 %v13312_v14, %v9825_v28 }
 0x429   : > { %v9826_v12 = vpop.f32.mrb[148].mxu0  ;;  %v10298_v26 = vpop.f32.mrb[20].mxu1 }
 0x42a   : > { %v10384_v20 = vadd.f32 %v10383_v15, %v10298_v26  ;;  %v9827_v47 = vpop.f32.mrb[149].mxu0  ;;  %v7440_v60 = vpop.f32.mrb[21].mxu1 }
 0x42b   : > { %v9828_v62 = vadd.f32 %v9827_v47, %v9826_v12  ;;  %v10393_v38 = vadd.f32 %v13365_v33, %v7440_v60  ;;  %v9829_v0 = vpop.f32.mrb[150].mxu0  ;;  %v10299_v50 = vpop.f32.mrb[22].mxu1 }
 0x42c   : > { %7589 = vst [vmem:[%s13400_s23 + $0x30] sm:$0xff] %v10384_v20  ;;  %v10402_v41 = vadd.f32 %v13372_v31, %v10299_v50  ;;  %v9830_v49 = vpop.f32.mrb[151].mxu0  ;;  %v7443_v52 = vpop.f32.mrb[23].mxu1 }
 0x42d   : > { %7587 = vst [vmem:[%s13400_s23 + $0x20] sm:$0xff] %v10393_v38  ;;  %v9831_v14 = vadd.f32 %v9830_v49, %v9829_v0  ;;  %v10411_v35 = vadd.f32 %v13368_v61, %v7443_v52  ;;  %v10491_v15 = vadd.f32 %v13315_v51, %v9828_v62 }
 0x42e   : > { %7590 = vst [vmem:[%s13400_s23 + $0x38] sm:$0xff] %v10402_v41 }
 0x42f   : > { %7588 = vst [vmem:[%s13400_s23 + $0x28] sm:$0xff] %v10411_v35  ;;  %v10509_v17 = vadd.f32 %v13318_v24, %v9831_v14 }
 0x431   : > { %v9832_v33 = vpop.f32.mrb[152].mxu0  ;;  %v10302_v34 = vpop.f32.mrb[24].mxu1 }
 0x432   : > { %v10420_v32 = vadd.f32 %v10419_v1, %v10302_v34  ;;  %v9833_v31 = vpop.f32.mrb[153].mxu0  ;;  %v7456_v6 = vpop.f32.mrb[25].mxu1 }
 0x433   : > { %v9834_v13 = vadd.f32 %v9833_v31, %v9832_v33  ;;  %v10429_v4 = vadd.f32 %v13375_v5, %v7456_v6  ;;  %v9835_v23 = vpop.f32.mrb[154].mxu0  ;;  %v10303_v7 = vpop.f32.mrb[26].mxu1 }
 0x434   : > { %7593 = vst [vmem:[%s13400_s23 + $0x50] sm:$0xff] %v10420_v32  ;;  %v10438_v51 = vadd.f32 %v13382_v22, %v10303_v7  ;;  %v9836_v61 = vpop.f32.mrb[155].mxu0  ;;  %v7459_v25 = vpop.f32.mrb[27].mxu1 }
 0x435   : > { %7591 = vst [vmem:[%s13400_s23 + $0x40] sm:$0xff] %v10429_v4  ;;  %v9837_v24 = vadd.f32 %v9836_v61, %v9835_v23  ;;  %v10447_v21 = vadd.f32 %v13378_v58, %v7459_v25  ;;  %v10536_v1 = vadd.f32 %v13321_v19, %v9834_v13 }
 0x436   : > { %7594 = vst [vmem:[%s13400_s23 + $0x58] sm:$0xff] %v10438_v51 }
 0x437   : > { %7592 = vst [vmem:[%s13400_s23 + $0x48] sm:$0xff] %v10447_v21  ;;  %v10554_v36 = vadd.f32 %v13324_v46, %v9837_v24 }
 0x439   : > { %v9838_v5 = vpop.f32.mrb[156].mxu0  ;;  %v10306_v3 = vpop.f32.mrb[28].mxu1 }
 0x43a   : > { %v10456_v2 = vadd.f32 %v13391_v43, %v10306_v3  ;;  %v9839_v22 = vpop.f32.mrb[157].mxu0  ;;  %v7472_v59 = vpop.f32.mrb[29].mxu1 }
 0x43b   : > { %v9840_v30 = vadd.f32 %v9839_v22, %v9838_v5  ;;  %v10465_v45 = vadd.f32 %v13385_v8, %v7472_v59  ;;  %v9841_v29 = vpop.f32.mrb[158].mxu0  ;;  %v10307_v58 = vpop.f32.mrb[30].mxu1 }
 0x43c   : > { %7597 = vst [vmem:[%s13400_s23 + $0x70] sm:$0xff] %v10456_v2  ;;  %v10474_v19 = vadd.f32 %v13395_v27, %v10307_v58  ;;  %v9842_v55 = vpop.f32.mrb[159].mxu0  ;;  %v7475_v54 = vpop.f32.mrb[31].mxu1 }
 0x43d   : > { %7595 = vst [vmem:[%s13400_s23 + $0x60] sm:$0xff] %v10465_v45  ;;  %v9843_v46 = vadd.f32 %v9842_v55, %v9841_v29  ;;  %v10483_v9 = vadd.f32 %v13388_v56, %v7475_v54  ;;  %v10527_v43 = vadd.f32 %v13327_v16, %v9840_v30 }
 0x43e   : > { %7598 = vst [vmem:[%s13400_s23 + $0x78] sm:$0xff] %v10474_v19 }
 0x43f   : > { %7596 = vst [vmem:[%s13400_s23 + $0x68] sm:$0xff] %v10483_v9  ;;  %v10545_v28 = vadd.f32 %v13330_v40, %v9843_v46 }
 0x441   : > { %v9844_v8 = vpop.f32.mrb[160].mxu0  ;;  %v10310_v48 = vpop.f32.mrb[32].mxu1 }
 0x442   : > { %v10492_v12 = vadd.f32 %v10491_v15, %v10310_v48  ;;  %v9845_v27 = vpop.f32.mrb[161].mxu0  ;;  %v7488_v26 = vpop.f32.mrb[33].mxu1 }
 0x443   : > { %v9846_v20 = vadd.f32 %v9845_v27, %v9844_v8  ;;  %v10501_v47 = vadd.f32 %v13407_v37, %v7488_v26  ;;  %v9847_v60 = vpop.f32.mrb[162].mxu0  ;;  %v10311_v62 = vpop.f32.mrb[34].mxu1 }
 0x444   : > { %7601 = vst [vmem:[%s13400_s23 + $0x90] sm:$0xff] %v10492_v12  ;;  %v10510_v56 = vadd.f32 %v10509_v17, %v10311_v62  ;;  %v9848_v16 = vpop.f32.mrb[163].mxu0  ;;  %v7491_v38 = vpop.f32.mrb[35].mxu1 }
 0x445   : > { %7599 = vst [vmem:[%s13400_s23 + $0x80] sm:$0xff] %v10501_v47  ;;  %v9849_v0 = vadd.f32 %v9848_v16, %v9847_v60  ;;  %v10519_v40 = vadd.f32 %v13412_v44, %v7491_v38  ;;  %v10572_v50 = vadd.f32 %v13333_v63, %v9846_v20 }
 0x446   : > { %7602 = vst [vmem:[%s13400_s23 + $0x98] sm:$0xff] %v10510_v56 }
 0x447   : > { %7600 = vst [vmem:[%s13400_s23 + $0x88] sm:$0xff] %v10519_v40  ;;  %v10590_v41 = vadd.f32 %v13336_v42, %v9849_v0 }
 0x449   : > { %v9850_v49 = vpop.f32.mrb[164].mxu0  ;;  %v10314_v37 = vpop.f32.mrb[36].mxu1 }
 0x44a   : > { %v10528_v52 = vadd.f32 %v10527_v43, %v10314_v37  ;;  %v9851_v14 = vpop.f32.mrb[165].mxu0  ;;  %v7504_v35 = vpop.f32.mrb[37].mxu1 }
 0x44b   : > { %v9852_v15 = vadd.f32 %v9851_v14, %v9850_v49  ;;  %v10537_v17 = vadd.f32 %v10536_v1, %v7504_v35  ;;  %v9853_v33 = vpop.f32.mrb[166].mxu0  ;;  %v10315_v34 = vpop.f32.mrb[38].mxu1 }
 0x44c   : > { %7605 = vst [vmem:[%s13400_s23 + $0xb0] sm:$0xff] %v10528_v52  ;;  %v10546_v44 = vadd.f32 %v10545_v28, %v10315_v34  ;;  %v9854_v32 = vpop.f32.mrb[167].mxu0  ;;  %v7507_v63 = vpop.f32.mrb[39].mxu1 }
 0x44d   : > { %7603 = vst [vmem:[%s13400_s23 + $0xa0] sm:$0xff] %v10537_v17  ;;  %v9855_v31 = vadd.f32 %v9854_v32, %v9853_v33  ;;  %v10555_v6 = vadd.f32 %v10554_v36, %v7507_v63  ;;  %v10563_v42 = vadd.f32 %v13339_v10, %v9852_v15 }
 0x44e   : > { %7606 = vst [vmem:[%s13400_s23 + $0xb8] sm:$0xff] %v10546_v44 }
 0x44f   : > { %7604 = vst [vmem:[%s13400_s23 + $0xa8] sm:$0xff] %v10555_v6  ;;  %v10581_v13 = vadd.f32 %v13342_v39, %v9855_v31 }
 0x451   : > { %v9856_v4 = vpop.f32.mrb[168].mxu0  ;;  %v10318_v23 = vpop.f32.mrb[40].mxu1 }
 0x452   : > { %v10564_v7 = vadd.f32 %v10563_v42, %v10318_v23  ;;  %v9857_v51 = vpop.f32.mrb[169].mxu0  ;;  %v7520_v61 = vpop.f32.mrb[41].mxu1 }
 0x453   : > { %v9858_v25 = vadd.f32 %v9857_v51, %v9856_v4  ;;  %v10573_v24 = vadd.f32 %v10572_v50, %v7520_v61  ;;  %v9859_v21 = vpop.f32.mrb[170].mxu0  ;;  %v10319_v1 = vpop.f32.mrb[42].mxu1 }
 0x454   : > { %7609 = vst [vmem:[%s13400_s23 + $0xd0] sm:$0xff] %v10564_v7  ;;  %v10582_v36 = vadd.f32 %v10581_v13, %v10319_v1  ;;  %v9860_v5 = vpop.f32.mrb[171].mxu0  ;;  %v7523_v10 = vpop.f32.mrb[43].mxu1 }
 0x455   : > { %7607 = vst [vmem:[%s13400_s23 + $0xc0] sm:$0xff] %v10573_v24  ;;  %v9861_v3 = vadd.f32 %v9860_v5, %v9859_v21  ;;  %v10591_v2 = vadd.f32 %v10590_v41, %v7523_v10  ;;  %v10608_v39 = vadd.f32 %v13345_v53, %v9858_v25 }
 0x456   : > { %7610 = vst [vmem:[%s13400_s23 + $0xd8] sm:$0xff] %v10582_v36 }
 0x457   : > { %7608 = vst [vmem:[%s13400_s23 + $0xc8] sm:$0xff] %v10591_v2  ;;  %v10626_v22 = vadd.f32 %v13348_v57, %v9861_v3 }
 0x459   : > { %v9862_v59 = vpop.f32.mrb[172].mxu0  ;;  %v10322_v30 = vpop.f32.mrb[44].mxu1 }
 0x45a   : > { %v9863_v45 = vpop.f32.mrb[173].mxu0  ;;  %v7536_v29 = vpop.f32.mrb[45].mxu1 }
 0x45b   : > { %v9864_v58 = vadd.f32 %v9863_v45, %v9862_v59  ;;  %v10609_v19 = vadd.f32 %v10608_v39, %v7536_v29  ;;  %v9865_v55 = vpop.f32.mrb[174].mxu0  ;;  %v10323_v54 = vpop.f32.mrb[46].mxu1 }
 0x45c   : > { %v9866_v46 = vpop.f32.mrb[175].mxu0  ;;  %v7539_v9 = vpop.f32.mrb[47].mxu1 }
 0x45d   : > { %v10599_v43 = vadd.f32 %v13351_v18, %v9864_v58  ;;  %7611 = vst [vmem:[%s13400_s23 + $0xe0] sm:$0xff] %v10609_v19  ;;  %v9867_v53 = vadd.f32 %v9866_v46, %v9865_v55  ;;  %v10627_v28 = vadd.f32 %v10626_v22, %v7539_v9 }
 0x45f   : > { %v10600_v8 = vadd.f32 %v10599_v43, %v10322_v30  ;;  %v10617_v57 = vadd.f32 %v13354_v11, %v9867_v53  ;;  %7612 = vst [vmem:[%s13400_s23 + $0xe8] sm:$0xff] %v10627_v28 }
 0x461   : > { %7613 = vst [vmem:[%s13400_s23 + $0xf0] sm:$0xff] %v10600_v8  ;;  %v10618_v48 = vadd.f32 %v10617_v57, %v10323_v54 }
 0x463   : > { %7614 = vst [vmem:[%s13400_s23 + $0xf8] sm:$0xff] %v10618_v48 }
 0x464 PF: > { %s12_s9 = sadd.s32 1, %s11511_s9  }
 0x465   : > { %p9_p4 = scmp.ge.s32.totalorder %s12_s9, 4  }
 0x467   :  { %11 = sbr.rel (!%p9_p4) target bundleno = 1 (0x1), region = 66 }

</bundles_post_ra>
